<compile_context>
chip_gen: v5e
topology: v5e:2x2
jax: 0.10.0
libtpu: 0.0.40
codegen_flags: <defaults>
</compile_context>

<pallas_src>
import jax
import jax.numpy as jnp
from jax.experimental import pallas as pl
from jax.experimental.pallas import tpu as pltpu

D_IN = 28 * 28        # 784
D_HID = 28 * 28       # 784
D_OUT = 10
N_PAD = 128           # lane-dense padded output width
TM = 128              # batch tile (multiple of 16 for bf16 sublane packing)


def mlp_kernel(x_ref, w1_ref, b1_ref, w2_ref, b2_ref, out_ref):
    # x_ref : (TM, 784)  bf16     w1_ref: (784, 784) bf16   b1_ref: (1, 784) f32
    # w2_ref: (784, 128) bf16(zero-padded)              b2_ref: (1, 128) f32
    # out_ref: (TM, 128) f32
    h = jnp.dot(x_ref[...], w1_ref[...], preferred_element_type=jnp.float32)
    h = h + b1_ref[...]                       # bias add in f32
    h = h.astype(jnp.bfloat16)                # bf16 MXU path for 2nd matmul
    o = jnp.dot(h, w2_ref[...], preferred_element_type=jnp.float32)
    out_ref[...] = (o + b2_ref[...]).astype(out_ref.dtype)


def mlp_forward(x, w1t, b1, w2t, b2):
    """Returns (output, x) exactly like the PyTorch module's forward.

    x:   (B, 784) f32
    w1t: (784, 784)  (stored as weight.T, any float dtype)
    b1:  (1, 784) f32
    w2t: (784, 10)
    b2:  (1, 10) f32
    """
    B = x.shape[0]
    b_pad = pl.cdiv(B, TM) * TM

    # Cast the matmul operands to bf16; pad batch and output-lane dims.
    x_bf = x.astype(jnp.bfloat16)
    if b_pad != B:
        x_bf = jnp.pad(x_bf, ((0, b_pad - B), (0, 0)))
    w1_bf = w1t.astype(jnp.bfloat16)
    w2_pad = jnp.zeros((D_HID, N_PAD), jnp.bfloat16).at[:, :D_OUT].set(
        w2t.astype(jnp.bfloat16))
    b1_f32 = b1.astype(jnp.float32)
    b2_pad = jnp.zeros((1, N_PAD), jnp.float32).at[:, :D_OUT].set(
        b2.astype(jnp.float32))

    grid = (b_pad // TM,)
    cost = pl.CostEstimate(
        flops=2 * b_pad * D_IN * (D_HID + N_PAD),
        transcendentals=0,
        bytes_accessed=(x_bf.size * 2 + w1_bf.size * 2 + w2_pad.size * 2 +
                        b1_f32.size * 4 + b2_pad.size * 4 + b_pad * N_PAD * 4),
    )

    out_padded = pl.pallas_call(
        mlp_kernel,
        out_shape=jax.ShapeDtypeStruct((b_pad, N_PAD), jnp.float32),
        grid=grid,
        in_specs=[
            # x: one batch tile per grid step
            pl.BlockSpec((TM, D_IN), lambda i: (i, 0)),
            # weights / biases: constant block index -> resident in VMEM
            pl.BlockSpec((D_IN, D_HID), lambda i: (0, 0)),
            pl.BlockSpec((1, D_HID), lambda i: (0, 0)),
            pl.BlockSpec((D_HID, N_PAD), lambda i: (0, 0)),
            pl.BlockSpec((1, N_PAD), lambda i: (0, 0)),
        ],
        out_specs=pl.BlockSpec((TM, N_PAD), lambda i: (i, 0)),
        compiler_params=pltpu.CompilerParams(
            dimension_semantics=("parallel",),
        ),
        cost_estimate=cost,
    )(x_bf, w1_bf, b1_f32, w2_pad, b2_pad)

    out = out_padded[:B, :D_OUT]
    return out, x


def init_params(key):
    """Deterministic init mimicking nn.Linear's U(-1/sqrt(fan_in), 1/sqrt(fan_in))."""
    k1, k2, k3, k4 = jax.random.split(key, 4)
    bound1 = 1.0 / jnp.sqrt(jnp.float32(D_IN))
    bound2 = 1.0 / jnp.sqrt(jnp.float32(D_HID))
    # stored as (in_features, out_features)  (i.e. PyTorch weight.T)
    w1t = jax.random.uniform(k1, (D_IN, D_HID), jnp.float32, -bound1, bound1)
    b1 = jax.random.uniform(k2, (1, D_HID), jnp.float32, -bound1, bound1)
    w2t = jax.random.uniform(k3, (D_HID, D_OUT), jnp.float32, -bound2, bound2)
    b2 = jax.random.uniform(k4, (1, D_OUT), jnp.float32, -bound2, bound2)
    return w1t, b1, w2t, b2


if __name__ == "__main__":
    key = jax.random.PRNGKey(0)
    kx, kp = jax.random.split(key)

    B = 200  # not a multiple of TM -> exercises the pad/slice path, grid=(2,)
    x = jax.random.normal(kx, (B, D_IN), jnp.float32)
    w1t, b1, w2t, b2 = init_params(kp)

    out, x_out = mlp_forward(x, w1t, b1, w2t, b2)
    jax.block_until_ready((out, x_out))

    # Reference in plain JAX, mirroring the kernel's bf16 rounding points.
    x_r = x.astype(jnp.bfloat16).astype(jnp.float32)
    w1_r = w1t.astype(jnp.bfloat16).astype(jnp.float32)
    w2_r = w2t.astype(jnp.bfloat16).astype(jnp.float32)
    h_r = (x_r @ w1_r + b1).astype(jnp.bfloat16).astype(jnp.float32)
    ref = h_r @ w2_r + b2

    assert out.shape == (B, D_OUT)
    assert x_out.shape == (B, D_IN)
    assert jnp.allclose(out, ref, atol=2e-2, rtol=2e-2)
    assert jnp.array_equal(x_out, x)

    print("KERNEL_OK")
</pallas_src>

<mosaic_0001>
module attributes {stable_mosaic.version = 11 : i64} {
  func.func @mlp_kernel(%arg0: i32, %arg1: memref<128x784xbf16, #tpu.memory_space<vmem>>, %arg2: memref<784x784xbf16, #tpu.memory_space<vmem>>, %arg3: memref<1x784xf32, #tpu.memory_space<vmem>>, %arg4: memref<784x128xbf16, #tpu.memory_space<vmem>>, %arg5: memref<1x128xf32, #tpu.memory_space<vmem>>, %arg6: memref<128x128xf32, #tpu.memory_space<vmem>>) attributes {dimension_semantics = [#tpu.dimension_semantics<parallel>], iteration_bounds = array<i64: 2>, scalar_prefetch = 0 : i64, scratch_operands = 0 : i64, tpu.core_type = #tpu.core_type<tc>, window_params = [{transform_indices = @transform_0, window_bounds = array<i64: 128, 784>}, {pipeline_mode = #tpu.pipeline_mode<synchronous>, transform_indices = @transform_1, window_bounds = array<i64: 784, 784>}, {pipeline_mode = #tpu.pipeline_mode<synchronous>, transform_indices = @transform_2, window_bounds = array<i64: 1, 784>}, {pipeline_mode = #tpu.pipeline_mode<synchronous>, transform_indices = @transform_3, window_bounds = array<i64: 784, 128>}, {pipeline_mode = #tpu.pipeline_mode<synchronous>, transform_indices = @transform_4, window_bounds = array<i64: 1, 128>}, {transform_indices = @transform_5, window_bounds = array<i64: 128, 128>}]} {
    %c0 = arith.constant 0 : index
    %c0_0 = arith.constant 0 : index
    %0 = vector.load %arg1[%c0, %c0_0] : memref<128x784xbf16, #tpu.memory_space<vmem>>, vector<128x784xbf16>
    %c0_1 = arith.constant 0 : index
    %c0_2 = arith.constant 0 : index
    %1 = vector.load %arg2[%c0_1, %c0_2] : memref<784x784xbf16, #tpu.memory_space<vmem>>, vector<784x784xbf16>
    %cst = arith.constant dense<0.000000e+00> : vector<128x784xf32>
    %2 = tpu.matmul %0, %1, %cst {dimension_numbers = #tpu.dot_dimension_numbers<[1], [0], [0], [1], [0, 0, 1, 1], [], []>} : vector<128x784xbf16>, vector<784x784xbf16>, vector<128x784xf32> -> vector<128x784xf32>
    %c0_3 = arith.constant 0 : index
    %c0_4 = arith.constant 0 : index
    %3 = vector.load %arg3[%c0_3, %c0_4] : memref<1x784xf32, #tpu.memory_space<vmem>>, vector<1x784xf32>
    %4 = vector.broadcast %3 : vector<1x784xf32> to vector<128x784xf32>
    %5 = arith.addf %2, %4 : vector<128x784xf32>
    %6 = arith.truncf %5 : vector<128x784xf32> to vector<128x784xbf16>
    %c0_5 = arith.constant 0 : index
    %c0_6 = arith.constant 0 : index
    %7 = vector.load %arg4[%c0_5, %c0_6] : memref<784x128xbf16, #tpu.memory_space<vmem>>, vector<784x128xbf16>
    %cst_7 = arith.constant dense<0.000000e+00> : vector<128x128xf32>
    %8 = tpu.matmul %6, %7, %cst_7 {dimension_numbers = #tpu.dot_dimension_numbers<[1], [0], [0], [1], [0, 0, 1, 1], [], []>} : vector<128x784xbf16>, vector<784x128xbf16>, vector<128x128xf32> -> vector<128x128xf32>
    %c0_8 = arith.constant 0 : index
    %c0_9 = arith.constant 0 : index
    %9 = vector.load %arg5[%c0_8, %c0_9] : memref<1x128xf32, #tpu.memory_space<vmem>>, vector<1x128xf32>
    %10 = vector.broadcast %9 : vector<1x128xf32> to vector<128x128xf32>
    %11 = arith.addf %8, %10 : vector<128x128xf32>
    %c0_10 = arith.constant 0 : index
    %c0_11 = arith.constant 0 : index
    %12 = vector.load %arg6[%c0_10, %c0_11] : memref<128x128xf32, #tpu.memory_space<vmem>>, vector<128x128xf32>
    tpu.vector_store %arg6[%c0_10, %c0_11], %11 {strides = array<i32>} : memref<128x128xf32, #tpu.memory_space<vmem>>, vector<128x128xf32>,
    return
  }
  func.func @transform_0(%arg0: i32) -> (i32, i32) {
    %c0_i32 = arith.constant 0 : i32
    %c0_i32_0 = arith.constant 0 : i32
    return %arg0, %c0_i32 : i32, i32
  }
  func.func @transform_1(%arg0: i32) -> (i32, i32) {
    %c0_i32 = arith.constant 0 : i32
    %c0_i32_0 = arith.constant 0 : i32
    %c0_i32_1 = arith.constant 0 : i32
    return %c0_i32, %c0_i32_0 : i32, i32
  }
  func.func @transform_2(%arg0: i32) -> (i32, i32) {
    %c0_i32 = arith.constant 0 : i32
    %c0_i32_0 = arith.constant 0 : i32
    %c0_i32_1 = arith.constant 0 : i32
    return %c0_i32, %c0_i32_0 : i32, i32
  }
  func.func @transform_3(%arg0: i32) -> (i32, i32) {
    %c0_i32 = arith.constant 0 : i32
    %c0_i32_0 = arith.constant 0 : i32
    %c0_i32_1 = arith.constant 0 : i32
    return %c0_i32, %c0_i32_0 : i32, i32
  }
  func.func @transform_4(%arg0: i32) -> (i32, i32) {
    %c0_i32 = arith.constant 0 : i32
    %c0_i32_0 = arith.constant 0 : i32
    %c0_i32_1 = arith.constant 0 : i32
    return %c0_i32, %c0_i32_0 : i32, i32
  }
  func.func @transform_5(%arg0: i32) -> (i32, i32) {
    %c0_i32 = arith.constant 0 : i32
    %c0_i32_0 = arith.constant 0 : i32
    return %arg0, %c0_i32 : i32, i32
  }
}

</mosaic_0001>

<bundles_post_ra>
// kernel: tpu_custom_call.1
= control target key start
LH: loop header
LB: loop body
LE: loop exit
PB: predicated region body
PF: predicated region fallthrough
CT: control target
= control target key end

     0   :  { %s10851_s0 = inlined_call_operand.vmem [shape: bf16[256,784], index: 0, kind: input, shape index: {}]   ;;  %s10852_s1 = inlined_call_operand.hbm [shape: bf16[784,784], index: 1, kind: input, shape index: {}]   ;;  %s10853_s2 = inlined_call_operand.hbm [shape: f32[1,784], index: 2, kind: input, shape index: {}]   ;;  %s10854_s3 = inlined_call_operand.hbm [shape: bf16[784,128], index: 3, kind: input, shape index: {}]   ;;  %s10855_s4 = inlined_call_operand.hbm [shape: f32[1,128], index: 4, kind: input, shape index: {}]   ;;  %s10856_s5 = inlined_call_operand.hbm [shape: f32[256,128], index: 5, kind: output, shape index: {}]  }
   0x1   :  { %11063 = sst [smem:[#allocation121_spill]] %s10852_s1 }
   0x2   :  { %11064 = sst [smem:[#allocation122_spill]] %s10853_s2 }
   0x3   :  { %10 = vsyncpa [#allocation3], 0 }
   0x4   :  { %11 = vsyncpa [#allocation6], 0 }
   0x5   :  { %12 = vsyncpa [#allocation9], 0 }
   0x6   :  { %13 = vsyncpa [#allocation4], 0 }
   0x7   :  { %15 = vsyncpa [#allocation4 + $0x1], 0  ;;  %s8842_s18 = smov 0   ;;  %s8844_s19 = smov 0  }
   0x8   :  { %s8846_s20 = smov 0   ;;  %s8848_s21 = smov 0  }
   0x9 LB: > { %s8863_s22 = sadd.s32 4294967295, %s8800_s21   ;;  %s6189_s23 = sadd.s32 4294967294, %s8800_s21   ;;  %s8800_s21 = sphi %s8848_s21, %s11453_s21   ;;  %s8796_s20 = sphi %s8846_s20, %s11452_s20   ;;  %s8792_s19 = sphi %s8844_s19, %s11451_s19   ;;  %s8788_s18 = sphi %s8842_s18, %s11450_s18  }
   0xa   : > { %s8867_s24 = sadd.s32 1, %s8800_s21   ;;  %s138_s25 = sadd.s32 1, %s8796_s20 }
   0xb   : > { %s135_s26 = ssub.s32 %s8800_s21, %s8867_s24  ;;  %p148_p0 = scmp.ne.s32.totalorder %s8796_s20, %s8792_s19 }
   0xc   : > { %p136_p1 = scmp.eq.s32.totalorder %s135_s26, 0  ;;  %p149_p2 = scmp.eq.s32.totalorder %s8863_s22, 1 }
   0xd   : > { %p154_p3 = scmp.ne.s32.totalorder %s8792_s19, %s8788_s18  ;;  %p155_p4 = scmp.eq.s32.totalorder %s6189_s23, 1 }
   0xe   : > { %s8878_s27 = scalar_select %p136_p1, %s8796_s20, %s138_s25  }
   0xf   : > { %p8880_p5 = por %p149_p2, %p148_p0  ;;  %p8884_p6 = por %p155_p4, %p154_p3 }
  0x10   : > { %p6190_p7 = scmp.ge.s32.totalorder %s8800_s21, 1  ;;  %p162_p8 = scmp.lt.s32.totalorder %s8800_s21, 3 }
  0x11   : > { %p8550_p9 = scmp.eq.s32.totalorder %s8863_s22, 0  ;;  %s11068_s2 = sld [smem:[#allocation122_spill]] }
  0x12   : > { %p8891_p10 = pnand %p6190_p7, %p162_p8  ;;  %s8802_s9 = smov [#allocation5]  }
  0x13   : > { %s190_s10 = sshll.u32 %s8802_s9, 4  ;;  %s11069_s1 = sld [smem:[#allocation121_spill]]  ;;  %s191_s10 = int_to_ptr.vmem [resolvable:$true] %s190_s10 }
  0x14   : > { %p8533_p11 = pneg %p8891_p10  ;;  %s8803_s15 = smov [#allocation2]  }
  0x15   : > { %s175_s16 = sshll.u32 %s8803_s15, 4  ;;  %s8804_s17 = smov 448   ;;  %s176_s16 = int_to_ptr.vmem [resolvable:$true] %s175_s16 }
  0x16   : > { %p8905_p12 = pnand %p8550_p9, %p8533_p11  ;;  %s8805_s23 = smov 28  }
  0x17   : > { %s188_s8 = sshll.u32 %s11068_s2, 4  ;;  %s199_s6 = sshll.u32 %s10854_s3, 4  ;;  %s189_s8 = int_to_ptr.hbm [resolvable:$true] %s188_s8  ;;  %s200_s6 = int_to_ptr.hbm [resolvable:$true] %s199_s6 }
  0x18   : > { %8539 = dma.hbm_to_vmem [thread:$0]  (!%p8905_p12), %s189_s8, 112, %s191_s10, [#allocation6]  }
  0x19   : > { %s173_s13 = sshll.u32 %s11069_s1, 4  ;;  %s8806_s7 = smov [#allocation7]   ;;  %s174_s13 = int_to_ptr.hbm [resolvable:$true] %s173_s13 }
  0x1a   : > { %8536 = dma.hbm_to_vmem [thread:$0]  (!%p8905_p12), %s174_s13, 43904, %s176_s16, [#allocation3], %s8804_s17, %s8804_s17, %s8805_s23  }
  0x1b   : > { %s201_s9 = sshll.u32 %s8806_s7, 4  ;;  %s214_s15 = sshll.u32 %s10855_s4, 4  ;;  %s202_s9 = int_to_ptr.vmem [resolvable:$true] %s201_s9  ;;  %s215_s15 = int_to_ptr.hbm [resolvable:$true] %s214_s15 }
  0x1c   : > { %s8807_s1 = smov 64   ;;  %s8808_s8 = smov 4  }
  0x1d   : > { %8542 = dma.hbm_to_vmem [thread:$0]  (!%p8905_p12), %s200_s6, 6272, %s202_s9, [#allocation6], %s8807_s1, %s8807_s1, %s8808_s8  }
  0x1e   : > { %s8809_s10 = smov [#allocation8]   ;;  %239 = sbr.rel (%p8891_p10) target bundleno = 2008 (0x7d8), region = 40 }
  0x1f   : > { %s216_s2 = sshll.u32 %s8809_s10, 4  ;;  %s217_s2 = int_to_ptr.vmem [resolvable:$true] %s216_s2 }
  0x20   : > { %8545 = dma.hbm_to_vmem [thread:$0]  (!%p8905_p12), %s215_s15, 16, %s217_s2, [#allocation9]  }
  0x23   : > { %8771 = dma.done.wait (%p8550_p9), [#allocation3], 43904  }
  0x24   : > { %8773 = vsyncadd (%p8550_p9), [#allocation3], 4294923392 }
  0x25   : > { %8775 = dma.done.wait (%p8550_p9), [#allocation6], 6384  }
  0x26   : > { %8777 = vsyncadd (%p8550_p9), [#allocation6], 4294960912 }
  0x27   : > { %8779 = dma.done.wait (%p8550_p9), [#allocation9], 16  }
  0x28   : > { %8781 = vsyncadd (%p8550_p9), [#allocation9], 4294967280  ;;  %s6202_s1 = sshll.u32 %s8863_s22, 4  ;;  %v6626_v0 = vld [vmem:[#allocation2 + $0x188] sm:$0xf]  ;;  %vm2809_vm0 = vcmask 130048  }
  0x29   : > { %v8173_v1 = vld [vmem:[#allocation2 + $0x1a0] sm:$0xf0]  ;;  %v6850_v2 = vld [vmem:[#allocation2 + $0x348] sm:$0xf]  ;;  %v6598_v11 = vld [vmem:[#allocation2 + $0x150] sm:$0xf] }
  0x2a   : > { %v6627_v3 = vor.u32 %v8173_v1, %v6626_v0  ;;  %v8229_v4 = vld [vmem:[#allocation2 + $0x360] sm:$0xf0]  ;;  %v7074_v5 = vld [vmem:[#allocation2 + $0x508] sm:$0xf]  ;;  %v8166_v13 = vld [vmem:[#allocation2 + $0x168] sm:$0xf0] }
  0x2b   : > { %v8285_v6 = vld [vmem:[#allocation2 + $0x520] sm:$0xf0]  ;;  %v6851_v7 = vor.u32 %v8229_v4, %v6850_v2  ;;  %v7298_v9 = vld [vmem:[#allocation2 + $0x6c8] sm:$0xf]  ;;  %v6822_v14 = vld [vmem:[#allocation2 + $0x310] sm:$0xf]  ;;  %v6599_v16 = vor.u32 %v8166_v13, %v6598_v11 }
  0x2c   : > { %v7075_v8 = vor.u32 %v8285_v6, %v7074_v5  ;;  %v8341_v10 = vld [vmem:[#allocation2 + $0x6e0] sm:$0xf0]  ;;  %2834 = vmatpush.bf16.msra.mxu0 %v6627_v3  ;;  %v8222_v15 = vld [vmem:[#allocation2 + $0x328] sm:$0xf0]  ;;  %v7046_v18 = vld [vmem:[#allocation2 + $0x4d0] sm:$0xf] }
  0x2d   : > { %v7299_v12 = vor.u32 %v8341_v10, %v7298_v9  ;;  %2883 = vmatpush.bf16.msra.mxu1 %v6851_v7  ;;  %v6823_v17 = vor.u32 %v8222_v15, %v6822_v14  ;;  %v8278_v19 = vld [vmem:[#allocation2 + $0x4e8] sm:$0xf0]  ;;  %v7270_v20 = vld [vmem:[#allocation2 + $0x690] sm:$0xf]  ;;  %v6570_v23 = vld [vmem:[#allocation2 + $0x118] sm:$0xf] }
  0x2e   : > { %2932 = vmatpush.bf16.msra.mxu2 %v7075_v8  ;;  %v7047_v21 = vor.u32 %v8278_v19, %v7046_v18  ;;  %v8334_v22 = vld [vmem:[#allocation2 + $0x6a8] sm:$0xf0]  ;;  %v8159_v24 = vld [vmem:[#allocation2 + $0x130] sm:$0xf0]  ;;  %v6794_v26 = vld [vmem:[#allocation2 + $0x2d8] sm:$0xf] }
  0x2f   : > { %2981 = vmatpush.bf16.msra.mxu3 %v7299_v12  ;;  %v7271_v25 = vor.u32 %v8334_v22, %v7270_v20  ;;  %v8215_v27 = vld [vmem:[#allocation2 + $0x2f0] sm:$0xf0]  ;;  %v7018_v28 = vld [vmem:[#allocation2 + $0x498] sm:$0xf]  ;;  %v6571_v29 = vor.u32 %v8159_v24, %v6570_v23  ;;  %v6542_v35 = vld [vmem:[#allocation2 + $0xe0] sm:$0xf] }
  0x30   : > { %2835 = vmatpush.bf16.msra.mxu0 %v6599_v16  ;;  %v8271_v30 = vld [vmem:[#allocation2 + $0x4b0] sm:$0xf0]  ;;  %v7242_v31 = vld [vmem:[#allocation2 + $0x658] sm:$0xf]  ;;  %v6795_v33 = vor.u32 %v8215_v27, %v6794_v26  ;;  %v8152_v36 = vld [vmem:[#allocation2 + $0xf8] sm:$0xf0] }
  0x31   : > { %v8327_v32 = vld [vmem:[#allocation2 + $0x670] sm:$0xf0]  ;;  %2884 = vmatpush.bf16.msra.mxu1 %v6823_v17  ;;  %v7019_v34 = vor.u32 %v8271_v30, %v7018_v28  ;;  %v6766_v37 = vld [vmem:[#allocation2 + $0x2a0] sm:$0xf]  ;;  %v8208_v39 = vld [vmem:[#allocation2 + $0x2b8] sm:$0xf0]  ;;  %v6543_v44 = vor.u32 %v8152_v36, %v6542_v35 }
  0x32   : > { %2933 = vmatpush.bf16.msra.mxu2 %v7047_v21  ;;  %v7243_v38 = vor.u32 %v8327_v32, %v7242_v31  ;;  %v6990_v40 = vld [vmem:[#allocation2 + $0x460] sm:$0xf]  ;;  %v8264_v41 = vld [vmem:[#allocation2 + $0x478] sm:$0xf0]  ;;  %p8940_p13 = scmp.lt.s32.totalorder %s6202_s1, 31  ;;  %v6767_v45 = vor.u32 %v8208_v39, %v6766_v37  ;;  %s281_s17 = sand.u32 1, %s8792_s19  }
  0x33   : > { %2982 = vmatpush.bf16.msra.mxu3 %v7271_v25  ;;  %v7214_v42 = vld [vmem:[#allocation2 + $0x620] sm:$0xf]  ;;  %v8320_v43 = vld [vmem:[#allocation2 + $0x638] sm:$0xf0]  ;;  %v6991_v46 = vor.u32 %v8264_v41, %v6990_v40  ;;  %v6514_v47 = vld [vmem:[#allocation2 + $0xa8] sm:$0xf] }
  0x34   : > { %2836 = vmatpush.bf16.msra.mxu0 %v6571_v29  ;;  %v8145_v48 = vld [vmem:[#allocation2 + $0xc0] sm:$0xf0]  ;;  %v6738_v49 = vld [vmem:[#allocation2 + $0x268] sm:$0xf]  ;;  %v7215_v50 = vor.u32 %v8320_v43, %v7214_v42  ;;  %s11455_s1 = smov (!%p8940_p13, %s6202_s1), 31  ;;  %s6201_s23 = sshll.u32 %s281_s17, 7 }
  0x35   : > { %2885 = vmatpush.bf16.msra.mxu1 %v6795_v33  ;;  %v8201_v51 = vld [vmem:[#allocation2 + $0x280] sm:$0xf0]  ;;  %v6962_v52 = vld [vmem:[#allocation2 + $0x428] sm:$0xf]  ;;  %v6515_v56 = vor.u32 %v8145_v48, %v6514_v47  ;;  %v6486_v59 = vld [vmem:[#allocation2 + $0x70] sm:$0xf] }
  0x36   : > { %2934 = vmatpush.bf16.msra.mxu2 %v7019_v34  ;;  %v8257_v53 = vld [vmem:[#allocation2 + $0x440] sm:$0xf0]  ;;  %v7186_v54 = vld [vmem:[#allocation2 + $0x5e8] sm:$0xf]  ;;  %v6739_v57 = vor.u32 %v8201_v51, %v6738_v49  ;;  %v8138_v60 = vld [vmem:[#allocation2 + $0x88] sm:$0xf0] }
  0x37   : > { %2983 = vmatpush.bf16.msra.mxu3 %v7243_v38  ;;  %v8313_v55 = vld [vmem:[#allocation2 + $0x600] sm:$0xf0]  ;;  %v6963_v58 = vor.u32 %v8257_v53, %v6962_v52  ;;  %v6710_v61 = vld [vmem:[#allocation2 + $0x230] sm:$0xf]  ;;  %v8194_v63 = vld [vmem:[#allocation2 + $0x248] sm:$0xf0]  ;;  %v6487_v4 = vor.u32 %v8138_v60, %v6486_v59 }
  0x38   : > { %2837 = vmatpush.bf16.msra.mxu0 %v6543_v44  ;;  %v7187_v62 = vor.u32 %v8313_v55, %v7186_v54  ;;  %v6934_v0 = vld [vmem:[#allocation2 + $0x3f0] sm:$0xf]  ;;  %v8250_v1 = vld [vmem:[#allocation2 + $0x408] sm:$0xf0]  ;;  %s8514_s30 = smul.u32 28, %s11455_s1  ;;  %v6711_v5 = vor.u32 %v8194_v63, %v6710_v61  ;;  %s10785_s25 = scalar_lea.vmem [#allocation10], %s6201_s23 }
  0x39   : > { %2886 = vmatpush.bf16.msra.mxu1 %v6767_v45  ;;  %v7158_v2 = vld [vmem:[#allocation2 + $0x5b0] sm:$0xf]  ;;  %v8306_v3 = vld [vmem:[#allocation2 + $0x5c8] sm:$0xf0]  ;;  %v6935_v6 = vor.u32 %v8250_v1, %v6934_v0  ;;  %v6458_v7 = vld [vmem:[#allocation2 + $0x38] sm:$0xf] }
  0x3a   : > { %2935 = vmatpush.bf16.msra.mxu2 %v6991_v46  ;;  %v8131_v8 = vld [vmem:[#allocation2 + $0x50] sm:$0xf0]  ;;  %v6682_v9 = vld [vmem:[#allocation2 + $0x1f8] sm:$0xf]  ;;  %v7159_v10 = vor.u32 %v8306_v3, %v7158_v2  ;;  %v6430_v16 = vld [vmem:[#allocation2] sm:$0xf]  ;;  %s8954_s16 = scalar_lea.vmem %s10851_s0, %s8514_s30 }
  0x3b   : > { %2984 = vmatpush.bf16.msra.mxu3 %v7215_v50  ;;  %v8187_v11 = vld [vmem:[#allocation2 + $0x210] sm:$0xf0]  ;;  %v6906_v12 = vld [vmem:[#allocation2 + $0x3b8] sm:$0xf]  ;;  %v6459_v17 = vor.u32 %v8131_v8, %v6458_v7  ;;  %v8124_v18 = vld [vmem:[#allocation2 + $0x18] sm:$0xf0] }
  0x3c   : > { %2838 = vmatpush.bf16.msra.mxu0 %v6515_v56  ;;  %v8243_v13 = vld [vmem:[#allocation2 + $0x3d0] sm:$0xf0]  ;;  %v7130_v14 = vld [vmem:[#allocation2 + $0x578] sm:$0xf]  ;;  %v6654_v19 = vld [vmem:[#allocation2 + $0x1c0] sm:$0xf]  ;;  %v6683_v21 = vor.u32 %v8187_v11, %v6682_v9  ;;  %v6431_v34 = vor.u32 %v8124_v18, %v6430_v16 }
  0x3d   : > { %2887 = vmatpush.bf16.msra.mxu1 %v6739_v57  ;;  %v8299_v15 = vld [vmem:[#allocation2 + $0x590] sm:$0xf0]  ;;  %v8180_v20 = vld [vmem:[#allocation2 + $0x1d8] sm:$0xf0]  ;;  %v6907_v22 = vor.u32 %v8243_v13, %v6906_v12  ;;  %v6878_v23 = vld [vmem:[#allocation2 + $0x380] sm:$0xf] }
  0x3e   : > { %2936 = vmatpush.bf16.msra.mxu2 %v6963_v58  ;;  %v8236_v24 = vld [vmem:[#allocation2 + $0x398] sm:$0xf0]  ;;  %v7102_v25 = vld [vmem:[#allocation2 + $0x540] sm:$0xf]  ;;  %v7131_v26 = vor.u32 %v8299_v15, %v7130_v14  ;;  %v8065_v30 = vld [vmem:[%s8954_s16 + $0x4] sm:$0xf]  ;;  %v6655_v38 = vor.u32 %v8180_v20, %v6654_v19 }
  0x3f   : > { %2985 = vmatpush.bf16.msra.mxu3 %v7187_v62  ;;  %v8292_v27 = vld [vmem:[#allocation2 + $0x558] sm:$0xf0]  ;;  %v6206_v28 = vld [vmem:[%s8954_s16] sm:$0xf]  ;;  %v7522_v32 = vld [vmem:[#allocation2 + $0x888] sm:$0xf]  ;;  %v6879_v39 = vor.u32 %v8236_v24, %v6878_v23 }
  0x40   : > { %2839 = vmatpush.bf16.msra.mxu0 %v6487_v4  ;;  %v8068_v29 = vld [vmem:[%s8954_s16 + $0x18] sm:$0xf0]  ;;  %v6208_v31 = vld [vmem:[%s8954_s16 + $0x1c] sm:$0xf0]  ;;  %v8397_v33 = vld [vmem:[#allocation2 + $0x8a0] sm:$0xf0]  ;;  %v7103_v43 = vor.u32 %v8292_v27, %v7102_v25 }
  0x41   : > { %2888 = vmatpush.bf16.msra.mxu1 %v6711_v5  ;;  %v6214_v35 = vld [vmem:[%s8954_s16 + $0x8] sm:$0xf]  ;;  %v7774_v36 = vld [vmem:[#allocation2 + $0xa80] sm:$0xf]  ;;  %v8460_v37 = vld [vmem:[#allocation2 + $0xa98] sm:$0xf0]  ;;  %v7523_v44 = vor.u32 %v8397_v33, %v7522_v32  ;;  %v8964_v48 = vor.u32 %v8068_v29, %v6206_v28  ;;  %v8966_v53 = vor.u32 %v8065_v30, %v6208_v31 }
  0x42   : > { %2937 = vmatpush.bf16.msra.mxu2 %v6935_v6  ;;  %v8069_v40 = vld [vmem:[%s8954_s16 + $0x20] sm:$0xf0]  ;;  %v8066_v41 = vld [vmem:[%s8954_s16 + $0xc] sm:$0xf]  ;;  %v6216_v42 = vld [vmem:[%s8954_s16 + $0x24] sm:$0xf0]  ;;  %v7775_v49 = vor.u32 %v8460_v37, %v7774_v36 }
  0x43   : > { %2986 = vmatpush.bf16.msra.mxu3 %v7159_v10  ;;  %v8170_v45 = vld [vmem:[#allocation2 + $0x18c] sm:$0xf]  ;;  %v7746_v46 = vld [vmem:[#allocation2 + $0xa48] sm:$0xf]  ;;  %v8453_v47 = vld [vmem:[#allocation2 + $0xa60] sm:$0xf0]  ;;  %v8968_v54 = vor.u32 %v8069_v40, %v6214_v35  ;;  %v8970_v55 = vor.u32 %v8066_v41, %v6216_v42 }
  0x44   : > { %2840 = vmatpush.bf16.msra.mxu0 %v6459_v17  ;;  %11072 = vst [vmem:[#allocation15_spill] sm:$0xff] %v8964_v48  ;;  %v6628_v50 = vld [vmem:[#allocation2 + $0x1a4] sm:$0xf0]  ;;  %v7494_v51 = vld [vmem:[#allocation2 + $0x850] sm:$0xf]  ;;  %v7747_v56 = vor.u32 %v8453_v47, %v7746_v46  ;;  %s8513_s26 = sshll.u32 %s8863_s22, 7 }
  0x45   : > { %2889 = vmatpush.bf16.msra.mxu1 %v6683_v21  ;;  %v8390_v52 = vld [vmem:[#allocation2 + $0x868] sm:$0xf0]  ;;  %11073 = vst [vmem:[#allocation16_spill] sm:$0xff] %v8966_v53  ;;  %v6631_v57 = vor.u32 %v8170_v45, %v6628_v50  ;;  %v7718_v59 = vld [vmem:[#allocation2 + $0xa10] sm:$0xf]  ;;  %s6082_s9 = scalar_lea.hbm %s10856_s5, %s8513_s26  ;;  %s6083_s11 = sshll.u32 %s10785_s25, 4  ;;  %s6084_s11 = int_to_ptr.vmem [resolvable:$true] %s6083_s11 }
  0x46   : > { %2938 = vmatpush.bf16.msra.mxu2 %v6907_v22  ;;  %11074 = vst [vmem:[#allocation17_spill] sm:$0xff] %v8968_v54  ;;  %v7495_v58 = vor.u32 %v8390_v52, %v7494_v51  ;;  %v8446_v60 = vld [vmem:[#allocation2 + $0xa28] sm:$0xf0]  ;;  %v8163_v61 = vld [vmem:[#allocation2 + $0x154] sm:$0xf]  ;;  %s6085_s12 = sshll.u32 %s6082_s9, 4  ;;  %s6086_s12 = int_to_ptr.hbm [resolvable:$true] %s6085_s12 }
  0x47   : > { %2987 = vmatpush.bf16.msra.mxu3 %v7131_v26  ;;  %11075 = vst [vmem:[#allocation18_spill] sm:$0xff] %v8970_v55  ;;  %v6600_v62 = vld [vmem:[#allocation2 + $0x16c] sm:$0xf0]  ;;  %v7719_v63 = vor.u32 %v8446_v60, %v7718_v59  ;;  %v7466_v0 = vld [vmem:[#allocation2 + $0x818] sm:$0xf]  ;;  %s6071_s22 = scalar_lea.sflag [#allocation4], %s281_s17 }
  0x48   : > { %2841 = vmatpush.bf16.msra.mxu0 %v6431_v34  ;;  %v8383_v1 = vld [vmem:[#allocation2 + $0x830] sm:$0xf0]  ;;  %v6603_v2 = vor.u32 %v8163_v61, %v6600_v62  ;;  %v7690_v4 = vld [vmem:[#allocation2 + $0x9d8] sm:$0xf]  ;;  %v8156_v6 = vld [vmem:[#allocation2 + $0x11c] sm:$0xf] }
  0x49   : > { %2890 = vmatpush.bf16.msra.mxu1 %v6655_v38  ;;  %v7467_v3 = vor.u32 %v8383_v1, %v7466_v0  ;;  %v8439_v5 = vld [vmem:[#allocation2 + $0x9f0] sm:$0xf0]  ;;  %v6572_v7 = vld [vmem:[#allocation2 + $0x134] sm:$0xf0]  ;;  %v8072_v12 = vld [vmem:[%s8954_s16 + $0x3c] sm:$0xf] }
  0x4a   : > { %2939 = vmatpush.bf16.msra.mxu2 %v6879_v39  ;;  %v7691_v8 = vor.u32 %v8439_v5, %v7690_v4  ;;  %v6575_v9 = vor.u32 %v8156_v6, %v6572_v7  ;;  %v6234_v10 = vld [vmem:[%s8954_s16 + $0x38] sm:$0xf]  ;;  %v8075_v11 = vld [vmem:[%s8954_s16 + $0x50] sm:$0xf0]  ;;  %v6242_v14 = vld [vmem:[%s8954_s16 + $0x40] sm:$0xf] }
  0x4b   : > { %2988 = vmatpush.bf16.msra.mxu3 %v7103_v43  ;;  %2842 = vmatmul.bf16.vlgmr.msra.gmra.mxu0 %v8964_v48  ;;  %v6236_v13 = vld [vmem:[%s8954_s16 + $0x54] sm:$0xf0]  ;;  %v8076_v15 = vld [vmem:[%s8954_s16 + $0x58] sm:$0xf0]  ;;  %v8073_v16 = vld [vmem:[%s8954_s16 + $0x44] sm:$0xf]  ;;  %v8984_v18 = vor.u32 %v8075_v11, %v6234_v10 }
  0x4c   : > { %3030 = vmatpush.bf16.msrb.mxu0 %v7523_v44  ;;  %2891 = vmatmul.bf16.vlgmr.msra.gmra.mxu1 %v8966_v53  ;;  %v6244_v17 = vld [vmem:[%s8954_s16 + $0x5c] sm:$0xf0]  ;;  %v8986_v19 = vor.u32 %v8072_v12, %v6236_v13  ;;  %v8988_v20 = vor.u32 %v8076_v15, %v6242_v14  ;;  %v8376_v23 = vld [vmem:[#allocation2 + $0x7f8] sm:$0xf0]  ;;  %v8149_v24 = vld [vmem:[#allocation2 + $0xe4] sm:$0xf] }
  0x4d   : > { %2940 = vmatmul.bf16.vlgmr.msra.gmra.mxu2 %v8968_v54  ;;  %3079 = vmatpush.bf16.msrb.mxu1 %v7747_v56  ;;  %11076 = vst [vmem:[#allocation19_spill] sm:$0xff] %v8984_v18  ;;  %v8990_v21 = vor.u32 %v8073_v16, %v6244_v17  ;;  %v7438_v22 = vld [vmem:[#allocation2 + $0x7e0] sm:$0xf]  ;;  %v8432_v28 = vld [vmem:[#allocation2 + $0x9b8] sm:$0xf0]  ;;  %s8740_s15 = sshra.s32 %s6086_s12, 4  ;;  %s8741_s15 = int_to_ptr.hbm [resolvable:$true] %s8740_s15 }
  0x4e   : > { %3135 = vmatpush.bf16.msrb.mxu2 %v7775_v49  ;;  %2989 = vmatmul.bf16.vlgmr.msra.gmra.mxu3 %v8970_v55  ;;  %11077 = vst [vmem:[#allocation20_spill] sm:$0xff] %v8986_v19  ;;  %v7439_v25 = vor.u32 %v8376_v23, %v7438_v22  ;;  %v6544_v26 = vld [vmem:[#allocation2 + $0xfc] sm:$0xf0]  ;;  %v6262_v31 = vld [vmem:[%s8954_s16 + $0x70] sm:$0xf]  ;;  %s8742_s8 = scalar_lea.hbm %s8741_s15, 128  ;;  %p8747_p3 = scmp.lt.s32.totalorder %s8741_s15, %s10856_s5 }
  0x4f   : > { %3177 = vmatpush.bf16.msrb.mxu3 %v6631_v57  ;;  %11078 = vst [vmem:[#allocation21_spill] sm:$0xff] %v8988_v20  ;;  %v7662_v27 = vld [vmem:[#allocation2 + $0x9a0] sm:$0xf]  ;;  %v6547_v29 = vor.u32 %v8149_v24, %v6544_v26  ;;  %v8082_v32 = vld [vmem:[%s8954_s16 + $0x88] sm:$0xf0]  ;;  %p8743_p0 = scmp.ne.s32.totalorder %s8741_s15, %s8742_s8  ;;  %s8746_s2 = scalar_lea.hbm %s10856_s5, 256 }
  0x50   : > { %3031 = vmatpush.bf16.msrb.mxu0 %v7495_v58  ;;  %11079 = vst [vmem:[#allocation22_spill] sm:$0xff] %v8990_v21  ;;  %v7663_v30 = vor.u32 %v8432_v28, %v7662_v27  ;;  %v8079_v33 = vld [vmem:[%s8954_s16 + $0x74] sm:$0xf]  ;;  %v6264_v34 = vld [vmem:[%s8954_s16 + $0x8c] sm:$0xf0]  ;;  %v9004_v39 = vor.u32 %v8082_v32, %v6262_v31  ;;  %p8748_p4 = scmp.lt.s32.totalorder %s8746_s2, %s8742_s8 }
  0x51   : > { %3080 = vmatpush.bf16.msrb.mxu1 %v7719_v63  ;;  %v6270_v35 = vld [vmem:[%s8954_s16 + $0x78] sm:$0xf]  ;;  %v8083_v36 = vld [vmem:[%s8954_s16 + $0x90] sm:$0xf0]  ;;  %v8080_v37 = vld [vmem:[%s8954_s16 + $0x7c] sm:$0xf]  ;;  %v9006_v40 = vor.u32 %v8079_v33, %v6264_v34  ;;  %p8744_p1 = pnand %p8743_p0, %p8880_p5 }
  0x52   : > { %v6272_v38 = vld [vmem:[%s8954_s16 + $0x94] sm:$0xf0]  ;;  %11080 = vst [vmem:[#allocation23_spill] sm:$0xff] %v9004_v39  ;;  %v9008_v41 = vor.u32 %v8083_v36, %v6270_v35  ;;  %v7410_v43 = vld [vmem:[#allocation2 + $0x7a8] sm:$0xf]  ;;  %p8749_p7 = por %p8748_p4, %p8747_p3 }
  0x53   : > { %3178 = vmatpush.bf16.msrb.mxu3 %v6603_v2  ;;  %11081 = vst [vmem:[#allocation24_spill] sm:$0xff] %v9006_v40  ;;  %v9010_v42 = vor.u32 %v8080_v37, %v6272_v38  ;;  %v8369_v44 = vld [vmem:[#allocation2 + $0x7c0] sm:$0xf0]  ;;  %v8142_v45 = vld [vmem:[#allocation2 + $0xac] sm:$0xf]  ;;  %p8745_p2 = pneg %p8744_p1 }
  0x54   : > { %3032 = vmatpush.bf16.msrb.mxu0 %v7467_v3  ;;  %11082 = vst [vmem:[#allocation25_spill] sm:$0xff] %v9008_v41  ;;  %v7411_v46 = vor.u32 %v8369_v44, %v7410_v43  ;;  %v6516_v47 = vld [vmem:[#allocation2 + $0xc4] sm:$0xf0]  ;;  %v8425_v50 = vld [vmem:[#allocation2 + $0x980] sm:$0xf0] }
  0x55   : > { %3081 = vmatpush.bf16.msrb.mxu1 %v7691_v8  ;;  %11083 = vst [vmem:[#allocation26_spill] sm:$0xff] %v9010_v42  ;;  %v7634_v49 = vld [vmem:[#allocation2 + $0x968] sm:$0xf]  ;;  %v6519_v51 = vor.u32 %v8142_v45, %v6516_v47  ;;  %v8089_v57 = vld [vmem:[%s8954_s16 + $0xc0] sm:$0xf0]  ;;  %p8750_p8 = pnand %p8749_p7, %p8745_p2 }
  0x56   : > { %v7635_v52 = vor.u32 %v8425_v50, %v7634_v49  ;;  %v6290_v56 = vld [vmem:[%s8954_s16 + $0xa8] sm:$0xf]  ;;  %v8086_v58 = vld [vmem:[%s8954_s16 + $0xac] sm:$0xf]  ;;  %v6298_v60 = vld [vmem:[%s8954_s16 + $0xb0] sm:$0xf] }
  0x57   : > { %3179 = vmatpush.bf16.msrb.mxu3 %v6575_v9  ;;  %v6292_v59 = vld [vmem:[%s8954_s16 + $0xc4] sm:$0xf0]  ;;  %v8090_v61 = vld [vmem:[%s8954_s16 + $0xc8] sm:$0xf0]  ;;  %v8087_v62 = vld [vmem:[%s8954_s16 + $0xb4] sm:$0xf]  ;;  %v9024_v0 = vor.u32 %v8089_v57, %v6290_v56 }
  0x58   : > { %3033 = vmatpush.bf16.msrb.mxu0 %v7439_v25  ;;  %v6300_v63 = vld [vmem:[%s8954_s16 + $0xcc] sm:$0xf0]  ;;  %v9026_v1 = vor.u32 %v8086_v58, %v6292_v59  ;;  %v9028_v2 = vor.u32 %v8090_v61, %v6298_v60  ;;  %v8362_v5 = vld [vmem:[#allocation2 + $0x788] sm:$0xf0]  ;;  %v8135_v6 = vld [vmem:[#allocation2 + $0x74] sm:$0xf] }
  0x59   : > { %3082 = vmatpush.bf16.msrb.mxu1 %v7663_v30  ;;  %11084 = vst [vmem:[#allocation27_spill] sm:$0xff] %v9024_v0  ;;  %v9030_v3 = vor.u32 %v8087_v62, %v6300_v63  ;;  %v7382_v4 = vld [vmem:[#allocation2 + $0x770] sm:$0xf]  ;;  %v8418_v10 = vld [vmem:[#allocation2 + $0x948] sm:$0xf0] }
  0x5a   : > { %11085 = vst [vmem:[#allocation28_spill] sm:$0xff] %v9026_v1  ;;  %v7383_v7 = vor.u32 %v8362_v5, %v7382_v4  ;;  %v6488_v8 = vld [vmem:[#allocation2 + $0x8c] sm:$0xf0]  ;;  %v6318_v13 = vld [vmem:[%s8954_s16 + $0xe0] sm:$0xf] }
  0x5b   : > { %2847 = vmatmul.bf16.gmra.mxu0 %v8984_v18  ;;  %3180 = vmatpush.bf16.msrb.mxu3 %v6547_v29  ;;  %11086 = vst [vmem:[#allocation29_spill] sm:$0xff] %v9028_v2  ;;  %v7606_v9 = vld [vmem:[#allocation2 + $0x930] sm:$0xf]  ;;  %v6491_v11 = vor.u32 %v8135_v6, %v6488_v8  ;;  %v8096_v14 = vld [vmem:[%s8954_s16 + $0xf8] sm:$0xf0] }
  0x5c   : > { %2896 = vmatmul.bf16.gmra.mxu1 %v8986_v19  ;;  %3034 = vmatpush.bf16.msrb.mxu0 %v7411_v46  ;;  %11087 = vst [vmem:[#allocation30_spill] sm:$0xff] %v9030_v3  ;;  %v7607_v12 = vor.u32 %v8418_v10, %v7606_v9  ;;  %v8093_v15 = vld [vmem:[%s8954_s16 + $0xe4] sm:$0xf]  ;;  %v6320_v16 = vld [vmem:[%s8954_s16 + $0xfc] sm:$0xf0]  ;;  %v9044_v25 = vor.u32 %v8096_v14, %v6318_v13 }
  0x5d   : > { %2945 = vmatmul.bf16.gmra.mxu2 %v8988_v20  ;;  %3083 = vmatpush.bf16.msrb.mxu1 %v7635_v52  ;;  %v6326_v17 = vld [vmem:[%s8954_s16 + $0xe8] sm:$0xf]  ;;  %v8097_v22 = vld [vmem:[%s8954_s16 + $0x100] sm:$0xf0]  ;;  %v8094_v23 = vld [vmem:[%s8954_s16 + $0xec] sm:$0xf]  ;;  %v9046_v26 = vor.u32 %v8093_v15, %v6320_v16 }
  0x5e   : > { %2994 = vmatmul.bf16.gmra.mxu3 %v8990_v21  ;;  %v6328_v24 = vld [vmem:[%s8954_s16 + $0x104] sm:$0xf0]  ;;  %11088 = vst [vmem:[#allocation31_spill] sm:$0xff] %v9044_v25  ;;  %v9048_v27 = vor.u32 %v8097_v22, %v6326_v17  ;;  %v7354_v29 = vld [vmem:[#allocation2 + $0x738] sm:$0xf] }
  0x5f   : > { %3181 = vmatpush.bf16.msrb.mxu3 %v6519_v51  ;;  %11089 = vst [vmem:[#allocation32_spill] sm:$0xff] %v9046_v26  ;;  %v9050_v28 = vor.u32 %v8094_v23, %v6328_v24  ;;  %v8355_v30 = vld [vmem:[#allocation2 + $0x750] sm:$0xf0]  ;;  %v8128_v31 = vld [vmem:[#allocation2 + $0x3c] sm:$0xf] }
  0x60   : > { %3035 = vmatpush.bf16.msrb.mxu0 %v7383_v7  ;;  %11090 = vst [vmem:[#allocation33_spill] sm:$0xff] %v9048_v27  ;;  %v7355_v32 = vor.u32 %v8355_v30, %v7354_v29  ;;  %v6460_v33 = vld [vmem:[#allocation2 + $0x54] sm:$0xf0]  ;;  %v8411_v35 = vld [vmem:[#allocation2 + $0x910] sm:$0xf0] }
  0x61   : > { %3084 = vmatpush.bf16.msrb.mxu1 %v7607_v12  ;;  %11091 = vst [vmem:[#allocation34_spill] sm:$0xff] %v9050_v28  ;;  %v7578_v34 = vld [vmem:[#allocation2 + $0x8f8] sm:$0xf]  ;;  %v6463_v36 = vor.u32 %v8128_v31, %v6460_v33  ;;  %v8103_v43 = vld [vmem:[%s8954_s16 + $0x130] sm:$0xf0] }
  0x62   : > { %v7579_v37 = vor.u32 %v8411_v35, %v7578_v34  ;;  %v6346_v38 = vld [vmem:[%s8954_s16 + $0x118] sm:$0xf]  ;;  %v8100_v44 = vld [vmem:[%s8954_s16 + $0x11c] sm:$0xf]  ;;  %v6354_v46 = vld [vmem:[%s8954_s16 + $0x120] sm:$0xf] }
  0x63   : > { %3182 = vmatpush.bf16.msrb.mxu3 %v6491_v11  ;;  %v6348_v45 = vld [vmem:[%s8954_s16 + $0x134] sm:$0xf0]  ;;  %v8104_v47 = vld [vmem:[%s8954_s16 + $0x138] sm:$0xf0]  ;;  %v8101_v49 = vld [vmem:[%s8954_s16 + $0x124] sm:$0xf]  ;;  %v9064_v51 = vor.u32 %v8103_v43, %v6346_v38 }
  0x64   : > { %3036 = vmatpush.bf16.msrb.mxu0 %v7355_v32  ;;  %v6356_v50 = vld [vmem:[%s8954_s16 + $0x13c] sm:$0xf0]  ;;  %v9066_v52 = vor.u32 %v8100_v44, %v6348_v45  ;;  %v9068_v56 = vor.u32 %v8104_v47, %v6354_v46  ;;  %v8348_v59 = vld [vmem:[#allocation2 + $0x718] sm:$0xf0]  ;;  %v8121_v60 = vld [vmem:[#allocation2 + $0x4] sm:$0xf] }
  0x65   : > { %3085 = vmatpush.bf16.msrb.mxu1 %v7579_v37  ;;  %11092 = vst [vmem:[#allocation35_spill] sm:$0xff] %v9064_v51  ;;  %v9070_v57 = vor.u32 %v8101_v49, %v6356_v50  ;;  %v7326_v58 = vld [vmem:[#allocation2 + $0x700] sm:$0xf]  ;;  %v8404_v4 = vld [vmem:[#allocation2 + $0x8d8] sm:$0xf0] }
  0x66   : > { %11093 = vst [vmem:[#allocation36_spill] sm:$0xff] %v9066_v52  ;;  %v7327_v61 = vor.u32 %v8348_v59, %v7326_v58  ;;  %v6432_v62 = vld [vmem:[#allocation2 + $0x1c] sm:$0xf0]  ;;  %v6374_v7 = vld [vmem:[%s8954_s16 + $0x150] sm:$0xf] }
  0x67   : > { %3183 = vmatpush.bf16.msrb.mxu3 %v6463_v36  ;;  %11094 = vst [vmem:[#allocation37_spill] sm:$0xff] %v9068_v56  ;;  %v7550_v63 = vld [vmem:[#allocation2 + $0x8c0] sm:$0xf]  ;;  %v6435_v5 = vor.u32 %v8121_v60, %v6432_v62  ;;  %v8110_v8 = vld [vmem:[%s8954_s16 + $0x168] sm:$0xf0] }
  0x68   : > { %11095 = vst [vmem:[#allocation38_spill] sm:$0xff] %v9070_v57  ;;  %v7551_v6 = vor.u32 %v8404_v4, %v7550_v63  ;;  %3037 = vmatpush.bf16.msrb.mxu0 %v7327_v61  ;;  %v8107_v9 = vld [vmem:[%s8954_s16 + $0x154] sm:$0xf]  ;;  %v6376_v10 = vld [vmem:[%s8954_s16 + $0x16c] sm:$0xf0]  ;;  %v9084_v15 = vor.u32 %v8110_v8, %v6374_v7 }
  0x69   : > { %v6382_v11 = vld [vmem:[%s8954_s16 + $0x158] sm:$0xf]  ;;  %v8111_v12 = vld [vmem:[%s8954_s16 + $0x170] sm:$0xf0]  ;;  %v8108_v13 = vld [vmem:[%s8954_s16 + $0x15c] sm:$0xf]  ;;  %v9086_v16 = vor.u32 %v8107_v9, %v6376_v10 }
  0x6a   : > { %3086 = vmatpush.bf16.msrb.mxu1 %v7551_v6  ;;  %v6384_v14 = vld [vmem:[%s8954_s16 + $0x174] sm:$0xf0]  ;;  %11096 = vst [vmem:[#allocation39_spill] sm:$0xff] %v9084_v15  ;;  %v9088_v17 = vor.u32 %v8111_v12, %v6382_v11  ;;  %v8226_v23 = vld [vmem:[#allocation2 + $0x34c] sm:$0xf] }
  0x6b   : > { %2852 = vmatmul.bf16.gmra.mxu0 %v9004_v39  ;;  %3184 = vmatpush.bf16.msrb.mxu3 %v6435_v5  ;;  %11097 = vst [vmem:[#allocation40_spill] sm:$0xff] %v9086_v16  ;;  %v9090_v22 = vor.u32 %v8108_v13, %v6384_v14  ;;  %v6852_v24 = vld [vmem:[#allocation2 + $0x364] sm:$0xf0]  ;;  %v8338_v31 = vld [vmem:[#allocation2 + $0x6cc] sm:$0xf] }
  0x6c   : > { %2901 = vmatmul.bf16.gmra.mxu1 %v9006_v40  ;;  %11098 = vst [vmem:[#allocation41_spill] sm:$0xff] %v9088_v17  ;;  %v6855_v29 = vor.u32 %v8226_v23, %v6852_v24  ;;  %v6402_v30 = vld [vmem:[%s8954_s16 + $0x188] sm:$0xf]  ;;  %v8394_v33 = vld [vmem:[#allocation2 + $0x88c] sm:$0xf] }
  0x6d   : > { %2950 = vmatmul.bf16.gmra.mxu2 %v9008_v41  ;;  %11099 = vst [vmem:[#allocation42_spill] sm:$0xff] %v9090_v22  ;;  %v7300_v32 = vld [vmem:[#allocation2 + $0x6e4] sm:$0xf0]  ;;  %v8117_v34 = vld [vmem:[%s8954_s16 + $0x1a0] sm:$0xf0] }
  0x6e   : > { %2999 = vmatmul.bf16.gmra.mxu3 %v9010_v42  ;;  %3226 = vmatpush.bf16.msra.mxu0 %v6855_v29  ;;  %v8114_v35 = vld [vmem:[%s8954_s16 + $0x18c] sm:$0xf]  ;;  %v7303_v36 = vor.u32 %v8338_v31, %v7300_v32  ;;  %v7524_v37 = vld [vmem:[#allocation2 + $0x8a4] sm:$0xf0]  ;;  %v6410_v43 = vld [vmem:[%s8954_s16 + $0x190] sm:$0xf]  ;;  %v9104_v49 = vor.u32 %v8117_v34, %v6402_v30 }
  0x6f   : > { %v6404_v38 = vld [vmem:[%s8954_s16 + $0x1a4] sm:$0xf0]  ;;  %v8118_v44 = vld [vmem:[%s8954_s16 + $0x1a8] sm:$0xf0]  ;;  %v7527_v45 = vor.u32 %v8394_v33, %v7524_v37  ;;  %v8115_v46 = vld [vmem:[%s8954_s16 + $0x194] sm:$0xf] }
  0x70   : > { %v6412_v47 = vld [vmem:[%s8954_s16 + $0x1ac] sm:$0xf0]  ;;  %3324 = vmatpush.bf16.msra.mxu2 %v7303_v36  ;;  %11100 = vst [vmem:[#allocation43_spill] sm:$0xff] %v9104_v49  ;;  %v9106_v50 = vor.u32 %v8114_v35, %v6404_v38  ;;  %v9108_v58 = vor.u32 %v8118_v44, %v6410_v43  ;;  %v8282_v60 = vld [vmem:[#allocation2 + $0x50c] sm:$0xf] }
  0x71   : > { %3373 = vmatpush.bf16.msra.mxu3 %v7527_v45  ;;  %v9110_v59 = vor.u32 %v8115_v46, %v6412_v47  ;;  %v7076_v61 = vld [vmem:[#allocation2 + $0x524] sm:$0xf0]  ;;  %v8219_v63 = vld [vmem:[#allocation2 + $0x314] sm:$0xf]  ;;  %v6824_v4 = vld [vmem:[#allocation2 + $0x32c] sm:$0xf0] }
  0x72   : > { %11101 = vst [vmem:[#allocation44_spill] sm:$0xff] %v9106_v50  ;;  %v7079_v62 = vor.u32 %v8282_v60, %v7076_v61  ;;  %v6827_v5 = vor.u32 %v8219_v63, %v6824_v4  ;;  %v749_v6 = vld [vmem:[#allocation5] sm:$0x7f]  ;;  %v6222_v8 = vld [vmem:[%s8954_s16 + $0x10] sm:$0xf] }
  0x73   : > { %11102 = vst [vmem:[#allocation45_spill] sm:$0xff] %v9108_v58  ;;  %v9116_v7 = vperm.slane %v749_v6, 0  ;;  %v8331_v9 = vld [vmem:[#allocation2 + $0x694] sm:$0xf]  ;;  %v7272_v10 = vld [vmem:[#allocation2 + $0x6ac] sm:$0xf0] }
  0x74   : > { %11103 = vst [vmem:[#allocation46_spill] sm:$0xff] %v9110_v59  ;;  %3275 = vmatpush.bf16.msra.mxu1 %v7079_v62  ;;  %3227 = vmatpush.bf16.msra.mxu0 %v6827_v5  ;;  %v8387_v11 = vld [vmem:[#allocation2 + $0x854] sm:$0xf]  ;;  %v8070_v12 = vld [vmem:[%s8954_s16 + $0x28] sm:$0xf0]  ;;  %v7275_v14 = vor.u32 %v8331_v9, %v7272_v10 }
  0x75   : > { %v8067_v13 = vld [vmem:[%s8954_s16 + $0x14] sm:$0xf]  ;;  %v7496_v23 = vld [vmem:[#allocation2 + $0x86c] sm:$0xf0]  ;;  %v6230_v29 = vld [vmem:[%s8954_s16 + $0x18] sm:$0xf]  ;;  %v9124_v32 = vor.u32 %v8070_v12, %v6222_v8 }
  0x76   : > { %v6224_v24 = vld [vmem:[%s8954_s16 + $0x2c] sm:$0xf0]  ;;  %v8071_v30 = vld [vmem:[%s8954_s16 + $0x30] sm:$0xf0]  ;;  %v7499_v31 = vor.u32 %v8387_v11, %v7496_v23  ;;  %3325 = vmatpush.bf16.msra.mxu2 %v7275_v14  ;;  %v8212_v46 = vld [vmem:[#allocation2 + $0x2dc] sm:$0xf] }
  0x77   : > { %11104 = vst [vmem:[#allocation47_spill] sm:$0xff] %v9124_v32  ;;  %v9126_v34 = vor.u32 %v8067_v13, %v6224_v24  ;;  %v9128_v35 = vor.u32 %v8071_v30, %v6230_v29  ;;  %v8275_v38 = vld [vmem:[#allocation2 + $0x4d4] sm:$0xf]  ;;  %v7048_v43 = vld [vmem:[#allocation2 + $0x4ec] sm:$0xf0] }
  0x78   : > { %3374 = vmatpush.bf16.msra.mxu3 %v7499_v31  ;;  %v7051_v45 = vor.u32 %v8275_v38, %v7048_v43  ;;  %v6796_v47 = vld [vmem:[#allocation2 + $0x2f4] sm:$0xf0]  ;;  %v6250_v9 = vld [vmem:[%s8954_s16 + $0x48] sm:$0xf]  ;;  %v8324_v11 = vld [vmem:[#allocation2 + $0x65c] sm:$0xf] }
  0x79   : > { %11105 = vst [vmem:[#allocation48_spill] sm:$0xff] %v9126_v34  ;;  %v6799_v60 = vor.u32 %v8212_v46, %v6796_v47  ;;  %v7244_v12 = vld [vmem:[#allocation2 + $0x674] sm:$0xf0]  ;;  %v8380_v13 = vld [vmem:[#allocation2 + $0x81c] sm:$0xf] }
  0x7a   : > { %11106 = vst [vmem:[#allocation49_spill] sm:$0xff] %v9128_v35  ;;  %3276 = vmatpush.bf16.msra.mxu1 %v7051_v45  ;;  %v8077_v14 = vld [vmem:[%s8954_s16 + $0x60] sm:$0xf0]  ;;  %v8074_v23 = vld [vmem:[%s8954_s16 + $0x4c] sm:$0xf]  ;;  %v7247_v24 = vor.u32 %v8324_v11, %v7244_v12 }
  0x7b   : > { %2857 = vmatmul.bf16.gmra.mxu0 %v9024_v0  ;;  %v7468_v29 = vld [vmem:[#allocation2 + $0x834] sm:$0xf0]  ;;  %v6252_v30 = vld [vmem:[%s8954_s16 + $0x64] sm:$0xf0]  ;;  %v6258_v31 = vld [vmem:[%s8954_s16 + $0x50] sm:$0xf]  ;;  %v9145_v38 = vor.u32 %v8077_v14, %v6250_v9 }
  0x7c   : > { %2906 = vmatmul.bf16.gmra.mxu1 %v9026_v1  ;;  %3228 = vmatpush.bf16.msra.mxu0 %v6799_v60  ;;  %v9147_v46 = vor.u32 %v8074_v23, %v6252_v30  ;;  %v8205_v9 = vld [vmem:[#allocation2 + $0x2a4] sm:$0xf] }
  0x7d   : > { %2955 = vmatmul.bf16.gmra.mxu2 %v9028_v2  ;;  %11107 = vst [vmem:[#allocation50_spill] sm:$0xff] %v9145_v38 }
  0x7e   : > { %3004 = vmatmul.bf16.gmra.mxu3 %v9030_v3  ;;  %3326 = vmatpush.bf16.msra.mxu2 %v7247_v24  ;;  %11108 = vst [vmem:[#allocation51_spill] sm:$0xff] %v9147_v46 }
  0x8b   : > { %2862 = vmatmul.bf16.gmra.mxu0 %v9044_v25 }
  0x8c   : > { %2911 = vmatmul.bf16.gmra.mxu1 %v9046_v26 }
  0x8d   : > { %2960 = vmatmul.bf16.gmra.mxu2 %v9048_v27 }
  0x8e   : > { %3009 = vmatmul.bf16.gmra.mxu3 %v9050_v28 }
  0x9b   : > { %2867 = vmatmul.bf16.gmra.mxu0 %v9064_v51 }
  0x9c   : > { %2916 = vmatmul.bf16.gmra.mxu1 %v9066_v52 }
  0x9d   : > { %2965 = vmatmul.bf16.gmra.mxu2 %v9068_v56 }
  0x9e   : > { %3014 = vmatmul.bf16.gmra.mxu3 %v9070_v57 }
  0xab   : > { %2872 = vmatmul.bf16.gmra.mxu0 %v9084_v15 }
  0xac   : > { %2921 = vmatmul.bf16.gmra.mxu1 %v9086_v16 }
  0xad   : > { %2970 = vmatmul.bf16.gmra.mxu2 %v9088_v17 }
  0xae   : > { %3019 = vmatmul.bf16.gmra.mxu3 %v9090_v22 }
  0xbb   : > { %2877 = vmatmul.bf16.gmra.mxu0 %v9104_v49 }
  0xbc   : > { %2926 = vmatmul.bf16.gmra.mxu1 %v9106_v50 }
  0xbd   : > { %2975 = vmatmul.bf16.gmra.mxu2 %v9108_v58 }
  0xbe   : > { %3024 = vmatmul.bf16.gmra.mxu3 %v9110_v59  ;;  %v6908_v59 = vld [vmem:[#allocation2 + $0x3d4] sm:$0xf0] }
  0xc8   : > { %v2843_v33 = vpop.f32.mrf.mxu0 }
  0xc9   : > { %v2844_v36 = vadd.f32 %v2843_v33, %v9116_v7  ;;  %v2892_v37 = vpop.f32.mrf.mxu1  ;;  %v8078_v33 = vld [vmem:[%s8954_s16 + $0x68] sm:$0xf0] }
  0xca   : > { %v9149_v47 = vor.u32 %v8078_v33, %v6258_v31  ;;  %v6278_v31 = vld [vmem:[%s8954_s16 + $0x80] sm:$0xf] }
  0xcb   : > { %v2893_v44 = vadd.f32 %v2892_v37, %v2844_v36  ;;  %3038 = vmatmul.bf16.vlgmr.msrb.gmra.mxu0 %v9124_v32  ;;  %v7471_v36 = vor.u32 %v8380_v13, %v7468_v29 }
  0xcc   : > { %3087 = vmatmul.bf16.vlgmr.msrb.gmra.mxu1 %v9126_v34  ;;  %11109 = vst [vmem:[#allocation52_spill] sm:$0xff] %v9149_v47  ;;  %v8240_v34 = vld [vmem:[#allocation2 + $0x3bc] sm:$0xf] }
  0xcd   : > { %7800 = vmatmul.msk.bf16.vlgmr.msrb.gmra.mxu2 %vm2809_vm0, %v9128_v35  ;;  %3375 = vmatpush.bf16.msra.mxu3 %v7471_v36  ;;  %v8317_v36 = vld [vmem:[#allocation2 + $0x624] sm:$0xf]  ;;  %v6936_v35 = vld [vmem:[#allocation2 + $0x40c] sm:$0xf0] }
  0xce   : > { %3185 = vmatmul.bf16.vlgmr.msrb.gmra.mxu3 %v8964_v48  ;;  %v8247_v48 = vld [vmem:[#allocation2 + $0x3f4] sm:$0xf] }
  0xd0   : > { %v2941_v61 = vpop.f32.mrf.mxu2  ;;  %v2845_v4 = vpop.f32.mrf.mxu0 }
  0xd1   : > { %v2942_v62 = vadd.f32 %v2941_v61, %v2893_v44  ;;  %v2990_v63 = vpop.f32.mrf.mxu3  ;;  %v2846_v5 = vadd.f32 %v2845_v4, %v9116_v7  ;;  %v2894_v6 = vpop.f32.mrf.mxu1  ;;  %v7020_v4 = vld [vmem:[#allocation2 + $0x4b4] sm:$0xf0] }
  0xd3   : > { %v9137_v8 = vadd.f32 %v2990_v63, %v2942_v62  ;;  %v2895_v10 = vadd.f32 %v2894_v6, %v2846_v5  ;;  %v8268_v63 = vld [vmem:[#allocation2 + $0x49c] sm:$0xf] }
  0xd4   : > { %v7023_v6 = vor.u32 %v8268_v63, %v7020_v4  ;;  %v6280_v63 = vld [vmem:[%s8954_s16 + $0x9c] sm:$0xf0]  ;;  %v6286_v4 = vld [vmem:[%s8954_s16 + $0x88] sm:$0xf] }
  0xd6   : > { %3277 = vmatpush.bf16.msra.mxu1 %v7023_v6 }
  0xd8   : > { %v2943_v37 = vpop.f32.mrf.mxu2  ;;  %v2848_v45 = vpop.f32.mrf.mxu0 }
  0xd9   : > { %v2944_v43 = vadd.f32 %v2943_v37, %v2895_v10  ;;  %v2992_v44 = vpop.f32.mrf.mxu3  ;;  %v2849_v60 = vadd.f32 %v2848_v45, %v9116_v7  ;;  %v2897_v61 = vpop.f32.mrf.mxu1  ;;  %v6768_v10 = vld [vmem:[#allocation2 + $0x2bc] sm:$0xf0]  ;;  %v8081_v45 = vld [vmem:[%s8954_s16 + $0x84] sm:$0xf] }
  0xda   : > { %v6771_v11 = vor.u32 %v8205_v9, %v6768_v10  ;;  %v7216_v37 = vld [vmem:[#allocation2 + $0x63c] sm:$0xf0] }
  0xdb   : > { %v9152_v62 = vadd.f32 %v2992_v44, %v2944_v43  ;;  %v2898_v5 = vadd.f32 %v2897_v61, %v2849_v60  ;;  %3043 = vmatmul.bf16.gmra.mxu0 %v9145_v38  ;;  %v8373_v43 = vld [vmem:[#allocation2 + $0x7e4] sm:$0xf]  ;;  %v8084_v44 = vld [vmem:[%s8954_s16 + $0x98] sm:$0xf0]  ;;  %v7219_v60 = vor.u32 %v8317_v36, %v7216_v37  ;;  %v7440_v61 = vld [vmem:[#allocation2 + $0x7fc] sm:$0xf0] }
  0xdc   : > { %3092 = vmatmul.bf16.gmra.mxu1 %v9147_v46  ;;  %3229 = vmatpush.bf16.msra.mxu0 %v6771_v11  ;;  %v7443_v6 = vor.u32 %v8373_v43, %v7440_v61  ;;  %v9168_v10 = vor.u32 %v8084_v44, %v6278_v31  ;;  %v8261_v37 = vld [vmem:[#allocation2 + $0x464] sm:$0xf]  ;;  %v6740_v44 = vld [vmem:[#allocation2 + $0x284] sm:$0xf0] }
  0xdd   : > { %7801 = vmatmul.msk.bf16.gmra.mxu2 %vm2809_vm0, %v9149_v47  ;;  %v8254_v47 = vld [vmem:[#allocation2 + $0x42c] sm:$0xf]  ;;  %v6964_v46 = vld [vmem:[#allocation2 + $0x444] sm:$0xf0] }
  0xde   : > { %3190 = vmatmul.bf16.gmra.mxu3 %v8984_v18  ;;  %3327 = vmatpush.bf16.msra.mxu2 %v7219_v60  ;;  %11110 = vst [vmem:[#allocation53_spill] sm:$0xff] %v9168_v10  ;;  %v6992_v18 = vld [vmem:[#allocation2 + $0x47c] sm:$0xf0] }
  0xdf   : > { %3376 = vmatpush.bf16.msra.mxu3 %v7443_v6  ;;  %v6995_v31 = vor.u32 %v8261_v37, %v6992_v18  ;;  %v8088_v37 = vld [vmem:[%s8954_s16 + $0xbc] sm:$0xf] }
  0xe0   : > { %v2946_v12 = vpop.f32.mrf.mxu2  ;;  %v2850_v23 = vpop.f32.mrf.mxu0 }
  0xe1   : > { %v2947_v13 = vadd.f32 %v2946_v12, %v2898_v5  ;;  %v2995_v14 = vpop.f32.mrf.mxu3  ;;  %v2851_v24 = vadd.f32 %v2850_v23, %v9116_v7  ;;  %v2899_v29 = vpop.f32.mrf.mxu1  ;;  %v8085_v5 = vld [vmem:[%s8954_s16 + $0xa0] sm:$0xf0]  ;;  %3278 = vmatpush.bf16.msra.mxu1 %v6995_v31 }
  0xe2   : > { %v9172_v23 = vor.u32 %v8085_v5, %v6286_v4 }
  0xe3   : > { %v9160_v30 = vadd.f32 %v2995_v14, %v2947_v13  ;;  %v2900_v33 = vadd.f32 %v2899_v29, %v2851_v24  ;;  %v9170_v14 = vor.u32 %v8081_v45, %v6280_v63 }
  0xe4   : > { %11112 = vst [vmem:[#allocation55_spill] sm:$0xff] %v9172_v23 }
  0xe5   : > { %11111 = vst [vmem:[#allocation54_spill] sm:$0xff] %v9170_v14 }
  0xe8   : > { %v2948_v9 = vpop.f32.mrf.mxu2  ;;  %v2853_v13 = vpop.f32.mrf.mxu0 }
  0xe9   : > { %v2949_v11 = vadd.f32 %v2948_v9, %v2900_v33  ;;  %v2997_v12 = vpop.f32.mrf.mxu3  ;;  %v2854_v24 = vadd.f32 %v2853_v13, %v9116_v7  ;;  %v2902_v29 = vpop.f32.mrf.mxu1  ;;  %v8198_v33 = vld [vmem:[#allocation2 + $0x26c] sm:$0xf]  ;;  %v6306_v9 = vld [vmem:[%s8954_s16 + $0xb8] sm:$0xf]  ;;  %v7188_v13 = vld [vmem:[#allocation2 + $0x604] sm:$0xf0] }
  0xea   : > { %v6743_v45 = vor.u32 %v8198_v33, %v6740_v44  ;;  %v6308_v33 = vld [vmem:[%s8954_s16 + $0xd4] sm:$0xf0]  ;;  %v6314_v44 = vld [vmem:[%s8954_s16 + $0xc0] sm:$0xf] }
  0xeb   : > { %v9175_v36 = vadd.f32 %v2997_v12, %v2949_v11  ;;  %v2903_v43 = vadd.f32 %v2902_v29, %v2854_v24  ;;  %3048 = vmatmul.bf16.gmra.mxu0 %v9168_v10  ;;  %v8310_v12 = vld [vmem:[#allocation2 + $0x5ec] sm:$0xf]  ;;  %v8091_v29 = vld [vmem:[%s8954_s16 + $0xd0] sm:$0xf0] }
  0xec   : > { %3097 = vmatmul.bf16.gmra.mxu1 %v9170_v14  ;;  %3230 = vmatpush.bf16.msra.mxu0 %v6743_v45  ;;  %v8366_v24 = vld [vmem:[#allocation2 + $0x7ac] sm:$0xf]  ;;  %v7191_v31 = vor.u32 %v8310_v12, %v7188_v13 }
  0xed   : > { %7802 = vmatmul.msk.bf16.gmra.mxu2 %vm2809_vm0, %v9172_v23  ;;  %v9191_v23 = vor.u32 %v8091_v29, %v6306_v9  ;;  %v6967_v9 = vor.u32 %v8254_v47, %v6964_v46 }
  0xee   : > { %3195 = vmatmul.bf16.gmra.mxu3 %v9004_v39  ;;  %3328 = vmatpush.bf16.msra.mxu2 %v7191_v31 }
  0xef   : > { %11113 = vst [vmem:[#allocation56_spill] sm:$0xff] %v9191_v23  ;;  %3279 = vmatpush.bf16.msra.mxu1 %v6967_v9 }
  0xf0   : > { %v2951_v60 = vpop.f32.mrf.mxu2  ;;  %v2855_v18 = vpop.f32.mrf.mxu0 }
  0xf1   : > { %v2952_v61 = vadd.f32 %v2951_v60, %v2903_v43  ;;  %v3000_v63 = vpop.f32.mrf.mxu3  ;;  %v2856_v4 = vadd.f32 %v2855_v18, %v9116_v7  ;;  %v2904_v5 = vpop.f32.mrf.mxu1  ;;  %v7412_v43 = vld [vmem:[#allocation2 + $0x7c4] sm:$0xf0]  ;;  %v8092_v60 = vld [vmem:[%s8954_s16 + $0xd8] sm:$0xf0] }
  0xf2   : > { %v7415_v39 = vor.u32 %v8366_v24, %v7412_v43 }
  0xf3   : > { %v9183_v6 = vadd.f32 %v3000_v63, %v2952_v61  ;;  %v2905_v11 = vadd.f32 %v2904_v5, %v2856_v4  ;;  %v9193_v4 = vor.u32 %v8088_v37, %v6308_v33  ;;  %v9195_v5 = vor.u32 %v8092_v60, %v6314_v44  ;;  %v6334_v44 = vld [vmem:[%s8954_s16 + $0xf0] sm:$0xf] }
  0xf4   : > { %3377 = vmatpush.bf16.msra.mxu3 %v7415_v39  ;;  %v8191_v39 = vld [vmem:[#allocation2 + $0x234] sm:$0xf] }
  0xf5   : > { %11114 = vst [vmem:[#allocation57_spill] sm:$0xff] %v9193_v4 }
  0xf6   : > { %11115 = vst [vmem:[#allocation58_spill] sm:$0xff] %v9195_v5 }
  0xf8   : > { %v2953_v45 = vpop.f32.mrf.mxu2  ;;  %v2858_v18 = vpop.f32.mrf.mxu0 }
  0xf9   : > { %v2954_v61 = vadd.f32 %v2953_v45, %v2905_v11  ;;  %v3002_v63 = vpop.f32.mrf.mxu3  ;;  %v2859_v14 = vadd.f32 %v2858_v18, %v9116_v7  ;;  %v2907_v12 = vpop.f32.mrf.mxu1  ;;  %v6712_v11 = vld [vmem:[#allocation2 + $0x24c] sm:$0xf0]  ;;  %v8303_v45 = vld [vmem:[#allocation2 + $0x5b4] sm:$0xf]  ;;  %v8098_v18 = vld [vmem:[%s8954_s16 + $0x108] sm:$0xf0] }
  0xfa   : > { %v6715_v29 = vor.u32 %v8191_v39, %v6712_v11  ;;  %v6336_v39 = vld [vmem:[%s8954_s16 + $0x10c] sm:$0xf0]  ;;  %v6342_v11 = vld [vmem:[%s8954_s16 + $0xf8] sm:$0xf] }
  0xfb   : > { %v9198_v13 = vadd.f32 %v3002_v63, %v2954_v61  ;;  %v2908_v24 = vadd.f32 %v2907_v12, %v2859_v14  ;;  %3053 = vmatmul.bf16.gmra.mxu0 %v9191_v23  ;;  %v7160_v61 = vld [vmem:[#allocation2 + $0x5cc] sm:$0xf0]  ;;  %v8359_v63 = vld [vmem:[#allocation2 + $0x774] sm:$0xf] }
  0xfc   : > { %3102 = vmatmul.bf16.gmra.mxu1 %v9193_v4  ;;  %3231 = vmatpush.bf16.msra.mxu0 %v6715_v29  ;;  %v8095_v12 = vld [vmem:[%s8954_s16 + $0xf4] sm:$0xf]  ;;  %v7163_v9 = vor.u32 %v8303_v45, %v7160_v61 }
  0xfd   : > { %7803 = vmatmul.msk.bf16.gmra.mxu2 %vm2809_vm0, %v9195_v5  ;;  %v9214_v5 = vor.u32 %v8098_v18, %v6334_v44  ;;  %v6939_v44 = vor.u32 %v8247_v48, %v6936_v35 }
  0xfe   : > { %3200 = vmatmul.bf16.gmra.mxu3 %v9024_v0  ;;  %3329 = vmatpush.bf16.msra.mxu2 %v7163_v9 }
  0xff   : > { %11116 = vst [vmem:[#allocation59_spill] sm:$0xff] %v9214_v5  ;;  %3280 = vmatpush.bf16.msra.mxu1 %v6939_v44 }
 0x100   : > { %v2956_v37 = vpop.f32.mrf.mxu2  ;;  %v2860_v46 = vpop.f32.mrf.mxu0 }
 0x101   : > { %v2957_v31 = vadd.f32 %v2956_v37, %v2908_v24  ;;  %v3005_v14 = vpop.f32.mrf.mxu3  ;;  %v2861_v47 = vadd.f32 %v2860_v46, %v9116_v7  ;;  %v2909_v43 = vpop.f32.mrf.mxu1  ;;  %v7384_v24 = vld [vmem:[#allocation2 + $0x78c] sm:$0xf0]  ;;  %v8099_v37 = vld [vmem:[%s8954_s16 + $0x110] sm:$0xf0] }
 0x102   : > { %v7387_v0 = vor.u32 %v8359_v63, %v7384_v24 }
 0x103   : > { %v9206_v33 = vadd.f32 %v3005_v14, %v2957_v31  ;;  %v2910_v60 = vadd.f32 %v2909_v43, %v2861_v47  ;;  %v9216_v47 = vor.u32 %v8095_v12, %v6336_v39  ;;  %v9218_v43 = vor.u32 %v8099_v37, %v6342_v11  ;;  %v6362_v11 = vld [vmem:[%s8954_s16 + $0x128] sm:$0xf] }
 0x104   : > { %3378 = vmatpush.bf16.msra.mxu3 %v7387_v0  ;;  %v8184_v0 = vld [vmem:[#allocation2 + $0x1fc] sm:$0xf] }
 0x105   : > { %11117 = vst [vmem:[#allocation60_spill] sm:$0xff] %v9216_v47 }
 0x106   : > { %11118 = vst [vmem:[#allocation61_spill] sm:$0xff] %v9218_v43 }
 0x108   : > { %v2958_v29 = vpop.f32.mrf.mxu2  ;;  %v2863_v46 = vpop.f32.mrf.mxu0 }
 0x109   : > { %v2959_v31 = vadd.f32 %v2958_v29, %v2910_v60  ;;  %v3007_v14 = vpop.f32.mrf.mxu3  ;;  %v2864_v4 = vadd.f32 %v2863_v46, %v9116_v7  ;;  %v2912_v45 = vpop.f32.mrf.mxu1  ;;  %v6684_v60 = vld [vmem:[#allocation2 + $0x214] sm:$0xf0]  ;;  %v8296_v29 = vld [vmem:[#allocation2 + $0x57c] sm:$0xf]  ;;  %v8105_v46 = vld [vmem:[%s8954_s16 + $0x140] sm:$0xf0] }
 0x10a   : > { %v6687_v18 = vor.u32 %v8184_v0, %v6684_v60  ;;  %v6364_v0 = vld [vmem:[%s8954_s16 + $0x144] sm:$0xf0]  ;;  %v6370_v60 = vld [vmem:[%s8954_s16 + $0x130] sm:$0xf] }
 0x10b   : > { %v9221_v61 = vadd.f32 %v3007_v14, %v2959_v31  ;;  %v2913_v63 = vadd.f32 %v2912_v45, %v2864_v4  ;;  %3058 = vmatmul.bf16.gmra.mxu0 %v9214_v5  ;;  %v7132_v31 = vld [vmem:[#allocation2 + $0x594] sm:$0xf0]  ;;  %v8352_v14 = vld [vmem:[#allocation2 + $0x73c] sm:$0xf]  ;;  %v8102_v45 = vld [vmem:[%s8954_s16 + $0x12c] sm:$0xf] }
 0x10c   : > { %3107 = vmatmul.bf16.gmra.mxu1 %v9216_v47  ;;  %3232 = vmatpush.bf16.msra.mxu0 %v6687_v18  ;;  %v7135_v44 = vor.u32 %v8296_v29, %v7132_v31 }
 0x10d   : > { %7804 = vmatmul.msk.bf16.gmra.mxu2 %vm2809_vm0, %v9218_v43  ;;  %v9237_v43 = vor.u32 %v8105_v46, %v6362_v11  ;;  %v6911_v11 = vor.u32 %v8240_v34, %v6908_v59 }
 0x10e   : > { %3205 = vmatmul.bf16.gmra.mxu3 %v9044_v25  ;;  %3330 = vmatpush.bf16.msra.mxu2 %v7135_v44 }
 0x10f   : > { %11119 = vst [vmem:[#allocation62_spill] sm:$0xff] %v9237_v43  ;;  %3281 = vmatpush.bf16.msra.mxu1 %v6911_v11 }
 0x110   : > { %v2961_v12 = vpop.f32.mrf.mxu2  ;;  %v2865_v48 = vpop.f32.mrf.mxu0 }
 0x111   : > { %v2962_v9 = vadd.f32 %v2961_v12, %v2913_v63  ;;  %v3010_v4 = vpop.f32.mrf.mxu3  ;;  %v2866_v35 = vadd.f32 %v2865_v48, %v9116_v7  ;;  %v2914_v24 = vpop.f32.mrf.mxu1  ;;  %v7356_v63 = vld [vmem:[#allocation2 + $0x754] sm:$0xf0]  ;;  %v8106_v12 = vld [vmem:[%s8954_s16 + $0x148] sm:$0xf0] }
 0x112   : > { %v7359_v25 = vor.u32 %v8352_v14, %v7356_v63 }
 0x113   : > { %v9229_v39 = vadd.f32 %v3010_v4, %v2962_v9  ;;  %v2915_v37 = vadd.f32 %v2914_v24, %v2866_v35  ;;  %v9239_v35 = vor.u32 %v8102_v45, %v6364_v0  ;;  %v9241_v24 = vor.u32 %v8106_v12, %v6370_v60  ;;  %v6390_v60 = vld [vmem:[%s8954_s16 + $0x160] sm:$0xf] }
 0x114   : > { %3379 = vmatpush.bf16.msra.mxu3 %v7359_v25  ;;  %v8177_v25 = vld [vmem:[#allocation2 + $0x1c4] sm:$0xf] }
 0x115   : > { %11120 = vst [vmem:[#allocation63_spill] sm:$0xff] %v9239_v35 }
 0x116   : > { %11121 = vst [vmem:[#allocation64_spill] sm:$0xff] %v9241_v24 }
 0x118   : > { %v2963_v18 = vpop.f32.mrf.mxu2  ;;  %v2868_v48 = vpop.f32.mrf.mxu0 }
 0x119   : > { %v2964_v9 = vadd.f32 %v2963_v18, %v2915_v37  ;;  %v3012_v4 = vpop.f32.mrf.mxu3  ;;  %v2869_v47 = vadd.f32 %v2868_v48, %v9116_v7  ;;  %v2917_v29 = vpop.f32.mrf.mxu1  ;;  %v6656_v37 = vld [vmem:[#allocation2 + $0x1dc] sm:$0xf0]  ;;  %v8289_v18 = vld [vmem:[#allocation2 + $0x544] sm:$0xf]  ;;  %v8112_v48 = vld [vmem:[%s8954_s16 + $0x178] sm:$0xf0] }
 0x11a   : > { %v6659_v46 = vor.u32 %v8177_v25, %v6656_v37  ;;  %v6392_v25 = vld [vmem:[%s8954_s16 + $0x17c] sm:$0xf0]  ;;  %v6398_v37 = vld [vmem:[%s8954_s16 + $0x168] sm:$0xf] }
 0x11b   : > { %v9244_v31 = vadd.f32 %v3012_v4, %v2964_v9  ;;  %v2918_v14 = vadd.f32 %v2917_v29, %v2869_v47  ;;  %3063 = vmatmul.bf16.gmra.mxu0 %v9237_v43  ;;  %v7104_v9 = vld [vmem:[#allocation2 + $0x55c] sm:$0xf0]  ;;  %v8345_v4 = vld [vmem:[#allocation2 + $0x704] sm:$0xf] }
 0x11c   : > { %3112 = vmatmul.bf16.gmra.mxu1 %v9239_v35  ;;  %3233 = vmatpush.bf16.msra.mxu0 %v6659_v46  ;;  %v8109_v29 = vld [vmem:[%s8954_s16 + $0x164] sm:$0xf]  ;;  %v7107_v11 = vor.u32 %v8289_v18, %v7104_v9 }
 0x11d   : > { %7805 = vmatmul.msk.bf16.gmra.mxu2 %vm2809_vm0, %v9241_v24  ;;  %v9260_v24 = vor.u32 %v8112_v48, %v6390_v60  ;;  %v9262_v35 = vor.u32 %v8109_v29, %v6392_v25  ;;  %v7748_v60 = vld [vmem:[#allocation2 + $0xa64] sm:$0xf0] }
 0x11e   : > { %3210 = vmatmul.bf16.gmra.mxu3 %v9064_v51  ;;  %3331 = vmatpush.bf16.msra.mxu2 %v7107_v11 }
 0x11f   : > { %11122 = vst [vmem:[#allocation65_spill] sm:$0xff] %v9260_v24 }
 0x120   : > { %v2966_v45 = vpop.f32.mrf.mxu2  ;;  %v2870_v59 = vpop.f32.mrf.mxu0  ;;  %11123 = vst [vmem:[#allocation66_spill] sm:$0xff] %v9262_v35 }
 0x121   : > { %v2967_v44 = vadd.f32 %v2966_v45, %v2918_v14  ;;  %v3015_v47 = vpop.f32.mrf.mxu3  ;;  %v2871_v34 = vadd.f32 %v2870_v59, %v9116_v7  ;;  %v2919_v63 = vpop.f32.mrf.mxu1  ;;  %v7328_v14 = vld [vmem:[#allocation2 + $0x71c] sm:$0xf0]  ;;  %v8113_v45 = vld [vmem:[%s8954_s16 + $0x180] sm:$0xf0] }
 0x122   : > { %v7331_v51 = vor.u32 %v8345_v4, %v7328_v14  ;;  %v9264_v58 = vor.u32 %v8113_v45, %v6398_v37  ;;  %v6418_v45 = vld [vmem:[%s8954_s16 + $0x198] sm:$0xf] }
 0x123   : > { %v9252_v0 = vadd.f32 %v3015_v47, %v2967_v44  ;;  %v2920_v12 = vadd.f32 %v2919_v63, %v2871_v34  ;;  %v8233_v44 = vld [vmem:[#allocation2 + $0x384] sm:$0xf]  ;;  %v6880_v47 = vld [vmem:[#allocation2 + $0x39c] sm:$0xf0] }
 0x124   : > { %3380 = vmatpush.bf16.msra.mxu3 %v7331_v51  ;;  %11124 = vst [vmem:[#allocation67_spill] sm:$0xff] %v9264_v58  ;;  %v6883_v18 = vor.u32 %v8233_v44, %v6880_v47  ;;  %v8450_v51 = vld [vmem:[#allocation2 + $0xa4c] sm:$0xf]  ;;  %v6634_v44 = vld [vmem:[#allocation2 + $0x190] sm:$0xf] }
 0x125   : > { %v8174_v47 = vld [vmem:[#allocation2 + $0x1a8] sm:$0xf0] }
 0x126   : > { %3282 = vmatpush.bf16.msra.mxu1 %v6883_v18  ;;  %v6635_v18 = vor.u32 %v8174_v47, %v6634_v44 }
 0x128   : > { %v2968_v46 = vpop.f32.mrf.mxu2  ;;  %v2873_v63 = vpop.f32.mrf.mxu0  ;;  %3520 = vmatpush.bf16.msrb.mxu2 %v6635_v18 }
 0x129   : > { %v2969_v59 = vadd.f32 %v2968_v46, %v2920_v12  ;;  %v3017_v34 = vpop.f32.mrf.mxu3  ;;  %v2874_v9 = vadd.f32 %v2873_v63, %v9116_v7  ;;  %v2922_v50 = vpop.f32.mrf.mxu1  ;;  %v7751_v12 = vor.u32 %v8450_v51, %v7748_v60  ;;  %v8116_v63 = vld [vmem:[%s8954_s16 + $0x19c] sm:$0xf]  ;;  %v6426_v51 = vld [vmem:[%s8954_s16 + $0x1a0] sm:$0xf] }
 0x12a   : > { %v8120_v60 = vld [vmem:[%s8954_s16 + $0x1b8] sm:$0xf0] }
 0x12b   : > { %v9267_v22 = vadd.f32 %v3017_v34, %v2969_v59  ;;  %v2923_v4 = vadd.f32 %v2922_v50, %v2874_v9  ;;  %3068 = vmatmul.bf16.gmra.mxu0 %v9260_v24  ;;  %v6858_v59 = vld [vmem:[#allocation2 + $0x350] sm:$0xf]  ;;  %v8119_v34 = vld [vmem:[%s8954_s16 + $0x1b0] sm:$0xf0]  ;;  %v8230_v9 = vld [vmem:[#allocation2 + $0x368] sm:$0xf0] }
 0x12c   : > { %3117 = vmatmul.bf16.gmra.mxu1 %v9262_v35  ;;  %3422 = vmatpush.bf16.msrb.mxu0 %v7751_v12  ;;  %v8457_v35 = vld [vmem:[#allocation2 + $0xa84] sm:$0xf]  ;;  %v7776_v24 = vld [vmem:[#allocation2 + $0xa9c] sm:$0xf0] }
 0x12d   : > { %7806 = vmatmul.msk.bf16.gmra.mxu2 %vm2809_vm0, %v9264_v58 }
 0x12e   : > { %3215 = vmatmul.bf16.gmra.mxu3 %v9084_v15  ;;  %v9283_v15 = vor.u32 %v8119_v34, %v6418_v45  ;;  %v7779_v45 = vor.u32 %v8457_v35, %v7776_v24  ;;  %v7720_v34 = vld [vmem:[#allocation2 + $0xa2c] sm:$0xf0] }
 0x130   : > { %v2971_v48 = vpop.f32.mrf.mxu2  ;;  %v2875_v50 = vpop.f32.mrf.mxu0  ;;  %11125 = vst [vmem:[#allocation68_spill] sm:$0xff] %v9283_v15  ;;  %3478 = vmatpush.bf16.msrb.mxu1 %v7779_v45 }
 0x131   : > { %v2972_v29 = vadd.f32 %v2971_v48, %v2923_v4  ;;  %v3020_v11 = vpop.f32.mrf.mxu3  ;;  %v2876_v14 = vadd.f32 %v2875_v50, %v9116_v7  ;;  %v2924_v25 = vpop.f32.mrf.mxu1  ;;  %v6420_v4 = vld [vmem:[%s8954_s16 + $0x1b4] sm:$0xf0]  ;;  %v6859_v48 = vor.u32 %v8230_v9, %v6858_v59 }
 0x133   : > { %v9275_v37 = vadd.f32 %v3020_v11, %v2972_v29  ;;  %v2925_v46 = vadd.f32 %v2924_v25, %v2876_v14  ;;  %3569 = vmatpush.bf16.msrb.mxu3 %v6859_v48  ;;  %v9285_v14 = vor.u32 %v8116_v63, %v6420_v4  ;;  %v9287_v25 = vor.u32 %v8120_v60, %v6426_v51  ;;  %v6606_v48 = vld [vmem:[#allocation2 + $0x158] sm:$0xf] }
 0x135   : > { %11126 = vst [vmem:[#allocation69_spill] sm:$0xff] %v9285_v14 }
 0x136   : > { %11127 = vst [vmem:[#allocation70_spill] sm:$0xff] %v9287_v25 }
 0x138   : > { %v2973_v12 = vpop.f32.mrf.mxu2  ;;  %v2878_v50 = vpop.f32.mrf.mxu0 }
 0x139   : > { %v2974_v29 = vadd.f32 %v2973_v12, %v2925_v46  ;;  %v3022_v11 = vpop.f32.mrf.mxu3  ;;  %v2879_v58 = vadd.f32 %v2878_v50, %v9116_v7  ;;  %v2927_v44 = vpop.f32.mrf.mxu1  ;;  %v8443_v46 = vld [vmem:[#allocation2 + $0xa14] sm:$0xf] }
 0x13a   : > { %v7723_v63 = vor.u32 %v8443_v46, %v7720_v34  ;;  %v8167_v12 = vld [vmem:[#allocation2 + $0x170] sm:$0xf0] }
 0x13b   : > { %v9290_v47 = vadd.f32 %v3022_v11, %v2974_v29  ;;  %v2928_v59 = vadd.f32 %v2927_v44, %v2879_v58  ;;  %3073 = vmatmul.bf16.gmra.mxu0 %v9283_v15  ;;  %v6830_v29 = vld [vmem:[#allocation2 + $0x318] sm:$0xf]  ;;  %v6607_v11 = vor.u32 %v8167_v12, %v6606_v48  ;;  %v8223_v50 = vld [vmem:[#allocation2 + $0x330] sm:$0xf0] }
 0x13c   : > { %3122 = vmatmul.bf16.gmra.mxu1 %v9285_v14  ;;  %3423 = vmatpush.bf16.msrb.mxu0 %v7723_v63  ;;  %v6831_v44 = vor.u32 %v8223_v50, %v6830_v29  ;;  %v6578_v50 = vld [vmem:[#allocation2 + $0x120] sm:$0xf] }
 0x13d   : > { %7807 = vmatmul.msk.bf16.gmra.mxu2 %vm2809_vm0, %v9287_v25 }
 0x13e   : > { %3220 = vmatmul.bf16.gmra.mxu3 %v9104_v49  ;;  %3521 = vmatpush.bf16.msrb.mxu2 %v6607_v11 }
 0x13f   : > { %3570 = vmatpush.bf16.msrb.mxu3 %v6831_v44  ;;  %v8160_v44 = vld [vmem:[#allocation2 + $0x138] sm:$0xf0] }
 0x140   : > { %v2976_v18 = vpop.f32.mrf.mxu2  ;;  %v2880_v51 = vpop.f32.mrf.mxu0 }
 0x141   : > { %v2977_v9 = vadd.f32 %v2976_v18, %v2928_v59  ;;  %v3025_v4 = vpop.f32.mrf.mxu3  ;;  %v2881_v58 = vadd.f32 %v2880_v51, %v9116_v7  ;;  %v2929_v60 = vpop.f32.mrf.mxu1  ;;  %v7692_v51 = vld [vmem:[#allocation2 + $0x9f4] sm:$0xf0] }
 0x143   : > { %v9298_v35 = vadd.f32 %v3025_v4, %v2977_v9  ;;  %v2930_v24 = vadd.f32 %v2929_v60, %v2881_v58  ;;  %v8436_v4 = vld [vmem:[#allocation2 + $0x9dc] sm:$0xf] }
 0x144   : > { %v7695_v58 = vor.u32 %v8436_v4, %v7692_v51 }
 0x146   : > { %3424 = vmatpush.bf16.msrb.mxu0 %v7695_v58 }
 0x148   : > { %v2978_v45 = vpop.f32.mrf.mxu2  ;;  %v3039_v34 = vpop.f32.mrf.mxu0 }
 0x149   : > { %v2979_v46 = vadd.f32 %v2978_v45, %v2930_v24  ;;  %v3027_v59 = vpop.f32.mrf.mxu3  ;;  %v3040_v63 = vadd.f32 %v3039_v34, %v9137_v8  ;;  %v3088_v18 = vpop.f32.mrf.mxu1  ;;  %v6802_v45 = vld [vmem:[#allocation2 + $0x2e0] sm:$0xf] }
 0x14b   : > { %v9301_v7 = vadd.f32 %v3027_v59, %v2979_v46  ;;  %v3089_v9 = vadd.f32 %v3088_v18, %v3040_v63  ;;  %3234 = vmatmul.bf16.vlgmr.msra.gmra.mxu0 %v8966_v53  ;;  %v6579_v46 = vor.u32 %v8160_v44, %v6578_v50  ;;  %v8216_v59 = vld [vmem:[#allocation2 + $0x2f8] sm:$0xf0] }
 0x14c   : > { %3283 = vmatmul.bf16.vlgmr.msra.gmra.mxu1 %v8968_v54  ;;  %v6803_v34 = vor.u32 %v8216_v59, %v6802_v45 }
 0x14d   : > { %3332 = vmatmul.bf16.vlgmr.msra.gmra.mxu2 %v8970_v55 }
 0x14e   : > { %3381 = vmatmul.bf16.vlgmr.msra.gmra.mxu3 %v9124_v32  ;;  %3522 = vmatpush.bf16.msrb.mxu2 %v6579_v46 }
 0x14f   : > { %3571 = vmatpush.bf16.msrb.mxu3 %v6803_v34  ;;  %v6550_v34 = vld [vmem:[#allocation2 + $0xe8] sm:$0xf] }
 0x150   : > { %v3137_v60 = vpop.f32.mrf.mxu2  ;;  %v3041_v8 = vpop.f32.mrf.mxu0 }
 0x151   : > { %v9307_v24 = vadd.f32 %v3137_v60, %v3089_v9  ;;  %v9309_v48 = vpop.f32.mrf.mxu3  ;;  %v3042_v12 = vadd.f32 %v3041_v8, %v9152_v62  ;;  %v3090_v29 = vpop.f32.mrf.mxu1  ;;  %v8429_v8 = vld [vmem:[#allocation2 + $0x9a4] sm:$0xf] }
 0x153   : > { %11128 = vst [vmem:[#allocation71_spill] sm:$0xff] %v9307_v24  ;;  %v3091_v11 = vadd.f32 %v3090_v29, %v3042_v12  ;;  %v7664_v12 = vld [vmem:[#allocation2 + $0x9bc] sm:$0xf0] }
 0x154   : > { %v7667_v29 = vor.u32 %v8429_v8, %v7664_v12 }
 0x156   : > { %3425 = vmatpush.bf16.msrb.mxu0 %v7667_v29 }
 0x158   : > { %v3139_v63 = vpop.f32.mrf.mxu2  ;;  %v3044_v4 = vpop.f32.mrf.mxu0 }
 0x159   : > { %v9312_v18 = vadd.f32 %v3139_v63, %v3091_v11  ;;  %v9314_v9 = vpop.f32.mrf.mxu3  ;;  %v3045_v51 = vadd.f32 %v3044_v4, %v9160_v30  ;;  %v3093_v58 = vpop.f32.mrf.mxu1  ;;  %v8153_v63 = vld [vmem:[#allocation2 + $0x100] sm:$0xf0]  ;;  %v6774_v4 = vld [vmem:[#allocation2 + $0x2a8] sm:$0xf] }
 0x15b   : > { %11129 = vst [vmem:[#allocation72_spill] sm:$0xff] %v9312_v18  ;;  %v3094_v60 = vadd.f32 %v3093_v58, %v3045_v51  ;;  %3239 = vmatmul.bf16.gmra.mxu0 %v8986_v19  ;;  %v6551_v51 = vor.u32 %v8153_v63, %v6550_v34  ;;  %v8209_v58 = vld [vmem:[#allocation2 + $0x2c0] sm:$0xf0] }
 0x15c   : > { %3288 = vmatmul.bf16.gmra.mxu1 %v8988_v20  ;;  %v6775_v62 = vor.u32 %v8209_v58, %v6774_v4  ;;  %v6522_v58 = vld [vmem:[#allocation2 + $0xb0] sm:$0xf] }
 0x15d   : > { %3337 = vmatmul.bf16.gmra.mxu2 %v8990_v21 }
 0x15e   : > { %3386 = vmatmul.bf16.gmra.mxu3 %v9145_v38  ;;  %3523 = vmatpush.bf16.msrb.mxu2 %v6551_v51 }
 0x15f   : > { %3572 = vmatpush.bf16.msrb.mxu3 %v6775_v62  ;;  %v7636_v62 = vld [vmem:[#allocation2 + $0x984] sm:$0xf0] }
 0x160   : > { %v3142_v11 = vpop.f32.mrf.mxu2  ;;  %v3046_v44 = vpop.f32.mrf.mxu0 }
 0x161   : > { %v9323_v50 = vadd.f32 %v3142_v11, %v3094_v60  ;;  %v9325_v30 = vpop.f32.mrf.mxu3  ;;  %v3047_v45 = vadd.f32 %v3046_v44, %v9175_v36  ;;  %v3095_v46 = vpop.f32.mrf.mxu1  ;;  %v8202_v36 = vld [vmem:[#allocation2 + $0x288] sm:$0xf0] }
 0x163   : > { %11130 = vst [vmem:[#allocation73_spill] sm:$0xff] %v9323_v50  ;;  %v3096_v59 = vadd.f32 %v3095_v46, %v3047_v45 }
 0x168   : > { %v3144_v24 = vpop.f32.mrf.mxu2  ;;  %v3049_v12 = vpop.f32.mrf.mxu0 }
 0x169   : > { %v9328_v8 = vadd.f32 %v3144_v24, %v3096_v59  ;;  %v9330_v60 = vpop.f32.mrf.mxu3  ;;  %v3050_v29 = vadd.f32 %v3049_v12, %v9183_v6  ;;  %v3098_v11 = vpop.f32.mrf.mxu1  ;;  %v8422_v24 = vld [vmem:[#allocation2 + $0x96c] sm:$0xf] }
 0x16a   : > { %v7639_v45 = vor.u32 %v8422_v24, %v7636_v62  ;;  %v8146_v12 = vld [vmem:[#allocation2 + $0xc8] sm:$0xf0] }
 0x16b   : > { %11131 = vst [vmem:[#allocation74_spill] sm:$0xff] %v9328_v8  ;;  %v3099_v44 = vadd.f32 %v3098_v11, %v3050_v29  ;;  %3244 = vmatmul.bf16.gmra.mxu0 %v9006_v40  ;;  %v6746_v29 = vld [vmem:[#allocation2 + $0x270] sm:$0xf]  ;;  %v6523_v11 = vor.u32 %v8146_v12, %v6522_v58 }
 0x16c   : > { %3293 = vmatmul.bf16.gmra.mxu1 %v9008_v41  ;;  %3426 = vmatpush.bf16.msrb.mxu0 %v7639_v45  ;;  %v6747_v50 = vor.u32 %v8202_v36, %v6746_v29 }
 0x16d   : > { %3342 = vmatmul.bf16.gmra.mxu2 %v9010_v42 }
 0x16e   : > { %3391 = vmatmul.bf16.gmra.mxu3 %v9168_v10  ;;  %3524 = vmatpush.bf16.msrb.mxu2 %v6523_v11  ;;  %v6494_v11 = vld [vmem:[#allocation2 + $0x78] sm:$0xf] }
 0x16f   : > { %3573 = vmatpush.bf16.msrb.mxu3 %v6747_v50  ;;  %v8415_v50 = vld [vmem:[#allocation2 + $0x934] sm:$0xf] }
 0x170   : > { %v3147_v46 = vpop.f32.mrf.mxu2  ;;  %v3051_v34 = vpop.f32.mrf.mxu0 }
 0x171   : > { %v9339_v59 = vadd.f32 %v3147_v46, %v3099_v44  ;;  %v9341_v6 = vpop.f32.mrf.mxu3  ;;  %v3052_v63 = vadd.f32 %v3051_v34, %v9198_v13  ;;  %v3100_v4 = vpop.f32.mrf.mxu1  ;;  %v8195_v13 = vld [vmem:[#allocation2 + $0x250] sm:$0xf0] }
 0x173   : > { %11132 = vst [vmem:[#allocation75_spill] sm:$0xff] %v9339_v59  ;;  %v3101_v51 = vadd.f32 %v3100_v4, %v3052_v63 }
 0x178   : > { %v3149_v8 = vpop.f32.mrf.mxu2  ;;  %v3054_v62 = vpop.f32.mrf.mxu0 }
 0x179   : > { %v9344_v24 = vadd.f32 %v3149_v8, %v3101_v51  ;;  %v9346_v44 = vpop.f32.mrf.mxu3  ;;  %v3055_v45 = vadd.f32 %v3054_v62, %v9206_v33  ;;  %v3103_v46 = vpop.f32.mrf.mxu1  ;;  %v7608_v8 = vld [vmem:[#allocation2 + $0x94c] sm:$0xf0]  ;;  %v8139_v62 = vld [vmem:[#allocation2 + $0x90] sm:$0xf0] }
 0x17a   : > { %v7611_v36 = vor.u32 %v8415_v50, %v7608_v8 }
 0x17b   : > { %11133 = vst [vmem:[#allocation76_spill] sm:$0xff] %v9344_v24  ;;  %v3104_v34 = vadd.f32 %v3103_v46, %v3055_v45  ;;  %3249 = vmatmul.bf16.gmra.mxu0 %v9026_v1  ;;  %v6718_v45 = vld [vmem:[#allocation2 + $0x238] sm:$0xf]  ;;  %v6495_v46 = vor.u32 %v8139_v62, %v6494_v11 }
 0x17c   : > { %3298 = vmatmul.bf16.gmra.mxu1 %v9028_v2  ;;  %3427 = vmatpush.bf16.msrb.mxu0 %v7611_v36  ;;  %v6719_v59 = vor.u32 %v8195_v13, %v6718_v45 }
 0x17d   : > { %3347 = vmatmul.bf16.gmra.mxu2 %v9030_v3 }
 0x17e   : > { %3396 = vmatmul.bf16.gmra.mxu3 %v9191_v23  ;;  %3525 = vmatpush.bf16.msrb.mxu2 %v6495_v46  ;;  %v6466_v46 = vld [vmem:[#allocation2 + $0x40] sm:$0xf] }
 0x17f   : > { %3574 = vmatpush.bf16.msrb.mxu3 %v6719_v59  ;;  %v8408_v59 = vld [vmem:[#allocation2 + $0x8fc] sm:$0xf] }
 0x180   : > { %v3152_v63 = vpop.f32.mrf.mxu2  ;;  %v3056_v51 = vpop.f32.mrf.mxu0 }
 0x181   : > { %v9355_v4 = vadd.f32 %v3152_v63, %v3104_v34  ;;  %v9357_v33 = vpop.f32.mrf.mxu3  ;;  %v3057_v58 = vadd.f32 %v3056_v51, %v9221_v61  ;;  %v3105_v12 = vpop.f32.mrf.mxu1  ;;  %v8188_v61 = vld [vmem:[#allocation2 + $0x218] sm:$0xf0] }
 0x183   : > { %11134 = vst [vmem:[#allocation77_spill] sm:$0xff] %v9355_v4  ;;  %v3106_v29 = vadd.f32 %v3105_v12, %v3057_v58 }
 0x188   : > { %v3154_v24 = vpop.f32.mrf.mxu2  ;;  %v3059_v8 = vpop.f32.mrf.mxu0 }
 0x189   : > { %v9360_v50 = vadd.f32 %v3154_v24, %v3106_v29  ;;  %v9362_v34 = vpop.f32.mrf.mxu3  ;;  %v3060_v36 = vadd.f32 %v3059_v8, %v9229_v39  ;;  %v3108_v63 = vpop.f32.mrf.mxu1  ;;  %v7580_v24 = vld [vmem:[#allocation2 + $0x914] sm:$0xf0]  ;;  %v8132_v8 = vld [vmem:[#allocation2 + $0x58] sm:$0xf0] }
 0x18a   : > { %v7583_v13 = vor.u32 %v8408_v59, %v7580_v24 }
 0x18b   : > { %11135 = vst [vmem:[#allocation78_spill] sm:$0xff] %v9360_v50  ;;  %v3109_v51 = vadd.f32 %v3108_v63, %v3060_v36  ;;  %3254 = vmatmul.bf16.gmra.mxu0 %v9046_v26  ;;  %v6690_v36 = vld [vmem:[#allocation2 + $0x200] sm:$0xf]  ;;  %v6467_v63 = vor.u32 %v8132_v8, %v6466_v46 }
 0x18c   : > { %3303 = vmatmul.bf16.gmra.mxu1 %v9048_v27  ;;  %3428 = vmatpush.bf16.msrb.mxu0 %v7583_v13  ;;  %v6691_v4 = vor.u32 %v8188_v61, %v6690_v36 }
 0x18d   : > { %3352 = vmatmul.bf16.gmra.mxu2 %v9050_v28 }
 0x18e   : > { %3401 = vmatmul.bf16.gmra.mxu3 %v9214_v5  ;;  %3526 = vmatpush.bf16.msrb.mxu2 %v6467_v63  ;;  %v6438_v63 = vld [vmem:[#allocation2 + $0x8] sm:$0xf] }
 0x18f   : > { %3575 = vmatpush.bf16.msrb.mxu3 %v6691_v4  ;;  %v8401_v4 = vld [vmem:[#allocation2 + $0x8c4] sm:$0xf] }
 0x190   : > { %v3157_v58 = vpop.f32.mrf.mxu2  ;;  %v3061_v29 = vpop.f32.mrf.mxu0 }
 0x191   : > { %v9371_v12 = vadd.f32 %v3157_v58, %v3109_v51  ;;  %v9373_v39 = vpop.f32.mrf.mxu3  ;;  %v3062_v11 = vadd.f32 %v3061_v29, %v9244_v31  ;;  %v3110_v62 = vpop.f32.mrf.mxu1  ;;  %v8181_v31 = vld [vmem:[#allocation2 + $0x1e0] sm:$0xf0] }
 0x193   : > { %11136 = vst [vmem:[#allocation79_spill] sm:$0xff] %v9371_v12  ;;  %v3111_v45 = vadd.f32 %v3110_v62, %v3062_v11 }
 0x198   : > { %v3159_v50 = vpop.f32.mrf.mxu2  ;;  %v3064_v24 = vpop.f32.mrf.mxu0 }
 0x199   : > { %v9376_v59 = vadd.f32 %v3159_v50, %v3111_v45  ;;  %v9378_v51 = vpop.f32.mrf.mxu3  ;;  %v3065_v13 = vadd.f32 %v3064_v24, %v9252_v0  ;;  %v3113_v58 = vpop.f32.mrf.mxu1  ;;  %v7552_v50 = vld [vmem:[#allocation2 + $0x8dc] sm:$0xf0]  ;;  %v8125_v24 = vld [vmem:[#allocation2 + $0x20] sm:$0xf0] }
 0x19a   : > { %v7555_v61 = vor.u32 %v8401_v4, %v7552_v50 }
 0x19b   : > { %11137 = vst [vmem:[#allocation80_spill] sm:$0xff] %v9376_v59  ;;  %v3114_v29 = vadd.f32 %v3113_v58, %v3065_v13  ;;  %3259 = vmatmul.bf16.gmra.mxu0 %v9066_v52  ;;  %v6662_v13 = vld [vmem:[#allocation2 + $0x1c8] sm:$0xf]  ;;  %v6439_v58 = vor.u32 %v8125_v24, %v6438_v63 }
 0x19c   : > { %3308 = vmatmul.bf16.gmra.mxu1 %v9068_v56  ;;  %3429 = vmatpush.bf16.msrb.mxu0 %v7555_v61  ;;  %v6663_v12 = vor.u32 %v8181_v31, %v6662_v13  ;;  %v11140_v31 = vld [vmem:[#allocation42_spill] sm:$0xff] }
 0x19d   : > { %3357 = vmatmul.bf16.gmra.mxu2 %v9070_v57 }
 0x19e   : > { %3406 = vmatmul.bf16.gmra.mxu3 %v9237_v43  ;;  %3527 = vmatpush.bf16.msrb.mxu2 %v6439_v58 }
 0x19f   : > { %3576 = vmatpush.bf16.msrb.mxu3 %v6663_v12  ;;  %v7082_v12 = vld [vmem:[#allocation2 + $0x510] sm:$0xf] }
 0x1a0   : > { %v3162_v11 = vpop.f32.mrf.mxu2  ;;  %v3066_v45 = vpop.f32.mrf.mxu0 }
 0x1a1   : > { %v9387_v62 = vadd.f32 %v3162_v11, %v3114_v29  ;;  %v9389_v0 = vpop.f32.mrf.mxu3  ;;  %v3067_v46 = vadd.f32 %v3066_v45, %v9267_v22  ;;  %v3115_v8 = vpop.f32.mrf.mxu1  ;;  %v7754_v22 = vld [vmem:[#allocation2 + $0xa50] sm:$0xf] }
 0x1a3   : > { %11138 = vst [vmem:[#allocation81_spill] sm:$0xff] %v9387_v62  ;;  %v3116_v36 = vadd.f32 %v3115_v8, %v3067_v46  ;;  %v11141_v46 = vld [vmem:[#allocation65_spill] sm:$0xff] }
 0x1a8   : > { %v3164_v59 = vpop.f32.mrf.mxu2  ;;  %v3069_v50 = vpop.f32.mrf.mxu0 }
 0x1a9   : > { %v9392_v4 = vadd.f32 %v3164_v59, %v3116_v36  ;;  %v9394_v29 = vpop.f32.mrf.mxu3  ;;  %v3070_v61 = vadd.f32 %v3069_v50, %v9275_v37  ;;  %v3118_v11 = vpop.f32.mrf.mxu1  ;;  %v8286_v59 = vld [vmem:[#allocation2 + $0x528] sm:$0xf0] }
 0x1aa   : > { %v7083_v8 = vor.u32 %v8286_v59, %v7082_v12 }
 0x1ab   : > { %11139 = vst [vmem:[#allocation82_spill] sm:$0xff] %v9392_v4  ;;  %v3119_v45 = vadd.f32 %v3118_v11, %v3070_v61  ;;  %3264 = vmatmul.bf16.gmra.mxu0 %v9086_v16  ;;  %v7530_v61 = vld [vmem:[#allocation2 + $0x890] sm:$0xf]  ;;  %v8398_v11 = vld [vmem:[#allocation2 + $0x8a8] sm:$0xf0] }
 0x1ac   : > { %3313 = vmatmul.bf16.gmra.mxu1 %v9088_v17  ;;  %3618 = vmatpush.bf16.msra.mxu0 %v7083_v8  ;;  %v7531_v62 = vor.u32 %v8398_v11, %v7530_v61  ;;  %v8454_v4 = vld [vmem:[#allocation2 + $0xa68] sm:$0xf0]  ;;  %v11144_v61 = vld [vmem:[#allocation44_spill] sm:$0xff]  ;;  %v8440_v17 = vld [vmem:[#allocation2 + $0x9f8] sm:$0xf0] }
 0x1ad   : > { %3362 = vmatmul.bf16.gmra.mxu2 %v11140_v31  ;;  %v7755_v18 = vor.u32 %v8454_v4, %v7754_v22  ;;  %v7054_v22 = vld [vmem:[#allocation2 + $0x4d8] sm:$0xf] }
 0x1ae   : > { %3411 = vmatmul.bf16.gmra.mxu3 %v11141_v46  ;;  %3716 = vmatpush.bf16.msra.mxu2 %v7531_v62  ;;  %v11145_v62 = vld [vmem:[#allocation45_spill] sm:$0xff] }
 0x1af   : > { %3765 = vmatpush.bf16.msra.mxu3 %v7755_v18  ;;  %v11146_v18 = vld [vmem:[#allocation46_spill] sm:$0xff] }
 0x1b0   : > { %v3167_v36 = vpop.f32.mrf.mxu2  ;;  %v3071_v24 = vpop.f32.mrf.mxu0 }
 0x1b1   : > { %v9403_v63 = vadd.f32 %v3167_v36, %v3119_v45  ;;  %v9405_v37 = vpop.f32.mrf.mxu3  ;;  %v3072_v13 = vadd.f32 %v3071_v24, %v9290_v47  ;;  %v3120_v58 = vpop.f32.mrf.mxu1  ;;  %v7306_v24 = vld [vmem:[#allocation2 + $0x6d0] sm:$0xf] }
 0x1b3   : > { %11142 = vst [vmem:[#allocation83_spill] sm:$0xff] %v9403_v63  ;;  %v3121_v50 = vadd.f32 %v3120_v58, %v3072_v13  ;;  %v8342_v13 = vld [vmem:[#allocation2 + $0x6e8] sm:$0xf0] }
 0x1b4   : > { %v7307_v4 = vor.u32 %v8342_v13, %v7306_v24  ;;  %v9424_v24 = vld [vmem:[#allocation5] sm:$0x7f] }
 0x1b5   : > { %v9427_v13 = vperm.slane %v9424_v24, 1 }
 0x1b6   : > { %3667 = vmatpush.bf16.msra.mxu1 %v7307_v4  ;;  %v7502_v4 = vld [vmem:[#allocation2 + $0x858] sm:$0xf] }
 0x1b8   : > { %v3169_v46 = vpop.f32.mrf.mxu2  ;;  %v3074_v59 = vpop.f32.mrf.mxu0 }
 0x1b9   : > { %v9408_v12 = vadd.f32 %v3169_v46, %v3121_v50  ;;  %v9410_v45 = vpop.f32.mrf.mxu3  ;;  %v3075_v8 = vadd.f32 %v3074_v59, %v9298_v35  ;;  %v3123_v36 = vpop.f32.mrf.mxu1  ;;  %v8279_v46 = vld [vmem:[#allocation2 + $0x4f0] sm:$0xf0] }
 0x1ba   : > { %v7055_v35 = vor.u32 %v8279_v46, %v7054_v22  ;;  %v8447_v46 = vld [vmem:[#allocation2 + $0xa30] sm:$0xf0] }
 0x1bb   : > { %11143 = vst [vmem:[#allocation84_spill] sm:$0xff] %v9408_v12  ;;  %v3124_v58 = vadd.f32 %v3123_v36, %v3075_v8  ;;  %3269 = vmatmul.bf16.gmra.mxu0 %v11144_v61  ;;  %v8391_v12 = vld [vmem:[#allocation2 + $0x870] sm:$0xf0] }
 0x1bc   : > { %3318 = vmatmul.bf16.gmra.mxu1 %v11145_v62  ;;  %3619 = vmatpush.bf16.msra.mxu0 %v7055_v35  ;;  %v7503_v22 = vor.u32 %v8391_v12, %v7502_v4  ;;  %v8335_v12 = vld [vmem:[#allocation2 + $0x6b0] sm:$0xf0] }
 0x1bd   : > { %3367 = vmatmul.bf16.gmra.mxu2 %v11146_v18 }
 0x1be   : > { %3416 = vmatmul.bf16.gmra.mxu3 %v9283_v15  ;;  %v7726_v15 = vld [vmem:[#allocation2 + $0xa18] sm:$0xf]  ;;  %3717 = vmatpush.bf16.msra.mxu2 %v7503_v22 }
 0x1c0   : > { %v3172_v50 = vpop.f32.mrf.mxu2  ;;  %v3076_v47 = vpop.f32.mrf.mxu0 }
 0x1c1   : > { %v9419_v11 = vadd.f32 %v3172_v50, %v3124_v58  ;;  %v9421_v59 = vpop.f32.mrf.mxu3  ;;  %v3077_v8 = vadd.f32 %v3076_v47, %v9301_v7  ;;  %v3125_v36 = vpop.f32.mrf.mxu1  ;;  %v7727_v58 = vor.u32 %v8447_v46, %v7726_v15  ;;  %v3187_v50 = vadd.f32 %v9309_v48, %v9427_v13  ;;  %v11149_v15 = vld [vmem:[#allocation48_spill] sm:$0xff]  ;;  %v11150_v46 = vld [vmem:[#allocation49_spill] sm:$0xff]  ;;  %v11151_v48 = vld [vmem:[#allocation15_spill] sm:$0xff] }
 0x1c3   : > { %11147 = vst [vmem:[#allocation85_spill] sm:$0xff] %v9419_v11  ;;  %v3126_v63 = vadd.f32 %v3125_v36, %v3077_v8  ;;  %3766 = vmatpush.bf16.msra.mxu3 %v7727_v58  ;;  %v7278_v36 = vld [vmem:[#allocation2 + $0x698] sm:$0xf] }
 0x1c4   : > { %v7279_v22 = vor.u32 %v8335_v12, %v7278_v36 }
 0x1c6   : > { %3668 = vmatpush.bf16.msra.mxu1 %v7279_v22 }
 0x1c8   : > { %v3174_v35 = vpop.f32.mrf.mxu2  ;;  %v3235_v18 = vpop.f32.mrf.mxu0 }
 0x1c9   : > { %v9431_v7 = vadd.f32 %v3174_v35, %v3126_v63  ;;  %v9433_v47 = vpop.f32.mrf.mxu3  ;;  %v3236_v62 = vadd.f32 %v3235_v18, %v3187_v50  ;;  %v3284_v31 = vpop.f32.mrf.mxu1  ;;  %v7026_v63 = vld [vmem:[#allocation2 + $0x4a0] sm:$0xf]  ;;  %v8272_v18 = vld [vmem:[#allocation2 + $0x4b8] sm:$0xf0]  ;;  %v3189_v50 = vadd.f32 %v9314_v9, %v9427_v13  ;;  %v3192_v9 = vadd.f32 %v9325_v30, %v9427_v13  ;;  %v8265_v30 = vld [vmem:[#allocation2 + $0x480] sm:$0xf0] }
 0x1ca   : > { %v7027_v58 = vor.u32 %v8272_v18, %v7026_v63 }
 0x1cb   : > { %11148 = vst [vmem:[#allocation86_spill] sm:$0xff] %v9431_v7  ;;  %v3285_v4 = vadd.f32 %v3284_v31, %v3236_v62  ;;  %3430 = vmatmul.bf16.vlgmr.msrb.gmra.mxu0 %v11149_v15 }
 0x1cc   : > { %7808 = vmatmul.msk.bf16.vlgmr.msrb.gmra.mxu1 %vm2809_vm0, %v11150_v46  ;;  %3620 = vmatpush.bf16.msra.mxu0 %v7027_v58  ;;  %v8384_v46 = vld [vmem:[#allocation2 + $0x838] sm:$0xf0] }
 0x1cd   : > { %3528 = vmatmul.bf16.vlgmr.msrb.gmra.mxu2 %v11151_v48  ;;  %v7474_v48 = vld [vmem:[#allocation2 + $0x820] sm:$0xf] }
 0x1ce   : > { %3577 = vmatmul.bf16.vlgmr.msrb.gmra.mxu3 %v8966_v53  ;;  %v7698_v53 = vld [vmem:[#allocation2 + $0x9e0] sm:$0xf]  ;;  %v7475_v22 = vor.u32 %v8384_v46, %v7474_v48  ;;  %v3194_v48 = vadd.f32 %v9330_v60, %v9427_v13  ;;  %v3197_v60 = vadd.f32 %v9341_v6, %v9427_v13  ;;  %v6970_v6 = vld [vmem:[#allocation2 + $0x430] sm:$0xf] }
 0x1cf   : > { %v7699_v43 = vor.u32 %v8440_v17, %v7698_v53  ;;  %v11153_v53 = vld [vmem:[#allocation52_spill] sm:$0xff]  ;;  %v11154_v17 = vld [vmem:[#allocation19_spill] sm:$0xff] }
 0x1d0   : > { %v3333_v35 = vpop.f32.mrf.mxu2  ;;  %v3237_v62 = vpop.f32.mrf.mxu0  ;;  %3718 = vmatpush.bf16.msra.mxu2 %v7475_v22 }
 0x1d1   : > { %v3334_v8 = vadd.f32 %v3333_v35, %v3285_v4  ;;  %v3382_v31 = vpop.f32.mrf.mxu3  ;;  %v3238_v36 = vadd.f32 %v3237_v62, %v3189_v50  ;;  %v3286_v12 = vpop.f32.mrf.mxu1  ;;  %3767 = vmatpush.bf16.msra.mxu3 %v7699_v43  ;;  %v8328_v62 = vld [vmem:[#allocation2 + $0x678] sm:$0xf0]  ;;  %v6998_v43 = vld [vmem:[#allocation2 + $0x468] sm:$0xf] }
 0x1d3   : > { %v9444_v11 = vadd.f32 %v3382_v31, %v3334_v8  ;;  %v3287_v7 = vadd.f32 %v3286_v12, %v3238_v36  ;;  %v7250_v31 = vld [vmem:[#allocation2 + $0x660] sm:$0xf]  ;;  %v11152_v12 = vld [vmem:[#allocation51_spill] sm:$0xff] }
 0x1d4   : > { %v7251_v46 = vor.u32 %v8328_v62, %v7250_v31  ;;  %v7446_v31 = vld [vmem:[#allocation2 + $0x7e8] sm:$0xf]  ;;  %v8377_v62 = vld [vmem:[#allocation2 + $0x800] sm:$0xf0] }
 0x1d6   : > { %3669 = vmatpush.bf16.msra.mxu1 %v7251_v46  ;;  %v7447_v46 = vor.u32 %v8377_v62, %v7446_v31  ;;  %v3199_v62 = vadd.f32 %v9346_v44, %v9427_v13  ;;  %v3202_v44 = vadd.f32 %v9357_v33, %v9427_v13  ;;  %v6942_v33 = vld [vmem:[#allocation2 + $0x3f8] sm:$0xf] }
 0x1d8   : > { %v3335_v63 = vpop.f32.mrf.mxu2  ;;  %v3240_v58 = vpop.f32.mrf.mxu0  ;;  %3719 = vmatpush.bf16.msra.mxu2 %v7447_v46 }
 0x1d9   : > { %v3336_v4 = vadd.f32 %v3335_v63, %v3287_v7  ;;  %v3384_v18 = vpop.f32.mrf.mxu3  ;;  %v3241_v50 = vadd.f32 %v3240_v58, %v3192_v9  ;;  %v3289_v35 = vpop.f32.mrf.mxu1  ;;  %v6999_v7 = vor.u32 %v8265_v30, %v6998_v43 }
 0x1db   : > { %v9448_v8 = vadd.f32 %v3384_v18, %v3336_v4  ;;  %v3290_v36 = vadd.f32 %v3289_v35, %v3241_v50  ;;  %3435 = vmatmul.bf16.gmra.mxu0 %v11152_v12 }
 0x1dc   : > { %7809 = vmatmul.msk.bf16.gmra.mxu1 %vm2809_vm0, %v11153_v53  ;;  %3621 = vmatpush.bf16.msra.mxu0 %v6999_v7 }
 0x1dd   : > { %3533 = vmatmul.bf16.gmra.mxu2 %v11154_v17  ;;  %v8433_v17 = vld [vmem:[#allocation2 + $0x9c0] sm:$0xf0] }
 0x1de   : > { %3582 = vmatmul.bf16.gmra.mxu3 %v8986_v19  ;;  %v7670_v19 = vld [vmem:[#allocation2 + $0x9a8] sm:$0xf] }
 0x1df   : > { %v7671_v53 = vor.u32 %v8433_v17, %v7670_v19  ;;  %v11156_v19 = vld [vmem:[#allocation55_spill] sm:$0xff] }
 0x1e0   : > { %v3338_v22 = vpop.f32.mrf.mxu2  ;;  %v3242_v4 = vpop.f32.mrf.mxu0  ;;  %v11157_v17 = vld [vmem:[#allocation23_spill] sm:$0xff] }
 0x1e1   : > { %v3339_v9 = vadd.f32 %v3338_v22, %v3290_v36  ;;  %v3387_v63 = vpop.f32.mrf.mxu3  ;;  %v3243_v18 = vadd.f32 %v3242_v4, %v3194_v48  ;;  %v3291_v58 = vpop.f32.mrf.mxu1  ;;  %3768 = vmatpush.bf16.msra.mxu3 %v7671_v53  ;;  %v8321_v4 = vld [vmem:[#allocation2 + $0x640] sm:$0xf0]  ;;  %v8258_v53 = vld [vmem:[#allocation2 + $0x448] sm:$0xf0] }
 0x1e3   : > { %v9457_v50 = vadd.f32 %v3387_v63, %v3339_v9  ;;  %v3292_v35 = vadd.f32 %v3291_v58, %v3243_v18  ;;  %v7222_v63 = vld [vmem:[#allocation2 + $0x628] sm:$0xf] }
 0x1e4   : > { %v11155_v58 = vld [vmem:[#allocation54_spill] sm:$0xff]  ;;  %v7223_v31 = vor.u32 %v8321_v4, %v7222_v63  ;;  %v7418_v63 = vld [vmem:[#allocation2 + $0x7b0] sm:$0xf]  ;;  %v8370_v4 = vld [vmem:[#allocation2 + $0x7c8] sm:$0xf0] }
 0x1e6   : > { %3670 = vmatpush.bf16.msra.mxu1 %v7223_v31  ;;  %v7419_v31 = vor.u32 %v8370_v4, %v7418_v63  ;;  %v3204_v4 = vadd.f32 %v9362_v34, %v9427_v13  ;;  %v3207_v34 = vadd.f32 %v9373_v39, %v9427_v13  ;;  %v6914_v39 = vld [vmem:[#allocation2 + $0x3c0] sm:$0xf] }
 0x1e8   : > { %v3340_v43 = vpop.f32.mrf.mxu2  ;;  %v3245_v7 = vpop.f32.mrf.mxu0  ;;  %3720 = vmatpush.bf16.msra.mxu2 %v7419_v31 }
 0x1e9   : > { %v3341_v36 = vadd.f32 %v3340_v43, %v3292_v35  ;;  %v3389_v30 = vpop.f32.mrf.mxu3  ;;  %v3246_v48 = vadd.f32 %v3245_v7, %v3197_v60  ;;  %v3294_v22 = vpop.f32.mrf.mxu1  ;;  %v6971_v35 = vor.u32 %v8258_v53, %v6970_v6 }
 0x1eb   : > { %v9461_v9 = vadd.f32 %v3389_v30, %v3341_v36  ;;  %v3295_v18 = vadd.f32 %v3294_v22, %v3246_v48  ;;  %3440 = vmatmul.bf16.gmra.mxu0 %v11155_v58 }
 0x1ec   : > { %7810 = vmatmul.msk.bf16.gmra.mxu1 %vm2809_vm0, %v11156_v19  ;;  %3622 = vmatpush.bf16.msra.mxu0 %v6971_v35 }
 0x1ed   : > { %3538 = vmatmul.bf16.gmra.mxu2 %v11157_v17  ;;  %v8426_v17 = vld [vmem:[#allocation2 + $0x988] sm:$0xf0] }
 0x1ee   : > { %3587 = vmatmul.bf16.gmra.mxu3 %v9006_v40  ;;  %v7642_v40 = vld [vmem:[#allocation2 + $0x970] sm:$0xf] }
 0x1ef   : > { %v7643_v19 = vor.u32 %v8426_v17, %v7642_v40  ;;  %v11159_v40 = vld [vmem:[#allocation58_spill] sm:$0xff]  ;;  %v11160_v17 = vld [vmem:[#allocation27_spill] sm:$0xff] }
 0x1f0   : > { %v3343_v46 = vpop.f32.mrf.mxu2  ;;  %v3247_v36 = vpop.f32.mrf.mxu0 }
 0x1f1   : > { %v3344_v60 = vadd.f32 %v3343_v46, %v3295_v18  ;;  %v3392_v43 = vpop.f32.mrf.mxu3  ;;  %v3248_v30 = vadd.f32 %v3247_v36, %v3199_v62  ;;  %v3296_v7 = vpop.f32.mrf.mxu1  ;;  %3769 = vmatpush.bf16.msra.mxu3 %v7643_v19  ;;  %v8314_v36 = vld [vmem:[#allocation2 + $0x608] sm:$0xf0]  ;;  %v8251_v19 = vld [vmem:[#allocation2 + $0x410] sm:$0xf0] }
 0x1f3   : > { %v9470_v48 = vadd.f32 %v3392_v43, %v3344_v60  ;;  %v3297_v22 = vadd.f32 %v3296_v7, %v3248_v30  ;;  %v7194_v43 = vld [vmem:[#allocation2 + $0x5f0] sm:$0xf]  ;;  %v11158_v7 = vld [vmem:[#allocation57_spill] sm:$0xff] }
 0x1f4   : > { %v7195_v63 = vor.u32 %v8314_v36, %v7194_v43  ;;  %v7390_v43 = vld [vmem:[#allocation2 + $0x778] sm:$0xf]  ;;  %v8363_v36 = vld [vmem:[#allocation2 + $0x790] sm:$0xf0] }
 0x1f6   : > { %3671 = vmatpush.bf16.msra.mxu1 %v7195_v63  ;;  %v7391_v63 = vor.u32 %v8363_v36, %v7390_v43  ;;  %v3209_v36 = vadd.f32 %v9378_v51, %v9427_v13  ;;  %v3212_v51 = vadd.f32 %v9389_v0, %v9427_v13  ;;  %v6886_v0 = vld [vmem:[#allocation2 + $0x388] sm:$0xf] }
 0x1f8   : > { %v3345_v6 = vpop.f32.mrf.mxu2  ;;  %v3250_v35 = vpop.f32.mrf.mxu0  ;;  %3721 = vmatpush.bf16.msra.mxu2 %v7391_v63 }
 0x1f9   : > { %v3346_v18 = vadd.f32 %v3345_v6, %v3297_v22  ;;  %v3394_v53 = vpop.f32.mrf.mxu3  ;;  %v3251_v62 = vadd.f32 %v3250_v35, %v3202_v44  ;;  %v3299_v46 = vpop.f32.mrf.mxu1  ;;  %v6943_v22 = vor.u32 %v8251_v19, %v6942_v33 }
 0x1fb   : > { %v9474_v60 = vadd.f32 %v3394_v53, %v3346_v18  ;;  %v3300_v30 = vadd.f32 %v3299_v46, %v3251_v62  ;;  %3445 = vmatmul.bf16.gmra.mxu0 %v11158_v7 }
 0x1fc   : > { %7811 = vmatmul.msk.bf16.gmra.mxu1 %vm2809_vm0, %v11159_v40  ;;  %3623 = vmatpush.bf16.msra.mxu0 %v6943_v22 }
 0x1fd   : > { %3543 = vmatmul.bf16.gmra.mxu2 %v11160_v17  ;;  %v8419_v17 = vld [vmem:[#allocation2 + $0x950] sm:$0xf0] }
 0x1fe   : > { %3592 = vmatmul.bf16.gmra.mxu3 %v9026_v1  ;;  %v7614_v1 = vld [vmem:[#allocation2 + $0x938] sm:$0xf] }
 0x1ff   : > { %v7615_v40 = vor.u32 %v8419_v17, %v7614_v1  ;;  %v11162_v1 = vld [vmem:[#allocation61_spill] sm:$0xff]  ;;  %v11163_v17 = vld [vmem:[#allocation31_spill] sm:$0xff] }
 0x200   : > { %v3348_v31 = vpop.f32.mrf.mxu2  ;;  %v3252_v18 = vpop.f32.mrf.mxu0 }
 0x201   : > { %v3349_v44 = vadd.f32 %v3348_v31, %v3300_v30  ;;  %v3397_v6 = vpop.f32.mrf.mxu3  ;;  %v3253_v53 = vadd.f32 %v3252_v18, %v3204_v4  ;;  %v3301_v35 = vpop.f32.mrf.mxu1  ;;  %3770 = vmatpush.bf16.msra.mxu3 %v7615_v40  ;;  %v8307_v18 = vld [vmem:[#allocation2 + $0x5d0] sm:$0xf0]  ;;  %v8244_v40 = vld [vmem:[#allocation2 + $0x3d8] sm:$0xf0] }
 0x203   : > { %v9483_v62 = vadd.f32 %v3397_v6, %v3349_v44  ;;  %v3302_v46 = vadd.f32 %v3301_v35, %v3253_v53  ;;  %v7166_v6 = vld [vmem:[#allocation2 + $0x5b8] sm:$0xf] }
 0x204   : > { %v11161_v35 = vld [vmem:[#allocation60_spill] sm:$0xff]  ;;  %v7167_v43 = vor.u32 %v8307_v18, %v7166_v6  ;;  %v7362_v6 = vld [vmem:[#allocation2 + $0x740] sm:$0xf]  ;;  %v8356_v18 = vld [vmem:[#allocation2 + $0x758] sm:$0xf0] }
 0x206   : > { %3672 = vmatpush.bf16.msra.mxu1 %v7167_v43  ;;  %v7363_v43 = vor.u32 %v8356_v18, %v7362_v6  ;;  %v3214_v18 = vadd.f32 %v9394_v29, %v9427_v13  ;;  %v3217_v29 = vadd.f32 %v9405_v37, %v9427_v13  ;;  %v11169_v37 = vld [vmem:[#allocation39_spill] sm:$0xff] }
 0x208   : > { %v3350_v33 = vpop.f32.mrf.mxu2  ;;  %v3255_v22 = vpop.f32.mrf.mxu0  ;;  %3722 = vmatpush.bf16.msra.mxu2 %v7363_v43 }
 0x209   : > { %v3351_v30 = vadd.f32 %v3350_v33, %v3302_v46  ;;  %v3399_v19 = vpop.f32.mrf.mxu3  ;;  %v3256_v4 = vadd.f32 %v3255_v22, %v3207_v34  ;;  %v3304_v31 = vpop.f32.mrf.mxu1  ;;  %v6915_v46 = vor.u32 %v8244_v40, %v6914_v39 }
 0x20b   : > { %v9487_v44 = vadd.f32 %v3399_v19, %v3351_v30  ;;  %v3305_v53 = vadd.f32 %v3304_v31, %v3256_v4  ;;  %3450 = vmatmul.bf16.gmra.mxu0 %v11161_v35 }
 0x20c   : > { %7812 = vmatmul.msk.bf16.gmra.mxu1 %vm2809_vm0, %v11162_v1  ;;  %3624 = vmatpush.bf16.msra.mxu0 %v6915_v46 }
 0x20d   : > { %3548 = vmatmul.bf16.gmra.mxu2 %v11163_v17  ;;  %v8412_v17 = vld [vmem:[#allocation2 + $0x918] sm:$0xf0] }
 0x20e   : > { %3597 = vmatmul.bf16.gmra.mxu3 %v9046_v26  ;;  %v7586_v26 = vld [vmem:[#allocation2 + $0x900] sm:$0xf] }
 0x20f   : > { %v7587_v1 = vor.u32 %v8412_v17, %v7586_v26  ;;  %v11165_v26 = vld [vmem:[#allocation64_spill] sm:$0xff]  ;;  %v11166_v17 = vld [vmem:[#allocation35_spill] sm:$0xff] }
 0x210   : > { %v3353_v63 = vpop.f32.mrf.mxu2  ;;  %v3257_v30 = vpop.f32.mrf.mxu0 }
 0x211   : > { %v3354_v34 = vadd.f32 %v3353_v63, %v3305_v53  ;;  %v3402_v33 = vpop.f32.mrf.mxu3  ;;  %v3258_v19 = vadd.f32 %v3257_v30, %v3209_v36  ;;  %v3306_v22 = vpop.f32.mrf.mxu1  ;;  %3771 = vmatpush.bf16.msra.mxu3 %v7587_v1  ;;  %v8300_v30 = vld [vmem:[#allocation2 + $0x598] sm:$0xf0]  ;;  %v8237_v1 = vld [vmem:[#allocation2 + $0x3a0] sm:$0xf0] }
 0x213   : > { %v9496_v4 = vadd.f32 %v3402_v33, %v3354_v34  ;;  %v3307_v31 = vadd.f32 %v3306_v22, %v3258_v19  ;;  %v7138_v33 = vld [vmem:[#allocation2 + $0x580] sm:$0xf]  ;;  %v11164_v22 = vld [vmem:[#allocation63_spill] sm:$0xff] }
 0x214   : > { %v7139_v6 = vor.u32 %v8300_v30, %v7138_v33  ;;  %v7334_v33 = vld [vmem:[#allocation2 + $0x708] sm:$0xf]  ;;  %v8349_v30 = vld [vmem:[#allocation2 + $0x720] sm:$0xf0] }
 0x216   : > { %3673 = vmatpush.bf16.msra.mxu1 %v7139_v6  ;;  %v7335_v6 = vor.u32 %v8349_v30, %v7334_v33  ;;  %v11167_v33 = vld [vmem:[#allocation66_spill] sm:$0xff]  ;;  %v3219_v30 = vadd.f32 %v9410_v45, %v9427_v13 }
 0x218   : > { %v3355_v39 = vpop.f32.mrf.mxu2  ;;  %v3260_v46 = vpop.f32.mrf.mxu0  ;;  %3723 = vmatpush.bf16.msra.mxu2 %v7335_v6 }
 0x219   : > { %v3356_v53 = vadd.f32 %v3355_v39, %v3307_v31  ;;  %v3404_v40 = vpop.f32.mrf.mxu3  ;;  %v3261_v36 = vadd.f32 %v3260_v46, %v3212_v51  ;;  %v3309_v63 = vpop.f32.mrf.mxu1  ;;  %v6887_v31 = vor.u32 %v8237_v1, %v6886_v0  ;;  %v8293_v1 = vld [vmem:[#allocation2 + $0x560] sm:$0xf0] }
 0x21b   : > { %v9500_v34 = vadd.f32 %v3404_v40, %v3356_v53  ;;  %v3310_v19 = vadd.f32 %v3309_v63, %v3261_v36  ;;  %3455 = vmatmul.bf16.gmra.mxu0 %v11164_v22 }
 0x21c   : > { %7813 = vmatmul.msk.bf16.gmra.mxu1 %vm2809_vm0, %v11165_v26  ;;  %3625 = vmatpush.bf16.msra.mxu0 %v6887_v31 }
 0x21d   : > { %3553 = vmatmul.bf16.gmra.mxu2 %v11166_v17  ;;  %v8405_v17 = vld [vmem:[#allocation2 + $0x8e0] sm:$0xf0] }
 0x21e   : > { %3602 = vmatmul.bf16.gmra.mxu3 %v9066_v52  ;;  %v7558_v52 = vld [vmem:[#allocation2 + $0x8c8] sm:$0xf] }
 0x21f   : > { %v7559_v26 = vor.u32 %v8405_v17, %v7558_v52  ;;  %v11168_v52 = vld [vmem:[#allocation67_spill] sm:$0xff]  ;;  %v8461_v17 = vld [vmem:[#allocation2 + $0xaa0] sm:$0xf0] }
 0x220   : > { %v3358_v43 = vpop.f32.mrf.mxu2  ;;  %v3262_v53 = vpop.f32.mrf.mxu0 }
 0x221   : > { %v3359_v51 = vadd.f32 %v3358_v43, %v3310_v19  ;;  %v3407_v39 = vpop.f32.mrf.mxu3  ;;  %v3263_v40 = vadd.f32 %v3262_v53, %v3214_v18  ;;  %v3311_v46 = vpop.f32.mrf.mxu1  ;;  %3772 = vmatpush.bf16.msra.mxu3 %v7559_v26  ;;  %v7110_v19 = vld [vmem:[#allocation2 + $0x548] sm:$0xf] }
 0x222   : > { %v7782_v26 = vld [vmem:[#allocation2 + $0xa88] sm:$0xf] }
 0x223   : > { %v9509_v36 = vadd.f32 %v3407_v39, %v3359_v51  ;;  %v3312_v63 = vadd.f32 %v3311_v46, %v3263_v40  ;;  %v7111_v51 = vor.u32 %v8293_v1, %v7110_v19 }
 0x225   : > { %3674 = vmatpush.bf16.msra.mxu1 %v7111_v51  ;;  %v8227_v51 = vld [vmem:[#allocation2 + $0x354] sm:$0xf] }
 0x228   : > { %v3360_v0 = vpop.f32.mrf.mxu2  ;;  %v3265_v43 = vpop.f32.mrf.mxu0 }
 0x229   : > { %v3361_v31 = vadd.f32 %v3360_v0, %v3312_v63  ;;  %v3409_v18 = vpop.f32.mrf.mxu3  ;;  %v3266_v39 = vadd.f32 %v3265_v43, %v3217_v29  ;;  %v3314_v53 = vpop.f32.mrf.mxu1  ;;  %v7783_v63 = vor.u32 %v8461_v17, %v7782_v26  ;;  %v3222_v26 = vadd.f32 %v9421_v59, %v9427_v13 }
 0x22b   : > { %v9513_v40 = vadd.f32 %v3409_v18, %v3361_v31  ;;  %v3315_v46 = vadd.f32 %v3314_v53, %v3266_v39  ;;  %3460 = vmatmul.bf16.gmra.mxu0 %v11167_v33  ;;  %v6860_v39 = vld [vmem:[#allocation2 + $0x36c] sm:$0xf0]  ;;  %v8283_v53 = vld [vmem:[#allocation2 + $0x514] sm:$0xf] }
 0x22c   : > { %7814 = vmatmul.msk.bf16.gmra.mxu1 %vm2809_vm0, %v11168_v52  ;;  %3821 = vmatpush.bf16.msrb.mxu0 %v7783_v63 }
 0x22d   : > { %3558 = vmatmul.bf16.gmra.mxu2 %v11169_v37  ;;  %v7084_v37 = vld [vmem:[#allocation2 + $0x52c] sm:$0xf0] }
 0x22e   : > { %3607 = vmatmul.bf16.gmra.mxu3 %v9086_v16  ;;  %v6863_v16 = vor.u32 %v8227_v51, %v6860_v39  ;;  %v7087_v45 = vor.u32 %v8283_v53, %v7084_v37 }
 0x230   : > { %v3363_v6 = vpop.f32.mrf.mxu2  ;;  %v3267_v19 = vpop.f32.mrf.mxu0  ;;  %3912 = vmatpush.bf16.msrb.mxu2 %v6863_v16  ;;  %3961 = vmatpush.bf16.msrb.mxu3 %v7087_v45  ;;  %v3224_v16 = vadd.f32 %v9433_v47, %v9427_v13  ;;  %v6832_v45 = vld [vmem:[#allocation2 + $0x334] sm:$0xf0] }
 0x231   : > { %v3364_v29 = vadd.f32 %v3363_v6, %v3315_v46  ;;  %v3412_v0 = vpop.f32.mrf.mxu3  ;;  %v3268_v1 = vadd.f32 %v3267_v19, %v3219_v30  ;;  %v3316_v31 = vpop.f32.mrf.mxu1  ;;  %v6636_v19 = vld [vmem:[#allocation2 + $0x1ac] sm:$0xf0] }
 0x233   : > { %v9522_v18 = vadd.f32 %v3412_v0, %v3364_v29  ;;  %v3317_v43 = vadd.f32 %v3316_v31, %v3268_v1  ;;  %v8171_v0 = vld [vmem:[#allocation2 + $0x194] sm:$0xf] }
 0x234   : > { %v6639_v31 = vor.u32 %v8171_v0, %v6636_v19 }
 0x236   : > { %3863 = vmatpush.bf16.msrb.mxu1 %v6639_v31 }
 0x238   : > { %v3365_v17 = vpop.f32.mrf.mxu2  ;;  %v3270_v6 = vpop.f32.mrf.mxu0 }
 0x239   : > { %v3366_v52 = vadd.f32 %v3365_v17, %v3317_v43  ;;  %v3414_v46 = vpop.f32.mrf.mxu3  ;;  %v3271_v63 = vadd.f32 %v3270_v6, %v3222_v26  ;;  %v3319_v30 = vpop.f32.mrf.mxu1  ;;  %v8220_v17 = vld [vmem:[#allocation2 + $0x31c] sm:$0xf] }
 0x23a   : > { %v6835_v6 = vor.u32 %v8220_v17, %v6832_v45 }
 0x23b   : > { %v9526_v29 = vadd.f32 %v3414_v46, %v3366_v52  ;;  %v3320_v1 = vadd.f32 %v3319_v30, %v3271_v63  ;;  %3465 = vmatmul.bf16.gmra.mxu0 %v9285_v14  ;;  %v8276_v46 = vld [vmem:[#allocation2 + $0x4dc] sm:$0xf]  ;;  %v7056_v63 = vld [vmem:[#allocation2 + $0x4f4] sm:$0xf0] }
 0x23c   : > { %7815 = vmatmul.msk.bf16.gmra.mxu1 %vm2809_vm0, %v9287_v25  ;;  %v7059_v0 = vor.u32 %v8276_v46, %v7056_v63  ;;  %3913 = vmatpush.bf16.msrb.mxu2 %v6835_v6  ;;  %v6804_v63 = vld [vmem:[#allocation2 + $0x2fc] sm:$0xf0] }
 0x23d   : > { %3563 = vmatmul.bf16.gmra.mxu2 %v9104_v49 }
 0x23e   : > { %3612 = vmatmul.bf16.gmra.mxu3 %v11144_v61 }
 0x23f   : > { %3962 = vmatpush.bf16.msrb.mxu3 %v7059_v0 }
 0x240   : > { %v3368_v59 = vpop.f32.mrf.mxu2  ;;  %v3272_v43 = vpop.f32.mrf.mxu0 }
 0x241   : > { %v3369_v52 = vadd.f32 %v3368_v59, %v3320_v1  ;;  %v3417_v37 = vpop.f32.mrf.mxu3  ;;  %v3273_v51 = vadd.f32 %v3272_v43, %v3224_v16  ;;  %v3321_v39 = vpop.f32.mrf.mxu1  ;;  %v8164_v16 = vld [vmem:[#allocation2 + $0x15c] sm:$0xf]  ;;  %v6608_v59 = vld [vmem:[#allocation2 + $0x174] sm:$0xf0]  ;;  %v9546_v43 = vperm.slane %v9424_v24, 2 }
 0x242   : > { %v8213_v24 = vld [vmem:[#allocation2 + $0x2e4] sm:$0xf] }
 0x243   : > { %v9535_v53 = vadd.f32 %v3417_v37, %v3369_v52  ;;  %v3322_v26 = vadd.f32 %v3321_v39, %v3273_v51  ;;  %v6611_v37 = vor.u32 %v8164_v16, %v6608_v59  ;;  %v6807_v0 = vor.u32 %v8213_v24, %v6804_v63 }
 0x245   : > { %3864 = vmatpush.bf16.msrb.mxu1 %v6611_v37  ;;  %3914 = vmatpush.bf16.msrb.mxu2 %v6807_v0 }
 0x248   : > { %v3370_v30 = vpop.f32.mrf.mxu2  ;;  %v3431_v61 = vpop.f32.mrf.mxu0 }
 0x249   : > { %v3371_v19 = vadd.f32 %v3370_v30, %v3322_v26  ;;  %v3419_v31 = vpop.f32.mrf.mxu3  ;;  %v3432_v13 = vadd.f32 %v3431_v61, %v9444_v11  ;;  %v3480_v47 = vpop.f32.mrf.mxu1  ;;  %v8269_v30 = vld [vmem:[#allocation2 + $0x4a4] sm:$0xf] }
 0x24b   : > { %v9538_v1 = vadd.f32 %v3419_v31, %v3371_v19  ;;  %v9540_v52 = vadd.f32 %v3480_v47, %v3432_v13  ;;  %3626 = vmatmul.bf16.vlgmr.msra.gmra.mxu0 %v8968_v54  ;;  %v7028_v19 = vld [vmem:[#allocation2 + $0x4bc] sm:$0xf0] }
 0x24c   : > { %3675 = vmatmul.bf16.vlgmr.msra.gmra.mxu1 %v8970_v55  ;;  %v7031_v13 = vor.u32 %v8269_v30, %v7028_v19 }
 0x24d   : > { %11170 = vst [vmem:[#allocation48_spill] sm:$0xff] %v9540_v52  ;;  %3724 = vmatmul.bf16.vlgmr.msra.gmra.mxu2 %v9124_v32 }
 0x24e   : > { %3773 = vmatmul.bf16.vlgmr.msra.gmra.mxu3 %v11149_v15 }
 0x24f   : > { %3963 = vmatpush.bf16.msrb.mxu3 %v7031_v13 }
 0x250   : > { %v3529_v61 = vpop.f32.mrf.mxu2  ;;  %v3433_v39 = vpop.f32.mrf.mxu0 }
 0x251   : > { %v3530_v11 = vadd.f32 %v3529_v61, %v9546_v43  ;;  %v3578_v51 = vpop.f32.mrf.mxu3  ;;  %v3434_v26 = vadd.f32 %v3433_v39, %v9448_v8  ;;  %v3482_v17 = vpop.f32.mrf.mxu1 }
 0x253   : > { %v9551_v45 = vadd.f32 %v3578_v51, %v3530_v11  ;;  %v9553_v46 = vadd.f32 %v3482_v17, %v3434_v26  ;;  %v8157_v11 = vld [vmem:[#allocation2 + $0x124] sm:$0xf]  ;;  %v6580_v51 = vld [vmem:[#allocation2 + $0x13c] sm:$0xf0] }
 0x254   : > { %v6583_v26 = vor.u32 %v8157_v11, %v6580_v51 }
 0x255   : > { %11171 = vst [vmem:[#allocation51_spill] sm:$0xff] %v9553_v46  ;;  %v7784_v46 = vld [vmem:[#allocation2 + $0xaa4] sm:$0xf0] }
 0x256   : > { %3865 = vmatpush.bf16.msrb.mxu1 %v6583_v26 }
 0x258   : > { %v3531_v31 = vpop.f32.mrf.mxu2  ;;  %v3436_v59 = vpop.f32.mrf.mxu0 }
 0x259   : > { %v3532_v47 = vadd.f32 %v3531_v31, %v9546_v43  ;;  %v3580_v16 = vpop.f32.mrf.mxu3  ;;  %v3437_v8 = vadd.f32 %v3436_v59, %v9457_v50  ;;  %v3485_v37 = vpop.f32.mrf.mxu1  ;;  %v8262_v59 = vld [vmem:[#allocation2 + $0x46c] sm:$0xf] }
 0x25b   : > { %v9559_v61 = vadd.f32 %v3580_v16, %v3532_v47  ;;  %v9561_v39 = vadd.f32 %v3485_v37, %v3437_v8  ;;  %3631 = vmatmul.bf16.gmra.mxu0 %v8988_v20  ;;  %v8206_v47 = vld [vmem:[#allocation2 + $0x2ac] sm:$0xf]  ;;  %v6776_v16 = vld [vmem:[#allocation2 + $0x2c4] sm:$0xf0] }
 0x25c   : > { %3680 = vmatmul.bf16.gmra.mxu1 %v8990_v21  ;;  %v6779_v8 = vor.u32 %v8206_v47, %v6776_v16  ;;  %v7000_v37 = vld [vmem:[#allocation2 + $0x484] sm:$0xf0] }
 0x25d   : > { %11172 = vst [vmem:[#allocation54_spill] sm:$0xff] %v9561_v39  ;;  %3729 = vmatmul.bf16.gmra.mxu2 %v9145_v38  ;;  %v7003_v51 = vor.u32 %v8262_v59, %v7000_v37 }
 0x25e   : > { %3778 = vmatmul.bf16.gmra.mxu3 %v11152_v12  ;;  %3915 = vmatpush.bf16.msrb.mxu2 %v6779_v8 }
 0x25f   : > { %3964 = vmatpush.bf16.msrb.mxu3 %v7003_v51 }
 0x260   : > { %v3534_v17 = vpop.f32.mrf.mxu2  ;;  %v3438_v63 = vpop.f32.mrf.mxu0 }
 0x261   : > { %v3535_v50 = vadd.f32 %v3534_v17, %v9546_v43  ;;  %v3583_v24 = vpop.f32.mrf.mxu3  ;;  %v3439_v30 = vadd.f32 %v3438_v63, %v9461_v9  ;;  %v3487_v0 = vpop.f32.mrf.mxu1  ;;  %v8150_v63 = vld [vmem:[#allocation2 + $0xec] sm:$0xf] }
 0x263   : > { %v9569_v19 = vadd.f32 %v3583_v24, %v3535_v50  ;;  %v9571_v31 = vadd.f32 %v3487_v0, %v3439_v30  ;;  %v6552_v30 = vld [vmem:[#allocation2 + $0x104] sm:$0xf0] }
 0x264   : > { %v6555_v47 = vor.u32 %v8150_v63, %v6552_v30  ;;  %v6972_v30 = vld [vmem:[#allocation2 + $0x44c] sm:$0xf0] }
 0x265   : > { %11173 = vst [vmem:[#allocation87_spill] sm:$0xff] %v9571_v31 }
 0x266   : > { %3866 = vmatpush.bf16.msrb.mxu1 %v6555_v47 }
 0x268   : > { %v3536_v11 = vpop.f32.mrf.mxu2  ;;  %v3441_v6 = vpop.f32.mrf.mxu0 }
 0x269   : > { %v3537_v26 = vadd.f32 %v3536_v11, %v9546_v43  ;;  %v3585_v17 = vpop.f32.mrf.mxu3  ;;  %v3442_v9 = vadd.f32 %v3441_v6, %v9470_v48  ;;  %v3490_v50 = vpop.f32.mrf.mxu1 }
 0x26b   : > { %v9577_v24 = vadd.f32 %v3585_v17, %v3537_v26  ;;  %v9579_v0 = vadd.f32 %v3490_v50, %v3442_v9  ;;  %3636 = vmatmul.bf16.gmra.mxu0 %v9008_v41  ;;  %v8199_v17 = vld [vmem:[#allocation2 + $0x274] sm:$0xf]  ;;  %v6748_v9 = vld [vmem:[#allocation2 + $0x28c] sm:$0xf0] }
 0x26c   : > { %3685 = vmatmul.bf16.gmra.mxu1 %v9010_v42  ;;  %v8255_v50 = vld [vmem:[#allocation2 + $0x434] sm:$0xf]  ;;  %v6751_v63 = vor.u32 %v8199_v17, %v6748_v9 }
 0x26d   : > { %11174 = vst [vmem:[#allocation88_spill] sm:$0xff] %v9579_v0  ;;  %3734 = vmatmul.bf16.gmra.mxu2 %v9168_v10  ;;  %v6975_v13 = vor.u32 %v8255_v50, %v6972_v30 }
 0x26e   : > { %3783 = vmatmul.bf16.gmra.mxu3 %v11155_v58  ;;  %3916 = vmatpush.bf16.msrb.mxu2 %v6751_v63 }
 0x26f   : > { %3965 = vmatpush.bf16.msrb.mxu3 %v6975_v13 }
 0x270   : > { %v3539_v16 = vpop.f32.mrf.mxu2  ;;  %v3443_v59 = vpop.f32.mrf.mxu0 }
 0x271   : > { %v3540_v48 = vadd.f32 %v3539_v16, %v9546_v43  ;;  %v3588_v6 = vpop.f32.mrf.mxu3  ;;  %v3444_v8 = vadd.f32 %v3443_v59, %v9474_v60  ;;  %v3492_v37 = vpop.f32.mrf.mxu1  ;;  %v8143_v59 = vld [vmem:[#allocation2 + $0xb4] sm:$0xf] }
 0x273   : > { %v9587_v11 = vadd.f32 %v3588_v6, %v3540_v48  ;;  %v9589_v51 = vadd.f32 %v3492_v37, %v3444_v8  ;;  %v6524_v8 = vld [vmem:[#allocation2 + $0xcc] sm:$0xf0] }
 0x274   : > { %v6527_v17 = vor.u32 %v8143_v59, %v6524_v8  ;;  %v6944_v8 = vld [vmem:[#allocation2 + $0x414] sm:$0xf0] }
 0x275   : > { %11175 = vst [vmem:[#allocation89_spill] sm:$0xff] %v9589_v51 }
 0x276   : > { %3867 = vmatpush.bf16.msrb.mxu1 %v6527_v17 }
 0x278   : > { %v3541_v47 = vpop.f32.mrf.mxu2  ;;  %v3446_v31 = vpop.f32.mrf.mxu0 }
 0x279   : > { %v3542_v16 = vadd.f32 %v3541_v47, %v9546_v43  ;;  %v3590_v39 = vpop.f32.mrf.mxu3  ;;  %v3447_v60 = vadd.f32 %v3446_v31, %v9483_v62  ;;  %v3495_v48 = vpop.f32.mrf.mxu1 }
 0x27b   : > { %v9595_v6 = vadd.f32 %v3590_v39, %v3542_v16  ;;  %v9597_v37 = vadd.f32 %v3495_v48, %v3447_v60  ;;  %3641 = vmatmul.bf16.gmra.mxu0 %v9028_v2  ;;  %v8192_v16 = vld [vmem:[#allocation2 + $0x23c] sm:$0xf]  ;;  %v6720_v60 = vld [vmem:[#allocation2 + $0x254] sm:$0xf0] }
 0x27c   : > { %3690 = vmatmul.bf16.gmra.mxu1 %v9030_v3  ;;  %v8248_v48 = vld [vmem:[#allocation2 + $0x3fc] sm:$0xf]  ;;  %v6723_v59 = vor.u32 %v8192_v16, %v6720_v60 }
 0x27d   : > { %11176 = vst [vmem:[#allocation90_spill] sm:$0xff] %v9597_v37  ;;  %3739 = vmatmul.bf16.gmra.mxu2 %v9191_v23  ;;  %v6947_v26 = vor.u32 %v8248_v48, %v6944_v8 }
 0x27e   : > { %3788 = vmatmul.bf16.gmra.mxu3 %v11158_v7  ;;  %3917 = vmatpush.bf16.msrb.mxu2 %v6723_v59 }
 0x27f   : > { %3966 = vmatpush.bf16.msrb.mxu3 %v6947_v26 }
 0x280   : > { %v3544_v9 = vpop.f32.mrf.mxu2  ;;  %v3448_v39 = vpop.f32.mrf.mxu0 }
 0x281   : > { %v3545_v62 = vadd.f32 %v3544_v9, %v9546_v43  ;;  %v3593_v31 = vpop.f32.mrf.mxu3  ;;  %v3449_v13 = vadd.f32 %v3448_v39, %v9487_v44  ;;  %v3497_v50 = vpop.f32.mrf.mxu1  ;;  %v8136_v39 = vld [vmem:[#allocation2 + $0x7c] sm:$0xf] }
 0x283   : > { %v9605_v63 = vadd.f32 %v3593_v31, %v3545_v62  ;;  %v9607_v30 = vadd.f32 %v3497_v50, %v3449_v13  ;;  %v6496_v13 = vld [vmem:[#allocation2 + $0x94] sm:$0xf0] }
 0x284   : > { %v6499_v16 = vor.u32 %v8136_v39, %v6496_v13  ;;  %v6916_v13 = vld [vmem:[#allocation2 + $0x3dc] sm:$0xf0] }
 0x285   : > { %11177 = vst [vmem:[#allocation91_spill] sm:$0xff] %v9607_v30 }
 0x286   : > { %3868 = vmatpush.bf16.msrb.mxu1 %v6499_v16 }
 0x288   : > { %v3546_v17 = vpop.f32.mrf.mxu2  ;;  %v3451_v51 = vpop.f32.mrf.mxu0 }
 0x289   : > { %v3547_v9 = vadd.f32 %v3546_v17, %v9546_v43  ;;  %v3595_v0 = vpop.f32.mrf.mxu3  ;;  %v3452_v44 = vadd.f32 %v3451_v51, %v9496_v4  ;;  %v3500_v62 = vpop.f32.mrf.mxu1 }
 0x28b   : > { %v9613_v31 = vadd.f32 %v3595_v0, %v3547_v9  ;;  %v9615_v50 = vadd.f32 %v3500_v62, %v3452_v44  ;;  %3646 = vmatmul.bf16.gmra.mxu0 %v9048_v27  ;;  %v8185_v9 = vld [vmem:[#allocation2 + $0x204] sm:$0xf]  ;;  %v6692_v44 = vld [vmem:[#allocation2 + $0x21c] sm:$0xf0] }
 0x28c   : > { %3695 = vmatmul.bf16.gmra.mxu1 %v9050_v28  ;;  %v8241_v62 = vld [vmem:[#allocation2 + $0x3c4] sm:$0xf]  ;;  %v6695_v39 = vor.u32 %v8185_v9, %v6692_v44 }
 0x28d   : > { %11178 = vst [vmem:[#allocation92_spill] sm:$0xff] %v9615_v50  ;;  %3744 = vmatmul.bf16.gmra.mxu2 %v9214_v5  ;;  %v6919_v47 = vor.u32 %v8241_v62, %v6916_v13  ;;  %v11181_v44 = vld [vmem:[#allocation62_spill] sm:$0xff] }
 0x28e   : > { %3793 = vmatmul.bf16.gmra.mxu3 %v11161_v35  ;;  %3918 = vmatpush.bf16.msrb.mxu2 %v6695_v39 }
 0x28f   : > { %3967 = vmatpush.bf16.msrb.mxu3 %v6919_v47 }
 0x290   : > { %v3549_v60 = vpop.f32.mrf.mxu2  ;;  %v3453_v0 = vpop.f32.mrf.mxu0 }
 0x291   : > { %v3550_v4 = vadd.f32 %v3549_v60, %v9546_v43  ;;  %v3598_v51 = vpop.f32.mrf.mxu3  ;;  %v3454_v26 = vadd.f32 %v3453_v0, %v9500_v34  ;;  %v3502_v48 = vpop.f32.mrf.mxu1  ;;  %v8129_v0 = vld [vmem:[#allocation2 + $0x44] sm:$0xf] }
 0x293   : > { %v9623_v59 = vadd.f32 %v3598_v51, %v3550_v4  ;;  %v9625_v8 = vadd.f32 %v3502_v48, %v3454_v26  ;;  %v6468_v26 = vld [vmem:[#allocation2 + $0x5c] sm:$0xf0] }
 0x294   : > { %v6471_v9 = vor.u32 %v8129_v0, %v6468_v26  ;;  %v8234_v0 = vld [vmem:[#allocation2 + $0x38c] sm:$0xf] }
 0x295   : > { %11179 = vst [vmem:[#allocation93_spill] sm:$0xff] %v9625_v8  ;;  %v6440_v8 = vld [vmem:[#allocation2 + $0x24] sm:$0xf0] }
 0x296   : > { %3869 = vmatpush.bf16.msrb.mxu1 %v6471_v9  ;;  %v6888_v9 = vld [vmem:[#allocation2 + $0x3a4] sm:$0xf0] }
 0x297   : > { %v6891_v50 = vor.u32 %v8234_v0, %v6888_v9  ;;  %v11186_v0 = vld [vmem:[#allocation65_spill] sm:$0xff] }
 0x298   : > { %v3551_v16 = vpop.f32.mrf.mxu2  ;;  %v3456_v30 = vpop.f32.mrf.mxu0 }
 0x299   : > { %v3552_v60 = vadd.f32 %v3551_v16, %v9546_v43  ;;  %v3600_v37 = vpop.f32.mrf.mxu3  ;;  %v3457_v34 = vadd.f32 %v3456_v30, %v9509_v36  ;;  %v3505_v4 = vpop.f32.mrf.mxu1  ;;  %3968 = vmatpush.bf16.msrb.mxu3 %v6891_v50 }
 0x29b   : > { %v9631_v51 = vadd.f32 %v3600_v37, %v3552_v60  ;;  %v9633_v48 = vadd.f32 %v3505_v4, %v3457_v34  ;;  %3651 = vmatmul.bf16.gmra.mxu0 %v9068_v56  ;;  %v8178_v34 = vld [vmem:[#allocation2 + $0x1cc] sm:$0xf]  ;;  %v6664_v4 = vld [vmem:[#allocation2 + $0x1e4] sm:$0xf0] }
 0x29c   : > { %3700 = vmatmul.bf16.gmra.mxu1 %v9070_v57  ;;  %v6667_v26 = vor.u32 %v8178_v34, %v6664_v4  ;;  %v11184_v34 = vld [vmem:[#allocation41_spill] sm:$0xff]  ;;  %v11185_v4 = vld [vmem:[#allocation42_spill] sm:$0xff] }
 0x29d   : > { %11180 = vst [vmem:[#allocation94_spill] sm:$0xff] %v9633_v48  ;;  %3749 = vmatmul.bf16.gmra.mxu2 %v11181_v44  ;;  %v8458_v48 = vld [vmem:[#allocation2 + $0xa8c] sm:$0xf] }
 0x29e   : > { %3798 = vmatmul.bf16.gmra.mxu3 %v11164_v22  ;;  %3919 = vmatpush.bf16.msrb.mxu2 %v6667_v26  ;;  %v7308_v26 = vld [vmem:[#allocation2 + $0x6ec] sm:$0xf0] }
 0x2a0   : > { %v3554_v62 = vpop.f32.mrf.mxu2  ;;  %v3458_v37 = vpop.f32.mrf.mxu0 }
 0x2a1   : > { %v3555_v36 = vadd.f32 %v3554_v62, %v9546_v43  ;;  %v3603_v30 = vpop.f32.mrf.mxu3  ;;  %v3459_v47 = vadd.f32 %v3458_v37, %v9513_v40  ;;  %v3507_v39 = vpop.f32.mrf.mxu1  ;;  %v8122_v62 = vld [vmem:[#allocation2 + $0xc] sm:$0xf] }
 0x2a3   : > { %v9641_v13 = vadd.f32 %v3603_v30, %v3555_v36  ;;  %v9643_v16 = vadd.f32 %v3507_v39, %v3459_v47  ;;  %v6443_v36 = vor.u32 %v8122_v62, %v6440_v8 }
 0x2a5   : > { %11182 = vst [vmem:[#allocation95_spill] sm:$0xff] %v9643_v16  ;;  %3870 = vmatpush.bf16.msrb.mxu1 %v6443_v36 }
 0x2a8   : > { %v3556_v17 = vpop.f32.mrf.mxu2  ;;  %v3461_v37 = vpop.f32.mrf.mxu0 }
 0x2a9   : > { %v3557_v52 = vadd.f32 %v3556_v17, %v9546_v43  ;;  %v3605_v40 = vpop.f32.mrf.mxu3  ;;  %v3462_v30 = vadd.f32 %v3461_v37, %v9522_v18  ;;  %v3510_v47 = vpop.f32.mrf.mxu1  ;;  %v8339_v17 = vld [vmem:[#allocation2 + $0x6d4] sm:$0xf] }
 0x2aa   : > { %v7311_v8 = vor.u32 %v8339_v17, %v7308_v26  ;;  %v7787_v26 = vor.u32 %v8458_v48, %v7784_v46  ;;  %v11190_v46 = vld [vmem:[#allocation46_spill] sm:$0xff]  ;;  %v11191_v48 = vld [vmem:[#allocation68_spill] sm:$0xff] }
 0x2ab   : > { %v9649_v39 = vadd.f32 %v3605_v40, %v3557_v52  ;;  %v9651_v60 = vadd.f32 %v3510_v47, %v3462_v30  ;;  %3656 = vmatmul.bf16.gmra.mxu0 %v11184_v34  ;;  %v8451_v30 = vld [vmem:[#allocation2 + $0xa54] sm:$0xf]  ;;  %v7756_v47 = vld [vmem:[#allocation2 + $0xa6c] sm:$0xf0] }
 0x2ac   : > { %3705 = vmatmul.bf16.gmra.mxu1 %v11185_v4  ;;  %4010 = vmatpush.bf16.msra.mxu0 %v7311_v8  ;;  %v7759_v16 = vor.u32 %v8451_v30, %v7756_v47  ;;  %v11189_v47 = vld [vmem:[#allocation45_spill] sm:$0xff] }
 0x2ad   : > { %11183 = vst [vmem:[#allocation96_spill] sm:$0xff] %v9651_v60  ;;  %3754 = vmatmul.bf16.gmra.mxu2 %v11186_v0  ;;  %4164 = vmatpush.bf16.msra.mxu3 %v7787_v26  ;;  %v7280_v26 = vld [vmem:[#allocation2 + $0x6b4] sm:$0xf0]  ;;  %v8444_v60 = vld [vmem:[#allocation2 + $0xa1c] sm:$0xf] }
 0x2ae   : > { %3803 = vmatmul.bf16.gmra.mxu3 %v11167_v33  ;;  %4108 = vmatpush.bf16.msra.mxu2 %v7759_v16  ;;  %v7532_v33 = vld [vmem:[#allocation2 + $0x8ac] sm:$0xf0]  ;;  %v8332_v16 = vld [vmem:[#allocation2 + $0x69c] sm:$0xf] }
 0x2b0   : > { %v3559_v9 = vpop.f32.mrf.mxu2  ;;  %v3463_v52 = vpop.f32.mrf.mxu0 }
 0x2b1   : > { %v3560_v18 = vadd.f32 %v3559_v9, %v9546_v43  ;;  %v3608_v50 = vpop.f32.mrf.mxu3  ;;  %v3464_v62 = vadd.f32 %v3463_v52, %v9526_v29  ;;  %v3512_v40 = vpop.f32.mrf.mxu1 }
 0x2b3   : > { %v9659_v37 = vadd.f32 %v3608_v50, %v3560_v18  ;;  %v9661_v36 = vadd.f32 %v3512_v40, %v3464_v62  ;;  %v8395_v40 = vld [vmem:[#allocation2 + $0x894] sm:$0xf] }
 0x2b4   : > { %v7535_v17 = vor.u32 %v8395_v40, %v7532_v33 }
 0x2b5   : > { %11187 = vst [vmem:[#allocation42_spill] sm:$0xff] %v9661_v36  ;;  %v7728_v36 = vld [vmem:[#allocation2 + $0xa34] sm:$0xf0] }
 0x2b6   : > { %4059 = vmatpush.bf16.msra.mxu1 %v7535_v17 }
 0x2b8   : > { %v3561_v9 = vpop.f32.mrf.mxu2  ;;  %v3466_v52 = vpop.f32.mrf.mxu0 }
 0x2b9   : > { %v3562_v8 = vadd.f32 %v3561_v9, %v9546_v43  ;;  %v3610_v29 = vpop.f32.mrf.mxu3  ;;  %v3467_v18 = vadd.f32 %v3466_v52, %v9535_v53  ;;  %v3515_v50 = vpop.f32.mrf.mxu1  ;;  %v7283_v53 = vor.u32 %v8332_v16, %v7280_v26 }
 0x2bb   : > { %v9667_v62 = vadd.f32 %v3610_v29, %v3562_v8  ;;  %v9669_v30 = vadd.f32 %v3515_v50, %v3467_v18  ;;  %3661 = vmatmul.bf16.gmra.mxu0 %v11189_v47 }
 0x2bc   : > { %3710 = vmatmul.bf16.gmra.mxu1 %v11190_v46  ;;  %4011 = vmatpush.bf16.msra.mxu0 %v7283_v53 }
 0x2bd   : > { %11188 = vst [vmem:[#allocation97_spill] sm:$0xff] %v9669_v30  ;;  %3759 = vmatmul.bf16.gmra.mxu2 %v11191_v48 }
 0x2be   : > { %3808 = vmatmul.bf16.gmra.mxu3 %v9285_v14  ;;  %v7731_v14 = vor.u32 %v8444_v60, %v7728_v36  ;;  %v11194_v36 = vld [vmem:[#allocation15_spill] sm:$0xff] }
 0x2c0   : > { %v3564_v9 = vpop.f32.mrf.mxu2  ;;  %v3468_v52 = vpop.f32.mrf.mxu0  ;;  %4109 = vmatpush.bf16.msra.mxu2 %v7731_v14  ;;  %v11195_v14 = vld [vmem:[#allocation16_spill] sm:$0xff] }
 0x2c1   : > { %v3565_v8 = vadd.f32 %v3564_v9, %v9546_v43  ;;  %v3613_v29 = vpop.f32.mrf.mxu3  ;;  %v3469_v18 = vadd.f32 %v3468_v52, %v9538_v1  ;;  %v3517_v50 = vpop.f32.mrf.mxu1 }
 0x2c3   : > { %v9677_v33 = vadd.f32 %v3613_v29, %v3565_v8  ;;  %v9679_v40 = vadd.f32 %v3517_v50, %v3469_v18  ;;  %v8388_v8 = vld [vmem:[#allocation2 + $0x85c] sm:$0xf]  ;;  %v7504_v29 = vld [vmem:[#allocation2 + $0x874] sm:$0xf0] }
 0x2c4   : > { %v11193_v50 = vld [vmem:[#allocation49_spill] sm:$0xff]  ;;  %v7507_v60 = vor.u32 %v8388_v8, %v7504_v29  ;;  %v8437_v29 = vld [vmem:[#allocation2 + $0x9e4] sm:$0xf] }
 0x2c5   : > { %11192 = vst [vmem:[#allocation98_spill] sm:$0xff] %v9679_v40  ;;  %v7700_v40 = vld [vmem:[#allocation2 + $0x9fc] sm:$0xf0] }
 0x2c6   : > { %4060 = vmatpush.bf16.msra.mxu1 %v7507_v60 }
 0x2c8   : > { %v3566_v16 = vpop.f32.mrf.mxu2  ;;  %v3627_v48 = vpop.f32.mrf.mxu0 }
 0x2c9   : > { %v3567_v26 = vadd.f32 %v3566_v16, %v9546_v43  ;;  %v3615_v9 = vpop.f32.mrf.mxu3  ;;  %v3628_v53 = vadd.f32 %v3627_v48, %v9551_v45  ;;  %v3676_v1 = vpop.f32.mrf.mxu1  ;;  %v8325_v43 = vld [vmem:[#allocation2 + $0x664] sm:$0xf]  ;;  %v7252_v16 = vld [vmem:[#allocation2 + $0x67c] sm:$0xf0] }
 0x2ca   : > { %v7255_v45 = vor.u32 %v8325_v43, %v7252_v16 }
 0x2cb   : > { %v9685_v52 = vadd.f32 %v3615_v9, %v3567_v26  ;;  %v3677_v18 = vadd.f32 %v3676_v1, %v3628_v53  ;;  %7816 = vmatmul.msk.bf16.vlgmr.msrb.gmra.mxu0 %vm2809_vm0, %v11193_v50 }
 0x2cc   : > { %3871 = vmatmul.bf16.vlgmr.msrb.gmra.mxu1 %v11194_v36  ;;  %4012 = vmatpush.bf16.msra.mxu0 %v7255_v45  ;;  %v8381_v45 = vld [vmem:[#allocation2 + $0x824] sm:$0xf] }
 0x2cd   : > { %3920 = vmatmul.bf16.vlgmr.msrb.gmra.mxu2 %v11195_v14  ;;  %v7703_v14 = vor.u32 %v8437_v29, %v7700_v40  ;;  %v11198_v40 = vld [vmem:[#allocation20_spill] sm:$0xff] }
 0x2ce   : > { %3969 = vmatmul.bf16.vlgmr.msrb.gmra.mxu3 %v8968_v54 }
 0x2cf   : > { %4110 = vmatpush.bf16.msra.mxu2 %v7703_v14  ;;  %v7224_v14 = vld [vmem:[#allocation2 + $0x644] sm:$0xf0] }
 0x2d0   : > { %v3725_v48 = vpop.f32.mrf.mxu2  ;;  %v3629_v17 = vpop.f32.mrf.mxu0 }
 0x2d1   : > { %v3726_v26 = vadd.f32 %v3725_v48, %v3677_v18  ;;  %v3774_v9 = vpop.f32.mrf.mxu3  ;;  %v3630_v53 = vadd.f32 %v3629_v17, %v9559_v61  ;;  %v3678_v1 = vpop.f32.mrf.mxu1  ;;  %v7476_v48 = vld [vmem:[#allocation2 + $0x83c] sm:$0xf0]  ;;  %v11196_v17 = vld [vmem:[#allocation52_spill] sm:$0xff] }
 0x2d3   : > { %v9693_v30 = vadd.f32 %v3774_v9, %v3726_v26  ;;  %v3679_v8 = vadd.f32 %v3678_v1, %v3630_v53  ;;  %v7479_v26 = vor.u32 %v8381_v45, %v7476_v48  ;;  %v11197_v9 = vld [vmem:[#allocation19_spill] sm:$0xff] }
 0x2d4   : > { %v7672_v45 = vld [vmem:[#allocation2 + $0x9c4] sm:$0xf0] }
 0x2d5   : > { %4061 = vmatpush.bf16.msra.mxu1 %v7479_v26 }
 0x2d8   : > { %v3727_v54 = vpop.f32.mrf.mxu2  ;;  %v3632_v46 = vpop.f32.mrf.mxu0 }
 0x2d9   : > { %v3728_v60 = vadd.f32 %v3727_v54, %v3679_v8  ;;  %v3776_v36 = vpop.f32.mrf.mxu3  ;;  %v3633_v43 = vadd.f32 %v3632_v46, %v9569_v19  ;;  %v3681_v18 = vpop.f32.mrf.mxu1  ;;  %v8318_v54 = vld [vmem:[#allocation2 + $0x62c] sm:$0xf] }
 0x2da   : > { %v7227_v19 = vor.u32 %v8318_v54, %v7224_v14 }
 0x2db   : > { %v9696_v16 = vadd.f32 %v3776_v36, %v3728_v60  ;;  %v3682_v61 = vadd.f32 %v3681_v18, %v3633_v43  ;;  %7817 = vmatmul.msk.bf16.gmra.mxu0 %vm2809_vm0, %v11196_v17  ;;  %v8430_v18 = vld [vmem:[#allocation2 + $0x9ac] sm:$0xf] }
 0x2dc   : > { %3876 = vmatmul.bf16.gmra.mxu1 %v11197_v9  ;;  %4013 = vmatpush.bf16.msra.mxu0 %v7227_v19  ;;  %v7675_v48 = vor.u32 %v8430_v18, %v7672_v45  ;;  %v8374_v19 = vld [vmem:[#allocation2 + $0x7ec] sm:$0xf] }
 0x2dd   : > { %3925 = vmatmul.bf16.gmra.mxu2 %v11198_v40 }
 0x2de   : > { %3974 = vmatmul.bf16.gmra.mxu3 %v8988_v20  ;;  %4111 = vmatpush.bf16.msra.mxu2 %v7675_v48 }
 0x2e0   : > { %v3730_v46 = vpop.f32.mrf.mxu2  ;;  %v3634_v1 = vpop.f32.mrf.mxu0 }
 0x2e1   : > { %v3731_v36 = vadd.f32 %v3730_v46, %v3682_v61  ;;  %v3779_v53 = vpop.f32.mrf.mxu3  ;;  %v3635_v8 = vadd.f32 %v3634_v1, %v9577_v24  ;;  %v3683_v29 = vpop.f32.mrf.mxu1  ;;  %v7448_v46 = vld [vmem:[#allocation2 + $0x804] sm:$0xf0] }
 0x2e2   : > { %v11199_v1 = vld [vmem:[#allocation55_spill] sm:$0xff] }
 0x2e3   : > { %v9704_v60 = vadd.f32 %v3779_v53, %v3731_v36  ;;  %v3684_v43 = vadd.f32 %v3683_v29, %v3635_v8  ;;  %v7451_v36 = vor.u32 %v8374_v19, %v7448_v46  ;;  %v11200_v53 = vld [vmem:[#allocation23_spill] sm:$0xff]  ;;  %v11201_v8 = vld [vmem:[#allocation24_spill] sm:$0xff] }
 0x2e4   : > { %v7196_v29 = vld [vmem:[#allocation2 + $0x60c] sm:$0xf0] }
 0x2e5   : > { %4062 = vmatpush.bf16.msra.mxu1 %v7451_v36  ;;  %v7644_v19 = vld [vmem:[#allocation2 + $0x98c] sm:$0xf0] }
 0x2e8   : > { %v3732_v20 = vpop.f32.mrf.mxu2  ;;  %v3637_v9 = vpop.f32.mrf.mxu0 }
 0x2e9   : > { %v3733_v26 = vadd.f32 %v3732_v20, %v3684_v43  ;;  %v3781_v40 = vpop.f32.mrf.mxu3  ;;  %v3638_v54 = vadd.f32 %v3637_v9, %v9587_v11  ;;  %v3686_v61 = vpop.f32.mrf.mxu1  ;;  %v8311_v20 = vld [vmem:[#allocation2 + $0x5f4] sm:$0xf] }
 0x2ea   : > { %v7199_v11 = vor.u32 %v8311_v20, %v7196_v29 }
 0x2eb   : > { %v9707_v14 = vadd.f32 %v3781_v40, %v3733_v26  ;;  %v3687_v24 = vadd.f32 %v3686_v61, %v3638_v54  ;;  %7818 = vmatmul.msk.bf16.gmra.mxu0 %vm2809_vm0, %v11199_v1  ;;  %v8423_v61 = vld [vmem:[#allocation2 + $0x974] sm:$0xf] }
 0x2ec   : > { %3881 = vmatmul.bf16.gmra.mxu1 %v11200_v53  ;;  %4014 = vmatpush.bf16.msra.mxu0 %v7199_v11  ;;  %v7647_v46 = vor.u32 %v8423_v61, %v7644_v19  ;;  %v8367_v11 = vld [vmem:[#allocation2 + $0x7b4] sm:$0xf] }
 0x2ed   : > { %3930 = vmatmul.bf16.gmra.mxu2 %v11201_v8 }
 0x2ee   : > { %3979 = vmatmul.bf16.gmra.mxu3 %v9008_v41  ;;  %4112 = vmatpush.bf16.msra.mxu2 %v7647_v46 }
 0x2f0   : > { %v3735_v9 = vpop.f32.mrf.mxu2  ;;  %v3639_v18 = vpop.f32.mrf.mxu0 }
 0x2f1   : > { %v3736_v40 = vadd.f32 %v3735_v9, %v3687_v24  ;;  %v3784_v43 = vpop.f32.mrf.mxu3  ;;  %v3640_v45 = vadd.f32 %v3639_v18, %v9595_v6  ;;  %v3688_v48 = vpop.f32.mrf.mxu1  ;;  %v7420_v9 = vld [vmem:[#allocation2 + $0x7cc] sm:$0xf0]  ;;  %v11202_v18 = vld [vmem:[#allocation58_spill] sm:$0xff] }
 0x2f3   : > { %v9715_v26 = vadd.f32 %v3784_v43, %v3736_v40  ;;  %v3689_v54 = vadd.f32 %v3688_v48, %v3640_v45  ;;  %v7423_v40 = vor.u32 %v8367_v11, %v7420_v9  ;;  %v11203_v43 = vld [vmem:[#allocation27_spill] sm:$0xff]  ;;  %v11204_v45 = vld [vmem:[#allocation28_spill] sm:$0xff] }
 0x2f4   : > { %v7168_v48 = vld [vmem:[#allocation2 + $0x5d4] sm:$0xf0] }
 0x2f5   : > { %4063 = vmatpush.bf16.msra.mxu1 %v7423_v40  ;;  %v7616_v11 = vld [vmem:[#allocation2 + $0x954] sm:$0xf0] }
 0x2f8   : > { %v3737_v41 = vpop.f32.mrf.mxu2  ;;  %v3642_v53 = vpop.f32.mrf.mxu0 }
 0x2f9   : > { %v3738_v36 = vadd.f32 %v3737_v41, %v3689_v54  ;;  %v3786_v8 = vpop.f32.mrf.mxu3  ;;  %v3643_v20 = vadd.f32 %v3642_v53, %v9605_v63  ;;  %v3691_v24 = vpop.f32.mrf.mxu1  ;;  %v8304_v41 = vld [vmem:[#allocation2 + $0x5bc] sm:$0xf] }
 0x2fa   : > { %v7171_v63 = vor.u32 %v8304_v41, %v7168_v48 }
 0x2fb   : > { %v9718_v29 = vadd.f32 %v3786_v8, %v3738_v36  ;;  %v3692_v6 = vadd.f32 %v3691_v24, %v3643_v20  ;;  %7819 = vmatmul.msk.bf16.gmra.mxu0 %vm2809_vm0, %v11202_v18  ;;  %v8416_v24 = vld [vmem:[#allocation2 + $0x93c] sm:$0xf] }
 0x2fc   : > { %3886 = vmatmul.bf16.gmra.mxu1 %v11203_v43  ;;  %4015 = vmatpush.bf16.msra.mxu0 %v7171_v63  ;;  %v7619_v9 = vor.u32 %v8416_v24, %v7616_v11  ;;  %v8360_v63 = vld [vmem:[#allocation2 + $0x77c] sm:$0xf] }
 0x2fd   : > { %3935 = vmatmul.bf16.gmra.mxu2 %v11204_v45 }
 0x2fe   : > { %3984 = vmatmul.bf16.gmra.mxu3 %v9028_v2  ;;  %4113 = vmatpush.bf16.msra.mxu2 %v7619_v9 }
 0x300   : > { %v3740_v53 = vpop.f32.mrf.mxu2  ;;  %v3644_v61 = vpop.f32.mrf.mxu0 }
 0x301   : > { %v3741_v8 = vadd.f32 %v3740_v53, %v3692_v6  ;;  %v3789_v54 = vpop.f32.mrf.mxu3  ;;  %v3645_v19 = vadd.f32 %v3644_v61, %v9613_v31  ;;  %v3693_v46 = vpop.f32.mrf.mxu1  ;;  %v7392_v53 = vld [vmem:[#allocation2 + $0x794] sm:$0xf0] }
 0x302   : > { %v11205_v61 = vld [vmem:[#allocation61_spill] sm:$0xff] }
 0x303   : > { %v9726_v36 = vadd.f32 %v3789_v54, %v3741_v8  ;;  %v3694_v20 = vadd.f32 %v3693_v46, %v3645_v19  ;;  %v7395_v8 = vor.u32 %v8360_v63, %v7392_v53  ;;  %v11206_v54 = vld [vmem:[#allocation31_spill] sm:$0xff]  ;;  %v11207_v19 = vld [vmem:[#allocation32_spill] sm:$0xff]  ;;  %v7140_v46 = vld [vmem:[#allocation2 + $0x59c] sm:$0xf0] }
 0x304   : > { %v7588_v63 = vld [vmem:[#allocation2 + $0x91c] sm:$0xf0] }
 0x305   : > { %4064 = vmatpush.bf16.msra.mxu1 %v7395_v8 }
 0x308   : > { %v3742_v2 = vpop.f32.mrf.mxu2  ;;  %v3647_v43 = vpop.f32.mrf.mxu0 }
 0x309   : > { %v3743_v40 = vadd.f32 %v3742_v2, %v3694_v20  ;;  %v3791_v45 = vpop.f32.mrf.mxu3  ;;  %v3648_v41 = vadd.f32 %v3647_v43, %v9623_v59  ;;  %v3696_v6 = vpop.f32.mrf.mxu1  ;;  %v8297_v2 = vld [vmem:[#allocation2 + $0x584] sm:$0xf] }
 0x30a   : > { %v7143_v59 = vor.u32 %v8297_v2, %v7140_v46 }
 0x30b   : > { %v9729_v48 = vadd.f32 %v3791_v45, %v3743_v40  ;;  %v3697_v31 = vadd.f32 %v3696_v6, %v3648_v41  ;;  %7820 = vmatmul.msk.bf16.gmra.mxu0 %vm2809_vm0, %v11205_v61  ;;  %v8409_v6 = vld [vmem:[#allocation2 + $0x904] sm:$0xf] }
 0x30c   : > { %3891 = vmatmul.bf16.gmra.mxu1 %v11206_v54  ;;  %4016 = vmatpush.bf16.msra.mxu0 %v7143_v59  ;;  %v7591_v53 = vor.u32 %v8409_v6, %v7588_v63  ;;  %v8353_v59 = vld [vmem:[#allocation2 + $0x744] sm:$0xf] }
 0x30d   : > { %3940 = vmatmul.bf16.gmra.mxu2 %v11207_v19 }
 0x30e   : > { %3989 = vmatmul.bf16.gmra.mxu3 %v9048_v27  ;;  %4114 = vmatpush.bf16.msra.mxu2 %v7591_v53 }
 0x310   : > { %v3745_v43 = vpop.f32.mrf.mxu2  ;;  %v3649_v24 = vpop.f32.mrf.mxu0 }
 0x311   : > { %v3746_v45 = vadd.f32 %v3745_v43, %v3697_v31  ;;  %v3794_v20 = vpop.f32.mrf.mxu3  ;;  %v3650_v11 = vadd.f32 %v3649_v24, %v9631_v51  ;;  %v3698_v9 = vpop.f32.mrf.mxu1  ;;  %v7364_v43 = vld [vmem:[#allocation2 + $0x75c] sm:$0xf0]  ;;  %v11208_v24 = vld [vmem:[#allocation64_spill] sm:$0xff] }
 0x313   : > { %v9737_v40 = vadd.f32 %v3794_v20, %v3746_v45  ;;  %v3699_v41 = vadd.f32 %v3698_v9, %v3650_v11  ;;  %v7367_v45 = vor.u32 %v8353_v59, %v7364_v43  ;;  %v11209_v20 = vld [vmem:[#allocation35_spill] sm:$0xff]  ;;  %v11210_v11 = vld [vmem:[#allocation36_spill] sm:$0xff] }
 0x314   : > { %v7112_v9 = vld [vmem:[#allocation2 + $0x564] sm:$0xf0] }
 0x315   : > { %4065 = vmatpush.bf16.msra.mxu1 %v7367_v45  ;;  %v7560_v59 = vld [vmem:[#allocation2 + $0x8e4] sm:$0xf0]  ;;  %v8346_v45 = vld [vmem:[#allocation2 + $0x70c] sm:$0xf] }
 0x318   : > { %v3747_v27 = vpop.f32.mrf.mxu2  ;;  %v3652_v54 = vpop.f32.mrf.mxu0 }
 0x319   : > { %v3748_v8 = vadd.f32 %v3747_v27, %v3699_v41  ;;  %v3796_v19 = vpop.f32.mrf.mxu3  ;;  %v3653_v2 = vadd.f32 %v3652_v54, %v9641_v13  ;;  %v3701_v31 = vpop.f32.mrf.mxu1  ;;  %v8290_v27 = vld [vmem:[#allocation2 + $0x54c] sm:$0xf] }
 0x31a   : > { %v7115_v13 = vor.u32 %v8290_v27, %v7112_v9 }
 0x31b   : > { %v9740_v46 = vadd.f32 %v3796_v19, %v3748_v8  ;;  %v3702_v51 = vadd.f32 %v3701_v31, %v3653_v2  ;;  %7821 = vmatmul.msk.bf16.gmra.mxu0 %vm2809_vm0, %v11208_v24  ;;  %v8402_v31 = vld [vmem:[#allocation2 + $0x8cc] sm:$0xf] }
 0x31c   : > { %3896 = vmatmul.bf16.gmra.mxu1 %v11209_v20  ;;  %4017 = vmatpush.bf16.msra.mxu0 %v7115_v13  ;;  %v7563_v43 = vor.u32 %v8402_v31, %v7560_v59 }
 0x31d   : > { %3945 = vmatmul.bf16.gmra.mxu2 %v11210_v11  ;;  %v7336_v11 = vld [vmem:[#allocation2 + $0x724] sm:$0xf0] }
 0x31e   : > { %3994 = vmatmul.bf16.gmra.mxu3 %v9068_v56  ;;  %4115 = vmatpush.bf16.msra.mxu2 %v7563_v43 }
 0x320   : > { %v3750_v54 = vpop.f32.mrf.mxu2  ;;  %v3654_v6 = vpop.f32.mrf.mxu0 }
 0x321   : > { %v3751_v19 = vadd.f32 %v3750_v54, %v3702_v51  ;;  %v3799_v41 = vpop.f32.mrf.mxu3  ;;  %v3655_v63 = vadd.f32 %v3654_v6, %v9649_v39  ;;  %v3703_v53 = vpop.f32.mrf.mxu1  ;;  %v7339_v51 = vor.u32 %v8346_v45, %v7336_v11  ;;  %v11213_v6 = vld [vmem:[#allocation40_spill] sm:$0xff] }
 0x323   : > { %v9748_v8 = vadd.f32 %v3799_v41, %v3751_v19  ;;  %v3704_v2 = vadd.f32 %v3703_v53, %v3655_v63  ;;  %4066 = vmatpush.bf16.msra.mxu1 %v7339_v51  ;;  %v11211_v19 = vld [vmem:[#allocation67_spill] sm:$0xff]  ;;  %v8175_v63 = vld [vmem:[#allocation2 + $0x1b0] sm:$0xf0]  ;;  %v7314_v51 = vld [vmem:[#allocation2 + $0x6d8] sm:$0xf] }
 0x324   : > { %v11212_v41 = vld [vmem:[#allocation39_spill] sm:$0xff] }
 0x328   : > { %v3752_v56 = vpop.f32.mrf.mxu2  ;;  %v3657_v9 = vpop.f32.mrf.mxu0 }
 0x329   : > { %v3753_v20 = vadd.f32 %v3752_v56, %v3704_v2  ;;  %v3801_v27 = vpop.f32.mrf.mxu3  ;;  %v3658_v54 = vadd.f32 %v3657_v9, %v9659_v37  ;;  %v3706_v13 = vpop.f32.mrf.mxu1  ;;  %v6642_v56 = vld [vmem:[#allocation2 + $0x198] sm:$0xf]  ;;  %v8287_v9 = vld [vmem:[#allocation2 + $0x530] sm:$0xf0] }
 0x32a   : > { %v6643_v53 = vor.u32 %v8175_v63, %v6642_v56 }
 0x32b   : > { %v9751_v0 = vadd.f32 %v3801_v27, %v3753_v20  ;;  %v3707_v39 = vadd.f32 %v3706_v13, %v3658_v54  ;;  %7822 = vmatmul.msk.bf16.gmra.mxu0 %vm2809_vm0, %v11211_v19  ;;  %v7090_v27 = vld [vmem:[#allocation2 + $0x518] sm:$0xf]  ;;  %v8343_v13 = vld [vmem:[#allocation2 + $0x6f0] sm:$0xf0] }
 0x32c   : > { %3901 = vmatmul.bf16.gmra.mxu1 %v11212_v41  ;;  %4206 = vmatpush.bf16.msrb.mxu0 %v6643_v53  ;;  %v7091_v54 = vor.u32 %v8287_v9, %v7090_v27 }
 0x32d   : > { %3950 = vmatmul.bf16.gmra.mxu2 %v11213_v6 }
 0x32e   : > { %3999 = vmatmul.bf16.gmra.mxu3 %v11184_v34  ;;  %v7315_v34 = vor.u32 %v8343_v13, %v7314_v51  ;;  %4304 = vmatpush.bf16.msrb.mxu2 %v7091_v54 }
 0x330   : > { %v3755_v11 = vpop.f32.mrf.mxu2  ;;  %v3659_v31 = vpop.f32.mrf.mxu0  ;;  %4353 = vmatpush.bf16.msrb.mxu3 %v7315_v34  ;;  %v6614_v34 = vld [vmem:[#allocation2 + $0x160] sm:$0xf] }
 0x331   : > { %v3756_v2 = vadd.f32 %v3755_v11, %v3707_v39  ;;  %v3804_v37 = vpop.f32.mrf.mxu3  ;;  %v3660_v20 = vadd.f32 %v3659_v31, %v9667_v62  ;;  %v3708_v59 = vpop.f32.mrf.mxu1 }
 0x333   : > { %v9759_v43 = vadd.f32 %v3804_v37, %v3756_v2  ;;  %v3709_v45 = vadd.f32 %v3708_v59, %v3660_v20  ;;  %v6866_v2 = vld [vmem:[#allocation2 + $0x358] sm:$0xf]  ;;  %v8231_v37 = vld [vmem:[#allocation2 + $0x370] sm:$0xf0] }
 0x334   : > { %v6867_v20 = vor.u32 %v8231_v37, %v6866_v2  ;;  %v11214_v59 = vld [vmem:[#allocation44_spill] sm:$0xff]  ;;  %v8336_v37 = vld [vmem:[#allocation2 + $0x6b8] sm:$0xf0] }
 0x336   : > { %4255 = vmatpush.bf16.msrb.mxu1 %v6867_v20 }
 0x338   : > { %v3757_v6 = vpop.f32.mrf.mxu2  ;;  %v3662_v63 = vpop.f32.mrf.mxu0 }
 0x339   : > { %v3758_v56 = vadd.f32 %v3757_v6, %v3709_v45  ;;  %v3806_v39 = vpop.f32.mrf.mxu3  ;;  %v3663_v53 = vadd.f32 %v3662_v63, %v9677_v33  ;;  %v3711_v11 = vpop.f32.mrf.mxu1  ;;  %v8168_v6 = vld [vmem:[#allocation2 + $0x178] sm:$0xf0]  ;;  %v7062_v63 = vld [vmem:[#allocation2 + $0x4e0] sm:$0xf] }
 0x33a   : > { %v6615_v33 = vor.u32 %v8168_v6, %v6614_v34 }
 0x33b   : > { %v9762_v62 = vadd.f32 %v3806_v39, %v3758_v56  ;;  %v3712_v31 = vadd.f32 %v3711_v11, %v3663_v53  ;;  %7823 = vmatmul.msk.bf16.gmra.mxu0 %vm2809_vm0, %v9287_v25  ;;  %v8280_v53 = vld [vmem:[#allocation2 + $0x4f8] sm:$0xf0]  ;;  %v7286_v11 = vld [vmem:[#allocation2 + $0x6a0] sm:$0xf] }
 0x33c   : > { %3906 = vmatmul.bf16.gmra.mxu1 %v9104_v49  ;;  %4207 = vmatpush.bf16.msrb.mxu0 %v6615_v33  ;;  %v7063_v2 = vor.u32 %v8280_v53, %v7062_v63  ;;  %v7287_v20 = vor.u32 %v8336_v37, %v7286_v11 }
 0x33d   : > { %3955 = vmatmul.bf16.gmra.mxu2 %v11214_v59 }
 0x33e   : > { %4004 = vmatmul.bf16.gmra.mxu3 %v11189_v47  ;;  %4305 = vmatpush.bf16.msrb.mxu2 %v7063_v2 }
 0x33f   : > { %4354 = vmatpush.bf16.msrb.mxu3 %v7287_v20 }
 0x340   : > { %v3760_v45 = vpop.f32.mrf.mxu2  ;;  %v3664_v51 = vpop.f32.mrf.mxu0 }
 0x341   : > { %v3761_v27 = vadd.f32 %v3760_v45, %v3712_v31  ;;  %v3809_v9 = vpop.f32.mrf.mxu3  ;;  %v3665_v54 = vadd.f32 %v3664_v51, %v9685_v52  ;;  %v3713_v13 = vpop.f32.mrf.mxu1  ;;  %v8603_v45 = vld [vmem:[#allocation5] sm:$0x7f]  ;;  %v6838_v51 = vld [vmem:[#allocation2 + $0x320] sm:$0xf] }
 0x342   : > { %v9772_v33 = vperm.slane %v8603_v45, 3  ;;  %v7034_v45 = vld [vmem:[#allocation2 + $0x4a8] sm:$0xf] }
 0x343   : > { %v9770_v56 = vadd.f32 %v3809_v9, %v3761_v27  ;;  %v3714_v39 = vadd.f32 %v3713_v13, %v3665_v54  ;;  %v8224_v54 = vld [vmem:[#allocation2 + $0x338] sm:$0xf0] }
 0x344   : > { %v6839_v13 = vor.u32 %v8224_v54, %v6838_v51  ;;  %v7258_v51 = vld [vmem:[#allocation2 + $0x668] sm:$0xf] }
 0x346   : > { %4256 = vmatpush.bf16.msrb.mxu1 %v6839_v13 }
 0x348   : > { %v3762_v47 = vpop.f32.mrf.mxu2  ;;  %v3823_v6 = vpop.f32.mrf.mxu0 }
 0x349   : > { %v3763_v34 = vadd.f32 %v3762_v47, %v3714_v39  ;;  %v3811_v31 = vpop.f32.mrf.mxu3  ;;  %v9775_v52 = vadd.f32 %v3823_v6, %v9693_v30  ;;  %v3872_v27 = vpop.f32.mrf.mxu1  ;;  %v6586_v30 = vld [vmem:[#allocation2 + $0x128] sm:$0xf]  ;;  %v8161_v47 = vld [vmem:[#allocation2 + $0x140] sm:$0xf0] }
 0x34a   : > { %v3873_v63 = vadd.f32 %v3872_v27, %v9772_v33  ;;  %v6587_v39 = vor.u32 %v8161_v47, %v6586_v30  ;;  %v8273_v27 = vld [vmem:[#allocation2 + $0x4c0] sm:$0xf0]  ;;  %v6810_v6 = vld [vmem:[#allocation2 + $0x2e8] sm:$0xf] }
 0x34b   : > { %11215 = vst [vmem:[#allocation49_spill] sm:$0xff] %v9775_v52  ;;  %v9777_v9 = vadd.f32 %v3811_v31, %v3763_v34  ;;  %4018 = vmatmul.bf16.vlgmr.msra.gmra.mxu0 %v8970_v55  ;;  %v7035_v13 = vor.u32 %v8273_v27, %v7034_v45  ;;  %v8329_v30 = vld [vmem:[#allocation2 + $0x680] sm:$0xf0]  ;;  %v8154_v27 = vld [vmem:[#allocation2 + $0x108] sm:$0xf0] }
 0x34c   : > { %4067 = vmatmul.bf16.vlgmr.msra.gmra.mxu1 %v9124_v32  ;;  %4208 = vmatpush.bf16.msrb.mxu0 %v6587_v39  ;;  %v8217_v52 = vld [vmem:[#allocation2 + $0x300] sm:$0xf0] }
 0x34d   : > { %4116 = vmatmul.bf16.vlgmr.msra.gmra.mxu2 %v11149_v15 }
 0x34e   : > { %7824 = vmatmul.msk.bf16.vlgmr.msra.gmra.mxu3 %vm2809_vm0, %v11193_v50  ;;  %4306 = vmatpush.bf16.msrb.mxu2 %v7035_v13 }
 0x350   : > { %v3921_v53 = vpop.f32.mrf.mxu2  ;;  %v3825_v37 = vpop.f32.mrf.mxu0 }
 0x351   : > { %v3922_v11 = vadd.f32 %v3921_v53, %v3873_v63  ;;  %v3970_v2 = vpop.f32.mrf.mxu3  ;;  %v9786_v20 = vadd.f32 %v3825_v37, %v9696_v16  ;;  %v3874_v34 = vpop.f32.mrf.mxu1  ;;  %v7259_v63 = vor.u32 %v8329_v30, %v7258_v51 }
 0x352   : > { %v3875_v54 = vadd.f32 %v3874_v34, %v9772_v33  ;;  %v6811_v34 = vor.u32 %v8217_v52, %v6810_v6 }
 0x353   : > { %11216 = vst [vmem:[#allocation52_spill] sm:$0xff] %v9786_v20  ;;  %v9788_v31 = vadd.f32 %v3970_v2, %v3922_v11  ;;  %4355 = vmatpush.bf16.msrb.mxu3 %v7259_v63 }
 0x354   : > { %4257 = vmatpush.bf16.msrb.mxu1 %v6811_v34 }
 0x358   : > { %v3923_v47 = vpop.f32.mrf.mxu2  ;;  %v3828_v53 = vpop.f32.mrf.mxu0 }
 0x359   : > { %v3924_v39 = vadd.f32 %v3923_v47, %v3875_v54  ;;  %v3972_v16 = vpop.f32.mrf.mxu3  ;;  %v9794_v11 = vadd.f32 %v3828_v53, %v9704_v60  ;;  %v3877_v2 = vpop.f32.mrf.mxu1  ;;  %v6558_v60 = vld [vmem:[#allocation2 + $0xf0] sm:$0xf]  ;;  %v8266_v53 = vld [vmem:[#allocation2 + $0x488] sm:$0xf0] }
 0x35a   : > { %v3878_v45 = vadd.f32 %v3877_v2, %v9772_v33  ;;  %v6559_v51 = vor.u32 %v8154_v27, %v6558_v60  ;;  %v7230_v2 = vld [vmem:[#allocation2 + $0x630] sm:$0xf]  ;;  %v8322_v27 = vld [vmem:[#allocation2 + $0x648] sm:$0xf0] }
 0x35b   : > { %11217 = vst [vmem:[#allocation44_spill] sm:$0xff] %v9794_v11  ;;  %v9796_v37 = vadd.f32 %v3972_v16, %v3924_v39  ;;  %4023 = vmatmul.bf16.gmra.mxu0 %v8990_v21  ;;  %v7006_v16 = vld [vmem:[#allocation2 + $0x470] sm:$0xf]  ;;  %v8210_v11 = vld [vmem:[#allocation2 + $0x2c8] sm:$0xf0] }
 0x35c   : > { %4072 = vmatmul.bf16.gmra.mxu1 %v9145_v38  ;;  %4209 = vmatpush.bf16.msrb.mxu0 %v6559_v51  ;;  %v7007_v60 = vor.u32 %v8266_v53, %v7006_v16  ;;  %v6782_v39 = vld [vmem:[#allocation2 + $0x2b0] sm:$0xf]  ;;  %v8147_v53 = vld [vmem:[#allocation2 + $0xd0] sm:$0xf0] }
 0x35d   : > { %4121 = vmatmul.bf16.gmra.mxu2 %v11152_v12 }
 0x35e   : > { %7825 = vmatmul.msk.bf16.gmra.mxu3 %vm2809_vm0, %v11196_v17  ;;  %4307 = vmatpush.bf16.msrb.mxu2 %v7007_v60 }
 0x360   : > { %v3926_v54 = vpop.f32.mrf.mxu2  ;;  %v3830_v63 = vpop.f32.mrf.mxu0 }
 0x361   : > { %v3927_v13 = vadd.f32 %v3926_v54, %v3878_v45  ;;  %v3975_v30 = vpop.f32.mrf.mxu3  ;;  %v9805_v52 = vadd.f32 %v3830_v63, %v9707_v14  ;;  %v3879_v6 = vpop.f32.mrf.mxu1  ;;  %v7231_v45 = vor.u32 %v8322_v27, %v7230_v2 }
 0x362   : > { %v3880_v34 = vadd.f32 %v3879_v6, %v9772_v33  ;;  %v6783_v6 = vor.u32 %v8210_v11, %v6782_v39 }
 0x363   : > { %11218 = vst [vmem:[#allocation99_spill] sm:$0xff] %v9805_v52  ;;  %v9807_v47 = vadd.f32 %v3975_v30, %v3927_v13  ;;  %4356 = vmatpush.bf16.msrb.mxu3 %v7231_v45 }
 0x364   : > { %4258 = vmatpush.bf16.msrb.mxu1 %v6783_v6 }
 0x368   : > { %v3928_v54 = vpop.f32.mrf.mxu2  ;;  %v3833_v63 = vpop.f32.mrf.mxu0 }
 0x369   : > { %v3929_v51 = vadd.f32 %v3928_v54, %v3880_v34  ;;  %v3977_v14 = vpop.f32.mrf.mxu3  ;;  %v9813_v13 = vadd.f32 %v3833_v63, %v9715_v26  ;;  %v3882_v30 = vpop.f32.mrf.mxu1  ;;  %v6530_v26 = vld [vmem:[#allocation2 + $0xb8] sm:$0xf]  ;;  %v8259_v63 = vld [vmem:[#allocation2 + $0x450] sm:$0xf0] }
 0x36a   : > { %v3883_v16 = vadd.f32 %v3882_v30, %v9772_v33  ;;  %v6531_v2 = vor.u32 %v8147_v53, %v6530_v26  ;;  %v7202_v30 = vld [vmem:[#allocation2 + $0x5f8] sm:$0xf]  ;;  %v8315_v53 = vld [vmem:[#allocation2 + $0x610] sm:$0xf0] }
 0x36b   : > { %11219 = vst [vmem:[#allocation100_spill] sm:$0xff] %v9813_v13  ;;  %v9815_v20 = vadd.f32 %v3977_v14, %v3929_v51  ;;  %4028 = vmatmul.bf16.gmra.mxu0 %v9010_v42  ;;  %v6978_v14 = vld [vmem:[#allocation2 + $0x438] sm:$0xf]  ;;  %v8203_v13 = vld [vmem:[#allocation2 + $0x290] sm:$0xf0] }
 0x36c   : > { %4077 = vmatmul.bf16.gmra.mxu1 %v9168_v10  ;;  %4210 = vmatpush.bf16.msrb.mxu0 %v6531_v2  ;;  %v6979_v26 = vor.u32 %v8259_v63, %v6978_v14  ;;  %v6754_v51 = vld [vmem:[#allocation2 + $0x278] sm:$0xf]  ;;  %v8140_v63 = vld [vmem:[#allocation2 + $0x98] sm:$0xf0] }
 0x36d   : > { %4126 = vmatmul.bf16.gmra.mxu2 %v11155_v58 }
 0x36e   : > { %7826 = vmatmul.msk.bf16.gmra.mxu3 %vm2809_vm0, %v11199_v1  ;;  %4308 = vmatpush.bf16.msrb.mxu2 %v6979_v26 }
 0x370   : > { %v3931_v34 = vpop.f32.mrf.mxu2  ;;  %v3835_v45 = vpop.f32.mrf.mxu0 }
 0x371   : > { %v3932_v60 = vadd.f32 %v3931_v34, %v3883_v16  ;;  %v3980_v27 = vpop.f32.mrf.mxu3  ;;  %v9824_v11 = vadd.f32 %v3835_v45, %v9718_v29  ;;  %v3884_v39 = vpop.f32.mrf.mxu1  ;;  %v7203_v16 = vor.u32 %v8315_v53, %v7202_v30 }
 0x372   : > { %v3885_v6 = vadd.f32 %v3884_v39, %v9772_v33  ;;  %v6755_v39 = vor.u32 %v8203_v13, %v6754_v51 }
 0x373   : > { %11220 = vst [vmem:[#allocation101_spill] sm:$0xff] %v9824_v11  ;;  %v9826_v54 = vadd.f32 %v3980_v27, %v3932_v60  ;;  %4357 = vmatpush.bf16.msrb.mxu3 %v7203_v16 }
 0x374   : > { %4259 = vmatpush.bf16.msrb.mxu1 %v6755_v39 }
 0x378   : > { %v3933_v34 = vpop.f32.mrf.mxu2  ;;  %v3838_v45 = vpop.f32.mrf.mxu0 }
 0x379   : > { %v3934_v2 = vadd.f32 %v3933_v34, %v3885_v6  ;;  %v3982_v29 = vpop.f32.mrf.mxu3  ;;  %v9832_v60 = vadd.f32 %v3838_v45, %v9726_v36  ;;  %v3887_v27 = vpop.f32.mrf.mxu1  ;;  %v6502_v36 = vld [vmem:[#allocation2 + $0x80] sm:$0xf]  ;;  %v8252_v45 = vld [vmem:[#allocation2 + $0x418] sm:$0xf0] }
 0x37a   : > { %v3888_v14 = vadd.f32 %v3887_v27, %v9772_v33  ;;  %v6503_v30 = vor.u32 %v8140_v63, %v6502_v36  ;;  %v7174_v27 = vld [vmem:[#allocation2 + $0x5c0] sm:$0xf]  ;;  %v8308_v63 = vld [vmem:[#allocation2 + $0x5d8] sm:$0xf0] }
 0x37b   : > { %11221 = vst [vmem:[#allocation102_spill] sm:$0xff] %v9832_v60  ;;  %v9834_v52 = vadd.f32 %v3982_v29, %v3934_v2  ;;  %4033 = vmatmul.bf16.gmra.mxu0 %v9030_v3  ;;  %v6950_v29 = vld [vmem:[#allocation2 + $0x400] sm:$0xf]  ;;  %v8196_v60 = vld [vmem:[#allocation2 + $0x258] sm:$0xf0] }
 0x37c   : > { %4082 = vmatmul.bf16.gmra.mxu1 %v9191_v23  ;;  %4211 = vmatpush.bf16.msrb.mxu0 %v6503_v30  ;;  %v6951_v36 = vor.u32 %v8252_v45, %v6950_v29  ;;  %v6726_v2 = vld [vmem:[#allocation2 + $0x240] sm:$0xf]  ;;  %v8133_v45 = vld [vmem:[#allocation2 + $0x60] sm:$0xf0] }
 0x37d   : > { %4131 = vmatmul.bf16.gmra.mxu2 %v11158_v7 }
 0x37e   : > { %7827 = vmatmul.msk.bf16.gmra.mxu3 %vm2809_vm0, %v11202_v18  ;;  %4309 = vmatpush.bf16.msrb.mxu2 %v6951_v36 }
 0x380   : > { %v3936_v6 = vpop.f32.mrf.mxu2  ;;  %v3840_v16 = vpop.f32.mrf.mxu0 }
 0x381   : > { %v3937_v26 = vadd.f32 %v3936_v6, %v3888_v14  ;;  %v3985_v53 = vpop.f32.mrf.mxu3  ;;  %v9843_v13 = vadd.f32 %v3840_v16, %v9729_v48  ;;  %v3889_v51 = vpop.f32.mrf.mxu1  ;;  %v7175_v14 = vor.u32 %v8308_v63, %v7174_v27 }
 0x382   : > { %v3890_v39 = vadd.f32 %v3889_v51, %v9772_v33  ;;  %v6727_v51 = vor.u32 %v8196_v60, %v6726_v2 }
 0x383   : > { %11222 = vst [vmem:[#allocation103_spill] sm:$0xff] %v9843_v13  ;;  %v9845_v34 = vadd.f32 %v3985_v53, %v3937_v26  ;;  %4358 = vmatpush.bf16.msrb.mxu3 %v7175_v14 }
 0x384   : > { %4260 = vmatpush.bf16.msrb.mxu1 %v6727_v51 }
 0x388   : > { %v3938_v6 = vpop.f32.mrf.mxu2  ;;  %v3843_v16 = vpop.f32.mrf.mxu0 }
 0x389   : > { %v3939_v30 = vadd.f32 %v3938_v6, %v3890_v39  ;;  %v3987_v48 = vpop.f32.mrf.mxu3  ;;  %v9851_v26 = vadd.f32 %v3843_v16, %v9737_v40  ;;  %v3892_v53 = vpop.f32.mrf.mxu1  ;;  %v6474_v40 = vld [vmem:[#allocation2 + $0x48] sm:$0xf]  ;;  %v8245_v16 = vld [vmem:[#allocation2 + $0x3e0] sm:$0xf0] }
 0x38a   : > { %v3893_v29 = vadd.f32 %v3892_v53, %v9772_v33  ;;  %v6475_v27 = vor.u32 %v8133_v45, %v6474_v40  ;;  %v7146_v53 = vld [vmem:[#allocation2 + $0x588] sm:$0xf]  ;;  %v8301_v45 = vld [vmem:[#allocation2 + $0x5a0] sm:$0xf0] }
 0x38b   : > { %11223 = vst [vmem:[#allocation104_spill] sm:$0xff] %v9851_v26  ;;  %v9853_v11 = vadd.f32 %v3987_v48, %v3939_v30  ;;  %4038 = vmatmul.bf16.gmra.mxu0 %v9050_v28  ;;  %v6922_v48 = vld [vmem:[#allocation2 + $0x3c8] sm:$0xf]  ;;  %v8189_v26 = vld [vmem:[#allocation2 + $0x220] sm:$0xf0] }
 0x38c   : > { %4087 = vmatmul.bf16.gmra.mxu1 %v9214_v5  ;;  %4212 = vmatpush.bf16.msrb.mxu0 %v6475_v27  ;;  %v6923_v40 = vor.u32 %v8245_v16, %v6922_v48  ;;  %v6698_v30 = vld [vmem:[#allocation2 + $0x208] sm:$0xf]  ;;  %v8126_v16 = vld [vmem:[#allocation2 + $0x28] sm:$0xf0] }
 0x38d   : > { %4136 = vmatmul.bf16.gmra.mxu2 %v11161_v35 }
 0x38e   : > { %7828 = vmatmul.msk.bf16.gmra.mxu3 %vm2809_vm0, %v11205_v61  ;;  %4310 = vmatpush.bf16.msrb.mxu2 %v6923_v40 }
 0x390   : > { %v3941_v39 = vpop.f32.mrf.mxu2  ;;  %v3845_v14 = vpop.f32.mrf.mxu0 }
 0x391   : > { %v3942_v36 = vadd.f32 %v3941_v39, %v3893_v29  ;;  %v3990_v63 = vpop.f32.mrf.mxu3  ;;  %v9862_v60 = vadd.f32 %v3845_v14, %v9740_v46  ;;  %v3894_v2 = vpop.f32.mrf.mxu1  ;;  %v7147_v29 = vor.u32 %v8301_v45, %v7146_v53 }
 0x392   : > { %v3895_v51 = vadd.f32 %v3894_v2, %v9772_v33  ;;  %v6699_v2 = vor.u32 %v8189_v26, %v6698_v30 }
 0x393   : > { %11224 = vst [vmem:[#allocation105_spill] sm:$0xff] %v9862_v60  ;;  %v9864_v6 = vadd.f32 %v3990_v63, %v3942_v36  ;;  %4359 = vmatpush.bf16.msrb.mxu3 %v7147_v29 }
 0x394   : > { %4261 = vmatpush.bf16.msrb.mxu1 %v6699_v2 }
 0x398   : > { %v3943_v39 = vpop.f32.mrf.mxu2  ;;  %v3848_v14 = vpop.f32.mrf.mxu0 }
 0x399   : > { %v3944_v27 = vadd.f32 %v3943_v39, %v3895_v51  ;;  %v3992_v46 = vpop.f32.mrf.mxu3  ;;  %v9870_v36 = vadd.f32 %v3848_v14, %v9748_v8  ;;  %v3897_v63 = vpop.f32.mrf.mxu1  ;;  %v6446_v8 = vld [vmem:[#allocation2 + $0x10] sm:$0xf]  ;;  %v8238_v14 = vld [vmem:[#allocation2 + $0x3a8] sm:$0xf0] }
 0x39a   : > { %v3898_v48 = vadd.f32 %v3897_v63, %v9772_v33  ;;  %v6447_v53 = vor.u32 %v8126_v16, %v6446_v8  ;;  %v7118_v63 = vld [vmem:[#allocation2 + $0x550] sm:$0xf]  ;;  %v8294_v16 = vld [vmem:[#allocation2 + $0x568] sm:$0xf0] }
 0x39b   : > { %11225 = vst [vmem:[#allocation106_spill] sm:$0xff] %v9870_v36  ;;  %v9872_v13 = vadd.f32 %v3992_v46, %v3944_v27  ;;  %4043 = vmatmul.bf16.gmra.mxu0 %v9070_v57  ;;  %v6894_v46 = vld [vmem:[#allocation2 + $0x390] sm:$0xf] }
 0x39c   : > { %4092 = vmatmul.bf16.gmra.mxu1 %v11181_v44  ;;  %4213 = vmatpush.bf16.msrb.mxu0 %v6447_v53  ;;  %v6895_v8 = vor.u32 %v8238_v14, %v6894_v46  ;;  %v6670_v53 = vld [vmem:[#allocation2 + $0x1d0] sm:$0xf]  ;;  %v11228_v46 = vld [vmem:[#allocation65_spill] sm:$0xff]  ;;  %v11229_v14 = vld [vmem:[#allocation66_spill] sm:$0xff] }
 0x39d   : > { %4141 = vmatmul.bf16.gmra.mxu2 %v11164_v22 }
 0x39e   : > { %7829 = vmatmul.msk.bf16.gmra.mxu3 %vm2809_vm0, %v11208_v24  ;;  %4311 = vmatpush.bf16.msrb.mxu2 %v6895_v8 }
 0x3a0   : > { %v3946_v51 = vpop.f32.mrf.mxu2  ;;  %v3850_v29 = vpop.f32.mrf.mxu0 }
 0x3a1   : > { %v3947_v40 = vadd.f32 %v3946_v51, %v3898_v48  ;;  %v3995_v45 = vpop.f32.mrf.mxu3  ;;  %v9881_v26 = vadd.f32 %v3850_v29, %v9751_v0  ;;  %v3899_v30 = vpop.f32.mrf.mxu1  ;;  %v7119_v48 = vor.u32 %v8294_v16, %v7118_v63  ;;  %v8182_v0 = vld [vmem:[#allocation2 + $0x1e8] sm:$0xf0]  ;;  %v7538_v63 = vld [vmem:[#allocation2 + $0x898] sm:$0xf] }
 0x3a2   : > { %v3900_v2 = vadd.f32 %v3899_v30, %v9772_v33 }
 0x3a3   : > { %11226 = vst [vmem:[#allocation107_spill] sm:$0xff] %v9881_v26  ;;  %v9883_v39 = vadd.f32 %v3995_v45, %v3947_v40  ;;  %4360 = vmatpush.bf16.msrb.mxu3 %v7119_v48  ;;  %v6671_v45 = vor.u32 %v8182_v0, %v6670_v53  ;;  %v11232_v0 = vld [vmem:[#allocation46_spill] sm:$0xff] }
 0x3a5   : > { %4262 = vmatpush.bf16.msrb.mxu1 %v6671_v45  ;;  %v8172_v45 = vld [vmem:[#allocation2 + $0x19c] sm:$0xf] }
 0x3a8   : > { %v3948_v51 = vpop.f32.mrf.mxu2  ;;  %v3853_v40 = vpop.f32.mrf.mxu0 }
 0x3a9   : > { %v3949_v29 = vadd.f32 %v3948_v51, %v3900_v2  ;;  %v3997_v60 = vpop.f32.mrf.mxu3  ;;  %v9889_v24 = vadd.f32 %v3853_v40, %v9759_v43  ;;  %v3902_v27 = vpop.f32.mrf.mxu1  ;;  %v8399_v2 = vld [vmem:[#allocation2 + $0x8b0] sm:$0xf0]  ;;  %v8462_v40 = vld [vmem:[#allocation2 + $0xaa8] sm:$0xf0] }
 0x3aa   : > { %v3903_v30 = vadd.f32 %v3902_v27, %v9772_v33  ;;  %v7539_v8 = vor.u32 %v8399_v2, %v7538_v63  ;;  %v6644_v2 = vld [vmem:[#allocation2 + $0x1b4] sm:$0xf0] }
 0x3ab   : > { %11227 = vst [vmem:[#allocation108_spill] sm:$0xff] %v9889_v24  ;;  %v9891_v36 = vadd.f32 %v3997_v60, %v3949_v29  ;;  %4048 = vmatmul.bf16.gmra.mxu0 %v11185_v4  ;;  %v7790_v29 = vld [vmem:[#allocation2 + $0xa90] sm:$0xf] }
 0x3ac   : > { %4097 = vmatmul.bf16.gmra.mxu1 %v11228_v46  ;;  %4402 = vmatpush.bf16.msra.mxu0 %v7539_v8  ;;  %v7791_v63 = vor.u32 %v8462_v40, %v7790_v29  ;;  %v11234_v29 = vld [vmem:[#allocation69_spill] sm:$0xff] }
 0x3ad   : > { %4146 = vmatmul.bf16.gmra.mxu2 %v11229_v14  ;;  %v7762_v40 = vld [vmem:[#allocation2 + $0xa58] sm:$0xf] }
 0x3ae   : > { %7830 = vmatmul.msk.bf16.gmra.mxu3 %vm2809_vm0, %v11211_v19  ;;  %4507 = vmatpush.bf16.msra.mxu2 %v7791_v63  ;;  %v7510_v63 = vld [vmem:[#allocation2 + $0x860] sm:$0xf] }
 0x3b0   : > { %v3951_v43 = vpop.f32.mrf.mxu2  ;;  %v3855_v60 = vpop.f32.mrf.mxu0 }
 0x3b1   : > { %v3952_v16 = vadd.f32 %v3951_v43, %v3903_v30  ;;  %v4000_v48 = vpop.f32.mrf.mxu3  ;;  %v9900_v51 = vadd.f32 %v3855_v60, %v9762_v62  ;;  %v3904_v53 = vpop.f32.mrf.mxu1  ;;  %v6647_v30 = vor.u32 %v8172_v45, %v6644_v2  ;;  %v8455_v45 = vld [vmem:[#allocation2 + $0xa70] sm:$0xf0] }
 0x3b2   : > { %v3905_v26 = vadd.f32 %v3904_v53, %v9772_v33  ;;  %v11233_v53 = vld [vmem:[#allocation68_spill] sm:$0xff] }
 0x3b3   : > { %11230 = vst [vmem:[#allocation65_spill] sm:$0xff] %v9900_v51  ;;  %v9902_v27 = vadd.f32 %v4000_v48, %v3952_v16  ;;  %4549 = vmatpush.bf16.msra.mxu3 %v6647_v30 }
 0x3b8   : > { %v3953_v43 = vpop.f32.mrf.mxu2  ;;  %v3858_v60 = vpop.f32.mrf.mxu0 }
 0x3b9   : > { %v3954_v8 = vadd.f32 %v3953_v43, %v3905_v26  ;;  %v4002_v62 = vpop.f32.mrf.mxu3  ;;  %v9908_v16 = vadd.f32 %v3858_v60, %v9770_v56  ;;  %v3907_v48 = vpop.f32.mrf.mxu1  ;;  %v7763_v26 = vor.u32 %v8455_v45, %v7762_v40  ;;  %v8392_v56 = vld [vmem:[#allocation2 + $0x878] sm:$0xf0]  ;;  %v6616_v40 = vld [vmem:[#allocation2 + $0x17c] sm:$0xf0] }
 0x3ba   : > { %v3908_v24 = vadd.f32 %v3907_v48, %v9772_v33  ;;  %v7511_v2 = vor.u32 %v8392_v56, %v7510_v63 }
 0x3bb   : > { %11231 = vst [vmem:[#allocation109_spill] sm:$0xff] %v9908_v16  ;;  %v9910_v19 = vadd.f32 %v4002_v62, %v3954_v8  ;;  %4053 = vmatmul.bf16.gmra.mxu0 %v11232_v0  ;;  %4451 = vmatpush.bf16.msra.mxu1 %v7763_v26  ;;  %v7734_v16 = vld [vmem:[#allocation2 + $0xa20] sm:$0xf] }
 0x3bc   : > { %4102 = vmatmul.bf16.gmra.mxu1 %v11233_v53  ;;  %4403 = vmatpush.bf16.msra.mxu0 %v7511_v2  ;;  %v11237_v53 = vld [vmem:[#allocation16_spill] sm:$0xff] }
 0x3bd   : > { %4151 = vmatmul.bf16.gmra.mxu2 %v11234_v29  ;;  %v11238_v29 = vld [vmem:[#allocation17_spill] sm:$0xff] }
 0x3be   : > { %7831 = vmatmul.msk.bf16.gmra.mxu3 %vm2809_vm0, %v9287_v25  ;;  %v8165_v25 = vld [vmem:[#allocation2 + $0x164] sm:$0xf] }
 0x3bf   : > { %v6619_v63 = vor.u32 %v8165_v25, %v6616_v40  ;;  %v8385_v40 = vld [vmem:[#allocation2 + $0x840] sm:$0xf0] }
 0x3c0   : > { %v3956_v30 = vpop.f32.mrf.mxu2  ;;  %v3860_v62 = vpop.f32.mrf.mxu0 }
 0x3c1   : > { %v3957_v43 = vadd.f32 %v3956_v30, %v3908_v24  ;;  %v4005_v8 = vpop.f32.mrf.mxu3  ;;  %v9919_v60 = vadd.f32 %v3860_v62, %v9777_v9  ;;  %v3909_v48 = vpop.f32.mrf.mxu1  ;;  %4550 = vmatpush.bf16.msra.mxu3 %v6619_v63 }
 0x3c2   : > { %v3910_v45 = vadd.f32 %v3909_v48, %v9772_v33  ;;  %v8448_v33 = vld [vmem:[#allocation2 + $0xa38] sm:$0xf0]  ;;  %v7482_v48 = vld [vmem:[#allocation2 + $0x828] sm:$0xf] }
 0x3c3   : > { %11235 = vst [vmem:[#allocation46_spill] sm:$0xff] %v9919_v60  ;;  %v9921_v51 = vadd.f32 %v4005_v8, %v3957_v43  ;;  %v11236_v8 = vld [vmem:[#allocation15_spill] sm:$0xff]  ;;  %v7735_v25 = vor.u32 %v8448_v33, %v7734_v16 }
 0x3c4   : > { %v8158_v60 = vld [vmem:[#allocation2 + $0x12c] sm:$0xf] }
 0x3c5   : > { %4452 = vmatpush.bf16.msra.mxu1 %v7735_v25 }
 0x3c8   : > { %v3958_v26 = vpop.f32.mrf.mxu2  ;;  %v4019_v30 = vpop.f32.mrf.mxu0 }
 0x3c9   : > { %v3959_v24 = vadd.f32 %v3958_v26, %v3910_v45  ;;  %v4007_v56 = vpop.f32.mrf.mxu3  ;;  %v4020_v2 = vadd.f32 %v4019_v30, %v9788_v31  ;;  %v4068_v9 = vpop.f32.mrf.mxu1  ;;  %v7483_v45 = vor.u32 %v8385_v40, %v7482_v48 }
 0x3cb   : > { %v9927_v62 = vadd.f32 %v4007_v56, %v3959_v24  ;;  %v4069_v43 = vadd.f32 %v4068_v9, %v4020_v2  ;;  %4214 = vmatmul.bf16.vlgmr.msrb.gmra.mxu0 %v11236_v8 }
 0x3cc   : > { %4263 = vmatmul.bf16.vlgmr.msrb.gmra.mxu1 %v11237_v53  ;;  %4404 = vmatpush.bf16.msra.mxu0 %v7483_v45 }
 0x3cd   : > { %4312 = vmatmul.bf16.vlgmr.msrb.gmra.mxu2 %v11238_v29  ;;  %v6588_v29 = vld [vmem:[#allocation2 + $0x144] sm:$0xf0] }
 0x3ce   : > { %4361 = vmatmul.bf16.vlgmr.msrb.gmra.mxu3 %v8970_v55  ;;  %v6591_v53 = vor.u32 %v8158_v60, %v6588_v29  ;;  %v8441_v29 = vld [vmem:[#allocation2 + $0xa00] sm:$0xf0] }
 0x3d0   : > { %v4117_v63 = vpop.f32.mrf.mxu2  ;;  %v4021_v24 = vpop.f32.mrf.mxu0  ;;  %4551 = vmatpush.bf16.msra.mxu3 %v6591_v53  ;;  %v7706_v53 = vld [vmem:[#allocation2 + $0x9e8] sm:$0xf] }
 0x3d1   : > { %v4118_v31 = vadd.f32 %v4117_v63, %v4069_v43  ;;  %v4166_v26 = vpop.f32.mrf.mxu3  ;;  %v4022_v56 = vadd.f32 %v4021_v24, %v9796_v37  ;;  %v4070_v30 = vpop.f32.mrf.mxu1  ;;  %v11241_v63 = vld [vmem:[#allocation19_spill] sm:$0xff]  ;;  %v7707_v60 = vor.u32 %v8441_v29, %v7706_v53  ;;  %v8151_v37 = vld [vmem:[#allocation2 + $0xf4] sm:$0xf] }
 0x3d2   : > { %v7454_v24 = vld [vmem:[#allocation2 + $0x7f0] sm:$0xf] }
 0x3d3   : > { %v9934_v2 = vadd.f32 %v4166_v26, %v4118_v31  ;;  %v4071_v9 = vadd.f32 %v4070_v30, %v4022_v56  ;;  %v11242_v31 = vld [vmem:[#allocation20_spill] sm:$0xff]  ;;  %v11243_v26 = vld [vmem:[#allocation21_spill] sm:$0xff]  ;;  %4453 = vmatpush.bf16.msra.mxu1 %v7707_v60 }
 0x3d5   : > { %11239 = vst [vmem:[#allocation15_spill] sm:$0xff] %v9934_v2  ;;  %v6560_v2 = vld [vmem:[#allocation2 + $0x10c] sm:$0xf0] }
 0x3d8   : > { %v4119_v16 = vpop.f32.mrf.mxu2  ;;  %v4024_v48 = vpop.f32.mrf.mxu0 }
 0x3d9   : > { %v4120_v33 = vadd.f32 %v4119_v16, %v4071_v9  ;;  %v4168_v55 = vpop.f32.mrf.mxu3  ;;  %v4025_v25 = vadd.f32 %v4024_v48, %v9807_v47  ;;  %v4073_v43 = vpop.f32.mrf.mxu1  ;;  %v8378_v47 = vld [vmem:[#allocation2 + $0x808] sm:$0xf0] }
 0x3da   : > { %v7455_v56 = vor.u32 %v8378_v47, %v7454_v24 }
 0x3db   : > { %v9937_v40 = vadd.f32 %v4168_v55, %v4120_v33  ;;  %v4074_v45 = vadd.f32 %v4073_v43, %v4025_v25  ;;  %4219 = vmatmul.bf16.gmra.mxu0 %v11241_v63 }
 0x3dc   : > { %4268 = vmatmul.bf16.gmra.mxu1 %v11242_v31  ;;  %4405 = vmatpush.bf16.msra.mxu0 %v7455_v56 }
 0x3dd   : > { %11240 = vst [vmem:[#allocation110_spill] sm:$0xff] %v9937_v40  ;;  %4317 = vmatmul.bf16.gmra.mxu2 %v11243_v26  ;;  %v6563_v40 = vor.u32 %v8151_v37, %v6560_v2  ;;  %v7678_v2 = vld [vmem:[#allocation2 + $0x9b0] sm:$0xf] }
 0x3de   : > { %4366 = vmatmul.bf16.gmra.mxu3 %v8990_v21 }
 0x3df   : > { %4552 = vmatpush.bf16.msra.mxu3 %v6563_v40  ;;  %v8434_v40 = vld [vmem:[#allocation2 + $0x9c8] sm:$0xf0] }
 0x3e0   : > { %v4122_v55 = vpop.f32.mrf.mxu2  ;;  %v4026_v16 = vpop.f32.mrf.mxu0  ;;  %v7679_v37 = vor.u32 %v8434_v40, %v7678_v2 }
 0x3e1   : > { %v4123_v30 = vadd.f32 %v4122_v55, %v4074_v45  ;;  %v4171_v9 = vpop.f32.mrf.mxu3  ;;  %v4027_v33 = vadd.f32 %v4026_v16, %v9815_v20  ;;  %v4075_v48 = vpop.f32.mrf.mxu1  ;;  %v11246_v55 = vld [vmem:[#allocation23_spill] sm:$0xff]  ;;  %v7426_v16 = vld [vmem:[#allocation2 + $0x7b8] sm:$0xf]  ;;  %v8144_v20 = vld [vmem:[#allocation2 + $0xbc] sm:$0xf] }
 0x3e2   : > { %4454 = vmatpush.bf16.msra.mxu1 %v7679_v37 }
 0x3e3   : > { %v9946_v25 = vadd.f32 %v4171_v9, %v4123_v30  ;;  %v4076_v43 = vadd.f32 %v4075_v48, %v4027_v33  ;;  %v11247_v30 = vld [vmem:[#allocation24_spill] sm:$0xff]  ;;  %v11248_v9 = vld [vmem:[#allocation25_spill] sm:$0xff] }
 0x3e5   : > { %11244 = vst [vmem:[#allocation19_spill] sm:$0xff] %v9946_v25  ;;  %v6532_v25 = vld [vmem:[#allocation2 + $0xd4] sm:$0xf0] }
 0x3e8   : > { %v4124_v53 = vpop.f32.mrf.mxu2  ;;  %v4029_v24 = vpop.f32.mrf.mxu0 }
 0x3e9   : > { %v4125_v29 = vadd.f32 %v4124_v53, %v4076_v43  ;;  %v4173_v21 = vpop.f32.mrf.mxu3  ;;  %v4030_v60 = vadd.f32 %v4029_v24, %v9826_v54  ;;  %v4078_v45 = vpop.f32.mrf.mxu1  ;;  %v8371_v54 = vld [vmem:[#allocation2 + $0x7d0] sm:$0xf0] }
 0x3ea   : > { %v7427_v33 = vor.u32 %v8371_v54, %v7426_v16 }
 0x3eb   : > { %v9949_v47 = vadd.f32 %v4173_v21, %v4125_v29  ;;  %v4079_v56 = vadd.f32 %v4078_v45, %v4030_v60  ;;  %4224 = vmatmul.bf16.gmra.mxu0 %v11246_v55 }
 0x3ec   : > { %4273 = vmatmul.bf16.gmra.mxu1 %v11247_v30  ;;  %4406 = vmatpush.bf16.msra.mxu0 %v7427_v33 }
 0x3ed   : > { %11245 = vst [vmem:[#allocation20_spill] sm:$0xff] %v9949_v47  ;;  %4322 = vmatmul.bf16.gmra.mxu2 %v11248_v9  ;;  %v6535_v47 = vor.u32 %v8144_v20, %v6532_v25  ;;  %v7650_v25 = vld [vmem:[#allocation2 + $0x978] sm:$0xf] }
 0x3ee   : > { %4371 = vmatmul.bf16.gmra.mxu3 %v9010_v42 }
 0x3ef   : > { %4553 = vmatpush.bf16.msra.mxu3 %v6535_v47  ;;  %v8427_v47 = vld [vmem:[#allocation2 + $0x990] sm:$0xf0] }
 0x3f0   : > { %v4127_v21 = vpop.f32.mrf.mxu2  ;;  %v4031_v53 = vpop.f32.mrf.mxu0  ;;  %v7651_v20 = vor.u32 %v8427_v47, %v7650_v25 }
 0x3f1   : > { %v4128_v48 = vadd.f32 %v4127_v21, %v4079_v56  ;;  %v4176_v43 = vpop.f32.mrf.mxu3  ;;  %v4032_v29 = vadd.f32 %v4031_v53, %v9834_v52  ;;  %v4080_v24 = vpop.f32.mrf.mxu1  ;;  %v11251_v21 = vld [vmem:[#allocation27_spill] sm:$0xff]  ;;  %v7398_v53 = vld [vmem:[#allocation2 + $0x780] sm:$0xf]  ;;  %v8137_v52 = vld [vmem:[#allocation2 + $0x84] sm:$0xf] }
 0x3f2   : > { %4455 = vmatpush.bf16.msra.mxu1 %v7651_v20 }
 0x3f3   : > { %v9958_v60 = vadd.f32 %v4176_v43, %v4128_v48  ;;  %v4081_v45 = vadd.f32 %v4080_v24, %v4032_v29  ;;  %v11252_v48 = vld [vmem:[#allocation28_spill] sm:$0xff]  ;;  %v11253_v43 = vld [vmem:[#allocation29_spill] sm:$0xff] }
 0x3f5   : > { %11249 = vst [vmem:[#allocation21_spill] sm:$0xff] %v9958_v60  ;;  %v6504_v60 = vld [vmem:[#allocation2 + $0x9c] sm:$0xf0] }
 0x3f8   : > { %v4129_v2 = vpop.f32.mrf.mxu2  ;;  %v4034_v16 = vpop.f32.mrf.mxu0 }
 0x3f9   : > { %v4130_v40 = vadd.f32 %v4129_v2, %v4081_v45  ;;  %v4178_v42 = vpop.f32.mrf.mxu3  ;;  %v4035_v37 = vadd.f32 %v4034_v16, %v9845_v34  ;;  %v4083_v56 = vpop.f32.mrf.mxu1  ;;  %v8364_v34 = vld [vmem:[#allocation2 + $0x798] sm:$0xf0] }
 0x3fa   : > { %v7399_v29 = vor.u32 %v8364_v34, %v7398_v53 }
 0x3fb   : > { %v9961_v54 = vadd.f32 %v4178_v42, %v4130_v40  ;;  %v4084_v33 = vadd.f32 %v4083_v56, %v4035_v37  ;;  %4229 = vmatmul.bf16.gmra.mxu0 %v11251_v21 }
 0x3fc   : > { %4278 = vmatmul.bf16.gmra.mxu1 %v11252_v48  ;;  %4407 = vmatpush.bf16.msra.mxu0 %v7399_v29 }
 0x3fd   : > { %11250 = vst [vmem:[#allocation24_spill] sm:$0xff] %v9961_v54  ;;  %4327 = vmatmul.bf16.gmra.mxu2 %v11253_v43  ;;  %v6507_v54 = vor.u32 %v8137_v52, %v6504_v60  ;;  %v7622_v60 = vld [vmem:[#allocation2 + $0x940] sm:$0xf] }
 0x3fe   : > { %4376 = vmatmul.bf16.gmra.mxu3 %v9030_v3 }
 0x3ff   : > { %4554 = vmatpush.bf16.msra.mxu3 %v6507_v54  ;;  %v8420_v54 = vld [vmem:[#allocation2 + $0x958] sm:$0xf0] }
 0x400   : > { %v4132_v42 = vpop.f32.mrf.mxu2  ;;  %v4036_v2 = vpop.f32.mrf.mxu0  ;;  %v7623_v52 = vor.u32 %v8420_v54, %v7622_v60 }
 0x401   : > { %v4133_v24 = vadd.f32 %v4132_v42, %v4084_v33  ;;  %v4181_v45 = vpop.f32.mrf.mxu3  ;;  %v4037_v40 = vadd.f32 %v4036_v2, %v9853_v11  ;;  %v4085_v16 = vpop.f32.mrf.mxu1  ;;  %v11256_v42 = vld [vmem:[#allocation31_spill] sm:$0xff] }
 0x402   : > { %v7370_v2 = vld [vmem:[#allocation2 + $0x748] sm:$0xf]  ;;  %4456 = vmatpush.bf16.msra.mxu1 %v7623_v52  ;;  %v8130_v11 = vld [vmem:[#allocation2 + $0x4c] sm:$0xf] }
 0x403   : > { %v9970_v37 = vadd.f32 %v4181_v45, %v4133_v24  ;;  %v4086_v56 = vadd.f32 %v4085_v16, %v4037_v40  ;;  %v11257_v24 = vld [vmem:[#allocation32_spill] sm:$0xff]  ;;  %v11258_v45 = vld [vmem:[#allocation33_spill] sm:$0xff] }
 0x405   : > { %11254 = vst [vmem:[#allocation25_spill] sm:$0xff] %v9970_v37  ;;  %v6476_v37 = vld [vmem:[#allocation2 + $0x64] sm:$0xf0] }
 0x408   : > { %v4134_v25 = vpop.f32.mrf.mxu2  ;;  %v4039_v53 = vpop.f32.mrf.mxu0 }
 0x409   : > { %v4135_v47 = vadd.f32 %v4134_v25, %v4086_v56  ;;  %v4183_v3 = vpop.f32.mrf.mxu3  ;;  %v4040_v20 = vadd.f32 %v4039_v53, %v9864_v6  ;;  %v4088_v33 = vpop.f32.mrf.mxu1  ;;  %v8357_v6 = vld [vmem:[#allocation2 + $0x760] sm:$0xf0] }
 0x40a   : > { %v7371_v40 = vor.u32 %v8357_v6, %v7370_v2 }
 0x40b   : > { %v9973_v34 = vadd.f32 %v4183_v3, %v4135_v47  ;;  %v4089_v29 = vadd.f32 %v4088_v33, %v4040_v20  ;;  %4234 = vmatmul.bf16.gmra.mxu0 %v11256_v42 }
 0x40c   : > { %4283 = vmatmul.bf16.gmra.mxu1 %v11257_v24  ;;  %4408 = vmatpush.bf16.msra.mxu0 %v7371_v40 }
 0x40d   : > { %11255 = vst [vmem:[#allocation28_spill] sm:$0xff] %v9973_v34  ;;  %4332 = vmatmul.bf16.gmra.mxu2 %v11258_v45  ;;  %v6479_v34 = vor.u32 %v8130_v11, %v6476_v37  ;;  %v7594_v37 = vld [vmem:[#allocation2 + $0x908] sm:$0xf] }
 0x40e   : > { %4381 = vmatmul.bf16.gmra.mxu3 %v9050_v28 }
 0x40f   : > { %4555 = vmatpush.bf16.msra.mxu3 %v6479_v34  ;;  %v8413_v34 = vld [vmem:[#allocation2 + $0x920] sm:$0xf0] }
 0x410   : > { %v4137_v3 = vpop.f32.mrf.mxu2  ;;  %v4041_v25 = vpop.f32.mrf.mxu0  ;;  %v7595_v11 = vor.u32 %v8413_v34, %v7594_v37  ;;  %v7566_v34 = vld [vmem:[#allocation2 + $0x8d0] sm:$0xf] }
 0x411   : > { %v4138_v16 = vadd.f32 %v4137_v3, %v4089_v29  ;;  %v4186_v56 = vpop.f32.mrf.mxu3  ;;  %v4042_v47 = vadd.f32 %v4041_v25, %v9872_v13  ;;  %v4090_v53 = vpop.f32.mrf.mxu1  ;;  %v11261_v3 = vld [vmem:[#allocation35_spill] sm:$0xff]  ;;  %v8123_v13 = vld [vmem:[#allocation2 + $0x14] sm:$0xf] }
 0x412   : > { %v7342_v25 = vld [vmem:[#allocation2 + $0x710] sm:$0xf]  ;;  %4457 = vmatpush.bf16.msra.mxu1 %v7595_v11 }
 0x413   : > { %v9982_v20 = vadd.f32 %v4186_v56, %v4138_v16  ;;  %v4091_v33 = vadd.f32 %v4090_v53, %v4042_v47  ;;  %v11262_v16 = vld [vmem:[#allocation36_spill] sm:$0xff]  ;;  %v11263_v56 = vld [vmem:[#allocation37_spill] sm:$0xff] }
 0x415   : > { %11259 = vst [vmem:[#allocation29_spill] sm:$0xff] %v9982_v20  ;;  %v6448_v20 = vld [vmem:[#allocation2 + $0x2c] sm:$0xf0] }
 0x418   : > { %v4139_v60 = vpop.f32.mrf.mxu2  ;;  %v4044_v2 = vpop.f32.mrf.mxu0 }
 0x419   : > { %v4140_v54 = vadd.f32 %v4139_v60, %v4091_v33  ;;  %v4188_v28 = vpop.f32.mrf.mxu3  ;;  %v4045_v52 = vadd.f32 %v4044_v2, %v9883_v39  ;;  %v4093_v29 = vpop.f32.mrf.mxu1  ;;  %v8350_v39 = vld [vmem:[#allocation2 + $0x728] sm:$0xf0] }
 0x41a   : > { %v7343_v47 = vor.u32 %v8350_v39, %v7342_v25 }
 0x41b   : > { %v9985_v6 = vadd.f32 %v4188_v28, %v4140_v54  ;;  %v4094_v40 = vadd.f32 %v4093_v29, %v4045_v52  ;;  %4239 = vmatmul.bf16.gmra.mxu0 %v11261_v3 }
 0x41c   : > { %4288 = vmatmul.bf16.gmra.mxu1 %v11262_v16  ;;  %4409 = vmatpush.bf16.msra.mxu0 %v7343_v47 }
 0x41d   : > { %11260 = vst [vmem:[#allocation32_spill] sm:$0xff] %v9985_v6  ;;  %4337 = vmatmul.bf16.gmra.mxu2 %v11263_v56  ;;  %v6451_v6 = vor.u32 %v8123_v13, %v6448_v20  ;;  %v11267_v13 = vld [vmem:[#allocation41_spill] sm:$0xff] }
 0x41e   : > { %4386 = vmatmul.bf16.gmra.mxu3 %v9070_v57  ;;  %v8406_v57 = vld [vmem:[#allocation2 + $0x8e8] sm:$0xf0] }
 0x41f   : > { %4556 = vmatpush.bf16.msra.mxu3 %v6451_v6  ;;  %v11266_v6 = vld [vmem:[#allocation40_spill] sm:$0xff] }
 0x420   : > { %v4142_v28 = vpop.f32.mrf.mxu2  ;;  %v4046_v60 = vpop.f32.mrf.mxu0 }
 0x421   : > { %v4143_v53 = vadd.f32 %v4142_v28, %v4094_v40  ;;  %v4191_v33 = vpop.f32.mrf.mxu3  ;;  %v4047_v54 = vadd.f32 %v4046_v60, %v9891_v36  ;;  %v4095_v2 = vpop.f32.mrf.mxu1  ;;  %v7567_v40 = vor.u32 %v8406_v57, %v7566_v34  ;;  %v6868_v57 = vld [vmem:[#allocation2 + $0x374] sm:$0xf0] }
 0x423   : > { %v9994_v52 = vadd.f32 %v4191_v33, %v4143_v53  ;;  %v4096_v29 = vadd.f32 %v4095_v2, %v4047_v54  ;;  %4458 = vmatpush.bf16.msra.mxu1 %v7567_v40  ;;  %v8228_v53 = vld [vmem:[#allocation2 + $0x35c] sm:$0xf] }
 0x424   : > { %v6871_v33 = vor.u32 %v8228_v53, %v6868_v57  ;;  %v8396_v40 = vld [vmem:[#allocation2 + $0x89c] sm:$0xf] }
 0x425   : > { %11264 = vst [vmem:[#allocation33_spill] sm:$0xff] %v9994_v52 }
 0x426   : > { %4598 = vmatpush.bf16.msrb.mxu0 %v6871_v33 }
 0x428   : > { %v4144_v37 = vpop.f32.mrf.mxu2  ;;  %v4049_v11 = vpop.f32.mrf.mxu0 }
 0x429   : > { %v4145_v25 = vadd.f32 %v4144_v37, %v4096_v29  ;;  %v4193_v39 = vpop.f32.mrf.mxu3  ;;  %v4050_v28 = vadd.f32 %v4049_v11, %v9902_v27  ;;  %v4098_v47 = vpop.f32.mrf.mxu1  ;;  %v7316_v11 = vld [vmem:[#allocation2 + $0x6f4] sm:$0xf0] }
 0x42b   : > { %v9997_v56 = vadd.f32 %v4193_v39, %v4145_v25  ;;  %v4099_v36 = vadd.f32 %v4098_v47, %v4050_v28  ;;  %4244 = vmatmul.bf16.gmra.mxu0 %v11212_v41  ;;  %v8340_v39 = vld [vmem:[#allocation2 + $0x6dc] sm:$0xf]  ;;  %v7540_v47 = vld [vmem:[#allocation2 + $0x8b4] sm:$0xf0] }
 0x42c   : > { %4293 = vmatmul.bf16.gmra.mxu1 %v11266_v6  ;;  %v7319_v28 = vor.u32 %v8340_v39, %v7316_v11  ;;  %v7543_v20 = vor.u32 %v8396_v40, %v7540_v47 }
 0x42d   : > { %11265 = vst [vmem:[#allocation36_spill] sm:$0xff] %v9997_v56  ;;  %4342 = vmatmul.bf16.gmra.mxu2 %v11267_v13 }
 0x42e   : > { %4391 = vmatmul.bf16.gmra.mxu3 %v11185_v4  ;;  %4696 = vmatpush.bf16.msrb.mxu2 %v7319_v28 }
 0x42f   : > { %4745 = vmatpush.bf16.msrb.mxu3 %v7543_v20  ;;  %v11270_v20 = vld [vmem:[#allocation45_spill] sm:$0xff] }
 0x430   : > { %v4147_v27 = vpop.f32.mrf.mxu2  ;;  %v4051_v2 = vpop.f32.mrf.mxu0 }
 0x431   : > { %v4148_v60 = vadd.f32 %v4147_v27, %v4099_v36  ;;  %v4196_v54 = vpop.f32.mrf.mxu3  ;;  %v4052_v29 = vadd.f32 %v4051_v2, %v9910_v19  ;;  %v4100_v37 = vpop.f32.mrf.mxu1 }
 0x433   : > { %v10006_v34 = vadd.f32 %v4196_v54, %v4148_v60  ;;  %v4101_v25 = vadd.f32 %v4100_v37, %v4052_v29  ;;  %v8284_v60 = vld [vmem:[#allocation2 + $0x51c] sm:$0xf]  ;;  %v7092_v54 = vld [vmem:[#allocation2 + $0x534] sm:$0xf0]  ;;  %v7512_v37 = vld [vmem:[#allocation2 + $0x87c] sm:$0xf0] }
 0x434   : > { %v7095_v29 = vor.u32 %v8284_v60, %v7092_v54  ;;  %v8389_v60 = vld [vmem:[#allocation2 + $0x864] sm:$0xf] }
 0x435   : > { %11268 = vst [vmem:[#allocation40_spill] sm:$0xff] %v10006_v34 }
 0x436   : > { %4647 = vmatpush.bf16.msrb.mxu1 %v7095_v29  ;;  %v8604_v29 = vld [vmem:[#allocation5] sm:$0x7f] }
 0x437   : > { %v10020_v34 = vperm.slane %v8604_v29, 4 }
 0x438   : > { %v4149_v52 = vpop.f32.mrf.mxu2  ;;  %v4054_v57 = vpop.f32.mrf.mxu0 }
 0x439   : > { %v4150_v53 = vadd.f32 %v4149_v52, %v4101_v25  ;;  %v4198_v36 = vpop.f32.mrf.mxu3  ;;  %v4055_v33 = vadd.f32 %v4054_v57, %v9921_v51  ;;  %v4103_v27 = vpop.f32.mrf.mxu1  ;;  %v8221_v51 = vld [vmem:[#allocation2 + $0x324] sm:$0xf]  ;;  %v6840_v52 = vld [vmem:[#allocation2 + $0x33c] sm:$0xf0] }
 0x43a   : > { %v6843_v25 = vor.u32 %v8221_v51, %v6840_v52  ;;  %v7515_v51 = vor.u32 %v8389_v60, %v7512_v37 }
 0x43b   : > { %v10009_v19 = vadd.f32 %v4198_v36, %v4150_v53  ;;  %v4104_v2 = vadd.f32 %v4103_v27, %v4055_v33  ;;  %4249 = vmatmul.bf16.gmra.mxu0 %v9104_v49  ;;  %v8333_v33 = vld [vmem:[#allocation2 + $0x6a4] sm:$0xf]  ;;  %v7288_v27 = vld [vmem:[#allocation2 + $0x6bc] sm:$0xf0] }
 0x43c   : > { %4298 = vmatmul.bf16.gmra.mxu1 %v11214_v59  ;;  %4599 = vmatpush.bf16.msrb.mxu0 %v6843_v25  ;;  %v7291_v54 = vor.u32 %v8333_v33, %v7288_v27  ;;  %v6812_v27 = vld [vmem:[#allocation2 + $0x304] sm:$0xf0] }
 0x43d   : > { %11269 = vst [vmem:[#allocation41_spill] sm:$0xff] %v10009_v19  ;;  %4347 = vmatmul.bf16.gmra.mxu2 %v11270_v20  ;;  %4746 = vmatpush.bf16.msrb.mxu3 %v7515_v51  ;;  %v7456_v19 = vld [vmem:[#allocation2 + $0x80c] sm:$0xf0] }
 0x43e   : > { %4396 = vmatmul.bf16.gmra.mxu3 %v11232_v0  ;;  %4697 = vmatpush.bf16.msrb.mxu2 %v7291_v54 }
 0x440   : > { %v4152_v39 = vpop.f32.mrf.mxu2  ;;  %v4056_v28 = vpop.f32.mrf.mxu0 }
 0x441   : > { %v4153_v11 = vadd.f32 %v4152_v39, %v4104_v2  ;;  %v4201_v40 = vpop.f32.mrf.mxu3  ;;  %v4057_v47 = vadd.f32 %v4056_v28, %v9927_v62  ;;  %v4105_v53 = vpop.f32.mrf.mxu1  ;;  %v8277_v28 = vld [vmem:[#allocation2 + $0x4e4] sm:$0xf] }
 0x443   : > { %v10018_v36 = vadd.f32 %v4201_v40, %v4153_v11  ;;  %v4106_v57 = vadd.f32 %v4105_v53, %v4057_v47  ;;  %v7064_v47 = vld [vmem:[#allocation2 + $0x4fc] sm:$0xf0] }
 0x444   : > { %v7067_v33 = vor.u32 %v8277_v28, %v7064_v47  ;;  %v7260_v28 = vld [vmem:[#allocation2 + $0x684] sm:$0xf0]  ;;  %v8382_v47 = vld [vmem:[#allocation2 + $0x82c] sm:$0xf] }
 0x445   : > { %11271 = vst [vmem:[#allocation45_spill] sm:$0xff] %v10018_v36  ;;  %v7484_v36 = vld [vmem:[#allocation2 + $0x844] sm:$0xf0] }
 0x446   : > { %4648 = vmatpush.bf16.msrb.mxu1 %v7067_v33  ;;  %v7487_v33 = vor.u32 %v8382_v47, %v7484_v36  ;;  %v8207_v36 = vld [vmem:[#allocation2 + $0x2b4] sm:$0xf] }
 0x448   : > { %v4154_v2 = vpop.f32.mrf.mxu2  ;;  %v4215_v39 = vpop.f32.mrf.mxu0  ;;  %4747 = vmatpush.bf16.msrb.mxu3 %v7487_v33 }
 0x449   : > { %v4155_v52 = vadd.f32 %v4154_v2, %v4106_v57  ;;  %v4203_v25 = vpop.f32.mrf.mxu3  ;;  %v4216_v62 = vadd.f32 %v4215_v39, %v10020_v34  ;;  %v4264_v11 = vpop.f32.mrf.mxu1  ;;  %v8214_v57 = vld [vmem:[#allocation2 + $0x2ec] sm:$0xf] }
 0x44a   : > { %v6815_v60 = vor.u32 %v8214_v57, %v6812_v27 }
 0x44b   : > { %v10023_v40 = vadd.f32 %v4203_v25, %v4155_v52  ;;  %v4265_v53 = vadd.f32 %v4264_v11, %v4216_v62  ;;  %4410 = vmatmul.bf16.vlgmr.msra.gmra.mxu0 %v9124_v32  ;;  %v8326_v11 = vld [vmem:[#allocation2 + $0x66c] sm:$0xf] }
 0x44c   : > { %4459 = vmatmul.bf16.vlgmr.msra.gmra.mxu1 %v11149_v15  ;;  %4600 = vmatpush.bf16.msrb.mxu0 %v6815_v60  ;;  %v7263_v37 = vor.u32 %v8326_v11, %v7260_v28 }
 0x44d   : > { %11272 = vst [vmem:[#allocation111_spill] sm:$0xff] %v10023_v40  ;;  %7832 = vmatmul.msk.bf16.vlgmr.msra.gmra.mxu2 %vm2809_vm0, %v11193_v50 }
 0x44e   : > { %4557 = vmatmul.bf16.vlgmr.msra.gmra.mxu3 %v11236_v8  ;;  %4698 = vmatpush.bf16.msrb.mxu2 %v7263_v37 }
 0x450   : > { %v4313_v54 = vpop.f32.mrf.mxu2  ;;  %v4217_v2 = vpop.f32.mrf.mxu0 }
 0x451   : > { %v4314_v29 = vadd.f32 %v4313_v54, %v4265_v53  ;;  %v4362_v51 = vpop.f32.mrf.mxu3  ;;  %v4218_v52 = vadd.f32 %v4217_v2, %v10020_v34  ;;  %v4266_v25 = vpop.f32.mrf.mxu1 }
 0x453   : > { %v10033_v39 = vadd.f32 %v4362_v51, %v4314_v29  ;;  %v4267_v62 = vadd.f32 %v4266_v25, %v4218_v52  ;;  %v8270_v29 = vld [vmem:[#allocation2 + $0x4ac] sm:$0xf]  ;;  %v7036_v51 = vld [vmem:[#allocation2 + $0x4c4] sm:$0xf0] }
 0x454   : > { %v7039_v25 = vor.u32 %v8270_v29, %v7036_v51  ;;  %v8375_v29 = vld [vmem:[#allocation2 + $0x7f4] sm:$0xf] }
 0x456   : > { %4649 = vmatpush.bf16.msrb.mxu1 %v7039_v25  ;;  %v7459_v25 = vor.u32 %v8375_v29, %v7456_v19  ;;  %v6756_v19 = vld [vmem:[#allocation2 + $0x294] sm:$0xf0] }
 0x458   : > { %v4315_v40 = vpop.f32.mrf.mxu2  ;;  %v4220_v27 = vpop.f32.mrf.mxu0  ;;  %4748 = vmatpush.bf16.msrb.mxu3 %v7459_v25 }
 0x459   : > { %v4316_v57 = vadd.f32 %v4315_v40, %v4267_v62  ;;  %v4364_v53 = vpop.f32.mrf.mxu3  ;;  %v4221_v60 = vadd.f32 %v4220_v27, %v10020_v34  ;;  %v4269_v54 = vpop.f32.mrf.mxu1  ;;  %v6784_v40 = vld [vmem:[#allocation2 + $0x2cc] sm:$0xf0] }
 0x45a   : > { %v6787_v37 = vor.u32 %v8207_v36, %v6784_v40 }
 0x45b   : > { %v10036_v2 = vadd.f32 %v4364_v53, %v4316_v57  ;;  %v4270_v52 = vadd.f32 %v4269_v54, %v4221_v60  ;;  %4415 = vmatmul.bf16.gmra.mxu0 %v9145_v38  ;;  %v8319_v60 = vld [vmem:[#allocation2 + $0x634] sm:$0xf]  ;;  %v7232_v54 = vld [vmem:[#allocation2 + $0x64c] sm:$0xf0] }
 0x45c   : > { %4464 = vmatmul.bf16.gmra.mxu1 %v11152_v12  ;;  %4601 = vmatpush.bf16.msrb.mxu0 %v6787_v37  ;;  %v7235_v51 = vor.u32 %v8319_v60, %v7232_v54 }
 0x45d   : > { %7833 = vmatmul.msk.bf16.gmra.mxu2 %vm2809_vm0, %v11196_v17 }
 0x45e   : > { %4562 = vmatmul.bf16.gmra.mxu3 %v11241_v63  ;;  %4699 = vmatpush.bf16.msrb.mxu2 %v7235_v51 }
 0x460   : > { %v4318_v62 = vpop.f32.mrf.mxu2  ;;  %v4222_v47 = vpop.f32.mrf.mxu0 }
 0x461   : > { %v4319_v11 = vadd.f32 %v4318_v62, %v4270_v52  ;;  %v4367_v28 = vpop.f32.mrf.mxu3  ;;  %v4223_v33 = vadd.f32 %v4222_v47, %v10020_v34  ;;  %v4271_v57 = vpop.f32.mrf.mxu1 }
 0x463   : > { %v10044_v53 = vadd.f32 %v4367_v28, %v4319_v11  ;;  %v4272_v27 = vadd.f32 %v4271_v57, %v4223_v33  ;;  %v8263_v11 = vld [vmem:[#allocation2 + $0x474] sm:$0xf]  ;;  %v7008_v28 = vld [vmem:[#allocation2 + $0x48c] sm:$0xf0] }
 0x464   : > { %v7011_v57 = vor.u32 %v8263_v11, %v7008_v28  ;;  %v8368_v11 = vld [vmem:[#allocation2 + $0x7bc] sm:$0xf] }
 0x466   : > { %4650 = vmatpush.bf16.msrb.mxu1 %v7011_v57 }
 0x468   : > { %v4320_v56 = vpop.f32.mrf.mxu2  ;;  %v4225_v40 = vpop.f32.mrf.mxu0 }
 0x469   : > { %v4321_v36 = vadd.f32 %v4320_v56, %v4272_v27  ;;  %v4369_v52 = vpop.f32.mrf.mxu3  ;;  %v4226_v37 = vadd.f32 %v4225_v40, %v10020_v34  ;;  %v4274_v62 = vpop.f32.mrf.mxu1  ;;  %v8200_v56 = vld [vmem:[#allocation2 + $0x27c] sm:$0xf] }
 0x46a   : > { %v6759_v27 = vor.u32 %v8200_v56, %v6756_v19 }
 0x46b   : > { %v10047_v47 = vadd.f32 %v4369_v52, %v4321_v36  ;;  %v4275_v33 = vadd.f32 %v4274_v62, %v4226_v37  ;;  %4420 = vmatmul.bf16.gmra.mxu0 %v9168_v10  ;;  %v8312_v37 = vld [vmem:[#allocation2 + $0x5fc] sm:$0xf]  ;;  %v7204_v62 = vld [vmem:[#allocation2 + $0x614] sm:$0xf0] }
 0x46c   : > { %4469 = vmatmul.bf16.gmra.mxu1 %v11155_v58  ;;  %4602 = vmatpush.bf16.msrb.mxu0 %v6759_v27  ;;  %v7207_v28 = vor.u32 %v8312_v37, %v7204_v62 }
 0x46d   : > { %7834 = vmatmul.msk.bf16.gmra.mxu2 %vm2809_vm0, %v11199_v1 }
 0x46e   : > { %4567 = vmatmul.bf16.gmra.mxu3 %v11246_v55  ;;  %v7428_v55 = vld [vmem:[#allocation2 + $0x7d4] sm:$0xf0]  ;;  %4700 = vmatpush.bf16.msrb.mxu2 %v7207_v28 }
 0x46f   : > { %v7431_v57 = vor.u32 %v8368_v11, %v7428_v55  ;;  %v6728_v55 = vld [vmem:[#allocation2 + $0x25c] sm:$0xf0] }
 0x470   : > { %v4323_v60 = vpop.f32.mrf.mxu2  ;;  %v4227_v51 = vpop.f32.mrf.mxu0 }
 0x471   : > { %v4324_v54 = vadd.f32 %v4323_v60, %v4275_v33  ;;  %v4372_v29 = vpop.f32.mrf.mxu3  ;;  %v4228_v25 = vadd.f32 %v4227_v51, %v10020_v34  ;;  %v4276_v36 = vpop.f32.mrf.mxu1  ;;  %4749 = vmatpush.bf16.msrb.mxu3 %v7431_v57 }
 0x473   : > { %v10055_v52 = vadd.f32 %v4372_v29, %v4324_v54  ;;  %v4277_v40 = vadd.f32 %v4276_v36, %v4228_v25  ;;  %v8256_v54 = vld [vmem:[#allocation2 + $0x43c] sm:$0xf]  ;;  %v6980_v29 = vld [vmem:[#allocation2 + $0x454] sm:$0xf0] }
 0x474   : > { %v6983_v36 = vor.u32 %v8256_v54, %v6980_v29  ;;  %v8361_v54 = vld [vmem:[#allocation2 + $0x784] sm:$0xf] }
 0x476   : > { %4651 = vmatpush.bf16.msrb.mxu1 %v6983_v36 }
 0x478   : > { %v4325_v1 = vpop.f32.mrf.mxu2  ;;  %v4230_v19 = vpop.f32.mrf.mxu0 }
 0x479   : > { %v4326_v56 = vadd.f32 %v4325_v1, %v4277_v40  ;;  %v4374_v33 = vpop.f32.mrf.mxu3  ;;  %v4231_v27 = vadd.f32 %v4230_v19, %v10020_v34  ;;  %v4279_v60 = vpop.f32.mrf.mxu1  ;;  %v8193_v1 = vld [vmem:[#allocation2 + $0x244] sm:$0xf] }
 0x47a   : > { %v6731_v40 = vor.u32 %v8193_v1, %v6728_v55 }
 0x47b   : > { %v10058_v51 = vadd.f32 %v4374_v33, %v4326_v56  ;;  %v4280_v25 = vadd.f32 %v4279_v60, %v4231_v27  ;;  %4425 = vmatmul.bf16.gmra.mxu0 %v9191_v23  ;;  %v8305_v27 = vld [vmem:[#allocation2 + $0x5c4] sm:$0xf]  ;;  %v7176_v60 = vld [vmem:[#allocation2 + $0x5dc] sm:$0xf0] }
 0x47c   : > { %4474 = vmatmul.bf16.gmra.mxu1 %v11158_v7  ;;  %4603 = vmatpush.bf16.msrb.mxu0 %v6731_v40  ;;  %v7179_v29 = vor.u32 %v8305_v27, %v7176_v60 }
 0x47d   : > { %7835 = vmatmul.msk.bf16.gmra.mxu2 %vm2809_vm0, %v11202_v18 }
 0x47e   : > { %4572 = vmatmul.bf16.gmra.mxu3 %v11251_v21  ;;  %v7400_v21 = vld [vmem:[#allocation2 + $0x79c] sm:$0xf0]  ;;  %4701 = vmatpush.bf16.msrb.mxu2 %v7179_v29 }
 0x47f   : > { %v7403_v36 = vor.u32 %v8361_v54, %v7400_v21  ;;  %v6700_v21 = vld [vmem:[#allocation2 + $0x224] sm:$0xf0] }
 0x480   : > { %v4328_v37 = vpop.f32.mrf.mxu2  ;;  %v4232_v28 = vpop.f32.mrf.mxu0 }
 0x481   : > { %v4329_v62 = vadd.f32 %v4328_v37, %v4280_v25  ;;  %v4377_v11 = vpop.f32.mrf.mxu3  ;;  %v4233_v57 = vadd.f32 %v4232_v28, %v10020_v34  ;;  %v4281_v56 = vpop.f32.mrf.mxu1  ;;  %4750 = vmatpush.bf16.msrb.mxu3 %v7403_v36 }
 0x483   : > { %v10066_v33 = vadd.f32 %v4377_v11, %v4329_v62  ;;  %v4282_v19 = vadd.f32 %v4281_v56, %v4233_v57  ;;  %v8249_v62 = vld [vmem:[#allocation2 + $0x404] sm:$0xf]  ;;  %v6952_v11 = vld [vmem:[#allocation2 + $0x41c] sm:$0xf0] }
 0x484   : > { %v6955_v56 = vor.u32 %v8249_v62, %v6952_v11  ;;  %v8354_v62 = vld [vmem:[#allocation2 + $0x74c] sm:$0xf] }
 0x486   : > { %4652 = vmatpush.bf16.msrb.mxu1 %v6955_v56 }
 0x488   : > { %v4330_v18 = vpop.f32.mrf.mxu2  ;;  %v4235_v55 = vpop.f32.mrf.mxu0 }
 0x489   : > { %v4331_v1 = vadd.f32 %v4330_v18, %v4282_v19  ;;  %v4379_v25 = vpop.f32.mrf.mxu3  ;;  %v4236_v40 = vadd.f32 %v4235_v55, %v10020_v34  ;;  %v4284_v37 = vpop.f32.mrf.mxu1  ;;  %v8186_v18 = vld [vmem:[#allocation2 + $0x20c] sm:$0xf] }
 0x48a   : > { %v6703_v19 = vor.u32 %v8186_v18, %v6700_v21 }
 0x48b   : > { %v10069_v28 = vadd.f32 %v4379_v25, %v4331_v1  ;;  %v4285_v57 = vadd.f32 %v4284_v37, %v4236_v40  ;;  %4430 = vmatmul.bf16.gmra.mxu0 %v9214_v5  ;;  %v8298_v40 = vld [vmem:[#allocation2 + $0x58c] sm:$0xf]  ;;  %v7148_v37 = vld [vmem:[#allocation2 + $0x5a4] sm:$0xf0] }
 0x48c   : > { %4479 = vmatmul.bf16.gmra.mxu1 %v11161_v35  ;;  %4604 = vmatpush.bf16.msrb.mxu0 %v6703_v19  ;;  %v7151_v11 = vor.u32 %v8298_v40, %v7148_v37 }
 0x48d   : > { %7836 = vmatmul.msk.bf16.gmra.mxu2 %vm2809_vm0, %v11205_v61 }
 0x48e   : > { %4577 = vmatmul.bf16.gmra.mxu3 %v11256_v42  ;;  %v7372_v42 = vld [vmem:[#allocation2 + $0x764] sm:$0xf0]  ;;  %4702 = vmatpush.bf16.msrb.mxu2 %v7151_v11 }
 0x48f   : > { %v7375_v56 = vor.u32 %v8354_v62, %v7372_v42  ;;  %v11273_v42 = vld [vmem:[#allocation64_spill] sm:$0xff] }
 0x490   : > { %v4333_v27 = vpop.f32.mrf.mxu2  ;;  %v4237_v29 = vpop.f32.mrf.mxu0 }
 0x491   : > { %v4334_v60 = vadd.f32 %v4333_v27, %v4285_v57  ;;  %v4382_v54 = vpop.f32.mrf.mxu3  ;;  %v4238_v36 = vadd.f32 %v4237_v29, %v10020_v34  ;;  %v4286_v1 = vpop.f32.mrf.mxu1  ;;  %4751 = vmatpush.bf16.msrb.mxu3 %v7375_v56 }
 0x493   : > { %v10077_v25 = vadd.f32 %v4382_v54, %v4334_v60  ;;  %v4287_v55 = vadd.f32 %v4286_v1, %v4238_v36  ;;  %v8242_v60 = vld [vmem:[#allocation2 + $0x3cc] sm:$0xf]  ;;  %v6924_v54 = vld [vmem:[#allocation2 + $0x3e4] sm:$0xf0] }
 0x494   : > { %v6927_v1 = vor.u32 %v8242_v60, %v6924_v54  ;;  %v7120_v60 = vld [vmem:[#allocation2 + $0x56c] sm:$0xf0]  ;;  %v8347_v54 = vld [vmem:[#allocation2 + $0x714] sm:$0xf] }
 0x496   : > { %4653 = vmatpush.bf16.msrb.mxu1 %v6927_v1 }
 0x498   : > { %v4335_v61 = vpop.f32.mrf.mxu2  ;;  %v4240_v21 = vpop.f32.mrf.mxu0 }
 0x499   : > { %v4336_v18 = vadd.f32 %v4335_v61, %v4287_v55  ;;  %v4384_v57 = vpop.f32.mrf.mxu3  ;;  %v4241_v19 = vadd.f32 %v4240_v21, %v10020_v34  ;;  %v4289_v27 = vpop.f32.mrf.mxu1  ;;  %v8179_v61 = vld [vmem:[#allocation2 + $0x1d4] sm:$0xf]  ;;  %v6672_v55 = vld [vmem:[#allocation2 + $0x1ec] sm:$0xf0] }
 0x49a   : > { %v6675_v40 = vor.u32 %v8179_v61, %v6672_v55  ;;  %v8235_v61 = vld [vmem:[#allocation2 + $0x394] sm:$0xf] }
 0x49b   : > { %v10080_v29 = vadd.f32 %v4384_v57, %v4336_v18  ;;  %v4290_v36 = vadd.f32 %v4289_v27, %v4241_v19  ;;  %4435 = vmatmul.bf16.gmra.mxu0 %v11181_v44  ;;  %v8291_v27 = vld [vmem:[#allocation2 + $0x554] sm:$0xf] }
 0x49c   : > { %4484 = vmatmul.bf16.gmra.mxu1 %v11164_v22  ;;  %4605 = vmatpush.bf16.msrb.mxu0 %v6675_v40 }
 0x49d   : > { %7837 = vmatmul.msk.bf16.gmra.mxu2 %vm2809_vm0, %v11273_v42  ;;  %v7123_v42 = vor.u32 %v8291_v27, %v7120_v60 }
 0x49e   : > { %4582 = vmatmul.bf16.gmra.mxu3 %v11261_v3  ;;  %v7344_v3 = vld [vmem:[#allocation2 + $0x72c] sm:$0xf0] }
 0x49f   : > { %v7347_v1 = vor.u32 %v8347_v54, %v7344_v3  ;;  %4703 = vmatpush.bf16.msrb.mxu2 %v7123_v42  ;;  %v11274_v3 = vld [vmem:[#allocation67_spill] sm:$0xff]  ;;  %v7764_v42 = vld [vmem:[#allocation2 + $0xa74] sm:$0xf0] }
 0x4a0   : > { %v4338_v37 = vpop.f32.mrf.mxu2  ;;  %v4242_v56 = vpop.f32.mrf.mxu0 }
 0x4a1   : > { %v4339_v62 = vadd.f32 %v4338_v37, %v4290_v36  ;;  %v4387_v11 = vpop.f32.mrf.mxu3  ;;  %v4243_v18 = vadd.f32 %v4242_v56, %v10020_v34  ;;  %v4291_v57 = vpop.f32.mrf.mxu1  ;;  %4752 = vmatpush.bf16.msrb.mxu3 %v7347_v1  ;;  %v6896_v36 = vld [vmem:[#allocation2 + $0x3ac] sm:$0xf0] }
 0x4a2   : > { %v6899_v35 = vor.u32 %v8235_v61, %v6896_v36 }
 0x4a3   : > { %v10088_v21 = vadd.f32 %v4387_v11, %v4339_v62  ;;  %v4292_v19 = vadd.f32 %v4291_v57, %v4243_v18 }
 0x4a4   : > { %4654 = vmatpush.bf16.msrb.mxu1 %v6899_v35 }
 0x4a8   : > { %v4340_v22 = vpop.f32.mrf.mxu2  ;;  %v4245_v40 = vpop.f32.mrf.mxu0 }
 0x4a9   : > { %v4341_v55 = vadd.f32 %v4340_v22, %v4292_v19  ;;  %v4389_v37 = vpop.f32.mrf.mxu3  ;;  %v4246_v56 = vadd.f32 %v4245_v40, %v10020_v34  ;;  %v4294_v62 = vpop.f32.mrf.mxu1  ;;  %v8452_v22 = vld [vmem:[#allocation2 + $0xa5c] sm:$0xf]  ;;  %v6874_v40 = vld [vmem:[#allocation2 + $0x360] sm:$0xf] }
 0x4aa   : > { %v7767_v57 = vor.u32 %v8452_v22, %v7764_v42 }
 0x4ab   : > { %v10091_v11 = vadd.f32 %v4389_v37, %v4341_v55  ;;  %v4295_v18 = vadd.f32 %v4294_v62, %v4246_v56  ;;  %4440 = vmatmul.bf16.gmra.mxu0 %v11228_v46  ;;  %v6650_v55 = vld [vmem:[#allocation2 + $0x1a0] sm:$0xf]  ;;  %v8176_v37 = vld [vmem:[#allocation2 + $0x1b8] sm:$0xf0] }
 0x4ac   : > { %4489 = vmatmul.bf16.gmra.mxu1 %v11229_v14  ;;  %4794 = vmatpush.bf16.msra.mxu0 %v7767_v57  ;;  %v6651_v56 = vor.u32 %v8176_v37, %v6650_v55  ;;  %v8232_v62 = vld [vmem:[#allocation2 + $0x378] sm:$0xf0]  ;;  %v11277_v37 = vld [vmem:[#allocation70_spill] sm:$0xff] }
 0x4ad   : > { %7838 = vmatmul.msk.bf16.gmra.mxu2 %vm2809_vm0, %v11274_v3  ;;  %v11276_v55 = vld [vmem:[#allocation69_spill] sm:$0xff] }
 0x4ae   : > { %4587 = vmatmul.bf16.gmra.mxu3 %v11212_v41  ;;  %v6875_v41 = vor.u32 %v8232_v62, %v6874_v40  ;;  %4892 = vmatpush.bf16.msra.mxu2 %v6651_v56 }
 0x4b0   : > { %v4343_v19 = vpop.f32.mrf.mxu2  ;;  %v4247_v54 = vpop.f32.mrf.mxu0  ;;  %4941 = vmatpush.bf16.msra.mxu3 %v6875_v41  ;;  %v8445_v41 = vld [vmem:[#allocation2 + $0xa24] sm:$0xf] }
 0x4b1   : > { %v4344_v27 = vadd.f32 %v4343_v19, %v4295_v18  ;;  %v4392_v60 = vpop.f32.mrf.mxu3  ;;  %v4248_v35 = vadd.f32 %v4247_v54, %v10020_v34  ;;  %v4296_v1 = vpop.f32.mrf.mxu1 }
 0x4b3   : > { %v10099_v61 = vadd.f32 %v4392_v60, %v4344_v27  ;;  %v4297_v36 = vadd.f32 %v4296_v1, %v4248_v35  ;;  %v8459_v27 = vld [vmem:[#allocation2 + $0xa94] sm:$0xf]  ;;  %v7792_v60 = vld [vmem:[#allocation2 + $0xaac] sm:$0xf0] }
 0x4b4   : > { %v11275_v1 = vld [vmem:[#allocation68_spill] sm:$0xff]  ;;  %v7795_v14 = vor.u32 %v8459_v27, %v7792_v60  ;;  %v6622_v27 = vld [vmem:[#allocation2 + $0x168] sm:$0xf]  ;;  %v8169_v60 = vld [vmem:[#allocation2 + $0x180] sm:$0xf0] }
 0x4b6   : > { %4850 = vmatpush.bf16.msra.mxu1 %v7795_v14 }
 0x4b8   : > { %v4345_v3 = vpop.f32.mrf.mxu2  ;;  %v4250_v42 = vpop.f32.mrf.mxu0 }
 0x4b9   : > { %v4346_v22 = vadd.f32 %v4345_v3, %v4297_v36  ;;  %v4394_v18 = vpop.f32.mrf.mxu3  ;;  %v4251_v57 = vadd.f32 %v4250_v42, %v10020_v34  ;;  %v4299_v19 = vpop.f32.mrf.mxu1  ;;  %v7736_v3 = vld [vmem:[#allocation2 + $0xa3c] sm:$0xf0] }
 0x4ba   : > { %v7739_v36 = vor.u32 %v8445_v41, %v7736_v3 }
 0x4bb   : > { %v10102_v54 = vadd.f32 %v4394_v18, %v4346_v22  ;;  %v4300_v35 = vadd.f32 %v4299_v19, %v4251_v57  ;;  %4445 = vmatmul.bf16.gmra.mxu0 %v11275_v1 }
 0x4bc   : > { %4494 = vmatmul.bf16.gmra.mxu1 %v11276_v55  ;;  %4795 = vmatpush.bf16.msra.mxu0 %v7739_v36  ;;  %v6623_v55 = vor.u32 %v8169_v60, %v6622_v27 }
 0x4bd   : > { %7839 = vmatmul.msk.bf16.gmra.mxu2 %vm2809_vm0, %v11277_v37  ;;  %v6846_v37 = vld [vmem:[#allocation2 + $0x328] sm:$0xf] }
 0x4be   : > { %4592 = vmatmul.bf16.gmra.mxu3 %v9104_v49  ;;  %v8225_v49 = vld [vmem:[#allocation2 + $0x340] sm:$0xf0]  ;;  %4893 = vmatpush.bf16.msra.mxu2 %v6623_v55  ;;  %v7708_v55 = vld [vmem:[#allocation2 + $0xa04] sm:$0xf0] }
 0x4bf   : > { %v6847_v14 = vor.u32 %v8225_v49, %v6846_v37  ;;  %v8438_v49 = vld [vmem:[#allocation2 + $0x9ec] sm:$0xf] }
 0x4c0   : > { %v4348_v40 = vpop.f32.mrf.mxu2  ;;  %v4252_v22 = vpop.f32.mrf.mxu0  ;;  %v7711_v37 = vor.u32 %v8438_v49, %v7708_v55 }
 0x4c1   : > { %v4349_v56 = vadd.f32 %v4348_v40, %v4300_v35  ;;  %v4397_v62 = vpop.f32.mrf.mxu3  ;;  %v4253_v18 = vadd.f32 %v4252_v22, %v10020_v34  ;;  %v4301_v42 = vpop.f32.mrf.mxu1  ;;  %4942 = vmatpush.bf16.msra.mxu3 %v6847_v14  ;;  %v11279_v22 = vld [vmem:[#allocation17_spill] sm:$0xff] }
 0x4c2   : > { %4796 = vmatpush.bf16.msra.mxu0 %v7711_v37 }
 0x4c3   : > { %v10110_v57 = vadd.f32 %v4397_v62, %v4349_v56  ;;  %v4302_v19 = vadd.f32 %v4301_v42, %v4253_v18  ;;  %v11278_v62 = vld [vmem:[#allocation16_spill] sm:$0xff]  ;;  %v11280_v18 = vld [vmem:[#allocation18_spill] sm:$0xff] }
 0x4c8   : > { %v4350_v7 = vpop.f32.mrf.mxu2  ;;  %v4411_v3 = vpop.f32.mrf.mxu0 }
 0x4c9   : > { %v4351_v41 = vadd.f32 %v4350_v7, %v4302_v19  ;;  %v4399_v35 = vpop.f32.mrf.mxu3  ;;  %v4412_v36 = vadd.f32 %v4411_v3, %v10033_v39  ;;  %v4460_v40 = vpop.f32.mrf.mxu1  ;;  %v6818_v3 = vld [vmem:[#allocation2 + $0x2f0] sm:$0xf] }
 0x4cb   : > { %v10113_v34 = vadd.f32 %v4399_v35, %v4351_v41  ;;  %v4461_v56 = vadd.f32 %v4460_v40, %v4412_v36  ;;  %4606 = vmatmul.bf16.vlgmr.msrb.gmra.mxu0 %v11278_v62  ;;  %v6594_v41 = vld [vmem:[#allocation2 + $0x130] sm:$0xf]  ;;  %v8162_v35 = vld [vmem:[#allocation2 + $0x148] sm:$0xf0] }
 0x4cc   : > { %4655 = vmatmul.bf16.vlgmr.msrb.gmra.mxu1 %v11279_v22  ;;  %v6595_v36 = vor.u32 %v8162_v35, %v6594_v41  ;;  %v8218_v40 = vld [vmem:[#allocation2 + $0x308] sm:$0xf0] }
 0x4cd   : > { %4704 = vmatmul.bf16.vlgmr.msrb.gmra.mxu2 %v11280_v18 }
 0x4ce   : > { %4753 = vmatmul.bf16.vlgmr.msrb.gmra.mxu3 %v9124_v32  ;;  %v6819_v32 = vor.u32 %v8218_v40, %v6818_v3  ;;  %4894 = vmatpush.bf16.msra.mxu2 %v6595_v36 }
 0x4d0   : > { %v4509_v7 = vpop.f32.mrf.mxu2  ;;  %v4413_v39 = vpop.f32.mrf.mxu0  ;;  %4943 = vmatpush.bf16.msra.mxu3 %v6819_v32  ;;  %v8431_v32 = vld [vmem:[#allocation2 + $0x9b4] sm:$0xf] }
 0x4d1   : > { %v10119_v42 = vadd.f32 %v4509_v7, %v4461_v56  ;;  %v10121_v19 = vpop.f32.mrf.mxu3  ;;  %v4414_v27 = vadd.f32 %v4413_v39, %v10036_v2  ;;  %v4462_v60 = vpop.f32.mrf.mxu1 }
 0x4d3   : > { %11281 = vst [vmem:[#allocation16_spill] sm:$0xff] %v10119_v42  ;;  %v4463_v14 = vadd.f32 %v4462_v60, %v4414_v27  ;;  %v11283_v27 = vld [vmem:[#allocation22_spill] sm:$0xff]  ;;  %v8211_v42 = vld [vmem:[#allocation2 + $0x2d0] sm:$0xf0] }
 0x4d8   : > { %v4511_v18 = vpop.f32.mrf.mxu2  ;;  %v4416_v55 = vpop.f32.mrf.mxu0 }
 0x4d9   : > { %v10124_v49 = vadd.f32 %v4511_v18, %v4463_v14  ;;  %v10126_v56 = vpop.f32.mrf.mxu3  ;;  %v4417_v37 = vadd.f32 %v4416_v55, %v10044_v53  ;;  %v4465_v7 = vpop.f32.mrf.mxu1  ;;  %v7680_v18 = vld [vmem:[#allocation2 + $0x9cc] sm:$0xf0]  ;;  %v6566_v55 = vld [vmem:[#allocation2 + $0xf8] sm:$0xf] }
 0x4da   : > { %v7683_v60 = vor.u32 %v8431_v32, %v7680_v18 }
 0x4db   : > { %11282 = vst [vmem:[#allocation17_spill] sm:$0xff] %v10124_v49  ;;  %v4466_v39 = vadd.f32 %v4465_v7, %v4417_v37  ;;  %4611 = vmatmul.bf16.gmra.mxu0 %v11242_v31  ;;  %v8155_v37 = vld [vmem:[#allocation2 + $0x110] sm:$0xf0]  ;;  %v6790_v7 = vld [vmem:[#allocation2 + $0x2b8] sm:$0xf] }
 0x4dc   : > { %4660 = vmatmul.bf16.gmra.mxu1 %v11243_v26  ;;  %4797 = vmatpush.bf16.msra.mxu0 %v7683_v60  ;;  %v6567_v2 = vor.u32 %v8155_v37, %v6566_v55  ;;  %v6791_v49 = vor.u32 %v8211_v42, %v6790_v7  ;;  %v11286_v42 = vld [vmem:[#allocation26_spill] sm:$0xff] }
 0x4dd   : > { %4709 = vmatmul.bf16.gmra.mxu2 %v11283_v27 }
 0x4de   : > { %4758 = vmatmul.bf16.gmra.mxu3 %v9145_v38  ;;  %4895 = vmatpush.bf16.msra.mxu2 %v6567_v2 }
 0x4df   : > { %4944 = vmatpush.bf16.msra.mxu3 %v6791_v49  ;;  %v7652_v49 = vld [vmem:[#allocation2 + $0x994] sm:$0xf0] }
 0x4e0   : > { %v4514_v14 = vpop.f32.mrf.mxu2  ;;  %v4418_v35 = vpop.f32.mrf.mxu0 }
 0x4e1   : > { %v10135_v41 = vadd.f32 %v4514_v14, %v4466_v39  ;;  %v10137_v53 = vpop.f32.mrf.mxu3  ;;  %v4419_v3 = vadd.f32 %v4418_v35, %v10047_v47  ;;  %v4467_v36 = vpop.f32.mrf.mxu1 }
 0x4e3   : > { %11284 = vst [vmem:[#allocation22_spill] sm:$0xff] %v10135_v41  ;;  %v4468_v40 = vadd.f32 %v4467_v36, %v4419_v3  ;;  %v8204_v41 = vld [vmem:[#allocation2 + $0x298] sm:$0xf0] }
 0x4e8   : > { %v4516_v38 = vpop.f32.mrf.mxu2  ;;  %v4421_v18 = vpop.f32.mrf.mxu0 }
 0x4e9   : > { %v10140_v32 = vadd.f32 %v4516_v38, %v4468_v40  ;;  %v10142_v39 = vpop.f32.mrf.mxu3  ;;  %v4422_v60 = vadd.f32 %v4421_v18, %v10055_v52  ;;  %v4470_v14 = vpop.f32.mrf.mxu1  ;;  %v8424_v38 = vld [vmem:[#allocation2 + $0x97c] sm:$0xf]  ;;  %v6538_v18 = vld [vmem:[#allocation2 + $0xc0] sm:$0xf] }
 0x4ea   : > { %v7655_v2 = vor.u32 %v8424_v38, %v7652_v49 }
 0x4eb   : > { %11285 = vst [vmem:[#allocation112_spill] sm:$0xff] %v10140_v32  ;;  %v4471_v35 = vadd.f32 %v4470_v14, %v4422_v60  ;;  %4616 = vmatmul.bf16.gmra.mxu0 %v11247_v30  ;;  %v8148_v60 = vld [vmem:[#allocation2 + $0xd8] sm:$0xf0]  ;;  %v6762_v14 = vld [vmem:[#allocation2 + $0x280] sm:$0xf] }
 0x4ec   : > { %4665 = vmatmul.bf16.gmra.mxu1 %v11248_v9  ;;  %4798 = vmatpush.bf16.msra.mxu0 %v7655_v2  ;;  %v6539_v47 = vor.u32 %v8148_v60, %v6538_v18  ;;  %v6763_v32 = vor.u32 %v8204_v41, %v6762_v14  ;;  %v11289_v41 = vld [vmem:[#allocation30_spill] sm:$0xff] }
 0x4ed   : > { %4714 = vmatmul.bf16.gmra.mxu2 %v11286_v42 }
 0x4ee   : > { %4763 = vmatmul.bf16.gmra.mxu3 %v9168_v10  ;;  %4896 = vmatpush.bf16.msra.mxu2 %v6539_v47 }
 0x4ef   : > { %4945 = vmatpush.bf16.msra.mxu3 %v6763_v32  ;;  %v7624_v32 = vld [vmem:[#allocation2 + $0x95c] sm:$0xf0] }
 0x4f0   : > { %v4519_v3 = vpop.f32.mrf.mxu2  ;;  %v4423_v40 = vpop.f32.mrf.mxu0 }
 0x4f1   : > { %v10151_v36 = vadd.f32 %v4519_v3, %v4471_v35  ;;  %v10153_v52 = vpop.f32.mrf.mxu3  ;;  %v4424_v55 = vadd.f32 %v4423_v40, %v10058_v51  ;;  %v4472_v37 = vpop.f32.mrf.mxu1 }
 0x4f3   : > { %11287 = vst [vmem:[#allocation26_spill] sm:$0xff] %v10151_v36  ;;  %v4473_v7 = vadd.f32 %v4472_v37, %v4424_v55  ;;  %v8197_v36 = vld [vmem:[#allocation2 + $0x260] sm:$0xf0] }
 0x4f8   : > { %v4521_v10 = vpop.f32.mrf.mxu2  ;;  %v4426_v49 = vpop.f32.mrf.mxu0 }
 0x4f9   : > { %v10156_v38 = vadd.f32 %v4521_v10, %v4473_v7  ;;  %v10158_v35 = vpop.f32.mrf.mxu3  ;;  %v4427_v2 = vadd.f32 %v4426_v49, %v10066_v33  ;;  %v4475_v3 = vpop.f32.mrf.mxu1  ;;  %v8417_v10 = vld [vmem:[#allocation2 + $0x944] sm:$0xf]  ;;  %v6510_v49 = vld [vmem:[#allocation2 + $0x88] sm:$0xf] }
 0x4fa   : > { %v7627_v47 = vor.u32 %v8417_v10, %v7624_v32 }
 0x4fb   : > { %11288 = vst [vmem:[#allocation113_spill] sm:$0xff] %v10156_v38  ;;  %v4476_v40 = vadd.f32 %v4475_v3, %v4427_v2  ;;  %4621 = vmatmul.bf16.gmra.mxu0 %v11252_v48  ;;  %v8141_v2 = vld [vmem:[#allocation2 + $0xa0] sm:$0xf0]  ;;  %v6734_v3 = vld [vmem:[#allocation2 + $0x248] sm:$0xf] }
 0x4fc   : > { %4670 = vmatmul.bf16.gmra.mxu1 %v11253_v43  ;;  %4799 = vmatpush.bf16.msra.mxu0 %v7627_v47  ;;  %v6511_v51 = vor.u32 %v8141_v2, %v6510_v49  ;;  %v6735_v38 = vor.u32 %v8197_v36, %v6734_v3  ;;  %v11292_v36 = vld [vmem:[#allocation34_spill] sm:$0xff] }
 0x4fd   : > { %4719 = vmatmul.bf16.gmra.mxu2 %v11289_v41 }
 0x4fe   : > { %4768 = vmatmul.bf16.gmra.mxu3 %v9191_v23  ;;  %4897 = vmatpush.bf16.msra.mxu2 %v6511_v51 }
 0x4ff   : > { %4946 = vmatpush.bf16.msra.mxu3 %v6735_v38  ;;  %v7596_v38 = vld [vmem:[#allocation2 + $0x924] sm:$0xf0] }
 0x500   : > { %v4524_v55 = vpop.f32.mrf.mxu2  ;;  %v4428_v7 = vpop.f32.mrf.mxu0 }
 0x501   : > { %v10167_v37 = vadd.f32 %v4524_v55, %v4476_v40  ;;  %v10169_v33 = vpop.f32.mrf.mxu3  ;;  %v4429_v18 = vadd.f32 %v4428_v7, %v10069_v28  ;;  %v4477_v60 = vpop.f32.mrf.mxu1 }
 0x503   : > { %11290 = vst [vmem:[#allocation30_spill] sm:$0xff] %v10167_v37  ;;  %v4478_v14 = vadd.f32 %v4477_v60, %v4429_v18  ;;  %v8190_v37 = vld [vmem:[#allocation2 + $0x228] sm:$0xf0] }
 0x508   : > { %v4526_v23 = vpop.f32.mrf.mxu2  ;;  %v4431_v32 = vpop.f32.mrf.mxu0 }
 0x509   : > { %v10172_v10 = vadd.f32 %v4526_v23, %v4478_v14  ;;  %v10174_v40 = vpop.f32.mrf.mxu3  ;;  %v4432_v47 = vadd.f32 %v4431_v32, %v10077_v25  ;;  %v4480_v55 = vpop.f32.mrf.mxu1  ;;  %v8410_v23 = vld [vmem:[#allocation2 + $0x90c] sm:$0xf]  ;;  %v6482_v32 = vld [vmem:[#allocation2 + $0x50] sm:$0xf] }
 0x50a   : > { %v7599_v51 = vor.u32 %v8410_v23, %v7596_v38 }
 0x50b   : > { %11291 = vst [vmem:[#allocation114_spill] sm:$0xff] %v10172_v10  ;;  %v4481_v7 = vadd.f32 %v4480_v55, %v4432_v47  ;;  %4626 = vmatmul.bf16.gmra.mxu0 %v11257_v24  ;;  %v8134_v47 = vld [vmem:[#allocation2 + $0x68] sm:$0xf0]  ;;  %v6706_v55 = vld [vmem:[#allocation2 + $0x210] sm:$0xf] }
 0x50c   : > { %4675 = vmatmul.bf16.gmra.mxu1 %v11258_v45  ;;  %4800 = vmatpush.bf16.msra.mxu0 %v7599_v51  ;;  %v6483_v28 = vor.u32 %v8134_v47, %v6482_v32  ;;  %v6707_v10 = vor.u32 %v8190_v37, %v6706_v55  ;;  %v11296_v37 = vld [vmem:[#allocation38_spill] sm:$0xff] }
 0x50d   : > { %4724 = vmatmul.bf16.gmra.mxu2 %v11292_v36 }
 0x50e   : > { %4773 = vmatmul.bf16.gmra.mxu3 %v9214_v5  ;;  %4898 = vmatpush.bf16.msra.mxu2 %v6483_v28 }
 0x50f   : > { %4947 = vmatpush.bf16.msra.mxu3 %v6707_v10  ;;  %v7568_v10 = vld [vmem:[#allocation2 + $0x8ec] sm:$0xf0] }
 0x510   : > { %v4529_v18 = vpop.f32.mrf.mxu2  ;;  %v4433_v14 = vpop.f32.mrf.mxu0 }
 0x511   : > { %v10183_v60 = vadd.f32 %v4529_v18, %v4481_v7  ;;  %v10185_v25 = vpop.f32.mrf.mxu3  ;;  %v4434_v49 = vadd.f32 %v4433_v14, %v10080_v29  ;;  %v4482_v2 = vpop.f32.mrf.mxu1  ;;  %v6678_v29 = vld [vmem:[#allocation2 + $0x1d8] sm:$0xf] }
 0x513   : > { %11293 = vst [vmem:[#allocation34_spill] sm:$0xff] %v10183_v60  ;;  %v4483_v3 = vadd.f32 %v4482_v2, %v4434_v49  ;;  %v11295_v49 = vld [vmem:[#allocation37_spill] sm:$0xff] }
 0x518   : > { %v4531_v5 = vpop.f32.mrf.mxu2  ;;  %v4436_v38 = vpop.f32.mrf.mxu0 }
 0x519   : > { %v10188_v23 = vadd.f32 %v4531_v5, %v4483_v3  ;;  %v10190_v7 = vpop.f32.mrf.mxu3  ;;  %v4437_v51 = vadd.f32 %v4436_v38, %v10088_v21  ;;  %v4485_v18 = vpop.f32.mrf.mxu1  ;;  %v8403_v5 = vld [vmem:[#allocation2 + $0x8d4] sm:$0xf] }
 0x51a   : > { %v7571_v28 = vor.u32 %v8403_v5, %v7568_v10 }
 0x51b   : > { %11294 = vst [vmem:[#allocation115_spill] sm:$0xff] %v10188_v23  ;;  %v4486_v14 = vadd.f32 %v4485_v18, %v4437_v51  ;;  %4631 = vmatmul.bf16.gmra.mxu0 %v11262_v16  ;;  %v6454_v51 = vld [vmem:[#allocation2 + $0x18] sm:$0xf]  ;;  %v8127_v18 = vld [vmem:[#allocation2 + $0x30] sm:$0xf0] }
 0x51c   : > { %4680 = vmatmul.bf16.gmra.mxu1 %v11295_v49  ;;  %4801 = vmatpush.bf16.msra.mxu0 %v7571_v28  ;;  %v6455_v60 = vor.u32 %v8127_v18, %v6454_v51  ;;  %v8183_v23 = vld [vmem:[#allocation2 + $0x1f0] sm:$0xf0]  ;;  %v7546_v18 = vld [vmem:[#allocation2 + $0x8a0] sm:$0xf] }
 0x51d   : > { %4729 = vmatmul.bf16.gmra.mxu2 %v11296_v37 }
 0x51e   : > { %4778 = vmatmul.bf16.gmra.mxu3 %v11181_v44  ;;  %v6679_v44 = vor.u32 %v8183_v23, %v6678_v29  ;;  %4899 = vmatpush.bf16.msra.mxu2 %v6455_v60  ;;  %v8288_v60 = vld [vmem:[#allocation2 + $0x538] sm:$0xf0] }
 0x520   : > { %v4534_v2 = vpop.f32.mrf.mxu2  ;;  %v4438_v32 = vpop.f32.mrf.mxu0  ;;  %4948 = vmatpush.bf16.msra.mxu3 %v6679_v44  ;;  %v7098_v44 = vld [vmem:[#allocation2 + $0x520] sm:$0xf] }
 0x521   : > { %v10199_v3 = vadd.f32 %v4534_v2, %v4486_v14  ;;  %v10201_v21 = vpop.f32.mrf.mxu3  ;;  %v4439_v47 = vadd.f32 %v4438_v32, %v10091_v11  ;;  %v4487_v55 = vpop.f32.mrf.mxu1  ;;  %v7099_v23 = vor.u32 %v8288_v60, %v7098_v44  ;;  %v8456_v11 = vld [vmem:[#allocation2 + $0xa78] sm:$0xf0] }
 0x523   : > { %11297 = vst [vmem:[#allocation37_spill] sm:$0xff] %v10199_v3  ;;  %v4488_v38 = vadd.f32 %v4487_v55, %v4439_v47  ;;  %4990 = vmatpush.bf16.msrb.mxu0 %v7099_v23 }
 0x528   : > { %v4536_v37 = vpop.f32.mrf.mxu2  ;;  %v4441_v10 = vpop.f32.mrf.mxu0 }
 0x529   : > { %v10204_v5 = vadd.f32 %v4536_v37, %v4488_v38  ;;  %v10206_v14 = vpop.f32.mrf.mxu3  ;;  %v4442_v28 = vadd.f32 %v4441_v10, %v10099_v61  ;;  %v4490_v2 = vpop.f32.mrf.mxu1  ;;  %v8400_v10 = vld [vmem:[#allocation2 + $0x8b8] sm:$0xf0] }
 0x52b   : > { %11298 = vst [vmem:[#allocation116_spill] sm:$0xff] %v10204_v5  ;;  %v4491_v32 = vadd.f32 %v4490_v2, %v4442_v28  ;;  %4636 = vmatmul.bf16.gmra.mxu0 %v11266_v6  ;;  %v7770_v28 = vld [vmem:[#allocation2 + $0xa60] sm:$0xf]  ;;  %v7547_v2 = vor.u32 %v8400_v10, %v7546_v18 }
 0x52c   : > { %4685 = vmatmul.bf16.gmra.mxu1 %v11267_v13  ;;  %v7771_v3 = vor.u32 %v8456_v11, %v7770_v28 }
 0x52d   : > { %4734 = vmatmul.bf16.gmra.mxu2 %v11185_v4 }
 0x52e   : > { %4783 = vmatmul.bf16.gmra.mxu3 %v11228_v46  ;;  %5088 = vmatpush.bf16.msrb.mxu2 %v7547_v2 }
 0x52f   : > { %5137 = vmatpush.bf16.msrb.mxu3 %v7771_v3  ;;  %v7070_v3 = vld [vmem:[#allocation2 + $0x4e8] sm:$0xf] }
 0x530   : > { %v4539_v29 = vpop.f32.mrf.mxu2  ;;  %v4443_v47 = vpop.f32.mrf.mxu0 }
 0x531   : > { %v10215_v37 = vadd.f32 %v4539_v29, %v4491_v32  ;;  %v10217_v61 = vpop.f32.mrf.mxu3  ;;  %v4444_v55 = vadd.f32 %v4443_v47, %v10102_v54  ;;  %v4492_v38 = vpop.f32.mrf.mxu1  ;;  %v7322_v47 = vld [vmem:[#allocation2 + $0x6e0] sm:$0xf]  ;;  %v7742_v54 = vld [vmem:[#allocation2 + $0xa28] sm:$0xf] }
 0x533   : > { %11299 = vst [vmem:[#allocation117_spill] sm:$0xff] %v10215_v37  ;;  %v4493_v51 = vadd.f32 %v4492_v38, %v4444_v55  ;;  %v8344_v55 = vld [vmem:[#allocation2 + $0x6f8] sm:$0xf0] }
 0x534   : > { %v7323_v11 = vor.u32 %v8344_v55, %v7322_v47  ;;  %v7518_v55 = vld [vmem:[#allocation2 + $0x868] sm:$0xf] }
 0x536   : > { %5039 = vmatpush.bf16.msrb.mxu1 %v7323_v11  ;;  %v8393_v11 = vld [vmem:[#allocation2 + $0x880] sm:$0xf0] }
 0x538   : > { %v4541_v5 = vpop.f32.mrf.mxu2  ;;  %v4446_v60 = vpop.f32.mrf.mxu0 }
 0x539   : > { %v10220_v44 = vadd.f32 %v4541_v5, %v4493_v51  ;;  %v10222_v32 = vpop.f32.mrf.mxu3  ;;  %v4447_v23 = vadd.f32 %v4446_v60, %v10110_v57  ;;  %v4495_v29 = vpop.f32.mrf.mxu1  ;;  %v8281_v5 = vld [vmem:[#allocation2 + $0x500] sm:$0xf0] }
 0x53a   : > { %v7071_v57 = vor.u32 %v8281_v5, %v7070_v3  ;;  %v7519_v3 = vor.u32 %v8393_v11, %v7518_v55  ;;  %v8449_v5 = vld [vmem:[#allocation2 + $0xa40] sm:$0xf0] }
 0x53b   : > { %11300 = vst [vmem:[#allocation118_spill] sm:$0xff] %v10220_v44  ;;  %v4496_v38 = vadd.f32 %v4495_v29, %v4447_v23  ;;  %4641 = vmatmul.bf16.gmra.mxu0 %v11214_v59  ;;  %v10236_v23 = vld [vmem:[#allocation5] sm:$0x7f]  ;;  %v8337_v55 = vld [vmem:[#allocation2 + $0x6c0] sm:$0xf0] }
 0x53c   : > { %4690 = vmatmul.bf16.gmra.mxu1 %v11270_v20  ;;  %4991 = vmatpush.bf16.msrb.mxu0 %v7071_v57  ;;  %v10239_v29 = vperm.slane %v10236_v23, 5 }
 0x53d   : > { %4739 = vmatmul.bf16.gmra.mxu2 %v11232_v0 }
 0x53e   : > { %4788 = vmatmul.bf16.gmra.mxu3 %v11275_v1  ;;  %5089 = vmatpush.bf16.msrb.mxu2 %v7519_v3  ;;  %v4561_v3 = vadd.f32 %v10126_v56, %v10239_v29  ;;  %v4564_v56 = vadd.f32 %v10137_v53, %v10239_v29  ;;  %v7014_v53 = vld [vmem:[#allocation2 + $0x478] sm:$0xf] }
 0x540   : > { %v4544_v51 = vpop.f32.mrf.mxu2  ;;  %v4448_v28 = vpop.f32.mrf.mxu0 }
 0x541   : > { %v10231_v18 = vadd.f32 %v4544_v51, %v4496_v38  ;;  %v10233_v10 = vpop.f32.mrf.mxu3  ;;  %v4449_v2 = vadd.f32 %v4448_v28, %v10113_v34  ;;  %v4497_v60 = vpop.f32.mrf.mxu1  ;;  %v7743_v38 = vor.u32 %v8449_v5, %v7742_v54  ;;  %v4559_v51 = vadd.f32 %v10121_v19, %v10239_v29  ;;  %v7042_v19 = vld [vmem:[#allocation2 + $0x4b0] sm:$0xf] }
 0x543   : > { %11301 = vst [vmem:[#allocation119_spill] sm:$0xff] %v10231_v18  ;;  %v4498_v47 = vadd.f32 %v4497_v60, %v4449_v2  ;;  %5138 = vmatpush.bf16.msrb.mxu3 %v7743_v38  ;;  %v7294_v60 = vld [vmem:[#allocation2 + $0x6a8] sm:$0xf]  ;;  %v8386_v2 = vld [vmem:[#allocation2 + $0x848] sm:$0xf0] }
 0x544   : > { %v7295_v54 = vor.u32 %v8337_v55, %v7294_v60  ;;  %v8442_v18 = vld [vmem:[#allocation2 + $0xa08] sm:$0xf0] }
 0x546   : > { %5040 = vmatpush.bf16.msrb.mxu1 %v7295_v54 }
 0x548   : > { %v4546_v57 = vpop.f32.mrf.mxu2  ;;  %v4607_v37 = vpop.f32.mrf.mxu0 }
 0x549   : > { %v10243_v34 = vadd.f32 %v4546_v57, %v4498_v47  ;;  %v10245_v28 = vpop.f32.mrf.mxu3  ;;  %v4608_v44 = vadd.f32 %v4607_v37, %v4559_v51  ;;  %v4656_v1 = vpop.f32.mrf.mxu1  ;;  %v8274_v37 = vld [vmem:[#allocation2 + $0x4c8] sm:$0xf0] }
 0x54a   : > { %v7043_v47 = vor.u32 %v8274_v37, %v7042_v19 }
 0x54b   : > { %11302 = vst [vmem:[#allocation120_spill] sm:$0xff] %v10243_v34  ;;  %v4657_v11 = vadd.f32 %v4656_v1, %v4608_v44  ;;  %4802 = vmatmul.bf16.vlgmr.msra.gmra.mxu0 %v11149_v15 }
 0x54c   : > { %7840 = vmatmul.msk.bf16.vlgmr.msra.gmra.mxu1 %vm2809_vm0, %v11193_v50  ;;  %4992 = vmatpush.bf16.msrb.mxu0 %v7043_v47 }
 0x54d   : > { %4900 = vmatmul.bf16.vlgmr.msra.gmra.mxu2 %v11236_v8  ;;  %v7490_v8 = vld [vmem:[#allocation2 + $0x830] sm:$0xf] }
 0x54e   : > { %4949 = vmatmul.bf16.vlgmr.msra.gmra.mxu3 %v11278_v62  ;;  %v7714_v62 = vld [vmem:[#allocation2 + $0x9f0] sm:$0xf]  ;;  %v7491_v54 = vor.u32 %v8386_v2, %v7490_v8 }
 0x54f   : > { %v7715_v34 = vor.u32 %v8442_v18, %v7714_v62  ;;  %v8267_v18 = vld [vmem:[#allocation2 + $0x490] sm:$0xf0] }
 0x550   : > { %v4705_v5 = vpop.f32.mrf.mxu2  ;;  %v4609_v44 = vpop.f32.mrf.mxu0  ;;  %5090 = vmatpush.bf16.msrb.mxu2 %v7491_v54 }
 0x551   : > { %v4706_v38 = vadd.f32 %v4705_v5, %v4657_v11  ;;  %v4754_v1 = vpop.f32.mrf.mxu3  ;;  %v4610_v51 = vadd.f32 %v4609_v44, %v4561_v3  ;;  %v4658_v57 = vpop.f32.mrf.mxu1  ;;  %5139 = vmatpush.bf16.msrb.mxu3 %v7715_v34  ;;  %v8330_v44 = vld [vmem:[#allocation2 + $0x688] sm:$0xf0]  ;;  %v7015_v34 = vor.u32 %v8267_v18, %v7014_v53 }
 0x553   : > { %v10256_v60 = vadd.f32 %v4754_v1, %v4706_v38  ;;  %v4659_v55 = vadd.f32 %v4658_v57, %v4610_v51  ;;  %v7266_v1 = vld [vmem:[#allocation2 + $0x670] sm:$0xf]  ;;  %v4566_v57 = vadd.f32 %v10142_v39, %v10239_v29  ;;  %4993 = vmatpush.bf16.msrb.mxu0 %v7015_v34  ;;  %v4569_v39 = vadd.f32 %v10153_v52, %v10239_v29  ;;  %v6986_v52 = vld [vmem:[#allocation2 + $0x440] sm:$0xf] }
 0x554   : > { %v7267_v2 = vor.u32 %v8330_v44, %v7266_v1 }
 0x556   : > { %5041 = vmatpush.bf16.msrb.mxu1 %v7267_v2 }
 0x558   : > { %v4707_v19 = vpop.f32.mrf.mxu2  ;;  %v4612_v47 = vpop.f32.mrf.mxu0 }
 0x559   : > { %v4708_v11 = vadd.f32 %v4707_v19, %v4659_v55  ;;  %v4756_v37 = vpop.f32.mrf.mxu3  ;;  %v4613_v3 = vadd.f32 %v4612_v47, %v4564_v56  ;;  %v4661_v5 = vpop.f32.mrf.mxu1  ;;  %v8379_v47 = vld [vmem:[#allocation2 + $0x810] sm:$0xf0] }
 0x55b   : > { %v10260_v38 = vadd.f32 %v4756_v37, %v4708_v11  ;;  %v4662_v51 = vadd.f32 %v4661_v5, %v4613_v3  ;;  %4807 = vmatmul.bf16.gmra.mxu0 %v11152_v12  ;;  %v8435_v5 = vld [vmem:[#allocation2 + $0x9d0] sm:$0xf0] }
 0x55c   : > { %7841 = vmatmul.msk.bf16.gmra.mxu1 %vm2809_vm0, %v11196_v17 }
 0x55d   : > { %4905 = vmatmul.bf16.gmra.mxu2 %v11241_v63  ;;  %v7462_v63 = vld [vmem:[#allocation2 + $0x7f8] sm:$0xf] }
 0x55e   : > { %4954 = vmatmul.bf16.gmra.mxu3 %v11242_v31  ;;  %v7686_v31 = vld [vmem:[#allocation2 + $0x9b8] sm:$0xf]  ;;  %v7463_v3 = vor.u32 %v8379_v47, %v7462_v63  ;;  %v4571_v47 = vadd.f32 %v10158_v35, %v10239_v29  ;;  %v4574_v35 = vadd.f32 %v10169_v33, %v10239_v29  ;;  %v6958_v33 = vld [vmem:[#allocation2 + $0x408] sm:$0xf] }
 0x55f   : > { %v7687_v1 = vor.u32 %v8435_v5, %v7686_v31 }
 0x560   : > { %v4710_v55 = vpop.f32.mrf.mxu2  ;;  %v4614_v54 = vpop.f32.mrf.mxu0  ;;  %5091 = vmatpush.bf16.msrb.mxu2 %v7463_v3 }
 0x561   : > { %v4711_v8 = vadd.f32 %v4710_v55, %v4662_v51  ;;  %v4759_v62 = vpop.f32.mrf.mxu3  ;;  %v4615_v56 = vadd.f32 %v4614_v54, %v4566_v57  ;;  %v4663_v19 = vpop.f32.mrf.mxu1  ;;  %5140 = vmatpush.bf16.msrb.mxu3 %v7687_v1  ;;  %v7238_v55 = vld [vmem:[#allocation2 + $0x638] sm:$0xf] }
 0x563   : > { %v10269_v11 = vadd.f32 %v4759_v62, %v4711_v8  ;;  %v4664_v37 = vadd.f32 %v4663_v19, %v4615_v56  ;;  %v8323_v8 = vld [vmem:[#allocation2 + $0x650] sm:$0xf0]  ;;  %v11303_v56 = vld [vmem:[#allocation55_spill] sm:$0xff] }
 0x564   : > { %v7239_v54 = vor.u32 %v8323_v8, %v7238_v55  ;;  %v11304_v19 = vld [vmem:[#allocation23_spill] sm:$0xff]  ;;  %v8428_v55 = vld [vmem:[#allocation2 + $0x998] sm:$0xf0] }
 0x566   : > { %5042 = vmatpush.bf16.msrb.mxu1 %v7239_v54 }
 0x568   : > { %v4712_v44 = vpop.f32.mrf.mxu2  ;;  %v4617_v53 = vpop.f32.mrf.mxu0 }
 0x569   : > { %v4713_v51 = vadd.f32 %v4712_v44, %v4664_v37  ;;  %v4761_v2 = vpop.f32.mrf.mxu3  ;;  %v4618_v18 = vadd.f32 %v4617_v53, %v4569_v39  ;;  %v4666_v34 = vpop.f32.mrf.mxu1  ;;  %v8260_v37 = vld [vmem:[#allocation2 + $0x458] sm:$0xf0]  ;;  %v7434_v53 = vld [vmem:[#allocation2 + $0x7c0] sm:$0xf] }
 0x56a   : > { %v6987_v63 = vor.u32 %v8260_v37, %v6986_v52 }
 0x56b   : > { %v10273_v57 = vadd.f32 %v4761_v2, %v4713_v51  ;;  %v4667_v62 = vadd.f32 %v4666_v34, %v4618_v18  ;;  %4812 = vmatmul.bf16.gmra.mxu0 %v11155_v58  ;;  %v8372_v18 = vld [vmem:[#allocation2 + $0x7d8] sm:$0xf0] }
 0x56c   : > { %7842 = vmatmul.msk.bf16.gmra.mxu1 %vm2809_vm0, %v11303_v56  ;;  %4994 = vmatpush.bf16.msrb.mxu0 %v6987_v63  ;;  %v7435_v34 = vor.u32 %v8372_v18, %v7434_v53  ;;  %v11307_v53 = vld [vmem:[#allocation27_spill] sm:$0xff] }
 0x56d   : > { %4910 = vmatmul.bf16.gmra.mxu2 %v11304_v19 }
 0x56e   : > { %4959 = vmatmul.bf16.gmra.mxu3 %v11247_v30  ;;  %v7658_v30 = vld [vmem:[#allocation2 + $0x980] sm:$0xf]  ;;  %5092 = vmatpush.bf16.msrb.mxu2 %v7435_v34 }
 0x56f   : > { %v7659_v8 = vor.u32 %v8428_v55, %v7658_v30  ;;  %v4576_v30 = vadd.f32 %v10174_v40, %v10239_v29  ;;  %v4579_v40 = vadd.f32 %v10185_v25, %v10239_v29  ;;  %v6930_v25 = vld [vmem:[#allocation2 + $0x3d0] sm:$0xf] }
 0x570   : > { %v4715_v31 = vpop.f32.mrf.mxu2  ;;  %v4619_v1 = vpop.f32.mrf.mxu0 }
 0x571   : > { %v4716_v3 = vadd.f32 %v4715_v31, %v4667_v62  ;;  %v4764_v5 = vpop.f32.mrf.mxu3  ;;  %v4620_v39 = vadd.f32 %v4619_v1, %v4571_v47  ;;  %v4668_v44 = vpop.f32.mrf.mxu1  ;;  %5141 = vmatpush.bf16.msrb.mxu3 %v7659_v8  ;;  %v7210_v31 = vld [vmem:[#allocation2 + $0x600] sm:$0xf] }
 0x572   : > { %v11305_v1 = vld [vmem:[#allocation57_spill] sm:$0xff] }
 0x573   : > { %v10282_v51 = vadd.f32 %v4764_v5, %v4716_v3  ;;  %v4669_v2 = vadd.f32 %v4668_v44, %v4620_v39  ;;  %v8316_v3 = vld [vmem:[#allocation2 + $0x618] sm:$0xf0]  ;;  %v11306_v44 = vld [vmem:[#allocation58_spill] sm:$0xff] }
 0x574   : > { %v7211_v39 = vor.u32 %v8316_v3, %v7210_v31  ;;  %v8421_v3 = vld [vmem:[#allocation2 + $0x960] sm:$0xf0] }
 0x576   : > { %5043 = vmatpush.bf16.msrb.mxu1 %v7211_v39 }
 0x578   : > { %v4717_v54 = vpop.f32.mrf.mxu2  ;;  %v4622_v52 = vpop.f32.mrf.mxu0 }
 0x579   : > { %v4718_v62 = vadd.f32 %v4717_v54, %v4669_v2  ;;  %v4766_v19 = vpop.f32.mrf.mxu3  ;;  %v4623_v37 = vadd.f32 %v4622_v52, %v4574_v35  ;;  %v4671_v63 = vpop.f32.mrf.mxu1  ;;  %v8253_v2 = vld [vmem:[#allocation2 + $0x420] sm:$0xf0] }
 0x57a   : > { %v6959_v18 = vor.u32 %v8253_v2, %v6958_v33 }
 0x57b   : > { %v10286_v47 = vadd.f32 %v4766_v19, %v4718_v62  ;;  %v4672_v5 = vadd.f32 %v4671_v63, %v4623_v37  ;;  %4817 = vmatmul.bf16.gmra.mxu0 %v11305_v1  ;;  %v7406_v37 = vld [vmem:[#allocation2 + $0x788] sm:$0xf]  ;;  %v8365_v63 = vld [vmem:[#allocation2 + $0x7a0] sm:$0xf0] }
 0x57c   : > { %7843 = vmatmul.msk.bf16.gmra.mxu1 %vm2809_vm0, %v11306_v44  ;;  %4995 = vmatpush.bf16.msrb.mxu0 %v6959_v18  ;;  %v7407_v31 = vor.u32 %v8365_v63, %v7406_v37  ;;  %v11309_v37 = vld [vmem:[#allocation61_spill] sm:$0xff]  ;;  %v11310_v63 = vld [vmem:[#allocation31_spill] sm:$0xff] }
 0x57d   : > { %4915 = vmatmul.bf16.gmra.mxu2 %v11307_v53 }
 0x57e   : > { %4964 = vmatmul.bf16.gmra.mxu3 %v11252_v48  ;;  %v7630_v48 = vld [vmem:[#allocation2 + $0x948] sm:$0xf]  ;;  %5093 = vmatpush.bf16.msrb.mxu2 %v7407_v31  ;;  %v4581_v31 = vadd.f32 %v10190_v7, %v10239_v29  ;;  %v4584_v7 = vadd.f32 %v10201_v21, %v10239_v29  ;;  %v6902_v21 = vld [vmem:[#allocation2 + $0x398] sm:$0xf] }
 0x57f   : > { %v7631_v39 = vor.u32 %v8421_v3, %v7630_v48 }
 0x580   : > { %v4720_v34 = vpop.f32.mrf.mxu2  ;;  %v4624_v35 = vpop.f32.mrf.mxu0 }
 0x581   : > { %v4721_v55 = vadd.f32 %v4720_v34, %v4672_v5  ;;  %v4769_v8 = vpop.f32.mrf.mxu3  ;;  %v4625_v54 = vadd.f32 %v4624_v35, %v4576_v30  ;;  %v4673_v62 = vpop.f32.mrf.mxu1  ;;  %5142 = vmatpush.bf16.msrb.mxu3 %v7631_v39 }
 0x583   : > { %v10295_v19 = vadd.f32 %v4769_v8, %v4721_v55  ;;  %v4674_v52 = vadd.f32 %v4673_v62, %v4625_v54  ;;  %v7182_v55 = vld [vmem:[#allocation2 + $0x5c8] sm:$0xf]  ;;  %v8309_v8 = vld [vmem:[#allocation2 + $0x5e0] sm:$0xf0]  ;;  %v11308_v54 = vld [vmem:[#allocation60_spill] sm:$0xff] }
 0x584   : > { %v7183_v62 = vor.u32 %v8309_v8, %v7182_v55  ;;  %v8358_v55 = vld [vmem:[#allocation2 + $0x768] sm:$0xf0] }
 0x586   : > { %5044 = vmatpush.bf16.msrb.mxu1 %v7183_v62  ;;  %v8414_v62 = vld [vmem:[#allocation2 + $0x928] sm:$0xf0] }
 0x588   : > { %v4722_v53 = vpop.f32.mrf.mxu2  ;;  %v4627_v2 = vpop.f32.mrf.mxu0 }
 0x589   : > { %v4723_v5 = vadd.f32 %v4722_v53, %v4674_v52  ;;  %v4771_v33 = vpop.f32.mrf.mxu3  ;;  %v4628_v18 = vadd.f32 %v4627_v2, %v4579_v40  ;;  %v4676_v30 = vpop.f32.mrf.mxu1  ;;  %v8246_v52 = vld [vmem:[#allocation2 + $0x3e8] sm:$0xf0] }
 0x58a   : > { %v6931_v48 = vor.u32 %v8246_v52, %v6930_v25 }
 0x58b   : > { %v10299_v34 = vadd.f32 %v4771_v33, %v4723_v5  ;;  %v4677_v35 = vadd.f32 %v4676_v30, %v4628_v18  ;;  %4822 = vmatmul.bf16.gmra.mxu0 %v11308_v54  ;;  %v7378_v30 = vld [vmem:[#allocation2 + $0x750] sm:$0xf] }
 0x58c   : > { %7844 = vmatmul.msk.bf16.gmra.mxu1 %vm2809_vm0, %v11309_v37  ;;  %4996 = vmatpush.bf16.msrb.mxu0 %v6931_v48  ;;  %v7379_v8 = vor.u32 %v8358_v55, %v7378_v30  ;;  %v11312_v55 = vld [vmem:[#allocation64_spill] sm:$0xff] }
 0x58d   : > { %4920 = vmatmul.bf16.gmra.mxu2 %v11310_v63 }
 0x58e   : > { %4969 = vmatmul.bf16.gmra.mxu3 %v11257_v24  ;;  %v7602_v24 = vld [vmem:[#allocation2 + $0x910] sm:$0xf]  ;;  %5094 = vmatpush.bf16.msrb.mxu2 %v7379_v8 }
 0x58f   : > { %v7603_v63 = vor.u32 %v8414_v62, %v7602_v24  ;;  %v11313_v24 = vld [vmem:[#allocation35_spill] sm:$0xff]  ;;  %v4586_v62 = vadd.f32 %v10206_v14, %v10239_v29  ;;  %v4589_v14 = vadd.f32 %v10217_v61, %v10239_v29 }
 0x590   : > { %v4725_v3 = vpop.f32.mrf.mxu2  ;;  %v4629_v53 = vpop.f32.mrf.mxu0  ;;  %v11316_v61 = vld [vmem:[#allocation39_spill] sm:$0xff] }
 0x591   : > { %v4726_v39 = vadd.f32 %v4725_v3, %v4677_v35  ;;  %v4774_v40 = vpop.f32.mrf.mxu3  ;;  %v4630_v5 = vadd.f32 %v4629_v53, %v4581_v31  ;;  %v4678_v33 = vpop.f32.mrf.mxu1  ;;  %5143 = vmatpush.bf16.msrb.mxu3 %v7603_v63  ;;  %v8302_v53 = vld [vmem:[#allocation2 + $0x5a8] sm:$0xf0] }
 0x593   : > { %v10308_v2 = vadd.f32 %v4774_v40, %v4726_v39  ;;  %v4679_v18 = vadd.f32 %v4678_v33, %v4630_v5  ;;  %v7154_v40 = vld [vmem:[#allocation2 + $0x590] sm:$0xf] }
 0x594   : > { %v11311_v33 = vld [vmem:[#allocation63_spill] sm:$0xff]  ;;  %v7155_v30 = vor.u32 %v8302_v53, %v7154_v40  ;;  %v7350_v40 = vld [vmem:[#allocation2 + $0x718] sm:$0xf]  ;;  %v8351_v53 = vld [vmem:[#allocation2 + $0x730] sm:$0xf0] }
 0x596   : > { %5045 = vmatpush.bf16.msrb.mxu1 %v7155_v30  ;;  %v7351_v30 = vor.u32 %v8351_v53, %v7350_v40  ;;  %v11314_v40 = vld [vmem:[#allocation66_spill] sm:$0xff]  ;;  %v11315_v53 = vld [vmem:[#allocation67_spill] sm:$0xff] }
 0x598   : > { %v4727_v25 = vpop.f32.mrf.mxu2  ;;  %v4632_v48 = vpop.f32.mrf.mxu0  ;;  %5095 = vmatpush.bf16.msrb.mxu2 %v7351_v30  ;;  %v4591_v30 = vadd.f32 %v10222_v32, %v10239_v29 }
 0x599   : > { %v4728_v35 = vadd.f32 %v4727_v25, %v4679_v18  ;;  %v4776_v52 = vpop.f32.mrf.mxu3  ;;  %v4633_v31 = vadd.f32 %v4632_v48, %v4584_v7  ;;  %v4681_v3 = vpop.f32.mrf.mxu1  ;;  %v8239_v18 = vld [vmem:[#allocation2 + $0x3b0] sm:$0xf0] }
 0x59a   : > { %v6903_v8 = vor.u32 %v8239_v18, %v6902_v21  ;;  %v8295_v18 = vld [vmem:[#allocation2 + $0x570] sm:$0xf0] }
 0x59b   : > { %v10312_v39 = vadd.f32 %v4776_v52, %v4728_v35  ;;  %v4682_v5 = vadd.f32 %v4681_v3, %v4633_v31  ;;  %4827 = vmatmul.bf16.gmra.mxu0 %v11311_v33 }
 0x59c   : > { %7845 = vmatmul.msk.bf16.gmra.mxu1 %vm2809_vm0, %v11312_v55  ;;  %4997 = vmatpush.bf16.msrb.mxu0 %v6903_v8 }
 0x59d   : > { %4925 = vmatmul.bf16.gmra.mxu2 %v11313_v24  ;;  %v8407_v24 = vld [vmem:[#allocation2 + $0x8f0] sm:$0xf0] }
 0x59e   : > { %4974 = vmatmul.bf16.gmra.mxu3 %v11262_v16  ;;  %v7574_v16 = vld [vmem:[#allocation2 + $0x8d8] sm:$0xf] }
 0x59f   : > { %v7575_v55 = vor.u32 %v8407_v24, %v7574_v16 }
 0x5a0   : > { %v4730_v63 = vpop.f32.mrf.mxu2  ;;  %v4634_v35 = vpop.f32.mrf.mxu0 }
 0x5a1   : > { %v4731_v7 = vadd.f32 %v4730_v63, %v4682_v5  ;;  %v4779_v25 = vpop.f32.mrf.mxu3  ;;  %v4635_v52 = vadd.f32 %v4634_v35, %v4586_v62  ;;  %v4683_v48 = vpop.f32.mrf.mxu1  ;;  %5144 = vmatpush.bf16.msrb.mxu3 %v7575_v55  ;;  %v7126_v5 = vld [vmem:[#allocation2 + $0x558] sm:$0xf] }
 0x5a2   : > { %v7798_v55 = vld [vmem:[#allocation2 + $0xa98] sm:$0xf] }
 0x5a3   : > { %v10321_v31 = vadd.f32 %v4779_v25, %v4731_v7  ;;  %v4684_v3 = vadd.f32 %v4683_v48, %v4635_v52  ;;  %v7127_v7 = vor.u32 %v8295_v18, %v7126_v5 }
 0x5a5   : > { %5046 = vmatpush.bf16.msrb.mxu1 %v7127_v7  ;;  %v8479_v7 = vld [vmem:[#allocation7 + $0x78] sm:$0xff] }
 0x5a6   : > { %5760 = vmatpush.bf16.msra.mxu2 %v8479_v7 }
 0x5a8   : > { %v4732_v21 = vpop.f32.mrf.mxu2  ;;  %v4637_v63 = vpop.f32.mrf.mxu0 }
 0x5a9   : > { %v4733_v8 = vadd.f32 %v4732_v21, %v4684_v3  ;;  %v4781_v62 = vpop.f32.mrf.mxu3  ;;  %v4638_v25 = vadd.f32 %v4637_v63, %v4589_v14  ;;  %v4686_v35 = vpop.f32.mrf.mxu1  ;;  %v8463_v3 = vld [vmem:[#allocation2 + $0xab0] sm:$0xf0] }
 0x5aa   : > { %v7799_v16 = vor.u32 %v8463_v3, %v7798_v55 }
 0x5ab   : > { %v10325_v52 = vadd.f32 %v4781_v62, %v4733_v8  ;;  %v4687_v48 = vadd.f32 %v4686_v35, %v4638_v25  ;;  %4832 = vmatmul.bf16.gmra.mxu0 %v11314_v40  ;;  %v8487_v25 = vld [vmem:[#allocation7 + $0xb8] sm:$0xff] }
 0x5ac   : > { %7846 = vmatmul.msk.bf16.gmra.mxu1 %vm2809_vm0, %v11315_v53  ;;  %5193 = vmatpush.bf16.msra.mxu0 %v7799_v16  ;;  %v8471_v16 = vld [vmem:[#allocation7 + $0x38] sm:$0xff] }
 0x5ad   : > { %4930 = vmatmul.bf16.gmra.mxu2 %v11316_v61  ;;  %5809 = vmatpush.bf16.msra.mxu3 %v8487_v25 }
 0x5ae   : > { %4979 = vmatmul.bf16.gmra.mxu3 %v11266_v6  ;;  %v4594_v6 = vadd.f32 %v10233_v10, %v10239_v29  ;;  %5711 = vmatpush.bf16.msra.mxu1 %v8471_v16  ;;  %v4596_v10 = vadd.f32 %v10245_v28, %v10239_v29 }
 0x5b0   : > { %v4735_v24 = vpop.f32.mrf.mxu2  ;;  %v4639_v5 = vpop.f32.mrf.mxu0 }
 0x5b1   : > { %v4736_v14 = vadd.f32 %v4735_v24, %v4687_v48  ;;  %v4784_v21 = vpop.f32.mrf.mxu3  ;;  %v4640_v18 = vadd.f32 %v4639_v5, %v4591_v30  ;;  %v4688_v8 = vpop.f32.mrf.mxu1  ;;  %v11319_v5 = vld [vmem:[#allocation43_spill] sm:$0xff] }
 0x5b3   : > { %v10334_v62 = vadd.f32 %v4784_v21, %v4736_v14  ;;  %v4689_v63 = vadd.f32 %v4688_v8, %v4640_v18  ;;  %v11317_v14 = vld [vmem:[#allocation69_spill] sm:$0xff]  ;;  %v11318_v21 = vld [vmem:[#allocation70_spill] sm:$0xff] }
 0x5b8   : > { %v4737_v35 = vpop.f32.mrf.mxu2  ;;  %v4642_v55 = vpop.f32.mrf.mxu0 }
 0x5b9   : > { %v4738_v61 = vadd.f32 %v4737_v35, %v4689_v63  ;;  %v4786_v32 = vpop.f32.mrf.mxu3  ;;  %v4643_v48 = vadd.f32 %v4642_v55, %v4594_v6  ;;  %v4691_v3 = vpop.f32.mrf.mxu1  ;;  %v8486_v55 = vld [vmem:[#allocation7 + $0xb0] sm:$0xff] }
 0x5ba   : > { %5810 = vmatpush.bf16.msra.mxu3 %v8486_v55 }
 0x5bb   : > { %v10338_v24 = vadd.f32 %v4786_v32, %v4738_v61  ;;  %v4692_v30 = vadd.f32 %v4691_v3, %v4643_v48  ;;  %4837 = vmatmul.bf16.gmra.mxu0 %v11317_v14  ;;  %v8478_v32 = vld [vmem:[#allocation7 + $0x70] sm:$0xff] }
 0x5bc   : > { %7847 = vmatmul.msk.bf16.gmra.mxu1 %vm2809_vm0, %v11318_v21  ;;  %5761 = vmatpush.bf16.msra.mxu2 %v8478_v32 }
 0x5bd   : > { %4935 = vmatmul.bf16.gmra.mxu2 %v11319_v5 }
 0x5be   : > { %4984 = vmatmul.bf16.gmra.mxu3 %v11214_v59 }
 0x5c0   : > { %v4740_v18 = vpop.f32.mrf.mxu2  ;;  %v4644_v7 = vpop.f32.mrf.mxu0 }
 0x5c1   : > { %v4741_v8 = vadd.f32 %v4740_v18, %v4692_v30  ;;  %v4789_v63 = vpop.f32.mrf.mxu3  ;;  %v4645_v25 = vadd.f32 %v4644_v7, %v4596_v10  ;;  %v4693_v6 = vpop.f32.mrf.mxu1  ;;  %v8470_v30 = vld [vmem:[#allocation7 + $0x30] sm:$0xff]  ;;  %v11320_v10 = vld [vmem:[#allocation18_spill] sm:$0xff] }
 0x5c2   : > { %5712 = vmatpush.bf16.msra.mxu1 %v8470_v30 }
 0x5c3   : > { %v10347_v35 = vadd.f32 %v4789_v63, %v4741_v8  ;;  %v4694_v61 = vadd.f32 %v4693_v6, %v4645_v25  ;;  %v11321_v8 = vld [vmem:[#allocation47_spill] sm:$0xff]  ;;  %v10358_v63 = vperm.slane %v10236_v23, 6 }
 0x5c4   : > { %v8477_v23 = vld [vmem:[#allocation7 + $0x68] sm:$0xff] }
 0x5c5   : > { %5762 = vmatpush.bf16.msra.mxu2 %v8477_v23 }
 0x5c8   : > { %v4742_v48 = vpop.f32.mrf.mxu2  ;;  %v4803_v16 = vpop.f32.mrf.mxu0 }
 0x5c9   : > { %v4743_v3 = vadd.f32 %v4742_v48, %v4694_v61  ;;  %v4791_v59 = vpop.f32.mrf.mxu3  ;;  %v4804_v5 = vadd.f32 %v4803_v16, %v10256_v60  ;;  %v4852_v29 = vpop.f32.mrf.mxu1 }
 0x5cb   : > { %v10350_v28 = vadd.f32 %v4791_v59, %v4743_v3  ;;  %v10352_v18 = vadd.f32 %v4852_v29, %v4804_v5  ;;  %4998 = vmatmul.bf16.vlgmr.msrb.gmra.mxu0 %v11279_v22  ;;  %v8485_v3 = vld [vmem:[#allocation7 + $0xa8] sm:$0xff] }
 0x5cc   : > { %5047 = vmatmul.bf16.vlgmr.msrb.gmra.mxu1 %v11320_v10  ;;  %5811 = vmatpush.bf16.msra.mxu3 %v8485_v3  ;;  %v8469_v10 = vld [vmem:[#allocation7 + $0x28] sm:$0xff] }
 0x5cd   : > { %5096 = vmatmul.bf16.vlgmr.msrb.gmra.mxu2 %v11321_v8  ;;  %5713 = vmatpush.bf16.msra.mxu1 %v8469_v10  ;;  %v8468_v10 = vld [vmem:[#allocation7 + $0x20] sm:$0xff] }
 0x5ce   : > { %5145 = vmatmul.bf16.vlgmr.msrb.gmra.mxu3 %v11149_v15 }
 0x5d0   : > { %v4901_v7 = vpop.f32.mrf.mxu2  ;;  %v4805_v6 = vpop.f32.mrf.mxu0 }
 0x5d1   : > { %v4902_v60 = vadd.f32 %v4901_v7, %v10358_v63  ;;  %v4950_v25 = vpop.f32.mrf.mxu3  ;;  %v4806_v61 = vadd.f32 %v4805_v6, %v10260_v38  ;;  %v4854_v32 = vpop.f32.mrf.mxu1  ;;  %v11322_v7 = vld [vmem:[#allocation50_spill] sm:$0xff]  ;;  %5714 = vmatpush.bf16.msra.mxu1 %v8468_v10  ;;  %v8467_v10 = vld [vmem:[#allocation7 + $0x18] sm:$0xff] }
 0x5d3   : > { %v10363_v55 = vadd.f32 %v4950_v25, %v4902_v60  ;;  %v10365_v22 = vadd.f32 %v4854_v32, %v4806_v61 }
 0x5d5   : > { %v5240_v48 = vpack.c.bf16 %v10365_v22, %v10352_v18  ;;  %5715 = vmatpush.bf16.msra.mxu1 %v8467_v10  ;;  %v8466_v10 = vld [vmem:[#allocation7 + $0x10] sm:$0xff] }
 0x5d8   : > { %v4903_v59 = vpop.f32.mrf.mxu2  ;;  %v4808_v5 = vpop.f32.mrf.mxu0 }
 0x5d9   : > { %v4904_v15 = vadd.f32 %v4903_v59, %v10358_v63  ;;  %v4952_v16 = vpop.f32.mrf.mxu3  ;;  %v4809_v29 = vadd.f32 %v4808_v5, %v10269_v11  ;;  %v4857_v38 = vpop.f32.mrf.mxu1  ;;  %v8484_v59 = vld [vmem:[#allocation7 + $0xa0] sm:$0xff]  ;;  %5716 = vmatpush.bf16.msra.mxu1 %v8466_v10  ;;  %v8465_v10 = vld [vmem:[#allocation7 + $0x8] sm:$0xff] }
 0x5da   : > { %5812 = vmatpush.bf16.msra.mxu3 %v8484_v59 }
 0x5db   : > { %v10371_v30 = vadd.f32 %v4952_v16, %v4904_v15  ;;  %v10373_v8 = vadd.f32 %v4857_v38, %v4809_v29  ;;  %5003 = vmatmul.bf16.gmra.mxu0 %v11243_v26 }
 0x5dc   : > { %5052 = vmatmul.bf16.gmra.mxu1 %v11283_v27  ;;  %v8476_v27 = vld [vmem:[#allocation7 + $0x60] sm:$0xff] }
 0x5dd   : > { %5101 = vmatmul.bf16.gmra.mxu2 %v11322_v7  ;;  %5717 = vmatpush.bf16.msra.mxu1 %v8465_v10  ;;  %v8464_v10 = vld [vmem:[#allocation7] sm:$0xff] }
 0x5de   : > { %5150 = vmatmul.bf16.gmra.mxu3 %v11152_v12  ;;  %5763 = vmatpush.bf16.msra.mxu2 %v8476_v27 }
 0x5e0   : > { %v4906_v60 = vpop.f32.mrf.mxu2  ;;  %v4810_v11 = vpop.f32.mrf.mxu0 }
 0x5e1   : > { %v4907_v25 = vadd.f32 %v4906_v60, %v10358_v63  ;;  %v4955_v6 = vpop.f32.mrf.mxu3  ;;  %v4811_v61 = vadd.f32 %v4810_v11, %v10273_v57  ;;  %v4859_v32 = vpop.f32.mrf.mxu1  ;;  %v11323_v60 = vld [vmem:[#allocation53_spill] sm:$0xff]  ;;  %5718 = vmatpush.bf16.msra.mxu1 %v8464_v10 }
 0x5e3   : > { %v10381_v23 = vadd.f32 %v4955_v6, %v4907_v25  ;;  %v10383_v3 = vadd.f32 %v4859_v32, %v4811_v61 }
 0x5e5   : > { %v5247_v26 = vpack.c.bf16 %v10383_v3, %v10373_v8 }
 0x5e8   : > { %v4908_v15 = vpop.f32.mrf.mxu2  ;;  %v4813_v5 = vpop.f32.mrf.mxu0 }
 0x5e9   : > { %v4909_v12 = vadd.f32 %v4908_v15, %v10358_v63  ;;  %v4957_v16 = vpop.f32.mrf.mxu3  ;;  %v4814_v29 = vadd.f32 %v4813_v5, %v10282_v51  ;;  %v4862_v57 = vpop.f32.mrf.mxu1  ;;  %v8483_v15 = vld [vmem:[#allocation7 + $0x98] sm:$0xff] }
 0x5ea   : > { %5813 = vmatpush.bf16.msra.mxu3 %v8483_v15 }
 0x5eb   : > { %v10389_v38 = vadd.f32 %v4957_v16, %v4909_v12  ;;  %v10391_v7 = vadd.f32 %v4862_v57, %v4814_v29  ;;  %5008 = vmatmul.bf16.gmra.mxu0 %v11248_v9 }
 0x5ec   : > { %5057 = vmatmul.bf16.gmra.mxu1 %v11286_v42  ;;  %v8475_v42 = vld [vmem:[#allocation7 + $0x58] sm:$0xff] }
 0x5ed   : > { %5106 = vmatmul.bf16.gmra.mxu2 %v11323_v60 }
 0x5ee   : > { %5155 = vmatmul.bf16.gmra.mxu3 %v11155_v58  ;;  %5764 = vmatpush.bf16.msra.mxu2 %v8475_v42 }
 0x5f0   : > { %v4911_v25 = vpop.f32.mrf.mxu2  ;;  %v4815_v51 = vpop.f32.mrf.mxu0 }
 0x5f1   : > { %v4912_v6 = vadd.f32 %v4911_v25, %v10358_v63  ;;  %v4960_v11 = vpop.f32.mrf.mxu3  ;;  %v4816_v61 = vadd.f32 %v4815_v51, %v10286_v47  ;;  %v4864_v32 = vpop.f32.mrf.mxu1  ;;  %v11324_v25 = vld [vmem:[#allocation56_spill] sm:$0xff] }
 0x5f3   : > { %v10399_v27 = vadd.f32 %v4960_v11, %v4912_v6  ;;  %v10401_v59 = vadd.f32 %v4864_v32, %v4816_v61 }
 0x5f5   : > { %v5254_v9 = vpack.c.bf16 %v10401_v59, %v10391_v7 }
 0x5f8   : > { %v4913_v12 = vpop.f32.mrf.mxu2  ;;  %v4818_v5 = vpop.f32.mrf.mxu0 }
 0x5f9   : > { %v4914_v58 = vadd.f32 %v4913_v12, %v10358_v63  ;;  %v4962_v16 = vpop.f32.mrf.mxu3  ;;  %v4819_v29 = vadd.f32 %v4818_v5, %v10295_v19  ;;  %v4867_v47 = vpop.f32.mrf.mxu1  ;;  %v8482_v12 = vld [vmem:[#allocation7 + $0x90] sm:$0xff] }
 0x5fa   : > { %5814 = vmatpush.bf16.msra.mxu3 %v8482_v12 }
 0x5fb   : > { %v10407_v57 = vadd.f32 %v4962_v16, %v4914_v58  ;;  %v10409_v60 = vadd.f32 %v4867_v47, %v4819_v29  ;;  %5013 = vmatmul.bf16.gmra.mxu0 %v11253_v43 }
 0x5fc   : > { %5062 = vmatmul.bf16.gmra.mxu1 %v11289_v41  ;;  %v8474_v41 = vld [vmem:[#allocation7 + $0x50] sm:$0xff] }
 0x5fd   : > { %5111 = vmatmul.bf16.gmra.mxu2 %v11324_v25 }
 0x5fe   : > { %5160 = vmatmul.bf16.gmra.mxu3 %v11305_v1  ;;  %5765 = vmatpush.bf16.msra.mxu2 %v8474_v41 }
 0x600   : > { %v4916_v6 = vpop.f32.mrf.mxu2  ;;  %v4820_v19 = vpop.f32.mrf.mxu0 }
 0x601   : > { %v4917_v11 = vadd.f32 %v4916_v6, %v10358_v63  ;;  %v4965_v51 = vpop.f32.mrf.mxu3  ;;  %v4821_v61 = vadd.f32 %v4820_v19, %v10299_v34  ;;  %v4869_v32 = vpop.f32.mrf.mxu1  ;;  %v11325_v6 = vld [vmem:[#allocation59_spill] sm:$0xff] }
 0x603   : > { %v10417_v42 = vadd.f32 %v4965_v51, %v4917_v11  ;;  %v10419_v15 = vadd.f32 %v4869_v32, %v4821_v61 }
 0x605   : > { %v5261_v43 = vpack.c.bf16 %v10419_v15, %v10409_v60 }
 0x608   : > { %v4918_v58 = vpop.f32.mrf.mxu2  ;;  %v4823_v5 = vpop.f32.mrf.mxu0 }
 0x609   : > { %v4919_v1 = vadd.f32 %v4918_v58, %v10358_v63  ;;  %v4967_v16 = vpop.f32.mrf.mxu3  ;;  %v4824_v29 = vadd.f32 %v4823_v5, %v10308_v2  ;;  %v4872_v34 = vpop.f32.mrf.mxu1  ;;  %v8481_v58 = vld [vmem:[#allocation7 + $0x88] sm:$0xff] }
 0x60a   : > { %5815 = vmatpush.bf16.msra.mxu3 %v8481_v58 }
 0x60b   : > { %v10425_v47 = vadd.f32 %v4967_v16, %v4919_v1  ;;  %v10427_v25 = vadd.f32 %v4872_v34, %v4824_v29  ;;  %5018 = vmatmul.bf16.gmra.mxu0 %v11258_v45 }
 0x60c   : > { %5067 = vmatmul.bf16.gmra.mxu1 %v11292_v36  ;;  %v8473_v36 = vld [vmem:[#allocation7 + $0x48] sm:$0xff] }
 0x60d   : > { %5116 = vmatmul.bf16.gmra.mxu2 %v11325_v6 }
 0x60e   : > { %5165 = vmatmul.bf16.gmra.mxu3 %v11308_v54  ;;  %5766 = vmatpush.bf16.msra.mxu2 %v8473_v36 }
 0x610   : > { %v4921_v11 = vpop.f32.mrf.mxu2  ;;  %v4825_v2 = vpop.f32.mrf.mxu0 }
 0x611   : > { %v4922_v51 = vadd.f32 %v4921_v11, %v10358_v63  ;;  %v4970_v19 = vpop.f32.mrf.mxu3  ;;  %v4826_v61 = vadd.f32 %v4825_v2, %v10312_v39  ;;  %v4874_v32 = vpop.f32.mrf.mxu1  ;;  %v11326_v11 = vld [vmem:[#allocation38_spill] sm:$0xff] }
 0x613   : > { %v10435_v41 = vadd.f32 %v4970_v19, %v4922_v51  ;;  %v10437_v12 = vadd.f32 %v4874_v32, %v4826_v61  ;;  %v11327_v51 = vld [vmem:[#allocation62_spill] sm:$0xff] }
 0x615   : > { %v5268_v45 = vpack.c.bf16 %v10437_v12, %v10427_v25 }
 0x618   : > { %v4923_v1 = vpop.f32.mrf.mxu2  ;;  %v4828_v5 = vpop.f32.mrf.mxu0 }
 0x619   : > { %v4924_v54 = vadd.f32 %v4923_v1, %v10358_v63  ;;  %v4972_v16 = vpop.f32.mrf.mxu3  ;;  %v4829_v29 = vadd.f32 %v4828_v5, %v10321_v31  ;;  %v4877_v39 = vpop.f32.mrf.mxu1 }
 0x61b   : > { %v10443_v34 = vadd.f32 %v4972_v16, %v4924_v54  ;;  %v10445_v6 = vadd.f32 %v4877_v39, %v4829_v29  ;;  %5023 = vmatmul.bf16.gmra.mxu0 %v11295_v49  ;;  %v8472_v54 = vld [vmem:[#allocation7 + $0x40] sm:$0xff] }
 0x61c   : > { %5072 = vmatmul.bf16.gmra.mxu1 %v11326_v11  ;;  %v8480_v16 = vld [vmem:[#allocation7 + $0x80] sm:$0xff]  ;;  %5767 = vmatpush.bf16.msra.mxu2 %v8472_v54 }
 0x61d   : > { %5121 = vmatmul.bf16.gmra.mxu2 %v11327_v51  ;;  %5816 = vmatpush.bf16.msra.mxu3 %v8480_v16 }
 0x61e   : > { %5170 = vmatmul.bf16.gmra.mxu3 %v11311_v33 }
 0x620   : > { %v4926_v19 = vpop.f32.mrf.mxu2  ;;  %v4830_v31 = vpop.f32.mrf.mxu0 }
 0x621   : > { %v4927_v2 = vadd.f32 %v4926_v19, %v10358_v63  ;;  %v4975_v61 = vpop.f32.mrf.mxu3  ;;  %v4831_v32 = vadd.f32 %v4830_v31, %v10325_v52  ;;  %v4879_v36 = vpop.f32.mrf.mxu1 }
 0x623   : > { %v10453_v58 = vadd.f32 %v4975_v61, %v4927_v2  ;;  %v10455_v1 = vadd.f32 %v4879_v36, %v4831_v32 }
 0x625   : > { %v5275_v49 = vpack.c.bf16 %v10455_v1, %v10445_v6 }
 0x628   : > { %v4928_v5 = vpop.f32.mrf.mxu2  ;;  %v4833_v39 = vpop.f32.mrf.mxu0 }
 0x629   : > { %v4929_v33 = vadd.f32 %v4928_v5, %v10358_v63  ;;  %v4977_v29 = vpop.f32.mrf.mxu3  ;;  %v4834_v52 = vadd.f32 %v4833_v39, %v10334_v62  ;;  %v4882_v11 = vpop.f32.mrf.mxu1  ;;  %v8511_v5 = vld [vmem:[#allocation7 + $0x178] sm:$0xff] }
 0x62a   : > { %5956 = vmatpush.bf16.msrb.mxu2 %v8511_v5 }
 0x62b   : > { %v10461_v51 = vadd.f32 %v4977_v29, %v4929_v33  ;;  %v10463_v19 = vadd.f32 %v4882_v11, %v4834_v52  ;;  %5028 = vmatmul.bf16.gmra.mxu0 %v11267_v13  ;;  %v8495_v13 = vld [vmem:[#allocation7 + $0xf8] sm:$0xff]  ;;  %v8512_v33 = vld [vmem:[#allocation7 + $0x180] sm:$0xff] }
 0x62c   : > { %5077 = vmatmul.bf16.gmra.mxu1 %v11185_v4  ;;  %5858 = vmatpush.bf16.msrb.mxu0 %v8495_v13  ;;  %v8503_v11 = vld [vmem:[#allocation7 + $0x138] sm:$0xff] }
 0x62d   : > { %5126 = vmatmul.bf16.gmra.mxu2 %v11228_v46  ;;  %6012 = vmatpush.bf16.msrb.mxu3 %v8512_v33 }
 0x62e   : > { %5175 = vmatmul.bf16.gmra.mxu3 %v11314_v40  ;;  %5907 = vmatpush.bf16.msrb.mxu1 %v8503_v11  ;;  %v8502_v11 = vld [vmem:[#allocation7 + $0x130] sm:$0xff] }
 0x630   : > { %v4931_v2 = vpop.f32.mrf.mxu2  ;;  %v4835_v32 = vpop.f32.mrf.mxu0 }
 0x631   : > { %v4932_v61 = vadd.f32 %v4931_v2, %v10358_v63  ;;  %v4980_v31 = vpop.f32.mrf.mxu3  ;;  %v4836_v62 = vadd.f32 %v4835_v32, %v10338_v24  ;;  %v4884_v36 = vpop.f32.mrf.mxu1 }
 0x632   : > { %5908 = vmatpush.bf16.msrb.mxu1 %v8502_v11 }
 0x633   : > { %v10471_v54 = vadd.f32 %v4980_v31, %v4932_v61  ;;  %v10473_v16 = vadd.f32 %v4884_v36, %v4836_v62  ;;  %v11328_v61 = vld [vmem:[#allocation68_spill] sm:$0xff] }
 0x635   : > { %v5282_v4 = vpack.c.bf16 %v10473_v16, %v10463_v19 }
 0x638   : > { %v4933_v46 = vpop.f32.mrf.mxu2  ;;  %v4838_v39 = vpop.f32.mrf.mxu0 }
 0x639   : > { %v4934_v40 = vadd.f32 %v4933_v46, %v10358_v63  ;;  %v4982_v29 = vpop.f32.mrf.mxu3  ;;  %v4839_v24 = vadd.f32 %v4838_v39, %v10347_v35  ;;  %v4887_v10 = vpop.f32.mrf.mxu1  ;;  %v8494_v46 = vld [vmem:[#allocation7 + $0xf0] sm:$0xff] }
 0x63a   : > { %5859 = vmatpush.bf16.msrb.mxu0 %v8494_v46 }
 0x63b   : > { %v10479_v52 = vadd.f32 %v4982_v29, %v4934_v40  ;;  %v10481_v2 = vadd.f32 %v4887_v10, %v4839_v24  ;;  %5033 = vmatmul.bf16.gmra.mxu0 %v11270_v20  ;;  %v8510_v20 = vld [vmem:[#allocation7 + $0x170] sm:$0xff] }
 0x63c   : > { %5082 = vmatmul.bf16.gmra.mxu1 %v11232_v0  ;;  %5957 = vmatpush.bf16.msrb.mxu2 %v8510_v20  ;;  %v11336_v20 = vld [vmem:[#allocation49_spill] sm:$0xff] }
 0x63d   : > { %5131 = vmatmul.bf16.gmra.mxu2 %v11328_v61 }
 0x63e   : > { %5180 = vmatmul.bf16.gmra.mxu3 %v11317_v14 }
 0x640   : > { %v4936_v31 = vpop.f32.mrf.mxu2  ;;  %v4840_v35 = vpop.f32.mrf.mxu0 }
 0x641   : > { %v4937_v32 = vadd.f32 %v4936_v31, %v10358_v63  ;;  %v4985_v62 = vpop.f32.mrf.mxu3  ;;  %v4841_v36 = vadd.f32 %v4840_v35, %v10350_v28  ;;  %v4889_v5 = vpop.f32.mrf.mxu1  ;;  %v11329_v31 = vld [vmem:[#allocation72_spill] sm:$0xff]  ;;  %v11332_v35 = vld [vmem:[#allocation51_spill] sm:$0xff] }
 0x643   : > { %v10489_v13 = vadd.f32 %v4985_v62, %v4937_v32  ;;  %v10491_v33 = vadd.f32 %v4889_v5, %v4841_v36  ;;  %v11330_v32 = vld [vmem:[#allocation71_spill] sm:$0xff]  ;;  %v11333_v36 = vld [vmem:[#allocation48_spill] sm:$0xff] }
 0x644   : > { %v11331_v62 = vpack.c.bf16 %v11329_v31, %v11330_v32  ;;  %v11334_v5 = vpack.c.bf16 %v11332_v35, %v11333_v36  ;;  %v8509_v31 = vld [vmem:[#allocation7 + $0x168] sm:$0xff] }
 0x645   : > { %v5289_v0 = vpack.c.bf16 %v10491_v33, %v10481_v2  ;;  %v8493_v32 = vld [vmem:[#allocation7 + $0xe8] sm:$0xff]  ;;  %5958 = vmatpush.bf16.msrb.mxu2 %v8509_v31 }
 0x646   : > { %5860 = vmatpush.bf16.msrb.mxu0 %v8493_v32 }
 0x648   : > { %v4938_v14 = vpop.f32.mrf.mxu2  ;;  %v4999_v39 = vpop.f32.mrf.mxu0 }
 0x649   : > { %v4939_v40 = vadd.f32 %v4938_v14, %v10358_v63  ;;  %v4987_v29 = vpop.f32.mrf.mxu3  ;;  %v5000_v24 = vadd.f32 %v4999_v39, %v10363_v55  ;;  %v5048_v28 = vpop.f32.mrf.mxu1  ;;  %v11335_v63 = vld [vmem:[#allocation52_spill] sm:$0xff] }
 0x64a   : > { %v11337_v46 = vpack.c.bf16 %v11335_v63, %v11336_v20  ;;  %v8501_v20 = vld [vmem:[#allocation7 + $0x128] sm:$0xff] }
 0x64b   : > { %v10497_v10 = vadd.f32 %v4987_v29, %v4939_v40  ;;  %v5049_v61 = vadd.f32 %v5048_v28, %v5000_v24  ;;  %7848 = vmatmul.msk.bf16.vlgmr.msra.gmra.mxu0 %vm2809_vm0, %v11193_v50  ;;  %5909 = vmatpush.bf16.msrb.mxu1 %v8501_v20 }
 0x64c   : > { %5719 = vmatmul.bf16.vlgmr.msra.gmra.mxu1 %v11331_v62 }
 0x64d   : > { %5768 = vmatmul.bf16.vlgmr.msra.gmra.mxu2 %v11334_v5 }
 0x64e   : > { %5817 = vmatmul.bf16.vlgmr.msra.gmra.mxu3 %v11337_v46 }
 0x650   : > { %v5097_v55 = vpop.f32.mrf.mxu2  ;;  %v5001_v29 = vpop.f32.mrf.mxu0 }
 0x651   : > { %v5098_v14 = vadd.f32 %v5097_v55, %v5049_v61  ;;  %v5146_v40 = vpop.f32.mrf.mxu3  ;;  %v5002_v39 = vadd.f32 %v5001_v29, %v10371_v30  ;;  %v5050_v50 = vpop.f32.mrf.mxu1  ;;  %v11338_v30 = vld [vmem:[#allocation74_spill] sm:$0xff]  ;;  %v11339_v55 = vld [vmem:[#allocation73_spill] sm:$0xff] }
 0x652   : > { %v11342_v29 = vld [vmem:[#allocation54_spill] sm:$0xff] }
 0x653   : > { %v10511_v24 = vadd.f32 %v5146_v40, %v5098_v14  ;;  %v5051_v28 = vadd.f32 %v5050_v50, %v5002_v39  ;;  %v11340_v14 = vpack.c.bf16 %v11338_v30, %v11339_v55  ;;  %v11341_v40 = vld [vmem:[#allocation87_spill] sm:$0xff]  ;;  %v8492_v30 = vld [vmem:[#allocation7 + $0xe0] sm:$0xff] }
 0x654   : > { %v11343_v39 = vpack.c.bf16 %v11341_v40, %v11342_v29  ;;  %v11344_v50 = vld [vmem:[#allocation99_spill] sm:$0xff]  ;;  %5861 = vmatpush.bf16.msrb.mxu0 %v8492_v30 }
 0x658   : > { %v5099_v62 = vpop.f32.mrf.mxu2  ;;  %v5004_v5 = vpop.f32.mrf.mxu0 }
 0x659   : > { %v5100_v35 = vadd.f32 %v5099_v62, %v5051_v28  ;;  %v5148_v36 = vpop.f32.mrf.mxu3  ;;  %v5005_v11 = vadd.f32 %v5004_v5, %v10381_v23  ;;  %v5053_v63 = vpop.f32.mrf.mxu1  ;;  %v11345_v28 = vld [vmem:[#allocation44_spill] sm:$0xff] }
 0x65a   : > { %v11346_v31 = vpack.c.bf16 %v11344_v50, %v11345_v28  ;;  %v8500_v50 = vld [vmem:[#allocation7 + $0x120] sm:$0xff] }
 0x65b   : > { %v10514_v61 = vadd.f32 %v5148_v36, %v5100_v35  ;;  %v5054_v46 = vadd.f32 %v5053_v63, %v5005_v11  ;;  %7849 = vmatmul.msk.bf16.gmra.mxu0 %vm2809_vm0, %v11196_v17  ;;  %v8508_v63 = vld [vmem:[#allocation7 + $0x160] sm:$0xff]  ;;  %5910 = vmatpush.bf16.msrb.mxu1 %v8500_v50 }
 0x65c   : > { %5724 = vmatmul.bf16.gmra.mxu1 %v11340_v14  ;;  %5959 = vmatpush.bf16.msrb.mxu2 %v8508_v63 }
 0x65d   : > { %5773 = vmatmul.bf16.gmra.mxu2 %v11343_v39 }
 0x65e   : > { %5822 = vmatmul.bf16.gmra.mxu3 %v11346_v31  ;;  %v11348_v31 = vld [vmem:[#allocation75_spill] sm:$0xff] }
 0x660   : > { %v5102_v23 = vpop.f32.mrf.mxu2  ;;  %v5006_v35 = vpop.f32.mrf.mxu0 }
 0x661   : > { %v5103_v32 = vadd.f32 %v5102_v23, %v5054_v46  ;;  %v5151_v62 = vpop.f32.mrf.mxu3  ;;  %v5007_v36 = vadd.f32 %v5006_v35, %v10389_v38  ;;  %v5055_v17 = vpop.f32.mrf.mxu1  ;;  %v11347_v38 = vld [vmem:[#allocation76_spill] sm:$0xff] }
 0x662   : > { %v11349_v23 = vpack.c.bf16 %v11347_v38, %v11348_v31 }
 0x663   : > { %v10528_v5 = vadd.f32 %v5151_v62, %v5103_v32  ;;  %v5056_v11 = vadd.f32 %v5055_v17, %v5007_v36  ;;  %v11350_v32 = vld [vmem:[#allocation89_spill] sm:$0xff]  ;;  %v11351_v62 = vld [vmem:[#allocation88_spill] sm:$0xff] }
 0x664   : > { %v11352_v35 = vpack.c.bf16 %v11350_v32, %v11351_v62  ;;  %v11353_v36 = vld [vmem:[#allocation101_spill] sm:$0xff]  ;;  %v11354_v17 = vld [vmem:[#allocation100_spill] sm:$0xff] }
 0x668   : > { %v5104_v55 = vpop.f32.mrf.mxu2  ;;  %v5009_v29 = vpop.f32.mrf.mxu0 }
 0x669   : > { %v5105_v14 = vadd.f32 %v5104_v55, %v5056_v11  ;;  %v5153_v40 = vpop.f32.mrf.mxu3  ;;  %v5010_v20 = vadd.f32 %v5009_v29, %v10399_v27  ;;  %v5058_v39 = vpop.f32.mrf.mxu1  ;;  %v11355_v11 = vpack.c.bf16 %v11353_v36, %v11354_v17  ;;  %v11357_v17 = vld [vmem:[#allocation77_spill] sm:$0xff] }
 0x66b   : > { %v10531_v46 = vadd.f32 %v5153_v40, %v5105_v14  ;;  %v5059_v28 = vadd.f32 %v5058_v39, %v5010_v20  ;;  %7850 = vmatmul.msk.bf16.gmra.mxu0 %vm2809_vm0, %v11303_v56  ;;  %v8507_v20 = vld [vmem:[#allocation7 + $0x158] sm:$0xff] }
 0x66c   : > { %5729 = vmatmul.bf16.gmra.mxu1 %v11349_v23  ;;  %v8491_v39 = vld [vmem:[#allocation7 + $0xd8] sm:$0xff]  ;;  %5960 = vmatpush.bf16.msrb.mxu2 %v8507_v20 }
 0x66d   : > { %5778 = vmatmul.bf16.gmra.mxu2 %v11352_v35  ;;  %5862 = vmatpush.bf16.msrb.mxu0 %v8491_v39  ;;  %v8499_v35 = vld [vmem:[#allocation7 + $0x118] sm:$0xff] }
 0x66e   : > { %5827 = vmatmul.bf16.gmra.mxu3 %v11355_v11  ;;  %5911 = vmatpush.bf16.msrb.mxu1 %v8499_v35 }
 0x670   : > { %v5107_v27 = vpop.f32.mrf.mxu2  ;;  %v5011_v55 = vpop.f32.mrf.mxu0 }
 0x671   : > { %v5108_v63 = vadd.f32 %v5107_v27, %v5059_v28  ;;  %v5156_v30 = vpop.f32.mrf.mxu3  ;;  %v5012_v14 = vadd.f32 %v5011_v55, %v10407_v57  ;;  %v5060_v56 = vpop.f32.mrf.mxu1  ;;  %v11356_v57 = vld [vmem:[#allocation78_spill] sm:$0xff]  ;;  %v11359_v27 = vld [vmem:[#allocation91_spill] sm:$0xff] }
 0x672   : > { %v11358_v11 = vpack.c.bf16 %v11356_v57, %v11357_v17  ;;  %v11362_v55 = vld [vmem:[#allocation103_spill] sm:$0xff] }
 0x673   : > { %v10545_v40 = vadd.f32 %v5156_v30, %v5108_v63  ;;  %v5061_v29 = vadd.f32 %v5060_v56, %v5012_v14  ;;  %v11360_v63 = vld [vmem:[#allocation90_spill] sm:$0xff] }
 0x674   : > { %v11361_v30 = vpack.c.bf16 %v11359_v27, %v11360_v63  ;;  %v11363_v14 = vld [vmem:[#allocation102_spill] sm:$0xff]  ;;  %v8498_v63 = vld [vmem:[#allocation7 + $0x110] sm:$0xff] }
 0x675   : > { %v11364_v56 = vpack.c.bf16 %v11362_v55, %v11363_v14  ;;  %v11366_v55 = vld [vmem:[#allocation79_spill] sm:$0xff]  ;;  %5912 = vmatpush.bf16.msrb.mxu1 %v8498_v63 }
 0x678   : > { %v5109_v38 = vpop.f32.mrf.mxu2  ;;  %v5014_v32 = vpop.f32.mrf.mxu0 }
 0x679   : > { %v5110_v31 = vadd.f32 %v5109_v38, %v5061_v29  ;;  %v5158_v23 = vpop.f32.mrf.mxu3  ;;  %v5015_v50 = vadd.f32 %v5014_v32, %v10417_v42  ;;  %v5063_v62 = vpop.f32.mrf.mxu1  ;;  %v8506_v32 = vld [vmem:[#allocation7 + $0x150] sm:$0xff] }
 0x67a   : > { %5961 = vmatpush.bf16.msrb.mxu2 %v8506_v32 }
 0x67b   : > { %v10548_v28 = vadd.f32 %v5158_v23, %v5110_v31  ;;  %v5064_v36 = vadd.f32 %v5063_v62, %v5015_v50  ;;  %7851 = vmatmul.msk.bf16.gmra.mxu0 %vm2809_vm0, %v11306_v44  ;;  %v8490_v50 = vld [vmem:[#allocation7 + $0xd0] sm:$0xff] }
 0x67c   : > { %5734 = vmatmul.bf16.gmra.mxu1 %v11358_v11  ;;  %5863 = vmatpush.bf16.msrb.mxu0 %v8490_v50 }
 0x67d   : > { %5783 = vmatmul.bf16.gmra.mxu2 %v11361_v30 }
 0x67e   : > { %5832 = vmatmul.bf16.gmra.mxu3 %v11364_v56  ;;  %v11368_v56 = vld [vmem:[#allocation93_spill] sm:$0xff] }
 0x680   : > { %v5112_v42 = vpop.f32.mrf.mxu2  ;;  %v5016_v39 = vpop.f32.mrf.mxu0 }
 0x681   : > { %v5113_v29 = vadd.f32 %v5112_v42, %v5064_v36  ;;  %v5161_v20 = vpop.f32.mrf.mxu3  ;;  %v5017_v38 = vadd.f32 %v5016_v39, %v10425_v47  ;;  %v5065_v44 = vpop.f32.mrf.mxu1  ;;  %v11365_v47 = vld [vmem:[#allocation80_spill] sm:$0xff] }
 0x682   : > { %v11367_v14 = vpack.c.bf16 %v11365_v47, %v11366_v55  ;;  %v11369_v42 = vld [vmem:[#allocation92_spill] sm:$0xff] }
 0x683   : > { %v10562_v31 = vadd.f32 %v5161_v20, %v5113_v29  ;;  %v5066_v23 = vadd.f32 %v5065_v44, %v5017_v38  ;;  %v11370_v29 = vpack.c.bf16 %v11368_v56, %v11369_v42  ;;  %v11371_v20 = vld [vmem:[#allocation105_spill] sm:$0xff]  ;;  %v11372_v39 = vld [vmem:[#allocation104_spill] sm:$0xff]  ;;  %v8497_v56 = vld [vmem:[#allocation7 + $0x108] sm:$0xff] }
 0x684   : > { %v11373_v38 = vpack.c.bf16 %v11371_v20, %v11372_v39  ;;  %v11376_v20 = vld [vmem:[#allocation81_spill] sm:$0xff]  ;;  %5913 = vmatpush.bf16.msrb.mxu1 %v8497_v56 }
 0x688   : > { %v5114_v62 = vpop.f32.mrf.mxu2  ;;  %v5019_v11 = vpop.f32.mrf.mxu0 }
 0x689   : > { %v5115_v57 = vadd.f32 %v5114_v62, %v5066_v23  ;;  %v5163_v17 = vpop.f32.mrf.mxu3  ;;  %v5020_v35 = vadd.f32 %v5019_v11, %v10435_v41  ;;  %v5068_v27 = vpop.f32.mrf.mxu1  ;;  %v8489_v11 = vld [vmem:[#allocation7 + $0xc8] sm:$0xff] }
 0x68a   : > { %5864 = vmatpush.bf16.msrb.mxu0 %v8489_v11 }
 0x68b   : > { %v10565_v36 = vadd.f32 %v5163_v17, %v5115_v57  ;;  %v5069_v30 = vadd.f32 %v5068_v27, %v5020_v35  ;;  %7852 = vmatmul.msk.bf16.gmra.mxu0 %vm2809_vm0, %v11309_v37  ;;  %v8505_v17 = vld [vmem:[#allocation7 + $0x148] sm:$0xff] }
 0x68c   : > { %5739 = vmatmul.bf16.gmra.mxu1 %v11367_v14  ;;  %5962 = vmatpush.bf16.msrb.mxu2 %v8505_v17 }
 0x68d   : > { %5788 = vmatmul.bf16.gmra.mxu2 %v11370_v29  ;;  %v11375_v29 = vld [vmem:[#allocation82_spill] sm:$0xff] }
 0x68e   : > { %5837 = vmatmul.bf16.gmra.mxu3 %v11373_v38  ;;  %v11377_v39 = vpack.c.bf16 %v11375_v29, %v11376_v20  ;;  %v11378_v38 = vld [vmem:[#allocation95_spill] sm:$0xff] }
 0x690   : > { %v5117_v41 = vpop.f32.mrf.mxu2  ;;  %v5021_v32 = vpop.f32.mrf.mxu0 }
 0x691   : > { %v5118_v44 = vadd.f32 %v5117_v41, %v5069_v30  ;;  %v5166_v23 = vpop.f32.mrf.mxu3  ;;  %v5022_v50 = vadd.f32 %v5021_v32, %v10443_v34  ;;  %v5070_v37 = vpop.f32.mrf.mxu1  ;;  %v11374_v34 = vld [vmem:[#allocation64_spill] sm:$0xff]  ;;  %v11379_v41 = vld [vmem:[#allocation94_spill] sm:$0xff] }
 0x692   : > { %v11382_v32 = vld [vmem:[#allocation106_spill] sm:$0xff] }
 0x693   : > { %v10579_v62 = vadd.f32 %v5166_v23, %v5118_v44  ;;  %v5071_v57 = vadd.f32 %v5070_v37, %v5022_v50  ;;  %v11380_v44 = vpack.c.bf16 %v11378_v38, %v11379_v41  ;;  %v11381_v23 = vld [vmem:[#allocation107_spill] sm:$0xff]  ;;  %v11384_v41 = vld [vmem:[#allocation84_spill] sm:$0xff] }
 0x694   : > { %v11383_v50 = vpack.c.bf16 %v11381_v23, %v11382_v32  ;;  %v11387_v32 = vld [vmem:[#allocation42_spill] sm:$0xff] }
 0x698   : > { %v5119_v35 = vpop.f32.mrf.mxu2  ;;  %v5024_v55 = vpop.f32.mrf.mxu0 }
 0x699   : > { %v5120_v27 = vadd.f32 %v5119_v35, %v5071_v57  ;;  %v5168_v47 = vpop.f32.mrf.mxu3  ;;  %v5025_v63 = vadd.f32 %v5024_v55, %v10453_v58  ;;  %v5073_v14 = vpop.f32.mrf.mxu1  ;;  %v8504_v55 = vld [vmem:[#allocation7 + $0x140] sm:$0xff] }
 0x69a   : > { %5963 = vmatpush.bf16.msrb.mxu2 %v8504_v55 }
 0x69b   : > { %v10582_v30 = vadd.f32 %v5168_v47, %v5120_v27  ;;  %v5074_v42 = vadd.f32 %v5073_v14, %v5025_v63  ;;  %7853 = vmatmul.msk.bf16.gmra.mxu0 %vm2809_vm0, %v11374_v34  ;;  %v8488_v63 = vld [vmem:[#allocation7 + $0xc0] sm:$0xff] }
 0x69c   : > { %5744 = vmatmul.bf16.gmra.mxu1 %v11377_v39  ;;  %5865 = vmatpush.bf16.msrb.mxu0 %v8488_v63  ;;  %v8496_v39 = vld [vmem:[#allocation7 + $0x100] sm:$0xff] }
 0x69d   : > { %5793 = vmatmul.bf16.gmra.mxu2 %v11380_v44  ;;  %5914 = vmatpush.bf16.msrb.mxu1 %v8496_v39  ;;  %v11385_v44 = vld [vmem:[#allocation83_spill] sm:$0xff] }
 0x69e   : > { %5842 = vmatmul.bf16.gmra.mxu3 %v11383_v50  ;;  %v11386_v23 = vpack.c.bf16 %v11384_v41, %v11385_v44  ;;  %v11388_v50 = vld [vmem:[#allocation96_spill] sm:$0xff] }
 0x6a0   : > { %v5122_v58 = vpop.f32.mrf.mxu2  ;;  %v5026_v17 = vpop.f32.mrf.mxu0 }
 0x6a1   : > { %v5123_v37 = vadd.f32 %v5122_v58, %v5074_v42  ;;  %v5171_v57 = vpop.f32.mrf.mxu3  ;;  %v5027_v11 = vadd.f32 %v5026_v17, %v10461_v51  ;;  %v5075_v35 = vpop.f32.mrf.mxu1  ;;  %v11389_v58 = vpack.c.bf16 %v11387_v32, %v11388_v50  ;;  %v11396_v32 = vld [vmem:[#allocation98_spill] sm:$0xff]  ;;  %v11397_v50 = vld [vmem:[#allocation97_spill] sm:$0xff] }
 0x6a3   : > { %v10596_v27 = vadd.f32 %v5171_v57, %v5123_v37  ;;  %v5076_v47 = vadd.f32 %v5075_v35, %v5027_v11  ;;  %v11390_v37 = vld [vmem:[#allocation65_spill] sm:$0xff]  ;;  %v11391_v57 = vld [vmem:[#allocation108_spill] sm:$0xff] }
 0x6a4   : > { %v11392_v17 = vpack.c.bf16 %v11390_v37, %v11391_v57  ;;  %v11399_v37 = vld [vmem:[#allocation46_spill] sm:$0xff]  ;;  %v11400_v57 = vld [vmem:[#allocation109_spill] sm:$0xff] }
 0x6a8   : > { %v5124_v14 = vpop.f32.mrf.mxu2  ;;  %v5029_v20 = vpop.f32.mrf.mxu0 }
 0x6a9   : > { %v5125_v34 = vadd.f32 %v5124_v14, %v5076_v47  ;;  %v5173_v29 = vpop.f32.mrf.mxu3  ;;  %v5030_v56 = vadd.f32 %v5029_v20, %v10471_v54  ;;  %v5078_v42 = vpop.f32.mrf.mxu1 }
 0x6ab   : > { %v10599_v38 = vadd.f32 %v5173_v29, %v5125_v34  ;;  %v5079_v51 = vadd.f32 %v5078_v42, %v5030_v56  ;;  %7854 = vmatmul.msk.bf16.gmra.mxu0 %vm2809_vm0, %v11315_v53 }
 0x6ac   : > { %5749 = vmatmul.bf16.gmra.mxu1 %v11386_v23  ;;  %v11394_v23 = vld [vmem:[#allocation85_spill] sm:$0xff] }
 0x6ad   : > { %5798 = vmatmul.bf16.gmra.mxu2 %v11389_v58  ;;  %v11398_v58 = vpack.c.bf16 %v11396_v32, %v11397_v50  ;;  %v11406_v32 = vld [vmem:[#allocation16_spill] sm:$0xff] }
 0x6ae   : > { %5847 = vmatmul.bf16.gmra.mxu3 %v11392_v17  ;;  %v11401_v17 = vpack.c.bf16 %v11399_v37, %v11400_v57 }
 0x6b0   : > { %v5127_v54 = vpop.f32.mrf.mxu2  ;;  %v5031_v47 = vpop.f32.mrf.mxu0 }
 0x6b1   : > { %v5128_v11 = vadd.f32 %v5127_v54, %v5079_v51  ;;  %v5176_v35 = vpop.f32.mrf.mxu3  ;;  %v5032_v55 = vadd.f32 %v5031_v47, %v10479_v52  ;;  %v5080_v63 = vpop.f32.mrf.mxu1  ;;  %v11393_v51 = vld [vmem:[#allocation86_spill] sm:$0xff] }
 0x6b2   : > { %v11395_v52 = vpack.c.bf16 %v11393_v51, %v11394_v23  ;;  %v11402_v51 = vld [vmem:[#allocation110_spill] sm:$0xff]  ;;  %v11403_v23 = vld [vmem:[#allocation15_spill] sm:$0xff] }
 0x6b3   : > { %v10613_v53 = vadd.f32 %v5176_v35, %v5128_v11  ;;  %v5081_v14 = vadd.f32 %v5080_v63, %v5032_v55 }
 0x6b8   : > { %v5129_v34 = vpop.f32.mrf.mxu2  ;;  %v5034_v39 = vpop.f32.mrf.mxu0 }
 0x6b9   : > { %v5130_v29 = vadd.f32 %v5129_v34, %v5081_v14  ;;  %v5178_v20 = vpop.f32.mrf.mxu3  ;;  %v5035_v56 = vadd.f32 %v5034_v39, %v10489_v13  ;;  %v5083_v42 = vpop.f32.mrf.mxu1 }
 0x6bb   : > { %v10616_v41 = vadd.f32 %v5178_v20, %v5130_v29  ;;  %v5084_v44 = vadd.f32 %v5083_v42, %v5035_v56  ;;  %7855 = vmatmul.msk.bf16.gmra.mxu0 %vm2809_vm0, %v11318_v21  ;;  %v10634_v42 = vld [vmem:[#allocation8] ss:$0 sm:$0xff] }
 0x6bc   : > { %5754 = vmatmul.bf16.gmra.mxu1 %v11395_v52  ;;  %v11405_v52 = vld [vmem:[#allocation17_spill] sm:$0xff] }
 0x6bd   : > { %5803 = vmatmul.bf16.gmra.mxu2 %v11398_v58 }
 0x6be   : > { %5852 = vmatmul.bf16.gmra.mxu3 %v11401_v17 }
 0x6c0   : > { %v5132_v13 = vpop.f32.mrf.mxu2  ;;  %v5036_v35 = vpop.f32.mrf.mxu0 }
 0x6c1   : > { %v5133_v54 = vadd.f32 %v5132_v13, %v5084_v44  ;;  %v5181_v11 = vpop.f32.mrf.mxu3  ;;  %v5037_v47 = vadd.f32 %v5036_v35, %v10497_v10  ;;  %v5085_v55 = vpop.f32.mrf.mxu1  ;;  %v11404_v44 = vpack.c.bf16 %v11402_v51, %v11403_v23  ;;  %v11407_v10 = vpack.c.bf16 %v11405_v52, %v11406_v32 }
 0x6c3   : > { %v10630_v21 = vadd.f32 %v5181_v11, %v5133_v54  ;;  %v5086_v63 = vadd.f32 %v5085_v55, %v5037_v47 }
 0x6c8   : > { %v5134_v14 = vpop.f32.mrf.mxu2  ;;  %v5195_v20 = vpop.f32.mrf.mxu0 }
 0x6c9   : > { %v5135_v34 = vadd.f32 %v5134_v14, %v5086_v63  ;;  %v5183_v29 = vpop.f32.mrf.mxu3  ;;  %v5720_v39 = vpop.f32.mrf.mxu1  ;;  %v5196_v13 = vadd.f32 %v5195_v20, %v10511_v24  ;;  %v11412_v20 = vld [vmem:[#allocation22_spill] sm:$0xff] }
 0x6ca   : > { %v5721_v50 = vadd.f32 %v10634_v42, %v5720_v39  ;;  %v11409_v39 = vld [vmem:[#allocation19_spill] sm:$0xff] }
 0x6cb   : > { %v10632_v56 = vadd.f32 %v5183_v29, %v5135_v34  ;;  %5866 = vmatmul.bf16.vlgmr.msrb.gmra.mxu0 %v11404_v44  ;;  %v11408_v29 = vld [vmem:[#allocation20_spill] sm:$0xff] }
 0x6cc   : > { %5915 = vmatmul.bf16.vlgmr.msrb.gmra.mxu1 %v11407_v10  ;;  %v11410_v24 = vpack.c.bf16 %v11408_v29, %v11409_v39 }
 0x6cd   : > { %5964 = vmatmul.bf16.vlgmr.msrb.gmra.mxu2 %v5240_v48 }
 0x6d0   : > { %v5769_v58 = vpop.f32.mrf.mxu2  ;;  %v5197_v17 = vpop.f32.mrf.mxu0 }
 0x6d1   : > { %v5770_v37 = vadd.f32 %v5769_v58, %v5721_v50  ;;  %v5818_v57 = vpop.f32.mrf.mxu3  ;;  %v5198_v54 = vadd.f32 %v5197_v17, %v10514_v61  ;;  %v5722_v11 = vpop.f32.mrf.mxu1  ;;  %v11411_v61 = vld [vmem:[#allocation112_spill] sm:$0xff] }
 0x6d2   : > { %v5723_v55 = vadd.f32 %v10634_v42, %v5722_v11  ;;  %v11413_v51 = vpack.c.bf16 %v11411_v61, %v11412_v20 }
 0x6d3   : > { %v10648_v35 = vadd.f32 %v5818_v57, %v5770_v37  ;;  %v5241_v47 = vpack.c.bf16 %v5198_v54, %v5196_v13 }
 0x6d5   : > { %8052 = vmatmul.msk.bf16.vlgmr.msrb.gmra.mxu3 %vm2809_vm0, %v5241_v47 }
 0x6d8   : > { %v5771_v18 = vpop.f32.mrf.mxu2  ;;  %v5200_v63 = vpop.f32.mrf.mxu0 }
 0x6d9   : > { %v5772_v22 = vadd.f32 %v5771_v18, %v5723_v55  ;;  %v5820_v48 = vpop.f32.mrf.mxu3  ;;  %v5725_v14 = vpop.f32.mrf.mxu1  ;;  %v5201_v50 = vadd.f32 %v5200_v63, %v10528_v5  ;;  %v11414_v55 = vld [vmem:[#allocation24_spill] sm:$0xff]  ;;  %v11415_v18 = vld [vmem:[#allocation21_spill] sm:$0xff] }
 0x6da   : > { %v5726_v23 = vadd.f32 %v10634_v42, %v5725_v14  ;;  %v11416_v5 = vpack.c.bf16 %v11414_v55, %v11415_v18 }
 0x6db   : > { %v10652_v34 = vadd.f32 %v5820_v48, %v5772_v22  ;;  %5871 = vmatmul.bf16.gmra.mxu0 %v11410_v24  ;;  %v11418_v22 = vld [vmem:[#allocation26_spill] sm:$0xff] }
 0x6dc   : > { %5920 = vmatmul.bf16.gmra.mxu1 %v11413_v51 }
 0x6dd   : > { %5969 = vmatmul.bf16.gmra.mxu2 %v5247_v26 }
 0x6e0   : > { %v5774_v44 = vpop.f32.mrf.mxu2  ;;  %v5202_v10 = vpop.f32.mrf.mxu0 }
 0x6e1   : > { %v5775_v52 = vadd.f32 %v5774_v44, %v5726_v23  ;;  %v5823_v32 = vpop.f32.mrf.mxu3  ;;  %v5203_v58 = vadd.f32 %v5202_v10, %v10531_v46  ;;  %v5727_v37 = vpop.f32.mrf.mxu1  ;;  %v11417_v46 = vld [vmem:[#allocation113_spill] sm:$0xff] }
 0x6e2   : > { %v5728_v13 = vadd.f32 %v10634_v42, %v5727_v37  ;;  %v11419_v48 = vpack.c.bf16 %v11417_v46, %v11418_v22  ;;  %v11421_v37 = vld [vmem:[#allocation25_spill] sm:$0xff] }
 0x6e3   : > { %v10666_v57 = vadd.f32 %v5823_v32, %v5775_v52  ;;  %v5248_v17 = vpack.c.bf16 %v5203_v58, %v5201_v50  ;;  %v11420_v58 = vld [vmem:[#allocation28_spill] sm:$0xff] }
 0x6e5   : > { %8053 = vmatmul.msk.bf16.gmra.mxu3 %vm2809_vm0, %v5248_v17  ;;  %v11424_v17 = vld [vmem:[#allocation30_spill] sm:$0xff] }
 0x6e8   : > { %v5776_v8 = vpop.f32.mrf.mxu2  ;;  %v5205_v54 = vpop.f32.mrf.mxu0 }
 0x6e9   : > { %v5777_v3 = vadd.f32 %v5776_v8, %v5728_v13  ;;  %v5825_v26 = vpop.f32.mrf.mxu3  ;;  %v5730_v11 = vpop.f32.mrf.mxu1  ;;  %v5206_v61 = vadd.f32 %v5205_v54, %v10545_v40  ;;  %v11422_v40 = vpack.c.bf16 %v11420_v58, %v11421_v37 }
 0x6ea   : > { %v5731_v63 = vadd.f32 %v10634_v42, %v5730_v11 }
 0x6eb   : > { %v10670_v47 = vadd.f32 %v5825_v26, %v5777_v3  ;;  %5876 = vmatmul.bf16.gmra.mxu0 %v11416_v5 }
 0x6ec   : > { %5925 = vmatmul.bf16.gmra.mxu1 %v11419_v48 }
 0x6ed   : > { %5974 = vmatmul.bf16.gmra.mxu2 %v5254_v9 }
 0x6f0   : > { %v5779_v14 = vpop.f32.mrf.mxu2  ;;  %v5207_v24 = vpop.f32.mrf.mxu0 }
 0x6f1   : > { %v5780_v29 = vadd.f32 %v5779_v14, %v5731_v63  ;;  %v5828_v39 = vpop.f32.mrf.mxu3  ;;  %v5208_v20 = vadd.f32 %v5207_v24, %v10548_v28  ;;  %v5732_v51 = vpop.f32.mrf.mxu1  ;;  %v11423_v28 = vld [vmem:[#allocation114_spill] sm:$0xff]  ;;  %v11427_v24 = vld [vmem:[#allocation29_spill] sm:$0xff] }
 0x6f2   : > { %v5733_v52 = vadd.f32 %v10634_v42, %v5732_v51  ;;  %v11425_v13 = vpack.c.bf16 %v11423_v28, %v11424_v17 }
 0x6f3   : > { %v10684_v23 = vadd.f32 %v5828_v39, %v5780_v29  ;;  %v5255_v44 = vpack.c.bf16 %v5208_v20, %v5206_v61  ;;  %v11426_v39 = vld [vmem:[#allocation32_spill] sm:$0xff]  ;;  %v11430_v61 = vld [vmem:[#allocation34_spill] sm:$0xff] }
 0x6f5   : > { %8054 = vmatmul.msk.bf16.gmra.mxu3 %vm2809_vm0, %v5255_v44 }
 0x6f8   : > { %v5781_v7 = vpop.f32.mrf.mxu2  ;;  %v5210_v32 = vpop.f32.mrf.mxu0 }
 0x6f9   : > { %v5782_v59 = vadd.f32 %v5781_v7, %v5733_v52  ;;  %v5830_v9 = vpop.f32.mrf.mxu3  ;;  %v5735_v10 = vpop.f32.mrf.mxu1  ;;  %v5211_v55 = vadd.f32 %v5210_v32, %v10562_v31  ;;  %v11428_v31 = vpack.c.bf16 %v11426_v39, %v11427_v24 }
 0x6fa   : > { %v5736_v8 = vadd.f32 %v10634_v42, %v5735_v10 }
 0x6fb   : > { %v10688_v50 = vadd.f32 %v5830_v9, %v5782_v59  ;;  %5881 = vmatmul.bf16.gmra.mxu0 %v11422_v40 }
 0x6fc   : > { %5930 = vmatmul.bf16.gmra.mxu1 %v11425_v13 }
 0x6fd   : > { %5979 = vmatmul.bf16.gmra.mxu2 %v5261_v43 }
 0x700   : > { %v5784_v3 = vpop.f32.mrf.mxu2  ;;  %v5212_v11 = vpop.f32.mrf.mxu0 }
 0x701   : > { %v5785_v26 = vadd.f32 %v5784_v3, %v5736_v8  ;;  %v5833_v54 = vpop.f32.mrf.mxu3  ;;  %v5213_v18 = vadd.f32 %v5212_v11, %v10565_v36  ;;  %v5737_v5 = vpop.f32.mrf.mxu1  ;;  %v11429_v36 = vld [vmem:[#allocation115_spill] sm:$0xff]  ;;  %v11432_v8 = vld [vmem:[#allocation36_spill] sm:$0xff]  ;;  %v11433_v3 = vld [vmem:[#allocation33_spill] sm:$0xff] }
 0x702   : > { %v5738_v48 = vadd.f32 %v10634_v42, %v5737_v5  ;;  %v11431_v20 = vpack.c.bf16 %v11429_v36, %v11430_v61  ;;  %v11438_v36 = vld [vmem:[#allocation41_spill] sm:$0xff]  ;;  %v11439_v61 = vld [vmem:[#allocation40_spill] sm:$0xff] }
 0x703   : > { %v10702_v46 = vadd.f32 %v5833_v54, %v5785_v26  ;;  %v5262_v22 = vpack.c.bf16 %v5213_v18, %v5211_v55  ;;  %v11436_v26 = vld [vmem:[#allocation37_spill] sm:$0xff] }
 0x705   : > { %8055 = vmatmul.msk.bf16.gmra.mxu3 %vm2809_vm0, %v5262_v22 }
 0x708   : > { %v5786_v60 = vpop.f32.mrf.mxu2  ;;  %v5215_v63 = vpop.f32.mrf.mxu0 }
 0x709   : > { %v5787_v15 = vadd.f32 %v5786_v60, %v5738_v48  ;;  %v5835_v43 = vpop.f32.mrf.mxu3  ;;  %v5740_v14 = vpop.f32.mrf.mxu1  ;;  %v5216_v9 = vadd.f32 %v5215_v63, %v10579_v62  ;;  %v11434_v62 = vpack.c.bf16 %v11432_v8, %v11433_v3  ;;  %v11444_v8 = vld [vmem:[#allocation111_spill] sm:$0xff]  ;;  %v11445_v3 = vld [vmem:[#allocation45_spill] sm:$0xff] }
 0x70a   : > { %v5741_v51 = vadd.f32 %v10634_v42, %v5740_v14 }
 0x70b   : > { %v10706_v29 = vadd.f32 %v5835_v43, %v5787_v15  ;;  %5886 = vmatmul.bf16.gmra.mxu0 %v11428_v31 }
 0x70c   : > { %5935 = vmatmul.bf16.gmra.mxu1 %v11431_v20  ;;  %v11442_v20 = vld [vmem:[#allocation117_spill] sm:$0xff] }
 0x70d   : > { %5984 = vmatmul.bf16.gmra.mxu2 %v5268_v45 }
 0x710   : > { %v5789_v44 = vpop.f32.mrf.mxu2  ;;  %v5217_v59 = vpop.f32.mrf.mxu0 }
 0x711   : > { %v5790_v52 = vadd.f32 %v5789_v44, %v5741_v51  ;;  %v5838_v7 = vpop.f32.mrf.mxu3  ;;  %v5218_v32 = vadd.f32 %v5217_v59, %v10582_v30  ;;  %v5742_v10 = vpop.f32.mrf.mxu1  ;;  %v11435_v30 = vld [vmem:[#allocation116_spill] sm:$0xff] }
 0x712   : > { %v5743_v40 = vadd.f32 %v10634_v42, %v5742_v10  ;;  %v11437_v54 = vpack.c.bf16 %v11435_v30, %v11436_v26 }
 0x713   : > { %v10720_v58 = vadd.f32 %v5838_v7, %v5790_v52  ;;  %v5269_v37 = vpack.c.bf16 %v5218_v32, %v5216_v9 }
 0x715   : > { %8056 = vmatmul.msk.bf16.gmra.mxu3 %vm2809_vm0, %v5269_v37 }
 0x718   : > { %v5791_v25 = vpop.f32.mrf.mxu2  ;;  %v5220_v28 = vpop.f32.mrf.mxu0 }
 0x719   : > { %v5792_v12 = vadd.f32 %v5791_v25, %v5743_v40  ;;  %v5840_v45 = vpop.f32.mrf.mxu3  ;;  %v5745_v17 = vpop.f32.mrf.mxu1  ;;  %v5221_v48 = vadd.f32 %v5220_v28, %v10596_v27  ;;  %v11440_v27 = vpack.c.bf16 %v11438_v36, %v11439_v61 }
 0x71a   : > { %v5746_v11 = vadd.f32 %v10634_v42, %v5745_v17 }
 0x71b   : > { %v10724_v13 = vadd.f32 %v5840_v45, %v5792_v12  ;;  %5891 = vmatmul.bf16.gmra.mxu0 %v11434_v62  ;;  %v11448_v62 = vld [vmem:[#allocation119_spill] sm:$0xff] }
 0x71c   : > { %5940 = vmatmul.bf16.gmra.mxu1 %v11437_v54 }
 0x71d   : > { %5989 = vmatmul.bf16.gmra.mxu2 %v5275_v49 }
 0x720   : > { %v5794_v55 = vpop.f32.mrf.mxu2  ;;  %v5222_v22 = vpop.f32.mrf.mxu0 }
 0x721   : > { %v5795_v18 = vadd.f32 %v5794_v55, %v5746_v11  ;;  %v5843_v5 = vpop.f32.mrf.mxu3  ;;  %v5223_v60 = vadd.f32 %v5222_v22, %v10599_v38  ;;  %v5747_v15 = vpop.f32.mrf.mxu1  ;;  %v11441_v38 = vld [vmem:[#allocation118_spill] sm:$0xff] }
 0x722   : > { %v5748_v14 = vadd.f32 %v10634_v42, %v5747_v15  ;;  %v11443_v51 = vpack.c.bf16 %v11441_v38, %v11442_v20 }
 0x723   : > { %v10738_v43 = vadd.f32 %v5843_v5, %v5795_v18  ;;  %v5276_v63 = vpack.c.bf16 %v5223_v60, %v5221_v48 }
 0x725   : > { %8057 = vmatmul.msk.bf16.gmra.mxu3 %vm2809_vm0, %v5276_v63 }
 0x728   : > { %v5796_v6 = vpop.f32.mrf.mxu2  ;;  %v5225_v39 = vpop.f32.mrf.mxu0 }
 0x729   : > { %v5797_v1 = vadd.f32 %v5796_v6, %v5748_v14  ;;  %v5845_v49 = vpop.f32.mrf.mxu3  ;;  %v5750_v24 = vpop.f32.mrf.mxu1  ;;  %v5226_v32 = vadd.f32 %v5225_v39, %v10613_v53  ;;  %v11446_v53 = vpack.c.bf16 %v11444_v8, %v11445_v3 }
 0x72a   : > { %v5751_v44 = vadd.f32 %v10634_v42, %v5750_v24 }
 0x72b   : > { %v10742_v31 = vadd.f32 %v5845_v49, %v5797_v1  ;;  %5896 = vmatmul.bf16.gmra.mxu0 %v11440_v27 }
 0x72c   : > { %5945 = vmatmul.bf16.gmra.mxu1 %v11443_v51 }
 0x72d   : > { %5994 = vmatmul.bf16.gmra.mxu2 %v5282_v4 }
 0x730   : > { %v5799_v52 = vpop.f32.mrf.mxu2  ;;  %v5227_v9 = vpop.f32.mrf.mxu0 }
 0x731   : > { %v5800_v7 = vadd.f32 %v5799_v52, %v5751_v44  ;;  %v5848_v59 = vpop.f32.mrf.mxu3  ;;  %v5228_v10 = vadd.f32 %v5227_v9, %v10616_v41  ;;  %v5752_v37 = vpop.f32.mrf.mxu1  ;;  %v11447_v41 = vld [vmem:[#allocation120_spill] sm:$0xff] }
 0x732   : > { %v5753_v12 = vadd.f32 %v10634_v42, %v5752_v37  ;;  %v11449_v30 = vpack.c.bf16 %v11447_v41, %v11448_v62 }
 0x733   : > { %v10756_v40 = vadd.f32 %v5848_v59, %v5800_v7  ;;  %v5283_v25 = vpack.c.bf16 %v5228_v10, %v5226_v32 }
 0x735   : > { %8058 = vmatmul.msk.bf16.gmra.mxu3 %vm2809_vm0, %v5283_v25 }
 0x738   : > { %v5801_v19 = vpop.f32.mrf.mxu2  ;;  %v5230_v45 = vpop.f32.mrf.mxu0 }
 0x739   : > { %v5802_v16 = vadd.f32 %v5801_v19, %v5753_v12  ;;  %v5850_v4 = vpop.f32.mrf.mxu3  ;;  %v5755_v28 = vpop.f32.mrf.mxu1  ;;  %v5231_v5 = vadd.f32 %v5230_v45, %v10630_v21 }
 0x73a   : > { %v5756_v26 = vadd.f32 %v10634_v42, %v5755_v28 }
 0x73b   : > { %v10760_v17 = vadd.f32 %v5850_v4, %v5802_v16  ;;  %5901 = vmatmul.bf16.gmra.mxu0 %v11446_v53 }
 0x73c   : > { %5950 = vmatmul.bf16.gmra.mxu1 %v11449_v30 }
 0x73d   : > { %5999 = vmatmul.bf16.gmra.mxu2 %v5289_v0 }
 0x740   : > { %v5804_v54 = vpop.f32.mrf.mxu2  ;;  %v5232_v18 = vpop.f32.mrf.mxu0 }
 0x741   : > { %v5805_v11 = vadd.f32 %v5804_v54, %v5756_v26  ;;  %v5853_v55 = vpop.f32.mrf.mxu3  ;;  %v5233_v22 = vadd.f32 %v5232_v18, %v10632_v56  ;;  %v5757_v48 = vpop.f32.mrf.mxu1 }
 0x742   : > { %v5758_v2 = vadd.f32 %v10634_v42, %v5757_v48 }
 0x743   : > { %v10774_v60 = vadd.f32 %v5853_v55, %v5805_v11  ;;  %v5290_v15 = vpack.c.bf16 %v5233_v22, %v5231_v5 }
 0x745   : > { %8059 = vmatmul.msk.bf16.gmra.mxu3 %vm2809_vm0, %v5290_v15 }
 0x748   : > { %v5806_v33 = vpop.f32.mrf.mxu2  ;;  %v5867_v63 = vpop.f32.mrf.mxu0 }
 0x749   : > { %v5807_v0 = vadd.f32 %v5806_v33, %v5758_v2  ;;  %v5855_v14 = vpop.f32.mrf.mxu3  ;;  %v5916_v6 = vpop.f32.mrf.mxu1  ;;  %v5868_v56 = vadd.f32 %v5867_v63, %v10648_v35 }
 0x74b   : > { %v10778_v1 = vadd.f32 %v5855_v14, %v5807_v0  ;;  %v5917_v24 = vadd.f32 %v5916_v6, %v5868_v56 }
 0x750   : > { %v5965_v21 = vpop.f32.mrf.mxu2  ;;  %v5869_v49 = vpop.f32.mrf.mxu0 }
 0x751   : > { %v5918_v39 = vpop.f32.mrf.mxu1  ;;  %v5966_v36 = vadd.f32 %v5965_v21, %v5917_v24  ;;  %v5870_v38 = vadd.f32 %v5869_v49, %v10652_v34 }
 0x753   : > { %v5919_v44 = vadd.f32 %v5918_v39, %v5870_v38 }
 0x758   : > { %v5967_v61 = vpop.f32.mrf.mxu2  ;;  %v5872_v27 = vpop.f32.mrf.mxu0 }
 0x759   : > { %v6014_v42 = vpop.f32.mrf.mxu3  ;;  %v5921_v20 = vpop.f32.mrf.mxu1  ;;  %v5968_v35 = vadd.f32 %v5967_v61, %v5919_v44  ;;  %v5873_v9 = vadd.f32 %v5872_v27, %v10666_v57 }
 0x75a   : > { %v6015_v51 = vadd.f32 %v6014_v42, %v5966_v36 }
 0x75b   : > { %v5922_v37 = vadd.f32 %v5921_v20, %v5873_v9 }
 0x75c   : > { %6054 = vst [vmem:[%s10785_s25] sm:$0xff] %v6015_v51 }
 0x760   : > { %v5970_v52 = vpop.f32.mrf.mxu2  ;;  %v5874_v7 = vpop.f32.mrf.mxu0 }
 0x761   : > { %v6016_v59 = vpop.f32.mrf.mxu3  ;;  %v5923_v32 = vpop.f32.mrf.mxu1  ;;  %v5971_v34 = vadd.f32 %v5970_v52, %v5922_v37  ;;  %v5875_v16 = vadd.f32 %v5874_v7, %v10670_v47 }
 0x762   : > { %v6017_v10 = vadd.f32 %v6016_v59, %v5968_v35 }
 0x763   : > { %v5924_v28 = vadd.f32 %v5923_v32, %v5875_v16 }
 0x764   : > { %6055 = vst [vmem:[%s10785_s25 + $0x8] sm:$0xff] %v6017_v10 }
 0x768   : > { %v5972_v25 = vpop.f32.mrf.mxu2  ;;  %v5877_v12 = vpop.f32.mrf.mxu0 }
 0x769   : > { %v6019_v19 = vpop.f32.mrf.mxu3  ;;  %v5926_v4 = vpop.f32.mrf.mxu1  ;;  %v5973_v8 = vadd.f32 %v5972_v25, %v5924_v28  ;;  %v5878_v41 = vadd.f32 %v5877_v12, %v10684_v23 }
 0x76a   : > { %v6020_v45 = vadd.f32 %v6019_v19, %v5971_v34 }
 0x76b   : > { %v5927_v26 = vadd.f32 %v5926_v4, %v5878_v41 }
 0x76c   : > { %6056 = vst [vmem:[%s10785_s25 + $0x10] sm:$0xff] %v6020_v45 }
 0x770   : > { %v5975_v3 = vpop.f32.mrf.mxu2  ;;  %v5879_v53 = vpop.f32.mrf.mxu0 }
 0x771   : > { %v6021_v57 = vpop.f32.mrf.mxu3  ;;  %v5928_v62 = vpop.f32.mrf.mxu1  ;;  %v5976_v54 = vadd.f32 %v5975_v3, %v5927_v26  ;;  %v5880_v18 = vadd.f32 %v5879_v53, %v10688_v50 }
 0x772   : > { %v6022_v30 = vadd.f32 %v6021_v57, %v5973_v8 }
 0x773   : > { %v5929_v48 = vadd.f32 %v5928_v62, %v5880_v18 }
 0x774   : > { %6057 = vst [vmem:[%s10785_s25 + $0x18] sm:$0xff] %v6022_v30 }
 0x778   : > { %v5977_v11 = vpop.f32.mrf.mxu2  ;;  %v5882_v55 = vpop.f32.mrf.mxu0 }
 0x779   : > { %v6024_v47 = vpop.f32.mrf.mxu3  ;;  %v5931_v5 = vpop.f32.mrf.mxu1  ;;  %v5978_v15 = vadd.f32 %v5977_v11, %v5929_v48  ;;  %v5883_v0 = vadd.f32 %v5882_v55, %v10702_v46 }
 0x77a   : > { %v6025_v22 = vadd.f32 %v6024_v47, %v5976_v54 }
 0x77b   : > { %v5932_v6 = vadd.f32 %v5931_v5, %v5883_v0 }
 0x77c   : > { %6058 = vst [vmem:[%s10785_s25 + $0x20] sm:$0xff] %v6025_v22 }
 0x780   : > { %v5980_v2 = vpop.f32.mrf.mxu2  ;;  %v5884_v33 = vpop.f32.mrf.mxu0 }
 0x781   : > { %v6026_v23 = vpop.f32.mrf.mxu3  ;;  %v5933_v63 = vpop.f32.mrf.mxu1  ;;  %v5981_v21 = vadd.f32 %v5980_v2, %v5932_v6  ;;  %v5885_v39 = vadd.f32 %v5884_v33, %v10706_v29 }
 0x782   : > { %v6027_v14 = vadd.f32 %v6026_v23, %v5978_v15 }
 0x783   : > { %v5934_v61 = vadd.f32 %v5933_v63, %v5885_v39 }
 0x784   : > { %6059 = vst [vmem:[%s10785_s25 + $0x28] sm:$0xff] %v6027_v14 }
 0x788   : > { %v5982_v49 = vpop.f32.mrf.mxu2  ;;  %v5887_v56 = vpop.f32.mrf.mxu0 }
 0x789   : > { %v6029_v50 = vpop.f32.mrf.mxu3  ;;  %v5936_v24 = vpop.f32.mrf.mxu1  ;;  %v5983_v27 = vadd.f32 %v5982_v49, %v5934_v61  ;;  %v5888_v20 = vadd.f32 %v5887_v56, %v10720_v58 }
 0x78a   : > { %v6030_v36 = vadd.f32 %v6029_v50, %v5981_v21 }
 0x78b   : > { %v5937_v35 = vadd.f32 %v5936_v24, %v5888_v20 }
 0x78c   : > { %6060 = vst [vmem:[%s10785_s25 + $0x30] sm:$0xff] %v6030_v36 }
 0x790   : > { %v5985_v42 = vpop.f32.mrf.mxu2  ;;  %v5889_v38 = vpop.f32.mrf.mxu0 }
 0x791   : > { %v6031_v46 = vpop.f32.mrf.mxu3  ;;  %v5938_v51 = vpop.f32.mrf.mxu1  ;;  %v5986_v52 = vadd.f32 %v5985_v42, %v5937_v35  ;;  %v5890_v9 = vadd.f32 %v5889_v38, %v10724_v13 }
 0x792   : > { %v6032_v44 = vadd.f32 %v6031_v46, %v5983_v27 }
 0x793   : > { %v5939_v37 = vadd.f32 %v5938_v51, %v5890_v9 }
 0x794   : > { %6061 = vst [vmem:[%s10785_s25 + $0x38] sm:$0xff] %v6032_v44 }
 0x798   : > { %v5987_v7 = vpop.f32.mrf.mxu2  ;;  %v5892_v59 = vpop.f32.mrf.mxu0 }
 0x799   : > { %v6034_v29 = vpop.f32.mrf.mxu3  ;;  %v5941_v32 = vpop.f32.mrf.mxu1  ;;  %v5988_v34 = vadd.f32 %v5987_v7, %v5939_v37  ;;  %v5893_v19 = vadd.f32 %v5892_v59, %v10738_v43 }
 0x79a   : > { %v6035_v10 = vadd.f32 %v6034_v29, %v5986_v52 }
 0x79b   : > { %v5942_v45 = vadd.f32 %v5941_v32, %v5893_v19 }
 0x79c   : > { %6062 = vst [vmem:[%s10785_s25 + $0x40] sm:$0xff] %v6035_v10 }
 0x7a0   : > { %v5990_v25 = vpop.f32.mrf.mxu2  ;;  %v5894_v12 = vpop.f32.mrf.mxu0 }
 0x7a1   : > { %v6036_v58 = vpop.f32.mrf.mxu3  ;;  %v5943_v4 = vpop.f32.mrf.mxu1  ;;  %v5991_v28 = vadd.f32 %v5990_v25, %v5942_v45  ;;  %v5895_v53 = vadd.f32 %v5894_v12, %v10742_v31 }
 0x7a2   : > { %v6037_v16 = vadd.f32 %v6036_v58, %v5988_v34 }
 0x7a3   : > { %v5944_v41 = vadd.f32 %v5943_v4, %v5895_v53 }
 0x7a4   : > { %6063 = vst [vmem:[%s10785_s25 + $0x48] sm:$0xff] %v6037_v16 }
 0x7a8   : > { %v5992_v8 = vpop.f32.mrf.mxu2  ;;  %v5897_v3 = vpop.f32.mrf.mxu0 }
 0x7a9   : > { %v6039_v13 = vpop.f32.mrf.mxu3  ;;  %v5946_v62 = vpop.f32.mrf.mxu1  ;;  %v5993_v30 = vadd.f32 %v5992_v8, %v5944_v41  ;;  %v5898_v43 = vadd.f32 %v5897_v3, %v10756_v40 }
 0x7aa   : > { %v6040_v57 = vadd.f32 %v6039_v13, %v5991_v28 }
 0x7ab   : > { %v5947_v47 = vadd.f32 %v5946_v62, %v5898_v43 }
 0x7ac   : > { %6064 = vst [vmem:[%s10785_s25 + $0x50] sm:$0xff] %v6040_v57 }
 0x7b0   : > { %v5995_v26 = vpop.f32.mrf.mxu2  ;;  %v5899_v55 = vpop.f32.mrf.mxu0 }
 0x7b1   : > { %v6041_v54 = vpop.f32.mrf.mxu3  ;;  %v5996_v18 = vadd.f32 %v5995_v26, %v5947_v47  ;;  %v5948_v5 = vpop.f32.mrf.mxu1  ;;  %v5900_v31 = vadd.f32 %v5899_v55, %v10760_v17 }
 0x7b2   : > { %v6042_v11 = vadd.f32 %v6041_v54, %v5993_v30 }
 0x7b3   : > { %v5949_v33 = vadd.f32 %v5948_v5, %v5900_v31 }
 0x7b4   : > { %6065 = vst [vmem:[%s10785_s25 + $0x58] sm:$0xff] %v6042_v11 }
 0x7b8   : > { %v5997_v22 = vpop.f32.mrf.mxu2  ;;  %v5902_v2 = vpop.f32.mrf.mxu0 }
 0x7b9   : > { %v6044_v48 = vpop.f32.mrf.mxu3  ;;  %v5998_v23 = vadd.f32 %v5997_v22, %v5949_v33  ;;  %v5903_v40 = vadd.f32 %v5902_v2, %v10774_v60  ;;  %v5951_v14 = vpop.f32.mrf.mxu1 }
 0x7ba   : > { %v6045_v15 = vadd.f32 %v6044_v48, %v5996_v18 }
 0x7bb   : > { %v5952_v21 = vadd.f32 %v5951_v14, %v5903_v40 }
 0x7bc   : > { %6066 = vst [vmem:[%s10785_s25 + $0x60] sm:$0xff] %v6045_v15 }
 0x7c0   : > { %v6000_v6 = vpop.f32.mrf.mxu2  ;;  %v5904_v49 = vpop.f32.mrf.mxu0 }
 0x7c1   : > { %v6046_v0 = vpop.f32.mrf.mxu3  ;;  %v6001_v56 = vadd.f32 %v6000_v6, %v5952_v21  ;;  %v5905_v50 = vadd.f32 %v5904_v49, %v10778_v1  ;;  %v5953_v60 = vpop.f32.mrf.mxu1 }
 0x7c2   : > { %v6047_v63 = vadd.f32 %v6046_v0, %v5998_v23 }
 0x7c3   : > { %v5954_v36 = vadd.f32 %v5953_v60, %v5905_v50 }
 0x7c4   : > { %6067 = vst [vmem:[%s10785_s25 + $0x68] sm:$0xff] %v6047_v63 }
 0x7c8   : > { %v6002_v24 = vpop.f32.mrf.mxu2 }
 0x7c9   : > { %v6049_v17 = vpop.f32.mrf.mxu3  ;;  %v6003_v61 = vadd.f32 %v6002_v24, %v5954_v36 }
 0x7ca   : > { %v6050_v39 = vadd.f32 %v6049_v17, %v6001_v56 }
 0x7cc   : > { %6068 = vst [vmem:[%s10785_s25 + $0x70] sm:$0xff] %v6050_v39 }
 0x7d1   : > { %v6051_v27 = vpop.f32.mrf.mxu3 }
 0x7d2   : > { %v6052_v42 = vadd.f32 %v6051_v27, %v6003_v61 }
 0x7d4   : > { %6069 = vst [vmem:[%s10785_s25 + $0x78] sm:$0xff] %v6052_v42 }
 0x7d5   : > { %8753 = shalt.err (!%p8750_p8)
}
 0x7d6   : > { %s8810_s14 = smov 128   ;;  %s8811_s16 = smov 8  }
 0x7d7   : > { %8531 = dma.vmem_to_hbm [thread:$0]  (%p8880_p5), %s6084_s11, 2048, %s6086_s12, %s6071_s22, %s8810_s14, %s8810_s14, %s8811_s16  }
 0x7d8 PF: > { %p8558_p9 = scmp.ge.s32.totalorder %s8800_s21, 2  ;;  %s6100_s17 = sand.u32 1, %s8788_s18  }
 0x7d9   : > { %s6101_s23 = scalar_lea.sflag [#allocation4], %s6100_s17 }
 0x7da   : > { %p8547_p10 = pnand %p8558_p9, %p8884_p6 }
 0x7dc   : > { %p8548_p11 = pneg %p8547_p10 }
 0x7de   : > { %8783 = dma.done.wait (%p8548_p11), %s6101_s23, 2048  }
 0x7df   : > { %8785 = vsyncadd (%p8548_p11), %s6101_s23, 4294965248  ;;  %p18_p12 = scmp.ge.s32.totalorder %s8867_s24, 4   ;;  %s11450_s18 = smov %s8792_s19 }
 0x7e0   : > { %s11451_s19 = smov %s8796_s20  ;;  %s11452_s20 = smov %s8878_s27 }
 0x7e1   : > { %s11453_s21 = smov %s8867_s24  ;;  %20 = sbr.rel (!%p18_p12) target bundleno = 9 (0x9), region = 92 }
 0x7e6   :  { %6107 = vsyncpa [#allocation3], 1 }
 0x7e7   :  { %6109 = vsyncpa [#allocation3 + $0x1], 1 }
 0x7e8   :  { %6110 = vsyncpa [#allocation6], 1 }
 0x7e9   :  { %6111 = vsyncpa [#allocation9], 1 }
 0x7ea   :  { %6112 = vsyncpa [#allocation4], 1 }
 0x7eb   :  { %6114 = vsyncpa [#allocation4 + $0x1], 1 }

</bundles_post_ra>
